<compile_context>
chip_gen: v7x
topology: tpu7x:2x2x1
jax: 0.10.0
libtpu: 0.0.40
codegen_flags: <defaults>
</compile_context>

<pallas_src>
import functools

import jax
import jax.numpy as jnp
from jax.experimental import pallas as pl
from jax.experimental.pallas import tpu as pltpu


def _round_up(x, m):
    return ((x + m - 1) // m) * m


def _pick_tk(kp, cap=2048):
    """Largest multiple-of-128 divisor of kp (kp is already a multiple of 128) <= cap."""
    q = kp // 128
    best = 1
    for d in range(1, q + 1):
        if q % d == 0 and 128 * d <= cap:
            best = d
    return 128 * best


# --------------------------------------------------------------------------------------
# Fused kernel: C = A @ W + b  -> GroupNorm -> (ReLU) -> (+residual, ReLU)
# Grid: (batch, K-tiles).  One M block == one batch element's full spatial extent.
# --------------------------------------------------------------------------------------
def _conv_gn_kernel(a_ref, w_ref, b_ref, gmat_ref, gam_ref, bet_ref, *rest,
                    relu, eps, inv_l, has_residual):
    if has_residual:
        res_ref, o_ref, acc_ref = rest
    else:
        o_ref, acc_ref = rest

    @pl.when(pl.program_id(1) == 0)
    def _():
        acc_ref[...] = jnp.zeros_like(acc_ref)

    acc_ref[...] += jnp.dot(a_ref[0], w_ref[...],
                            preferred_element_type=jnp.float32)

    @pl.when(pl.program_id(1) == pl.num_programs(1) - 1)
    def _():
        x = acc_ref[...] + b_ref[...]                              # (HW, Cp) f32
        # GroupNorm: per-channel sums -> per-group stats broadcast back to channels
        # via a tiny constant same-group indicator matmul (lane-dense, MXU slot).
        s = jnp.sum(x, axis=0, keepdims=True)                      # (1, Cp)
        mean = jnp.dot(s, gmat_ref[...],
                       preferred_element_type=jnp.float32) * inv_l
        xc = x - mean                                              # centered (better numerics)
        ss = jnp.sum(xc * xc, axis=0, keepdims=True)
        var = jnp.dot(ss, gmat_ref[...],
                      preferred_element_type=jnp.float32) * inv_l
        inv = jax.lax.rsqrt(var + eps)
        y = xc * (inv * gam_ref[...]) + bet_ref[...]
        if relu:
            y = jnp.maximum(y, 0.0)
        if has_residual:
            y = jnp.maximum(y + res_ref[0], 0.0)
        o_ref[0] = y


def conv_gn(x, conv_p, gn_p, *, stride, padding, relu, residual=None, eps=1e-5):
    """Fused Conv2d(NHWC, carried-padded channels) + bias + GroupNorm (+ReLU) (+residual).

    x:        (B, H, W, Cc) f32, Cc = carried channel count (padded, or 3 for the input)
    conv_p:   pre-packed weight dict from _pack_conv
    gn_p:     pre-packed GroupNorm dict from _pack_gn
    residual: optional (B, Ho, Wo, Np) f32; out = relu(gn(conv(x)) [+relu] + residual)
    returns:  (B, Ho, Wo, Np) f32 with Np = 128-padded Cout (padded channels are 0)
    """
    B, H, W, Cc = x.shape
    kh, kw = conv_p["kh"], conv_p["kw"]
    Ho = (H + 2 * padding - kh) // stride + 1
    Wo = (W + 2 * padding - kw) // stride + 1
    HW = Ho * Wo
    Kp, Np = conv_p["w"].shape
    K = kh * kw * Cc
    assert Kp == _round_up(K, 128), (Kp, K)

    # bf16 cast before im2col so the tap-inflated HBM copy is half width.
    xb = x.astype(jnp.bfloat16)
    if padding:
        xb = jnp.pad(xb, ((0, 0), (padding, padding), (padding, padding), (0, 0)))
    # TODO(synk): implicit-GEMM tap gather inside the kernel instead of HBM im2col.
    cols = []
    for i in range(kh):
        for j in range(kw):
            cols.append(xb[:, i:i + stride * Ho:stride, j:j + stride * Wo:stride, :])
    A = jnp.concatenate(cols, axis=-1).reshape(B, HW, K)           # (B, HW, kh*kw*Cc)
    if Kp > K:
        A = jnp.pad(A, ((0, 0), (0, 0), (0, Kp - K)))

    tk = _pick_tk(Kp)
    Kt = Kp // tk
    inv_l = 1.0 / float(gn_p["cg"] * HW)
    has_res = residual is not None

    inputs = [A, conv_p["w"], conv_p["b"], gn_p["gmat"], gn_p["gamma"], gn_p["beta"]]
    in_specs = [
        pl.BlockSpec((1, HW, tk), lambda b, k: (b, 0, k)),
        pl.BlockSpec((tk, Np), lambda b, k: (k, 0)),
        pl.BlockSpec((1, Np), lambda b, k: (0, 0)),
        pl.BlockSpec((Np, Np), lambda b, k: (0, 0)),
        pl.BlockSpec((1, Np), lambda b, k: (0, 0)),
        pl.BlockSpec((1, Np), lambda b, k: (0, 0)),
    ]
    if has_res:
        inputs.append(residual.reshape(B, HW, Np))
        in_specs.append(pl.BlockSpec((1, HW, Np), lambda b, k: (b, 0, 0)))

    cost = pl.CostEstimate(
        flops=2 * B * HW * Kp * Np,
        transcendentals=B * Np,
        bytes_accessed=(B * HW * Kp * 2 + Kp * Np * 2
                        + B * HW * Np * 4 * (2 if has_res else 1)),
    )

    out = pl.pallas_call(
        functools.partial(_conv_gn_kernel, relu=relu, eps=eps, inv_l=inv_l,
                          has_residual=has_res),
        out_shape=jax.ShapeDtypeStruct((B, HW, Np), jnp.float32),
        grid=(B, Kt),
        in_specs=in_specs,
        out_specs=pl.BlockSpec((1, HW, Np), lambda b, k: (b, 0, 0)),
        scratch_shapes=[pltpu.VMEM((HW, Np), jnp.float32)],
        compiler_params=pltpu.CompilerParams(
            dimension_semantics=("parallel", "arbitrary"),
            vmem_limit_bytes=32 * 1024 * 1024,
        ),
        cost_estimate=cost,
    )(*inputs)
    return out.reshape(B, Ho, Wo, Np)


# --------------------------------------------------------------------------------------
# Parameter packing (done ONCE at init: transpose + pad + bf16 cast)
# --------------------------------------------------------------------------------------
def _pack_conv(key, cout, cin_real, cin_carried, kh, kw):
    w = jax.random.normal(key, (cout, cin_real, kh, kw), jnp.float32) * 0.05
    b = jnp.zeros((cout,), jnp.float32)
    cout_p = _round_up(cout, 128)
    K = kh * kw * cin_carried
    Kp = _round_up(K, 128)
    wm = jnp.zeros((kh, kw, cin_carried, cout_p), jnp.float32)
    wm = wm.at[:, :, :cin_real, :cout].set(jnp.transpose(w, (2, 3, 1, 0)))
    wm = wm.reshape(K, cout_p)
    wm = jnp.pad(wm, ((0, Kp - K), (0, 0)))
    bp = jnp.pad(b, (0, cout_p - cout)).reshape(1, cout_p)
    return {"w": wm.astype(jnp.bfloat16), "b": bp, "kh": kh, "kw": kw}


def _pack_gn(c_real, c_pad, num_groups):
    cg = c_real // num_groups
    gam = jnp.zeros((1, c_pad), jnp.float32).at[0, :c_real].set(1.0)   # PyTorch default gamma=1
    bet = jnp.zeros((1, c_pad), jnp.float32)                           # beta=0
    gid = jnp.arange(c_pad) // cg   # padded channels land in their own groups (never pollute real stats)
    gmat = (gid[:, None] == gid[None, :]).astype(jnp.float32)
    return {"gamma": gam, "beta": bet, "gmat": gmat, "cg": cg}


def _init_res_block(key, in_planes, planes, stride, cin_carried):
    k1, k2, k3 = jax.random.split(key, 3)
    ng = planes // 8
    cp = _round_up(planes, 128)
    p = {"stride": stride}
    p["conv1"] = _pack_conv(k1, planes, in_planes, cin_carried, 3, 3)
    p["gn1"] = _pack_gn(planes, cp, ng)
    p["conv2"] = _pack_conv(k2, planes, planes, cp, 3, 3)
    p["gn2"] = _pack_gn(planes, cp, ng)
    if not (stride == 1 and in_planes == planes):
        p["down"] = _pack_conv(k3, planes, in_planes, cin_carried, 1, 1)
        p["gn3"] = _pack_gn(planes, cp, ng)
    return p


def init_unet_extractor(key, in_channel=3, encoder_dim=(64, 96, 128)):
    keys = jax.random.split(key, 7)
    CP = 128  # carried (padded) channel width for every layer in this network
    params = {}
    params["in_ds_conv"] = _pack_conv(keys[0], 32, in_channel, in_channel, 5, 5)
    params["in_ds_gn"] = _pack_gn(32, CP, num_groups=8)
    params["res1"] = [
        _init_res_block(keys[1], 32, encoder_dim[0], stride=1, cin_carried=CP),
        _init_res_block(keys[2], encoder_dim[0], encoder_dim[0], stride=1, cin_carried=CP),
    ]
    params["res2"] = [
        _init_res_block(keys[3], encoder_dim[0], encoder_dim[1], stride=2, cin_carried=CP),
        _init_res_block(keys[4], encoder_dim[1], encoder_dim[1], stride=1, cin_carried=CP),
    ]
    params["res3"] = [
        _init_res_block(keys[5], encoder_dim[1], encoder_dim[2], stride=2, cin_carried=CP),
        _init_res_block(keys[6], encoder_dim[2], encoder_dim[2], stride=1, cin_carried=CP),
    ]
    return params


# --------------------------------------------------------------------------------------
# Forward pass (internally NHWC + carried padded channels; NCHW at the module boundary)
# --------------------------------------------------------------------------------------
def residual_block_forward(p, x):
    stride = p["stride"]
    y = conv_gn(x, p["conv1"], p["gn1"], stride=stride, padding=1, relu=True)
    if "down" in p:
        sc = conv_gn(x, p["down"], p["gn3"], stride=stride, padding=0, relu=False)
    else:
        sc = x
    # PyTorch: out = relu(downsample(x) + relu(norm2(conv2(y)))) — fused in one call.
    return conv_gn(y, p["conv2"], p["gn2"], stride=1, padding=1, relu=True, residual=sc)


def unet_extractor_forward(params, x_nchw, encoder_dim=(64, 96, 128)):
    x = jnp.transpose(x_nchw, (0, 2, 3, 1))      # NCHW -> NHWC (once)

    # in_ds: Conv2d(k=5, s=2, p=2) + GroupNorm(8, 32) + ReLU, one fused call
    x = conv_gn(x, params["in_ds_conv"], params["in_ds_gn"], stride=2, padding=2, relu=True)

    for blk in params["res1"]:
        x = residual_block_forward(blk, x)
    x1 = x
    for blk in params["res2"]:
        x = residual_block_forward(blk, x)
    x2 = x
    for blk in params["res3"]:
        x = residual_block_forward(blk, x)
    x3 = x

    def to_out(t, c):   # slice carried channel padding + NHWC -> NCHW, only at outputs
        return jnp.transpose(t[:, :, :, :c], (0, 3, 1, 2))

    return (to_out(x1, encoder_dim[0]), to_out(x2, encoder_dim[1]), to_out(x3, encoder_dim[2]))


# --------------------------------------------------------------------------------------
if __name__ == "__main__":
    key = jax.random.PRNGKey(0)
    pkey, xkey = jax.random.split(key)

    params = init_unet_extractor(pkey, in_channel=3, encoder_dim=(64, 96, 128))

    # Small NCHW input: (batch=2, channels=3, 16, 16)
    x = jax.random.normal(xkey, (2, 3, 16, 16), jnp.float32)

    # Close over params so static packing metadata (kh/kw/stride/cg) stays Python.
    forward = jax.jit(functools.partial(unet_extractor_forward, params))
    x1, x2, x3 = forward(x)
    jax.block_until_ready((x1, x2, x3))

    assert x1.shape == (2, 64, 8, 8), x1.shape
    assert x2.shape == (2, 96, 4, 4), x2.shape
    assert x3.shape == (2, 128, 2, 2), x3.shape
    assert bool(jnp.all(jnp.isfinite(x1)))
    assert bool(jnp.all(jnp.isfinite(x2)))
    assert bool(jnp.all(jnp.isfinite(x3)))

    print("KERNEL_OK")
</pallas_src>

<mosaic_0001>
module attributes {stable_mosaic.version = 11 : i64} {
  func.func @_conv_gn_kernel(%arg0: i32, %arg1: i32, %arg2: memref<1x64x128xbf16, #tpu.memory_space<vmem>>, %arg3: memref<128x128xbf16, #tpu.memory_space<vmem>>, %arg4: memref<1x128xf32, #tpu.memory_space<vmem>>, %arg5: memref<128x128xf32, #tpu.memory_space<vmem>>, %arg6: memref<1x128xf32, #tpu.memory_space<vmem>>, %arg7: memref<1x128xf32, #tpu.memory_space<vmem>>, %arg8: memref<1x64x128xf32, #tpu.memory_space<vmem>>, %arg9: memref<64x128xf32, #tpu.memory_space<vmem>>) attributes {dimension_semantics = [#tpu.dimension_semantics<parallel>, #tpu.dimension_semantics<arbitrary>], iteration_bounds = array<i64: 2, 1>, scalar_prefetch = 0 : i64, scratch_operands = 1 : i64, tpu.core_type = #tpu.core_type<tc>, window_params = [{transform_indices = @transform_0, window_bounds = array<i64: 1, 64, 128>}, {transform_indices = @transform_1, window_bounds = array<i64: 128, 128>}, {pipeline_mode = #tpu.pipeline_mode<synchronous>, transform_indices = @transform_2, window_bounds = array<i64: 1, 128>}, {pipeline_mode = #tpu.pipeline_mode<synchronous>, transform_indices = @transform_3, window_bounds = array<i64: 128, 128>}, {pipeline_mode = #tpu.pipeline_mode<synchronous>, transform_indices = @transform_4, window_bounds = array<i64: 1, 128>}, {pipeline_mode = #tpu.pipeline_mode<synchronous>, transform_indices = @transform_5, window_bounds = array<i64: 1, 128>}, {transform_indices = @transform_6, window_bounds = array<i64: 1, 64, 128>}]} {
    %c0_i32 = arith.constant 0 : i32
    %0 = arith.cmpi eq, %arg1, %c0_i32 : i32
    %1 = arith.extui %0 : i1 to i32
    %c0_i32_0 = arith.constant 0 : i32
    %2 = arith.cmpi ne, %1, %c0_i32_0 : i32
    scf.if %2 {
      %cst_11 = arith.constant 0.000000e+00 : f32
      %13 = vector.broadcast %cst_11 : f32 to vector<64x128xf32>
      %c0_12 = arith.constant 0 : index
      %c0_13 = arith.constant 0 : index
      %14 = vector.load %arg9[%c0_12, %c0_13] : memref<64x128xf32, #tpu.memory_space<vmem>>, vector<64x128xf32>
      tpu.vector_store %arg9[%c0_12, %c0_13], %13 {strides = array<i32>} : memref<64x128xf32, #tpu.memory_space<vmem>>, vector<64x128xf32>,
    } else {
    }
    %c0 = arith.constant 0 : index
    %c0_1 = arith.constant 0 : index
    %3 = vector.load %arg9[%c0, %c0_1] : memref<64x128xf32, #tpu.memory_space<vmem>>, vector<64x128xf32>
    %c0_2 = arith.constant 0 : index
    %c0_3 = arith.constant 0 : index
    %c0_4 = arith.constant 0 : index
    %4 = vector.load %arg2[%c0_2, %c0_3, %c0_4] : memref<1x64x128xbf16, #tpu.memory_space<vmem>>, vector<1x64x128xbf16>
    %5 = vector.shape_cast %4 : vector<1x64x128xbf16> to vector<64x128xbf16>
    %c0_5 = arith.constant 0 : index
    %c0_6 = arith.constant 0 : index
    %6 = vector.load %arg3[%c0_5, %c0_6] : memref<128x128xbf16, #tpu.memory_space<vmem>>, vector<128x128xbf16>
    %cst = arith.constant dense<0.000000e+00> : vector<64x128xf32>
    %7 = tpu.matmul %5, %6, %cst {dimension_numbers = #tpu.dot_dimension_numbers<[1], [0], [0], [1], [0, 0, 1, 1], [], []>} : vector<64x128xbf16>, vector<128x128xbf16>, vector<64x128xf32> -> vector<64x128xf32>
    %8 = arith.addf %3, %7 : vector<64x128xf32>
    %c0_7 = arith.constant 0 : index
    %c0_8 = arith.constant 0 : index
    %9 = vector.load %arg9[%c0_7, %c0_8] : memref<64x128xf32, #tpu.memory_space<vmem>>, vector<64x128xf32>
    tpu.vector_store %arg9[%c0_7, %c0_8], %8 {strides = array<i32>} : memref<64x128xf32, #tpu.memory_space<vmem>>, vector<64x128xf32>,
    %c0_i32_9 = arith.constant 0 : i32
    %10 = arith.cmpi eq, %arg1, %c0_i32_9 : i32
    %11 = arith.extui %10 : i1 to i32
    %c0_i32_10 = arith.constant 0 : i32
    %12 = arith.cmpi ne, %11, %c0_i32_10 : i32
    scf.if %12 {
      %c0_11 = arith.constant 0 : index
      %c0_12 = arith.constant 0 : index
      %13 = vector.load %arg9[%c0_11, %c0_12] : memref<64x128xf32, #tpu.memory_space<vmem>>, vector<64x128xf32>
      %c0_13 = arith.constant 0 : index
      %c0_14 = arith.constant 0 : index
      %14 = vector.load %arg4[%c0_13, %c0_14] : memref<1x128xf32, #tpu.memory_space<vmem>>, vector<1x128xf32>
      %15 = vector.broadcast %14 : vector<1x128xf32> to vector<64x128xf32>
      %16 = arith.addf %13, %15 : vector<64x128xf32>
      %cst_15 = arith.constant dense<0.000000e+00> : vector<128xf32>
      %17 = vector.multi_reduction <add>, %16, %cst_15 [0] : vector<64x128xf32> to vector<128xf32>
      %18 = vector.shape_cast %17 : vector<128xf32> to vector<1x128xf32>
      %c0_16 = arith.constant 0 : index
      %c0_17 = arith.constant 0 : index
      %19 = vector.load %arg5[%c0_16, %c0_17] : memref<128x128xf32, #tpu.memory_space<vmem>>, vector<128x128xf32>
      %cst_18 = arith.constant dense<0.000000e+00> : vector<1x128xf32>
      %20 = tpu.matmul %18, %19, %cst_18 {dimension_numbers = #tpu.dot_dimension_numbers<[1], [0], [0], [1], [0, 0, 1, 1], [], []>} : vector<1x128xf32>, vector<128x128xf32>, vector<1x128xf32> -> vector<1x128xf32>
      %cst_19 = arith.constant 3.906250e-03 : f32
      %21 = vector.broadcast %cst_19 : f32 to vector<1x128xf32>
      %22 = arith.mulf %20, %21 : vector<1x128xf32>
      %23 = vector.broadcast %22 : vector<1x128xf32> to vector<64x128xf32>
      %24 = arith.subf %16, %23 : vector<64x128xf32>
      %25 = arith.mulf %24, %24 : vector<64x128xf32>
      %cst_20 = arith.constant dense<0.000000e+00> : vector<128xf32>
      %26 = vector.multi_reduction <add>, %25, %cst_20 [0] : vector<64x128xf32> to vector<128xf32>
      %27 = vector.shape_cast %26 : vector<128xf32> to vector<1x128xf32>
      %c0_21 = arith.constant 0 : index
      %c0_22 = arith.constant 0 : index
      %28 = vector.load %arg5[%c0_21, %c0_22] : memref<128x128xf32, #tpu.memory_space<vmem>>, vector<128x128xf32>
      %cst_23 = arith.constant dense<0.000000e+00> : vector<1x128xf32>
      %29 = tpu.matmul %27, %28, %cst_23 {dimension_numbers = #tpu.dot_dimension_numbers<[1], [0], [0], [1], [0, 0, 1, 1], [], []>} : vector<1x128xf32>, vector<128x128xf32>, vector<1x128xf32> -> vector<1x128xf32>
      %cst_24 = arith.constant 3.906250e-03 : f32
      %30 = vector.broadcast %cst_24 : f32 to vector<1x128xf32>
      %31 = arith.mulf %29, %30 : vector<1x128xf32>
      %cst_25 = arith.constant 9.99999974E-6 : f32
      %32 = vector.broadcast %cst_25 : f32 to vector<1x128xf32>
      %33 = arith.addf %31, %32 : vector<1x128xf32>
      %34 = math.rsqrt %33 : vector<1x128xf32>
      %c0_26 = arith.constant 0 : index
      %c0_27 = arith.constant 0 : index
      %35 = vector.load %arg6[%c0_26, %c0_27] : memref<1x128xf32, #tpu.memory_space<vmem>>, vector<1x128xf32>
      %36 = arith.mulf %34, %35 : vector<1x128xf32>
      %37 = vector.broadcast %36 : vector<1x128xf32> to vector<64x128xf32>
      %38 = arith.mulf %24, %37 : vector<64x128xf32>
      %c0_28 = arith.constant 0 : index
      %c0_29 = arith.constant 0 : index
      %39 = vector.load %arg7[%c0_28, %c0_29] : memref<1x128xf32, #tpu.memory_space<vmem>>, vector<1x128xf32>
      %40 = vector.broadcast %39 : vector<1x128xf32> to vector<64x128xf32>
      %41 = arith.addf %38, %40 : vector<64x128xf32>
      %cst_30 = arith.constant 0.000000e+00 : f32
      %42 = vector.broadcast %cst_30 : f32 to vector<64x128xf32>
      %43 = arith.maximumf %41, %42 : vector<64x128xf32>
      %c0_31 = arith.constant 0 : index
      %c0_32 = arith.constant 0 : index
      %c0_33 = arith.constant 0 : index
      %44 = vector.load %arg8[%c0_31, %c0_32, %c0_33] : memref<1x64x128xf32, #tpu.memory_space<vmem>>, vector<1x64x128xf32>
      %45 = vector.shape_cast %44 : vector<1x64x128xf32> to vector<64x128xf32>
      %46 = vector.shape_cast %43 : vector<64x128xf32> to vector<1x64x128xf32>
      tpu.vector_store %arg8[%c0_31, %c0_32, %c0_33], %46 {strides = array<i32>} : memref<1x64x128xf32, #tpu.memory_space<vmem>>, vector<1x64x128xf32>,
    } else {
    }
    return
  }
  func.func @transform_0(%arg0: i32, %arg1: i32) -> (i32, i32, i32) {
    %c0_i32 = arith.constant 0 : i32
    %c0_i32_0 = arith.constant 0 : i32
    return %arg0, %c0_i32, %arg1 : i32, i32, i32
  }
  func.func @transform_1(%arg0: i32, %arg1: i32) -> (i32, i32) {
    %c0_i32 = arith.constant 0 : i32
    %c0_i32_0 = arith.constant 0 : i32
    return %arg1, %c0_i32 : i32, i32
  }
  func.func @transform_2(%arg0: i32, %arg1: i32) -> (i32, i32) {
    %c0_i32 = arith.constant 0 : i32
    %c0_i32_0 = arith.constant 0 : i32
    %c0_i32_1 = arith.constant 0 : i32
    return %c0_i32, %c0_i32_0 : i32, i32
  }
  func.func @transform_3(%arg0: i32, %arg1: i32) -> (i32, i32) {
    %c0_i32 = arith.constant 0 : i32
    %c0_i32_0 = arith.constant 0 : i32
    %c0_i32_1 = arith.constant 0 : i32
    return %c0_i32, %c0_i32_0 : i32, i32
  }
  func.func @transform_4(%arg0: i32, %arg1: i32) -> (i32, i32) {
    %c0_i32 = arith.constant 0 : i32
    %c0_i32_0 = arith.constant 0 : i32
    %c0_i32_1 = arith.constant 0 : i32
    return %c0_i32, %c0_i32_0 : i32, i32
  }
  func.func @transform_5(%arg0: i32, %arg1: i32) -> (i32, i32) {
    %c0_i32 = arith.constant 0 : i32
    %c0_i32_0 = arith.constant 0 : i32
    %c0_i32_1 = arith.constant 0 : i32
    return %c0_i32, %c0_i32_0 : i32, i32
  }
  func.func @transform_6(%arg0: i32, %arg1: i32) -> (i32, i32, i32) {
    %c0_i32 = arith.constant 0 : i32
    %c0_i32_0 = arith.constant 0 : i32
    %c0_i32_1 = arith.constant 0 : i32
    return %arg0, %c0_i32, %c0_i32_0 : i32, i32, i32
  }
}

module attributes {stable_mosaic.version = 11 : i64} {
  func.func @_conv_gn_kernel(%arg0: i32, %arg1: i32, %arg2: memref<1x64x1152xbf16, #tpu.memory_space<vmem>>, %arg3: memref<1152x128xbf16, #tpu.memory_space<vmem>>, %arg4: memref<1x128xf32, #tpu.memory_space<vmem>>, %arg5: memref<128x128xf32, #tpu.memory_space<vmem>>, %arg6: memref<1x128xf32, #tpu.memory_space<vmem>>, %arg7: memref<1x128xf32, #tpu.memory_space<vmem>>, %arg8: memref<1x64x128xf32, #tpu.memory_space<vmem>>, %arg9: memref<64x128xf32, #tpu.memory_space<vmem>>) attributes {dimension_semantics = [#tpu.dimension_semantics<parallel>, #tpu.dimension_semantics<arbitrary>], iteration_bounds = array<i64: 2, 1>, scalar_prefetch = 0 : i64, scratch_operands = 1 : i64, tpu.core_type = #tpu.core_type<tc>, window_params = [{transform_indices = @transform_0, window_bounds = array<i64: 1, 64, 1152>}, {transform_indices = @transform_1, window_bounds = array<i64: 1152, 128>}, {pipeline_mode = #tpu.pipeline_mode<synchronous>, transform_indices = @transform_2, window_bounds = array<i64: 1, 128>}, {pipeline_mode = #tpu.pipeline_mode<synchronous>, transform_indices = @transform_3, window_bounds = array<i64: 128, 128>}, {pipeline_mode = #tpu.pipeline_mode<synchronous>, transform_indices = @transform_4, window_bounds = array<i64: 1, 128>}, {pipeline_mode = #tpu.pipeline_mode<synchronous>, transform_indices = @transform_5, window_bounds = array<i64: 1, 128>}, {transform_indices = @transform_6, window_bounds = array<i64: 1, 64, 128>}]} {
    %c0_i32 = arith.constant 0 : i32
    %0 = arith.cmpi eq, %arg1, %c0_i32 : i32
    %1 = arith.extui %0 : i1 to i32
    %c0_i32_0 = arith.constant 0 : i32
    %2 = arith.cmpi ne, %1, %c0_i32_0 : i32
    scf.if %2 {
      %cst_11 = arith.constant 0.000000e+00 : f32
      %13 = vector.broadcast %cst_11 : f32 to vector<64x128xf32>
      %c0_12 = arith.constant 0 : index
      %c0_13 = arith.constant 0 : index
      %14 = vector.load %arg9[%c0_12, %c0_13] : memref<64x128xf32, #tpu.memory_space<vmem>>, vector<64x128xf32>
      tpu.vector_store %arg9[%c0_12, %c0_13], %13 {strides = array<i32>} : memref<64x128xf32, #tpu.memory_space<vmem>>, vector<64x128xf32>,
    } else {
    }
    %c0 = arith.constant 0 : index
    %c0_1 = arith.constant 0 : index
    %3 = vector.load %arg9[%c0, %c0_1] : memref<64x128xf32, #tpu.memory_space<vmem>>, vector<64x128xf32>
    %c0_2 = arith.constant 0 : index
    %c0_3 = arith.constant 0 : index
    %c0_4 = arith.constant 0 : index
    %4 = vector.load %arg2[%c0_2, %c0_3, %c0_4] : memref<1x64x1152xbf16, #tpu.memory_space<vmem>>, vector<1x64x1152xbf16>
    %5 = vector.shape_cast %4 : vector<1x64x1152xbf16> to vector<64x1152xbf16>
    %c0_5 = arith.constant 0 : index
    %c0_6 = arith.constant 0 : index
    %6 = vector.load %arg3[%c0_5, %c0_6] : memref<1152x128xbf16, #tpu.memory_space<vmem>>, vector<1152x128xbf16>
    %cst = arith.constant dense<0.000000e+00> : vector<64x128xf32>
    %7 = tpu.matmul %5, %6, %cst {dimension_numbers = #tpu.dot_dimension_numbers<[1], [0], [0], [1], [0, 0, 1, 1], [], []>} : vector<64x1152xbf16>, vector<1152x128xbf16>, vector<64x128xf32> -> vector<64x128xf32>
    %8 = arith.addf %3, %7 : vector<64x128xf32>
    %c0_7 = arith.constant 0 : index
    %c0_8 = arith.constant 0 : index
    %9 = vector.load %arg9[%c0_7, %c0_8] : memref<64x128xf32, #tpu.memory_space<vmem>>, vector<64x128xf32>
    tpu.vector_store %arg9[%c0_7, %c0_8], %8 {strides = array<i32>} : memref<64x128xf32, #tpu.memory_space<vmem>>, vector<64x128xf32>,
    %c0_i32_9 = arith.constant 0 : i32
    %10 = arith.cmpi eq, %arg1, %c0_i32_9 : i32
    %11 = arith.extui %10 : i1 to i32
    %c0_i32_10 = arith.constant 0 : i32
    %12 = arith.cmpi ne, %11, %c0_i32_10 : i32
    scf.if %12 {
      %c0_11 = arith.constant 0 : index
      %c0_12 = arith.constant 0 : index
      %13 = vector.load %arg9[%c0_11, %c0_12] : memref<64x128xf32, #tpu.memory_space<vmem>>, vector<64x128xf32>
      %c0_13 = arith.constant 0 : index
      %c0_14 = arith.constant 0 : index
      %14 = vector.load %arg4[%c0_13, %c0_14] : memref<1x128xf32, #tpu.memory_space<vmem>>, vector<1x128xf32>
      %15 = vector.broadcast %14 : vector<1x128xf32> to vector<64x128xf32>
      %16 = arith.addf %13, %15 : vector<64x128xf32>
      %cst_15 = arith.constant dense<0.000000e+00> : vector<128xf32>
      %17 = vector.multi_reduction <add>, %16, %cst_15 [0] : vector<64x128xf32> to vector<128xf32>
      %18 = vector.shape_cast %17 : vector<128xf32> to vector<1x128xf32>
      %c0_16 = arith.constant 0 : index
      %c0_17 = arith.constant 0 : index
      %19 = vector.load %arg5[%c0_16, %c0_17] : memref<128x128xf32, #tpu.memory_space<vmem>>, vector<128x128xf32>
      %cst_18 = arith.constant dense<0.000000e+00> : vector<1x128xf32>
      %20 = tpu.matmul %18, %19, %cst_18 {dimension_numbers = #tpu.dot_dimension_numbers<[1], [0], [0], [1], [0, 0, 1, 1], [], []>} : vector<1x128xf32>, vector<128x128xf32>, vector<1x128xf32> -> vector<1x128xf32>
      %cst_19 = arith.constant 0.001953125 : f32
      %21 = vector.broadcast %cst_19 : f32 to vector<1x128xf32>
      %22 = arith.mulf %20, %21 : vector<1x128xf32>
      %23 = vector.broadcast %22 : vector<1x128xf32> to vector<64x128xf32>
      %24 = arith.subf %16, %23 : vector<64x128xf32>
      %25 = arith.mulf %24, %24 : vector<64x128xf32>
      %cst_20 = arith.constant dense<0.000000e+00> : vector<128xf32>
      %26 = vector.multi_reduction <add>, %25, %cst_20 [0] : vector<64x128xf32> to vector<128xf32>
      %27 = vector.shape_cast %26 : vector<128xf32> to vector<1x128xf32>
      %c0_21 = arith.constant 0 : index
      %c0_22 = arith.constant 0 : index
      %28 = vector.load %arg5[%c0_21, %c0_22] : memref<128x128xf32, #tpu.memory_space<vmem>>, vector<128x128xf32>
      %cst_23 = arith.constant dense<0.000000e+00> : vector<1x128xf32>
      %29 = tpu.matmul %27, %28, %cst_23 {dimension_numbers = #tpu.dot_dimension_numbers<[1], [0], [0], [1], [0, 0, 1, 1], [], []>} : vector<1x128xf32>, vector<128x128xf32>, vector<1x128xf32> -> vector<1x128xf32>
      %cst_24 = arith.constant 0.001953125 : f32
      %30 = vector.broadcast %cst_24 : f32 to vector<1x128xf32>
      %31 = arith.mulf %29, %30 : vector<1x128xf32>
      %cst_25 = arith.constant 9.99999974E-6 : f32
      %32 = vector.broadcast %cst_25 : f32 to vector<1x128xf32>
      %33 = arith.addf %31, %32 : vector<1x128xf32>
      %34 = math.rsqrt %33 : vector<1x128xf32>
      %c0_26 = arith.constant 0 : index
      %c0_27 = arith.constant 0 : index
      %35 = vector.load %arg6[%c0_26, %c0_27] : memref<1x128xf32, #tpu.memory_space<vmem>>, vector<1x128xf32>
      %36 = arith.mulf %34, %35 : vector<1x128xf32>
      %37 = vector.broadcast %36 : vector<1x128xf32> to vector<64x128xf32>
      %38 = arith.mulf %24, %37 : vector<64x128xf32>
      %c0_28 = arith.constant 0 : index
      %c0_29 = arith.constant 0 : index
      %39 = vector.load %arg7[%c0_28, %c0_29] : memref<1x128xf32, #tpu.memory_space<vmem>>, vector<1x128xf32>
      %40 = vector.broadcast %39 : vector<1x128xf32> to vector<64x128xf32>
      %41 = arith.addf %38, %40 : vector<64x128xf32>
      %cst_30 = arith.constant 0.000000e+00 : f32
      %42 = vector.broadcast %cst_30 : f32 to vector<64x128xf32>
      %43 = arith.maximumf %41, %42 : vector<64x128xf32>
      %c0_31 = arith.constant 0 : index
      %c0_32 = arith.constant 0 : index
      %c0_33 = arith.constant 0 : index
      %44 = vector.load %arg8[%c0_31, %c0_32, %c0_33] : memref<1x64x128xf32, #tpu.memory_space<vmem>>, vector<1x64x128xf32>
      %45 = vector.shape_cast %44 : vector<1x64x128xf32> to vector<64x128xf32>
      %46 = vector.shape_cast %43 : vector<64x128xf32> to vector<1x64x128xf32>
      tpu.vector_store %arg8[%c0_31, %c0_32, %c0_33], %46 {strides = array<i32>} : memref<1x64x128xf32, #tpu.memory_space<vmem>>, vector<1x64x128xf32>,
    } else {
    }
    return
  }
  func.func @transform_0(%arg0: i32, %arg1: i32) -> (i32, i32, i32) {
    %c0_i32 = arith.constant 0 : i32
    %c0_i32_0 = arith.constant 0 : i32
    return %arg0, %c0_i32, %arg1 : i32, i32, i32
  }
  func.func @transform_1(%arg0: i32, %arg1: i32) -> (i32, i32) {
    %c0_i32 = arith.constant 0 : i32
    %c0_i32_0 = arith.constant 0 : i32
    return %arg1, %c0_i32 : i32, i32
  }
  func.func @transform_2(%arg0: i32, %arg1: i32) -> (i32, i32) {
    %c0_i32 = arith.constant 0 : i32
    %c0_i32_0 = arith.constant 0 : i32
    %c0_i32_1 = arith.constant 0 : i32
    return %c0_i32, %c0_i32_0 : i32, i32
  }
  func.func @transform_3(%arg0: i32, %arg1: i32) -> (i32, i32) {
    %c0_i32 = arith.constant 0 : i32
    %c0_i32_0 = arith.constant 0 : i32
    %c0_i32_1 = arith.constant 0 : i32
    return %c0_i32, %c0_i32_0 : i32, i32
  }
  func.func @transform_4(%arg0: i32, %arg1: i32) -> (i32, i32) {
    %c0_i32 = arith.constant 0 : i32
    %c0_i32_0 = arith.constant 0 : i32
    %c0_i32_1 = arith.constant 0 : i32
    return %c0_i32, %c0_i32_0 : i32, i32
  }
  func.func @transform_5(%arg0: i32, %arg1: i32) -> (i32, i32) {
    %c0_i32 = arith.constant 0 : i32
    %c0_i32_0 = arith.constant 0 : i32
    %c0_i32_1 = arith.constant 0 : i32
    return %c0_i32, %c0_i32_0 : i32, i32
  }
  func.func @transform_6(%arg0: i32, %arg1: i32) -> (i32, i32, i32) {
    %c0_i32 = arith.constant 0 : i32
    %c0_i32_0 = arith.constant 0 : i32
    %c0_i32_1 = arith.constant 0 : i32
    return %arg0, %c0_i32, %c0_i32_0 : i32, i32, i32
  }
}

module attributes {stable_mosaic.version = 11 : i64} {
  func.func @_conv_gn_kernel(%arg0: i32, %arg1: i32, %arg2: memref<1x64x128xbf16, #tpu.memory_space<vmem>>, %arg3: memref<128x128xbf16, #tpu.memory_space<vmem>>, %arg4: memref<1x128xf32, #tpu.memory_space<vmem>>, %arg5: memref<128x128xf32, #tpu.memory_space<vmem>>, %arg6: memref<1x128xf32, #tpu.memory_space<vmem>>, %arg7: memref<1x128xf32, #tpu.memory_space<vmem>>, %arg8: memref<1x64x128xf32, #tpu.memory_space<vmem>>, %arg9: memref<64x128xf32, #tpu.memory_space<vmem>>) attributes {dimension_semantics = [#tpu.dimension_semantics<parallel>, #tpu.dimension_semantics<arbitrary>], iteration_bounds = array<i64: 2, 1>, scalar_prefetch = 0 : i64, scratch_operands = 1 : i64, tpu.core_type = #tpu.core_type<tc>, window_params = [{transform_indices = @transform_0, window_bounds = array<i64: 1, 64, 128>}, {transform_indices = @transform_1, window_bounds = array<i64: 128, 128>}, {pipeline_mode = #tpu.pipeline_mode<synchronous>, transform_indices = @transform_2, window_bounds = array<i64: 1, 128>}, {pipeline_mode = #tpu.pipeline_mode<synchronous>, transform_indices = @transform_3, window_bounds = array<i64: 128, 128>}, {pipeline_mode = #tpu.pipeline_mode<synchronous>, transform_indices = @transform_4, window_bounds = array<i64: 1, 128>}, {pipeline_mode = #tpu.pipeline_mode<synchronous>, transform_indices = @transform_5, window_bounds = array<i64: 1, 128>}, {transform_indices = @transform_6, window_bounds = array<i64: 1, 64, 128>}]} {
    %c0_i32 = arith.constant 0 : i32
    %0 = arith.cmpi eq, %arg1, %c0_i32 : i32
    %1 = arith.extui %0 : i1 to i32
    %c0_i32_0 = arith.constant 0 : i32
    %2 = arith.cmpi ne, %1, %c0_i32_0 : i32
    scf.if %2 {
      %cst_11 = arith.constant 0.000000e+00 : f32
      %13 = vector.broadcast %cst_11 : f32 to vector<64x128xf32>
      %c0_12 = arith.constant 0 : index
      %c0_13 = arith.constant 0 : index
      %14 = vector.load %arg9[%c0_12, %c0_13] : memref<64x128xf32, #tpu.memory_space<vmem>>, vector<64x128xf32>
      tpu.vector_store %arg9[%c0_12, %c0_13], %13 {strides = array<i32>} : memref<64x128xf32, #tpu.memory_space<vmem>>, vector<64x128xf32>,
    } else {
    }
    %c0 = arith.constant 0 : index
    %c0_1 = arith.constant 0 : index
    %3 = vector.load %arg9[%c0, %c0_1] : memref<64x128xf32, #tpu.memory_space<vmem>>, vector<64x128xf32>
    %c0_2 = arith.constant 0 : index
    %c0_3 = arith.constant 0 : index
    %c0_4 = arith.constant 0 : index
    %4 = vector.load %arg2[%c0_2, %c0_3, %c0_4] : memref<1x64x128xbf16, #tpu.memory_space<vmem>>, vector<1x64x128xbf16>
    %5 = vector.shape_cast %4 : vector<1x64x128xbf16> to vector<64x128xbf16>
    %c0_5 = arith.constant 0 : index
    %c0_6 = arith.constant 0 : index
    %6 = vector.load %arg3[%c0_5, %c0_6] : memref<128x128xbf16, #tpu.memory_space<vmem>>, vector<128x128xbf16>
    %cst = arith.constant dense<0.000000e+00> : vector<64x128xf32>
    %7 = tpu.matmul %5, %6, %cst {dimension_numbers = #tpu.dot_dimension_numbers<[1], [0], [0], [1], [0, 0, 1, 1], [], []>} : vector<64x128xbf16>, vector<128x128xbf16>, vector<64x128xf32> -> vector<64x128xf32>
    %8 = arith.addf %3, %7 : vector<64x128xf32>
    %c0_7 = arith.constant 0 : index
    %c0_8 = arith.constant 0 : index
    %9 = vector.load %arg9[%c0_7, %c0_8] : memref<64x128xf32, #tpu.memory_space<vmem>>, vector<64x128xf32>
    tpu.vector_store %arg9[%c0_7, %c0_8], %8 {strides = array<i32>} : memref<64x128xf32, #tpu.memory_space<vmem>>, vector<64x128xf32>,
    %c0_i32_9 = arith.constant 0 : i32
    %10 = arith.cmpi eq, %arg1, %c0_i32_9 : i32
    %11 = arith.extui %10 : i1 to i32
    %c0_i32_10 = arith.constant 0 : i32
    %12 = arith.cmpi ne, %11, %c0_i32_10 : i32
    scf.if %12 {
      %c0_11 = arith.constant 0 : index
      %c0_12 = arith.constant 0 : index
      %13 = vector.load %arg9[%c0_11, %c0_12] : memref<64x128xf32, #tpu.memory_space<vmem>>, vector<64x128xf32>
      %c0_13 = arith.constant 0 : index
      %c0_14 = arith.constant 0 : index
      %14 = vector.load %arg4[%c0_13, %c0_14] : memref<1x128xf32, #tpu.memory_space<vmem>>, vector<1x128xf32>
      %15 = vector.broadcast %14 : vector<1x128xf32> to vector<64x128xf32>
      %16 = arith.addf %13, %15 : vector<64x128xf32>
      %cst_15 = arith.constant dense<0.000000e+00> : vector<128xf32>
      %17 = vector.multi_reduction <add>, %16, %cst_15 [0] : vector<64x128xf32> to vector<128xf32>
      %18 = vector.shape_cast %17 : vector<128xf32> to vector<1x128xf32>
      %c0_16 = arith.constant 0 : index
      %c0_17 = arith.constant 0 : index
      %19 = vector.load %arg5[%c0_16, %c0_17] : memref<128x128xf32, #tpu.memory_space<vmem>>, vector<128x128xf32>
      %cst_18 = arith.constant dense<0.000000e+00> : vector<1x128xf32>
      %20 = tpu.matmul %18, %19, %cst_18 {dimension_numbers = #tpu.dot_dimension_numbers<[1], [0], [0], [1], [0, 0, 1, 1], [], []>} : vector<1x128xf32>, vector<128x128xf32>, vector<1x128xf32> -> vector<1x128xf32>
      %cst_19 = arith.constant 0.001953125 : f32
      %21 = vector.broadcast %cst_19 : f32 to vector<1x128xf32>
      %22 = arith.mulf %20, %21 : vector<1x128xf32>
      %23 = vector.broadcast %22 : vector<1x128xf32> to vector<64x128xf32>
      %24 = arith.subf %16, %23 : vector<64x128xf32>
      %25 = arith.mulf %24, %24 : vector<64x128xf32>
      %cst_20 = arith.constant dense<0.000000e+00> : vector<128xf32>
      %26 = vector.multi_reduction <add>, %25, %cst_20 [0] : vector<64x128xf32> to vector<128xf32>
      %27 = vector.shape_cast %26 : vector<128xf32> to vector<1x128xf32>
      %c0_21 = arith.constant 0 : index
      %c0_22 = arith.constant 0 : index
      %28 = vector.load %arg5[%c0_21, %c0_22] : memref<128x128xf32, #tpu.memory_space<vmem>>, vector<128x128xf32>
      %cst_23 = arith.constant dense<0.000000e+00> : vector<1x128xf32>
      %29 = tpu.matmul %27, %28, %cst_23 {dimension_numbers = #tpu.dot_dimension_numbers<[1], [0], [0], [1], [0, 0, 1, 1], [], []>} : vector<1x128xf32>, vector<128x128xf32>, vector<1x128xf32> -> vector<1x128xf32>
      %cst_24 = arith.constant 0.001953125 : f32
      %30 = vector.broadcast %cst_24 : f32 to vector<1x128xf32>
      %31 = arith.mulf %29, %30 : vector<1x128xf32>
      %cst_25 = arith.constant 9.99999974E-6 : f32
      %32 = vector.broadcast %cst_25 : f32 to vector<1x128xf32>
      %33 = arith.addf %31, %32 : vector<1x128xf32>
      %34 = math.rsqrt %33 : vector<1x128xf32>
      %c0_26 = arith.constant 0 : index
      %c0_27 = arith.constant 0 : index
      %35 = vector.load %arg6[%c0_26, %c0_27] : memref<1x128xf32, #tpu.memory_space<vmem>>, vector<1x128xf32>
      %36 = arith.mulf %34, %35 : vector<1x128xf32>
      %37 = vector.broadcast %36 : vector<1x128xf32> to vector<64x128xf32>
      %38 = arith.mulf %24, %37 : vector<64x128xf32>
      %c0_28 = arith.constant 0 : index
      %c0_29 = arith.constant 0 : index
      %39 = vector.load %arg7[%c0_28, %c0_29] : memref<1x128xf32, #tpu.memory_space<vmem>>, vector<1x128xf32>
      %40 = vector.broadcast %39 : vector<1x128xf32> to vector<64x128xf32>
      %41 = arith.addf %38, %40 : vector<64x128xf32>
      %c0_30 = arith.constant 0 : index
      %c0_31 = arith.constant 0 : index
      %c0_32 = arith.constant 0 : index
      %42 = vector.load %arg8[%c0_30, %c0_31, %c0_32] : memref<1x64x128xf32, #tpu.memory_space<vmem>>, vector<1x64x128xf32>
      %43 = vector.shape_cast %42 : vector<1x64x128xf32> to vector<64x128xf32>
      %44 = vector.shape_cast %41 : vector<64x128xf32> to vector<1x64x128xf32>
      tpu.vector_store %arg8[%c0_30, %c0_31, %c0_32], %44 {strides = array<i32>} : memref<1x64x128xf32, #tpu.memory_space<vmem>>, vector<1x64x128xf32>,
    } else {
    }
    return
  }
  func.func @transform_0(%arg0: i32, %arg1: i32) -> (i32, i32, i32) {
    %c0_i32 = arith.constant 0 : i32
    %c0_i32_0 = arith.constant 0 : i32
    return %arg0, %c0_i32, %arg1 : i32, i32, i32
  }
  func.func @transform_1(%arg0: i32, %arg1: i32) -> (i32, i32) {
    %c0_i32 = arith.constant 0 : i32
    %c0_i32_0 = arith.constant 0 : i32
    return %arg1, %c0_i32 : i32, i32
  }
  func.func @transform_2(%arg0: i32, %arg1: i32) -> (i32, i32) {
    %c0_i32 = arith.constant 0 : i32
    %c0_i32_0 = arith.constant 0 : i32
    %c0_i32_1 = arith.constant 0 : i32
    return %c0_i32, %c0_i32_0 : i32, i32
  }
  func.func @transform_3(%arg0: i32, %arg1: i32) -> (i32, i32) {
    %c0_i32 = arith.constant 0 : i32
    %c0_i32_0 = arith.constant 0 : i32
    %c0_i32_1 = arith.constant 0 : i32
    return %c0_i32, %c0_i32_0 : i32, i32
  }
  func.func @transform_4(%arg0: i32, %arg1: i32) -> (i32, i32) {
    %c0_i32 = arith.constant 0 : i32
    %c0_i32_0 = arith.constant 0 : i32
    %c0_i32_1 = arith.constant 0 : i32
    return %c0_i32, %c0_i32_0 : i32, i32
  }
  func.func @transform_5(%arg0: i32, %arg1: i32) -> (i32, i32) {
    %c0_i32 = arith.constant 0 : i32
    %c0_i32_0 = arith.constant 0 : i32
    %c0_i32_1 = arith.constant 0 : i32
    return %c0_i32, %c0_i32_0 : i32, i32
  }
  func.func @transform_6(%arg0: i32, %arg1: i32) -> (i32, i32, i32) {
    %c0_i32 = arith.constant 0 : i32
    %c0_i32_0 = arith.constant 0 : i32
    %c0_i32_1 = arith.constant 0 : i32
    return %arg0, %c0_i32, %c0_i32_0 : i32, i32, i32
  }
}

module attributes {stable_mosaic.version = 11 : i64} {
  func.func @_conv_gn_kernel(%arg0: i32, %arg1: i32, %arg2: memref<1x64x1152xbf16, #tpu.memory_space<vmem>>, %arg3: memref<1152x128xbf16, #tpu.memory_space<vmem>>, %arg4: memref<1x128xf32, #tpu.memory_space<vmem>>, %arg5: memref<128x128xf32, #tpu.memory_space<vmem>>, %arg6: memref<1x128xf32, #tpu.memory_space<vmem>>, %arg7: memref<1x128xf32, #tpu.memory_space<vmem>>, %arg8: memref<1x64x128xf32, #tpu.memory_space<vmem>>, %arg9: memref<1x64x128xf32, #tpu.memory_space<vmem>>, %arg10: memref<64x128xf32, #tpu.memory_space<vmem>>) attributes {dimension_semantics = [#tpu.dimension_semantics<parallel>, #tpu.dimension_semantics<arbitrary>], iteration_bounds = array<i64: 2, 1>, scalar_prefetch = 0 : i64, scratch_operands = 1 : i64, tpu.core_type = #tpu.core_type<tc>, window_params = [{transform_indices = @transform_0, window_bounds = array<i64: 1, 64, 1152>}, {transform_indices = @transform_1, window_bounds = array<i64: 1152, 128>}, {pipeline_mode = #tpu.pipeline_mode<synchronous>, transform_indices = @transform_2, window_bounds = array<i64: 1, 128>}, {pipeline_mode = #tpu.pipeline_mode<synchronous>, transform_indices = @transform_3, window_bounds = array<i64: 128, 128>}, {pipeline_mode = #tpu.pipeline_mode<synchronous>, transform_indices = @transform_4, window_bounds = array<i64: 1, 128>}, {pipeline_mode = #tpu.pipeline_mode<synchronous>, transform_indices = @transform_5, window_bounds = array<i64: 1, 128>}, {transform_indices = @transform_6, window_bounds = array<i64: 1, 64, 128>}, {transform_indices = @transform_7, window_bounds = array<i64: 1, 64, 128>}]} {
    %c0_i32 = arith.constant 0 : i32
    %0 = arith.cmpi eq, %arg1, %c0_i32 : i32
    %1 = arith.extui %0 : i1 to i32
    %c0_i32_0 = arith.constant 0 : i32
    %2 = arith.cmpi ne, %1, %c0_i32_0 : i32
    scf.if %2 {
      %cst_11 = arith.constant 0.000000e+00 : f32
      %13 = vector.broadcast %cst_11 : f32 to vector<64x128xf32>
      %c0_12 = arith.constant 0 : index
      %c0_13 = arith.constant 0 : index
      %14 = vector.load %arg10[%c0_12, %c0_13] : memref<64x128xf32, #tpu.memory_space<vmem>>, vector<64x128xf32>
      tpu.vector_store %arg10[%c0_12, %c0_13], %13 {strides = array<i32>} : memref<64x128xf32, #tpu.memory_space<vmem>>, vector<64x128xf32>,
    } else {
    }
    %c0 = arith.constant 0 : index
    %c0_1 = arith.constant 0 : index
    %3 = vector.load %arg10[%c0, %c0_1] : memref<64x128xf32, #tpu.memory_space<vmem>>, vector<64x128xf32>
    %c0_2 = arith.constant 0 : index
    %c0_3 = arith.constant 0 : index
    %c0_4 = arith.constant 0 : index
    %4 = vector.load %arg2[%c0_2, %c0_3, %c0_4] : memref<1x64x1152xbf16, #tpu.memory_space<vmem>>, vector<1x64x1152xbf16>
    %5 = vector.shape_cast %4 : vector<1x64x1152xbf16> to vector<64x1152xbf16>
    %c0_5 = arith.constant 0 : index
    %c0_6 = arith.constant 0 : index
    %6 = vector.load %arg3[%c0_5, %c0_6] : memref<1152x128xbf16, #tpu.memory_space<vmem>>, vector<1152x128xbf16>
    %cst = arith.constant dense<0.000000e+00> : vector<64x128xf32>
    %7 = tpu.matmul %5, %6, %cst {dimension_numbers = #tpu.dot_dimension_numbers<[1], [0], [0], [1], [0, 0, 1, 1], [], []>} : vector<64x1152xbf16>, vector<1152x128xbf16>, vector<64x128xf32> -> vector<64x128xf32>
    %8 = arith.addf %3, %7 : vector<64x128xf32>
    %c0_7 = arith.constant 0 : index
    %c0_8 = arith.constant 0 : index
    %9 = vector.load %arg10[%c0_7, %c0_8] : memref<64x128xf32, #tpu.memory_space<vmem>>, vector<64x128xf32>
    tpu.vector_store %arg10[%c0_7, %c0_8], %8 {strides = array<i32>} : memref<64x128xf32, #tpu.memory_space<vmem>>, vector<64x128xf32>,
    %c0_i32_9 = arith.constant 0 : i32
    %10 = arith.cmpi eq, %arg1, %c0_i32_9 : i32
    %11 = arith.extui %10 : i1 to i32
    %c0_i32_10 = arith.constant 0 : i32
    %12 = arith.cmpi ne, %11, %c0_i32_10 : i32
    scf.if %12 {
      %c0_11 = arith.constant 0 : index
      %c0_12 = arith.constant 0 : index
      %13 = vector.load %arg10[%c0_11, %c0_12] : memref<64x128xf32, #tpu.memory_space<vmem>>, vector<64x128xf32>
      %c0_13 = arith.constant 0 : index
      %c0_14 = arith.constant 0 : index
      %14 = vector.load %arg4[%c0_13, %c0_14] : memref<1x128xf32, #tpu.memory_space<vmem>>, vector<1x128xf32>
      %15 = vector.broadcast %14 : vector<1x128xf32> to vector<64x128xf32>
      %16 = arith.addf %13, %15 : vector<64x128xf32>
      %cst_15 = arith.constant dense<0.000000e+00> : vector<128xf32>
      %17 = vector.multi_reduction <add>, %16, %cst_15 [0] : vector<64x128xf32> to vector<128xf32>
      %18 = vector.shape_cast %17 : vector<128xf32> to vector<1x128xf32>
      %c0_16 = arith.constant 0 : index
      %c0_17 = arith.constant 0 : index
      %19 = vector.load %arg5[%c0_16, %c0_17] : memref<128x128xf32, #tpu.memory_space<vmem>>, vector<128x128xf32>
      %cst_18 = arith.constant dense<0.000000e+00> : vector<1x128xf32>
      %20 = tpu.matmul %18, %19, %cst_18 {dimension_numbers = #tpu.dot_dimension_numbers<[1], [0], [0], [1], [0, 0, 1, 1], [], []>} : vector<1x128xf32>, vector<128x128xf32>, vector<1x128xf32> -> vector<1x128xf32>
      %cst_19 = arith.constant 0.001953125 : f32
      %21 = vector.broadcast %cst_19 : f32 to vector<1x128xf32>
      %22 = arith.mulf %20, %21 : vector<1x128xf32>
      %23 = vector.broadcast %22 : vector<1x128xf32> to vector<64x128xf32>
      %24 = arith.subf %16, %23 : vector<64x128xf32>
      %25 = arith.mulf %24, %24 : vector<64x128xf32>
      %cst_20 = arith.constant dense<0.000000e+00> : vector<128xf32>
      %26 = vector.multi_reduction <add>, %25, %cst_20 [0] : vector<64x128xf32> to vector<128xf32>
      %27 = vector.shape_cast %26 : vector<128xf32> to vector<1x128xf32>
      %c0_21 = arith.constant 0 : index
      %c0_22 = arith.constant 0 : index
      %28 = vector.load %arg5[%c0_21, %c0_22] : memref<128x128xf32, #tpu.memory_space<vmem>>, vector<128x128xf32>
      %cst_23 = arith.constant dense<0.000000e+00> : vector<1x128xf32>
      %29 = tpu.matmul %27, %28, %cst_23 {dimension_numbers = #tpu.dot_dimension_numbers<[1], [0], [0], [1], [0, 0, 1, 1], [], []>} : vector<1x128xf32>, vector<128x128xf32>, vector<1x128xf32> -> vector<1x128xf32>
      %cst_24 = arith.constant 0.001953125 : f32
      %30 = vector.broadcast %cst_24 : f32 to vector<1x128xf32>
      %31 = arith.mulf %29, %30 : vector<1x128xf32>
      %cst_25 = arith.constant 9.99999974E-6 : f32
      %32 = vector.broadcast %cst_25 : f32 to vector<1x128xf32>
      %33 = arith.addf %31, %32 : vector<1x128xf32>
      %34 = math.rsqrt %33 : vector<1x128xf32>
      %c0_26 = arith.constant 0 : index
      %c0_27 = arith.constant 0 : index
      %35 = vector.load %arg6[%c0_26, %c0_27] : memref<1x128xf32, #tpu.memory_space<vmem>>, vector<1x128xf32>
      %36 = arith.mulf %34, %35 : vector<1x128xf32>
      %37 = vector.broadcast %36 : vector<1x128xf32> to vector<64x128xf32>
      %38 = arith.mulf %24, %37 : vector<64x128xf32>
      %c0_28 = arith.constant 0 : index
      %c0_29 = arith.constant 0 : index
      %39 = vector.load %arg7[%c0_28, %c0_29] : memref<1x128xf32, #tpu.memory_space<vmem>>, vector<1x128xf32>
      %40 = vector.broadcast %39 : vector<1x128xf32> to vector<64x128xf32>
      %41 = arith.addf %38, %40 : vector<64x128xf32>
      %cst_30 = arith.constant 0.000000e+00 : f32
      %42 = vector.broadcast %cst_30 : f32 to vector<64x128xf32>
      %43 = arith.maximumf %41, %42 : vector<64x128xf32>
      %c0_31 = arith.constant 0 : index
      %c0_32 = arith.constant 0 : index
      %c0_33 = arith.constant 0 : index
      %44 = vector.load %arg8[%c0_31, %c0_32, %c0_33] : memref<1x64x128xf32, #tpu.memory_space<vmem>>, vector<1x64x128xf32>
      %45 = vector.shape_cast %44 : vector<1x64x128xf32> to vector<64x128xf32>
      %46 = arith.addf %43, %45 : vector<64x128xf32>
      %cst_34 = arith.constant 0.000000e+00 : f32
      %47 = vector.broadcast %cst_34 : f32 to vector<64x128xf32>
      %48 = arith.maximumf %46, %47 : vector<64x128xf32>
      %c0_35 = arith.constant 0 : index
      %c0_36 = arith.constant 0 : index
      %c0_37 = arith.constant 0 : index
      %49 = vector.load %arg9[%c0_35, %c0_36, %c0_37] : memref<1x64x128xf32, #tpu.memory_space<vmem>>, vector<1x64x128xf32>
      %50 = vector.shape_cast %49 : vector<1x64x128xf32> to vector<64x128xf32>
      %51 = vector.shape_cast %48 : vector<64x128xf32> to vector<1x64x128xf32>
      tpu.vector_store %arg9[%c0_35, %c0_36, %c0_37], %51 {strides = array<i32>} : memref<1x64x128xf32, #tpu.memory_space<vmem>>, vector<1x64x128xf32>,
    } else {
    }
    return
  }
  func.func @transform_0(%arg0: i32, %arg1: i32) -> (i32, i32, i32) {
    %c0_i32 = arith.constant 0 : i32
    %c0_i32_0 = arith.constant 0 : i32
    return %arg0, %c0_i32, %arg1 : i32, i32, i32
  }
  func.func @transform_1(%arg0: i32, %arg1: i32) -> (i32, i32) {
    %c0_i32 = arith.constant 0 : i32
    %c0_i32_0 = arith.constant 0 : i32
    return %arg1, %c0_i32 : i32, i32
  }
  func.func @transform_2(%arg0: i32, %arg1: i32) -> (i32, i32) {
    %c0_i32 = arith.constant 0 : i32
    %c0_i32_0 = arith.constant 0 : i32
    %c0_i32_1 = arith.constant 0 : i32
    return %c0_i32, %c0_i32_0 : i32, i32
  }
  func.func @transform_3(%arg0: i32, %arg1: i32) -> (i32, i32) {
    %c0_i32 = arith.constant 0 : i32
    %c0_i32_0 = arith.constant 0 : i32
    %c0_i32_1 = arith.constant 0 : i32
    return %c0_i32, %c0_i32_0 : i32, i32
  }
  func.func @transform_4(%arg0: i32, %arg1: i32) -> (i32, i32) {
    %c0_i32 = arith.constant 0 : i32
    %c0_i32_0 = arith.constant 0 : i32
    %c0_i32_1 = arith.constant 0 : i32
    return %c0_i32, %c0_i32_0 : i32, i32
  }
  func.func @transform_5(%arg0: i32, %arg1: i32) -> (i32, i32) {
    %c0_i32 = arith.constant 0 : i32
    %c0_i32_0 = arith.constant 0 : i32
    %c0_i32_1 = arith.constant 0 : i32
    return %c0_i32, %c0_i32_0 : i32, i32
  }
  func.func @transform_6(%arg0: i32, %arg1: i32) -> (i32, i32, i32) {
    %c0_i32 = arith.constant 0 : i32
    %c0_i32_0 = arith.constant 0 : i32
    %c0_i32_1 = arith.constant 0 : i32
    return %arg0, %c0_i32, %c0_i32_0 : i32, i32, i32
  }
  func.func @transform_7(%arg0: i32, %arg1: i32) -> (i32, i32, i32) {
    %c0_i32 = arith.constant 0 : i32
    %c0_i32_0 = arith.constant 0 : i32
    %c0_i32_1 = arith.constant 0 : i32
    return %arg0, %c0_i32, %c0_i32_0 : i32, i32, i32
  }
}

module attributes {stable_mosaic.version = 11 : i64} {
  func.func @_conv_gn_kernel(%arg0: i32, %arg1: i32, %arg2: memref<1x16x1152xbf16, #tpu.memory_space<vmem>>, %arg3: memref<1152x128xbf16, #tpu.memory_space<vmem>>, %arg4: memref<1x128xf32, #tpu.memory_space<vmem>>, %arg5: memref<128x128xf32, #tpu.memory_space<vmem>>, %arg6: memref<1x128xf32, #tpu.memory_space<vmem>>, %arg7: memref<1x128xf32, #tpu.memory_space<vmem>>, %arg8: memref<1x16x128xf32, #tpu.memory_space<vmem>>, %arg9: memref<16x128xf32, #tpu.memory_space<vmem>>) attributes {dimension_semantics = [#tpu.dimension_semantics<parallel>, #tpu.dimension_semantics<arbitrary>], iteration_bounds = array<i64: 2, 1>, scalar_prefetch = 0 : i64, scratch_operands = 1 : i64, tpu.core_type = #tpu.core_type<tc>, window_params = [{transform_indices = @transform_0, window_bounds = array<i64: 1, 16, 1152>}, {transform_indices = @transform_1, window_bounds = array<i64: 1152, 128>}, {pipeline_mode = #tpu.pipeline_mode<synchronous>, transform_indices = @transform_2, window_bounds = array<i64: 1, 128>}, {pipeline_mode = #tpu.pipeline_mode<synchronous>, transform_indices = @transform_3, window_bounds = array<i64: 128, 128>}, {pipeline_mode = #tpu.pipeline_mode<synchronous>, transform_indices = @transform_4, window_bounds = array<i64: 1, 128>}, {pipeline_mode = #tpu.pipeline_mode<synchronous>, transform_indices = @transform_5, window_bounds = array<i64: 1, 128>}, {transform_indices = @transform_6, window_bounds = array<i64: 1, 16, 128>}]} {
    %c0_i32 = arith.constant 0 : i32
    %0 = arith.cmpi eq, %arg1, %c0_i32 : i32
    %1 = arith.extui %0 : i1 to i32
    %c0_i32_0 = arith.constant 0 : i32
    %2 = arith.cmpi ne, %1, %c0_i32_0 : i32
    scf.if %2 {
      %cst_11 = arith.constant 0.000000e+00 : f32
      %13 = vector.broadcast %cst_11 : f32 to vector<16x128xf32>
      %c0_12 = arith.constant 0 : index
      %c0_13 = arith.constant 0 : index
      %14 = vector.load %arg9[%c0_12, %c0_13] : memref<16x128xf32, #tpu.memory_space<vmem>>, vector<16x128xf32>
      tpu.vector_store %arg9[%c0_12, %c0_13], %13 {strides = array<i32>} : memref<16x128xf32, #tpu.memory_space<vmem>>, vector<16x128xf32>,
    } else {
    }
    %c0 = arith.constant 0 : index
    %c0_1 = arith.constant 0 : index
    %3 = vector.load %arg9[%c0, %c0_1] : memref<16x128xf32, #tpu.memory_space<vmem>>, vector<16x128xf32>
    %c0_2 = arith.constant 0 : index
    %c0_3 = arith.constant 0 : index
    %c0_4 = arith.constant 0 : index
    %4 = vector.load %arg2[%c0_2, %c0_3, %c0_4] : memref<1x16x1152xbf16, #tpu.memory_space<vmem>>, vector<1x16x1152xbf16>
    %5 = vector.shape_cast %4 : vector<1x16x1152xbf16> to vector<16x1152xbf16>
    %c0_5 = arith.constant 0 : index
    %c0_6 = arith.constant 0 : index
    %6 = vector.load %arg3[%c0_5, %c0_6] : memref<1152x128xbf16, #tpu.memory_space<vmem>>, vector<1152x128xbf16>
    %cst = arith.constant dense<0.000000e+00> : vector<16x128xf32>
    %7 = tpu.matmul %5, %6, %cst {dimension_numbers = #tpu.dot_dimension_numbers<[1], [0], [0], [1], [0, 0, 1, 1], [], []>} : vector<16x1152xbf16>, vector<1152x128xbf16>, vector<16x128xf32> -> vector<16x128xf32>
    %8 = arith.addf %3, %7 : vector<16x128xf32>
    %c0_7 = arith.constant 0 : index
    %c0_8 = arith.constant 0 : index
    %9 = vector.load %arg9[%c0_7, %c0_8] : memref<16x128xf32, #tpu.memory_space<vmem>>, vector<16x128xf32>
    tpu.vector_store %arg9[%c0_7, %c0_8], %8 {strides = array<i32>} : memref<16x128xf32, #tpu.memory_space<vmem>>, vector<16x128xf32>,
    %c0_i32_9 = arith.constant 0 : i32
    %10 = arith.cmpi eq, %arg1, %c0_i32_9 : i32
    %11 = arith.extui %10 : i1 to i32
    %c0_i32_10 = arith.constant 0 : i32
    %12 = arith.cmpi ne, %11, %c0_i32_10 : i32
    scf.if %12 {
      %c0_11 = arith.constant 0 : index
      %c0_12 = arith.constant 0 : index
      %13 = vector.load %arg9[%c0_11, %c0_12] : memref<16x128xf32, #tpu.memory_space<vmem>>, vector<16x128xf32>
      %c0_13 = arith.constant 0 : index
      %c0_14 = arith.constant 0 : index
      %14 = vector.load %arg4[%c0_13, %c0_14] : memref<1x128xf32, #tpu.memory_space<vmem>>, vector<1x128xf32>
      %15 = vector.broadcast %14 : vector<1x128xf32> to vector<16x128xf32>
      %16 = arith.addf %13, %15 : vector<16x128xf32>
      %cst_15 = arith.constant dense<0.000000e+00> : vector<128xf32>
      %17 = vector.multi_reduction <add>, %16, %cst_15 [0] : vector<16x128xf32> to vector<128xf32>
      %18 = vector.shape_cast %17 : vector<128xf32> to vector<1x128xf32>
      %c0_16 = arith.constant 0 : index
      %c0_17 = arith.constant 0 : index
      %19 = vector.load %arg5[%c0_16, %c0_17] : memref<128x128xf32, #tpu.memory_space<vmem>>, vector<128x128xf32>
      %cst_18 = arith.constant dense<0.000000e+00> : vector<1x128xf32>
      %20 = tpu.matmul %18, %19, %cst_18 {dimension_numbers = #tpu.dot_dimension_numbers<[1], [0], [0], [1], [0, 0, 1, 1], [], []>} : vector<1x128xf32>, vector<128x128xf32>, vector<1x128xf32> -> vector<1x128xf32>
      %cst_19 = arith.constant 7.812500e-03 : f32
      %21 = vector.broadcast %cst_19 : f32 to vector<1x128xf32>
      %22 = arith.mulf %20, %21 : vector<1x128xf32>
      %23 = vector.broadcast %22 : vector<1x128xf32> to vector<16x128xf32>
      %24 = arith.subf %16, %23 : vector<16x128xf32>
      %25 = arith.mulf %24, %24 : vector<16x128xf32>
      %cst_20 = arith.constant dense<0.000000e+00> : vector<128xf32>
      %26 = vector.multi_reduction <add>, %25, %cst_20 [0] : vector<16x128xf32> to vector<128xf32>
      %27 = vector.shape_cast %26 : vector<128xf32> to vector<1x128xf32>
      %c0_21 = arith.constant 0 : index
      %c0_22 = arith.constant 0 : index
      %28 = vector.load %arg5[%c0_21, %c0_22] : memref<128x128xf32, #tpu.memory_space<vmem>>, vector<128x128xf32>
      %cst_23 = arith.constant dense<0.000000e+00> : vector<1x128xf32>
      %29 = tpu.matmul %27, %28, %cst_23 {dimension_numbers = #tpu.dot_dimension_numbers<[1], [0], [0], [1], [0, 0, 1, 1], [], []>} : vector<1x128xf32>, vector<128x128xf32>, vector<1x128xf32> -> vector<1x128xf32>
      %cst_24 = arith.constant 7.812500e-03 : f32
      %30 = vector.broadcast %cst_24 : f32 to vector<1x128xf32>
      %31 = arith.mulf %29, %30 : vector<1x128xf32>
      %cst_25 = arith.constant 9.99999974E-6 : f32
      %32 = vector.broadcast %cst_25 : f32 to vector<1x128xf32>
      %33 = arith.addf %31, %32 : vector<1x128xf32>
      %34 = math.rsqrt %33 : vector<1x128xf32>
      %c0_26 = arith.constant 0 : index
      %c0_27 = arith.constant 0 : index
      %35 = vector.load %arg6[%c0_26, %c0_27] : memref<1x128xf32, #tpu.memory_space<vmem>>, vector<1x128xf32>
      %36 = arith.mulf %34, %35 : vector<1x128xf32>
      %37 = vector.broadcast %36 : vector<1x128xf32> to vector<16x128xf32>
      %38 = arith.mulf %24, %37 : vector<16x128xf32>
      %c0_28 = arith.constant 0 : index
      %c0_29 = arith.constant 0 : index
      %39 = vector.load %arg7[%c0_28, %c0_29] : memref<1x128xf32, #tpu.memory_space<vmem>>, vector<1x128xf32>
      %40 = vector.broadcast %39 : vector<1x128xf32> to vector<16x128xf32>
      %41 = arith.addf %38, %40 : vector<16x128xf32>
      %cst_30 = arith.constant 0.000000e+00 : f32
      %42 = vector.broadcast %cst_30 : f32 to vector<16x128xf32>
      %43 = arith.maximumf %41, %42 : vector<16x128xf32>
      %c0_31 = arith.constant 0 : index
      %c0_32 = arith.constant 0 : index
      %c0_33 = arith.constant 0 : index
      %44 = vector.load %arg8[%c0_31, %c0_32, %c0_33] : memref<1x16x128xf32, #tpu.memory_space<vmem>>, vector<1x16x128xf32>
      %45 = vector.shape_cast %44 : vector<1x16x128xf32> to vector<16x128xf32>
      %46 = vector.shape_cast %43 : vector<16x128xf32> to vector<1x16x128xf32>
      tpu.vector_store %arg8[%c0_31, %c0_32, %c0_33], %46 {strides = array<i32>} : memref<1x16x128xf32, #tpu.memory_space<vmem>>, vector<1x16x128xf32>,
    } else {
    }
    return
  }
  func.func @transform_0(%arg0: i32, %arg1: i32) -> (i32, i32, i32) {
    %c0_i32 = arith.constant 0 : i32
    %c0_i32_0 = arith.constant 0 : i32
    return %arg0, %c0_i32, %arg1 : i32, i32, i32
  }
  func.func @transform_1(%arg0: i32, %arg1: i32) -> (i32, i32) {
    %c0_i32 = arith.constant 0 : i32
    %c0_i32_0 = arith.constant 0 : i32
    return %arg1, %c0_i32 : i32, i32
  }
  func.func @transform_2(%arg0: i32, %arg1: i32) -> (i32, i32) {
    %c0_i32 = arith.constant 0 : i32
    %c0_i32_0 = arith.constant 0 : i32
    %c0_i32_1 = arith.constant 0 : i32
    return %c0_i32, %c0_i32_0 : i32, i32
  }
  func.func @transform_3(%arg0: i32, %arg1: i32) -> (i32, i32) {
    %c0_i32 = arith.constant 0 : i32
    %c0_i32_0 = arith.constant 0 : i32
    %c0_i32_1 = arith.constant 0 : i32
    return %c0_i32, %c0_i32_0 : i32, i32
  }
  func.func @transform_4(%arg0: i32, %arg1: i32) -> (i32, i32) {
    %c0_i32 = arith.constant 0 : i32
    %c0_i32_0 = arith.constant 0 : i32
    %c0_i32_1 = arith.constant 0 : i32
    return %c0_i32, %c0_i32_0 : i32, i32
  }
  func.func @transform_5(%arg0: i32, %arg1: i32) -> (i32, i32) {
    %c0_i32 = arith.constant 0 : i32
    %c0_i32_0 = arith.constant 0 : i32
    %c0_i32_1 = arith.constant 0 : i32
    return %c0_i32, %c0_i32_0 : i32, i32
  }
  func.func @transform_6(%arg0: i32, %arg1: i32) -> (i32, i32, i32) {
    %c0_i32 = arith.constant 0 : i32
    %c0_i32_0 = arith.constant 0 : i32
    %c0_i32_1 = arith.constant 0 : i32
    return %arg0, %c0_i32, %c0_i32_0 : i32, i32, i32
  }
}

module attributes {stable_mosaic.version = 11 : i64} {
  func.func @_conv_gn_kernel(%arg0: i32, %arg1: i32, %arg2: memref<1x16x128xbf16, #tpu.memory_space<vmem>>, %arg3: memref<128x128xbf16, #tpu.memory_space<vmem>>, %arg4: memref<1x128xf32, #tpu.memory_space<vmem>>, %arg5: memref<128x128xf32, #tpu.memory_space<vmem>>, %arg6: memref<1x128xf32, #tpu.memory_space<vmem>>, %arg7: memref<1x128xf32, #tpu.memory_space<vmem>>, %arg8: memref<1x16x128xf32, #tpu.memory_space<vmem>>, %arg9: memref<16x128xf32, #tpu.memory_space<vmem>>) attributes {dimension_semantics = [#tpu.dimension_semantics<parallel>, #tpu.dimension_semantics<arbitrary>], iteration_bounds = array<i64: 2, 1>, scalar_prefetch = 0 : i64, scratch_operands = 1 : i64, tpu.core_type = #tpu.core_type<tc>, window_params = [{transform_indices = @transform_0, window_bounds = array<i64: 1, 16, 128>}, {transform_indices = @transform_1, window_bounds = array<i64: 128, 128>}, {pipeline_mode = #tpu.pipeline_mode<synchronous>, transform_indices = @transform_2, window_bounds = array<i64: 1, 128>}, {pipeline_mode = #tpu.pipeline_mode<synchronous>, transform_indices = @transform_3, window_bounds = array<i64: 128, 128>}, {pipeline_mode = #tpu.pipeline_mode<synchronous>, transform_indices = @transform_4, window_bounds = array<i64: 1, 128>}, {pipeline_mode = #tpu.pipeline_mode<synchronous>, transform_indices = @transform_5, window_bounds = array<i64: 1, 128>}, {transform_indices = @transform_6, window_bounds = array<i64: 1, 16, 128>}]} {
    %c0_i32 = arith.constant 0 : i32
    %0 = arith.cmpi eq, %arg1, %c0_i32 : i32
    %1 = arith.extui %0 : i1 to i32
    %c0_i32_0 = arith.constant 0 : i32
    %2 = arith.cmpi ne, %1, %c0_i32_0 : i32
    scf.if %2 {
      %cst_11 = arith.constant 0.000000e+00 : f32
      %13 = vector.broadcast %cst_11 : f32 to vector<16x128xf32>
      %c0_12 = arith.constant 0 : index
      %c0_13 = arith.constant 0 : index
      %14 = vector.load %arg9[%c0_12, %c0_13] : memref<16x128xf32, #tpu.memory_space<vmem>>, vector<16x128xf32>
      tpu.vector_store %arg9[%c0_12, %c0_13], %13 {strides = array<i32>} : memref<16x128xf32, #tpu.memory_space<vmem>>, vector<16x128xf32>,
    } else {
    }
    %c0 = arith.constant 0 : index
    %c0_1 = arith.constant 0 : index
    %3 = vector.load %arg9[%c0, %c0_1] : memref<16x128xf32, #tpu.memory_space<vmem>>, vector<16x128xf32>
    %c0_2 = arith.constant 0 : index
    %c0_3 = arith.constant 0 : index
    %c0_4 = arith.constant 0 : index
    %4 = vector.load %arg2[%c0_2, %c0_3, %c0_4] : memref<1x16x128xbf16, #tpu.memory_space<vmem>>, vector<1x16x128xbf16>
    %5 = vector.shape_cast %4 : vector<1x16x128xbf16> to vector<16x128xbf16>
    %c0_5 = arith.constant 0 : index
    %c0_6 = arith.constant 0 : index
    %6 = vector.load %arg3[%c0_5, %c0_6] : memref<128x128xbf16, #tpu.memory_space<vmem>>, vector<128x128xbf16>
    %cst = arith.constant dense<0.000000e+00> : vector<16x128xf32>
    %7 = tpu.matmul %5, %6, %cst {dimension_numbers = #tpu.dot_dimension_numbers<[1], [0], [0], [1], [0, 0, 1, 1], [], []>} : vector<16x128xbf16>, vector<128x128xbf16>, vector<16x128xf32> -> vector<16x128xf32>
    %8 = arith.addf %3, %7 : vector<16x128xf32>
    %c0_7 = arith.constant 0 : index
    %c0_8 = arith.constant 0 : index
    %9 = vector.load %arg9[%c0_7, %c0_8] : memref<16x128xf32, #tpu.memory_space<vmem>>, vector<16x128xf32>
    tpu.vector_store %arg9[%c0_7, %c0_8], %8 {strides = array<i32>} : memref<16x128xf32, #tpu.memory_space<vmem>>, vector<16x128xf32>,
    %c0_i32_9 = arith.constant 0 : i32
    %10 = arith.cmpi eq, %arg1, %c0_i32_9 : i32
    %11 = arith.extui %10 : i1 to i32
    %c0_i32_10 = arith.constant 0 : i32
    %12 = arith.cmpi ne, %11, %c0_i32_10 : i32
    scf.if %12 {
      %c0_11 = arith.constant 0 : index
      %c0_12 = arith.constant 0 : index
      %13 = vector.load %arg9[%c0_11, %c0_12] : memref<16x128xf32, #tpu.memory_space<vmem>>, vector<16x128xf32>
      %c0_13 = arith.constant 0 : index
      %c0_14 = arith.constant 0 : index
      %14 = vector.load %arg4[%c0_13, %c0_14] : memref<1x128xf32, #tpu.memory_space<vmem>>, vector<1x128xf32>
      %15 = vector.broadcast %14 : vector<1x128xf32> to vector<16x128xf32>
      %16 = arith.addf %13, %15 : vector<16x128xf32>
      %cst_15 = arith.constant dense<0.000000e+00> : vector<128xf32>
      %17 = vector.multi_reduction <add>, %16, %cst_15 [0] : vector<16x128xf32> to vector<128xf32>
      %18 = vector.shape_cast %17 : vector<128xf32> to vector<1x128xf32>
      %c0_16 = arith.constant 0 : index
      %c0_17 = arith.constant 0 : index
      %19 = vector.load %arg5[%c0_16, %c0_17] : memref<128x128xf32, #tpu.memory_space<vmem>>, vector<128x128xf32>
      %cst_18 = arith.constant dense<0.000000e+00> : vector<1x128xf32>
      %20 = tpu.matmul %18, %19, %cst_18 {dimension_numbers = #tpu.dot_dimension_numbers<[1], [0], [0], [1], [0, 0, 1, 1], [], []>} : vector<1x128xf32>, vector<128x128xf32>, vector<1x128xf32> -> vector<1x128xf32>
      %cst_19 = arith.constant 7.812500e-03 : f32
      %21 = vector.broadcast %cst_19 : f32 to vector<1x128xf32>
      %22 = arith.mulf %20, %21 : vector<1x128xf32>
      %23 = vector.broadcast %22 : vector<1x128xf32> to vector<16x128xf32>
      %24 = arith.subf %16, %23 : vector<16x128xf32>
      %25 = arith.mulf %24, %24 : vector<16x128xf32>
      %cst_20 = arith.constant dense<0.000000e+00> : vector<128xf32>
      %26 = vector.multi_reduction <add>, %25, %cst_20 [0] : vector<16x128xf32> to vector<128xf32>
      %27 = vector.shape_cast %26 : vector<128xf32> to vector<1x128xf32>
      %c0_21 = arith.constant 0 : index
      %c0_22 = arith.constant 0 : index
      %28 = vector.load %arg5[%c0_21, %c0_22] : memref<128x128xf32, #tpu.memory_space<vmem>>, vector<128x128xf32>
      %cst_23 = arith.constant dense<0.000000e+00> : vector<1x128xf32>
      %29 = tpu.matmul %27, %28, %cst_23 {dimension_numbers = #tpu.dot_dimension_numbers<[1], [0], [0], [1], [0, 0, 1, 1], [], []>} : vector<1x128xf32>, vector<128x128xf32>, vector<1x128xf32> -> vector<1x128xf32>
      %cst_24 = arith.constant 7.812500e-03 : f32
      %30 = vector.broadcast %cst_24 : f32 to vector<1x128xf32>
      %31 = arith.mulf %29, %30 : vector<1x128xf32>
      %cst_25 = arith.constant 9.99999974E-6 : f32
      %32 = vector.broadcast %cst_25 : f32 to vector<1x128xf32>
      %33 = arith.addf %31, %32 : vector<1x128xf32>
      %34 = math.rsqrt %33 : vector<1x128xf32>
      %c0_26 = arith.constant 0 : index
      %c0_27 = arith.constant 0 : index
      %35 = vector.load %arg6[%c0_26, %c0_27] : memref<1x128xf32, #tpu.memory_space<vmem>>, vector<1x128xf32>
      %36 = arith.mulf %34, %35 : vector<1x128xf32>
      %37 = vector.broadcast %36 : vector<1x128xf32> to vector<16x128xf32>
      %38 = arith.mulf %24, %37 : vector<16x128xf32>
      %c0_28 = arith.constant 0 : index
      %c0_29 = arith.constant 0 : index
      %39 = vector.load %arg7[%c0_28, %c0_29] : memref<1x128xf32, #tpu.memory_space<vmem>>, vector<1x128xf32>
      %40 = vector.broadcast %39 : vector<1x128xf32> to vector<16x128xf32>
      %41 = arith.addf %38, %40 : vector<16x128xf32>
      %c0_30 = arith.constant 0 : index
      %c0_31 = arith.constant 0 : index
      %c0_32 = arith.constant 0 : index
      %42 = vector.load %arg8[%c0_30, %c0_31, %c0_32] : memref<1x16x128xf32, #tpu.memory_space<vmem>>, vector<1x16x128xf32>
      %43 = vector.shape_cast %42 : vector<1x16x128xf32> to vector<16x128xf32>
      %44 = vector.shape_cast %41 : vector<16x128xf32> to vector<1x16x128xf32>
      tpu.vector_store %arg8[%c0_30, %c0_31, %c0_32], %44 {strides = array<i32>} : memref<1x16x128xf32, #tpu.memory_space<vmem>>, vector<1x16x128xf32>,
    } else {
    }
    return
  }
  func.func @transform_0(%arg0: i32, %arg1: i32) -> (i32, i32, i32) {
    %c0_i32 = arith.constant 0 : i32
    %c0_i32_0 = arith.constant 0 : i32
    return %arg0, %c0_i32, %arg1 : i32, i32, i32
  }
  func.func @transform_1(%arg0: i32, %arg1: i32) -> (i32, i32) {
    %c0_i32 = arith.constant 0 : i32
    %c0_i32_0 = arith.constant 0 : i32
    return %arg1, %c0_i32 : i32, i32
  }
  func.func @transform_2(%arg0: i32, %arg1: i32) -> (i32, i32) {
    %c0_i32 = arith.constant 0 : i32
    %c0_i32_0 = arith.constant 0 : i32
    %c0_i32_1 = arith.constant 0 : i32
    return %c0_i32, %c0_i32_0 : i32, i32
  }
  func.func @transform_3(%arg0: i32, %arg1: i32) -> (i32, i32) {
    %c0_i32 = arith.constant 0 : i32
    %c0_i32_0 = arith.constant 0 : i32
    %c0_i32_1 = arith.constant 0 : i32
    return %c0_i32, %c0_i32_0 : i32, i32
  }
  func.func @transform_4(%arg0: i32, %arg1: i32) -> (i32, i32) {
    %c0_i32 = arith.constant 0 : i32
    %c0_i32_0 = arith.constant 0 : i32
    %c0_i32_1 = arith.constant 0 : i32
    return %c0_i32, %c0_i32_0 : i32, i32
  }
  func.func @transform_5(%arg0: i32, %arg1: i32) -> (i32, i32) {
    %c0_i32 = arith.constant 0 : i32
    %c0_i32_0 = arith.constant 0 : i32
    %c0_i32_1 = arith.constant 0 : i32
    return %c0_i32, %c0_i32_0 : i32, i32
  }
  func.func @transform_6(%arg0: i32, %arg1: i32) -> (i32, i32, i32) {
    %c0_i32 = arith.constant 0 : i32
    %c0_i32_0 = arith.constant 0 : i32
    %c0_i32_1 = arith.constant 0 : i32
    return %arg0, %c0_i32, %c0_i32_0 : i32, i32, i32
  }
}

module attributes {stable_mosaic.version = 11 : i64} {
  func.func @_conv_gn_kernel(%arg0: i32, %arg1: i32, %arg2: memref<1x16x1152xbf16, #tpu.memory_space<vmem>>, %arg3: memref<1152x128xbf16, #tpu.memory_space<vmem>>, %arg4: memref<1x128xf32, #tpu.memory_space<vmem>>, %arg5: memref<128x128xf32, #tpu.memory_space<vmem>>, %arg6: memref<1x128xf32, #tpu.memory_space<vmem>>, %arg7: memref<1x128xf32, #tpu.memory_space<vmem>>, %arg8: memref<1x16x128xf32, #tpu.memory_space<vmem>>, %arg9: memref<1x16x128xf32, #tpu.memory_space<vmem>>, %arg10: memref<16x128xf32, #tpu.memory_space<vmem>>) attributes {dimension_semantics = [#tpu.dimension_semantics<parallel>, #tpu.dimension_semantics<arbitrary>], iteration_bounds = array<i64: 2, 1>, scalar_prefetch = 0 : i64, scratch_operands = 1 : i64, tpu.core_type = #tpu.core_type<tc>, window_params = [{transform_indices = @transform_0, window_bounds = array<i64: 1, 16, 1152>}, {transform_indices = @transform_1, window_bounds = array<i64: 1152, 128>}, {pipeline_mode = #tpu.pipeline_mode<synchronous>, transform_indices = @transform_2, window_bounds = array<i64: 1, 128>}, {pipeline_mode = #tpu.pipeline_mode<synchronous>, transform_indices = @transform_3, window_bounds = array<i64: 128, 128>}, {pipeline_mode = #tpu.pipeline_mode<synchronous>, transform_indices = @transform_4, window_bounds = array<i64: 1, 128>}, {pipeline_mode = #tpu.pipeline_mode<synchronous>, transform_indices = @transform_5, window_bounds = array<i64: 1, 128>}, {transform_indices = @transform_6, window_bounds = array<i64: 1, 16, 128>}, {transform_indices = @transform_7, window_bounds = array<i64: 1, 16, 128>}]} {
    %c0_i32 = arith.constant 0 : i32
    %0 = arith.cmpi eq, %arg1, %c0_i32 : i32
    %1 = arith.extui %0 : i1 to i32
    %c0_i32_0 = arith.constant 0 : i32
    %2 = arith.cmpi ne, %1, %c0_i32_0 : i32
    scf.if %2 {
      %cst_11 = arith.constant 0.000000e+00 : f32
      %13 = vector.broadcast %cst_11 : f32 to vector<16x128xf32>
      %c0_12 = arith.constant 0 : index
      %c0_13 = arith.constant 0 : index
      %14 = vector.load %arg10[%c0_12, %c0_13] : memref<16x128xf32, #tpu.memory_space<vmem>>, vector<16x128xf32>
      tpu.vector_store %arg10[%c0_12, %c0_13], %13 {strides = array<i32>} : memref<16x128xf32, #tpu.memory_space<vmem>>, vector<16x128xf32>,
    } else {
    }
    %c0 = arith.constant 0 : index
    %c0_1 = arith.constant 0 : index
    %3 = vector.load %arg10[%c0, %c0_1] : memref<16x128xf32, #tpu.memory_space<vmem>>, vector<16x128xf32>
    %c0_2 = arith.constant 0 : index
    %c0_3 = arith.constant 0 : index
    %c0_4 = arith.constant 0 : index
    %4 = vector.load %arg2[%c0_2, %c0_3, %c0_4] : memref<1x16x1152xbf16, #tpu.memory_space<vmem>>, vector<1x16x1152xbf16>
    %5 = vector.shape_cast %4 : vector<1x16x1152xbf16> to vector<16x1152xbf16>
    %c0_5 = arith.constant 0 : index
    %c0_6 = arith.constant 0 : index
    %6 = vector.load %arg3[%c0_5, %c0_6] : memref<1152x128xbf16, #tpu.memory_space<vmem>>, vector<1152x128xbf16>
    %cst = arith.constant dense<0.000000e+00> : vector<16x128xf32>
    %7 = tpu.matmul %5, %6, %cst {dimension_numbers = #tpu.dot_dimension_numbers<[1], [0], [0], [1], [0, 0, 1, 1], [], []>} : vector<16x1152xbf16>, vector<1152x128xbf16>, vector<16x128xf32> -> vector<16x128xf32>
    %8 = arith.addf %3, %7 : vector<16x128xf32>
    %c0_7 = arith.constant 0 : index
    %c0_8 = arith.constant 0 : index
    %9 = vector.load %arg10[%c0_7, %c0_8] : memref<16x128xf32, #tpu.memory_space<vmem>>, vector<16x128xf32>
    tpu.vector_store %arg10[%c0_7, %c0_8], %8 {strides = array<i32>} : memref<16x128xf32, #tpu.memory_space<vmem>>, vector<16x128xf32>,
    %c0_i32_9 = arith.constant 0 : i32
    %10 = arith.cmpi eq, %arg1, %c0_i32_9 : i32
    %11 = arith.extui %10 : i1 to i32
    %c0_i32_10 = arith.constant 0 : i32
    %12 = arith.cmpi ne, %11, %c0_i32_10 : i32
    scf.if %12 {
      %c0_11 = arith.constant 0 : index
      %c0_12 = arith.constant 0 : index
      %13 = vector.load %arg10[%c0_11, %c0_12] : memref<16x128xf32, #tpu.memory_space<vmem>>, vector<16x128xf32>
      %c0_13 = arith.constant 0 : index
      %c0_14 = arith.constant 0 : index
      %14 = vector.load %arg4[%c0_13, %c0_14] : memref<1x128xf32, #tpu.memory_space<vmem>>, vector<1x128xf32>
      %15 = vector.broadcast %14 : vector<1x128xf32> to vector<16x128xf32>
      %16 = arith.addf %13, %15 : vector<16x128xf32>
      %cst_15 = arith.constant dense<0.000000e+00> : vector<128xf32>
      %17 = vector.multi_reduction <add>, %16, %cst_15 [0] : vector<16x128xf32> to vector<128xf32>
      %18 = vector.shape_cast %17 : vector<128xf32> to vector<1x128xf32>
      %c0_16 = arith.constant 0 : index
      %c0_17 = arith.constant 0 : index
      %19 = vector.load %arg5[%c0_16, %c0_17] : memref<128x128xf32, #tpu.memory_space<vmem>>, vector<128x128xf32>
      %cst_18 = arith.constant dense<0.000000e+00> : vector<1x128xf32>
      %20 = tpu.matmul %18, %19, %cst_18 {dimension_numbers = #tpu.dot_dimension_numbers<[1], [0], [0], [1], [0, 0, 1, 1], [], []>} : vector<1x128xf32>, vector<128x128xf32>, vector<1x128xf32> -> vector<1x128xf32>
      %cst_19 = arith.constant 7.812500e-03 : f32
      %21 = vector.broadcast %cst_19 : f32 to vector<1x128xf32>
      %22 = arith.mulf %20, %21 : vector<1x128xf32>
      %23 = vector.broadcast %22 : vector<1x128xf32> to vector<16x128xf32>
      %24 = arith.subf %16, %23 : vector<16x128xf32>
      %25 = arith.mulf %24, %24 : vector<16x128xf32>
      %cst_20 = arith.constant dense<0.000000e+00> : vector<128xf32>
      %26 = vector.multi_reduction <add>, %25, %cst_20 [0] : vector<16x128xf32> to vector<128xf32>
      %27 = vector.shape_cast %26 : vector<128xf32> to vector<1x128xf32>
      %c0_21 = arith.constant 0 : index
      %c0_22 = arith.constant 0 : index
      %28 = vector.load %arg5[%c0_21, %c0_22] : memref<128x128xf32, #tpu.memory_space<vmem>>, vector<128x128xf32>
      %cst_23 = arith.constant dense<0.000000e+00> : vector<1x128xf32>
      %29 = tpu.matmul %27, %28, %cst_23 {dimension_numbers = #tpu.dot_dimension_numbers<[1], [0], [0], [1], [0, 0, 1, 1], [], []>} : vector<1x128xf32>, vector<128x128xf32>, vector<1x128xf32> -> vector<1x128xf32>
      %cst_24 = arith.constant 7.812500e-03 : f32
      %30 = vector.broadcast %cst_24 : f32 to vector<1x128xf32>
      %31 = arith.mulf %29, %30 : vector<1x128xf32>
      %cst_25 = arith.constant 9.99999974E-6 : f32
      %32 = vector.broadcast %cst_25 : f32 to vector<1x128xf32>
      %33 = arith.addf %31, %32 : vector<1x128xf32>
      %34 = math.rsqrt %33 : vector<1x128xf32>
      %c0_26 = arith.constant 0 : index
      %c0_27 = arith.constant 0 : index
      %35 = vector.load %arg6[%c0_26, %c0_27] : memref<1x128xf32, #tpu.memory_space<vmem>>, vector<1x128xf32>
      %36 = arith.mulf %34, %35 : vector<1x128xf32>
      %37 = vector.broadcast %36 : vector<1x128xf32> to vector<16x128xf32>
      %38 = arith.mulf %24, %37 : vector<16x128xf32>
      %c0_28 = arith.constant 0 : index
      %c0_29 = arith.constant 0 : index
      %39 = vector.load %arg7[%c0_28, %c0_29] : memref<1x128xf32, #tpu.memory_space<vmem>>, vector<1x128xf32>
      %40 = vector.broadcast %39 : vector<1x128xf32> to vector<16x128xf32>
      %41 = arith.addf %38, %40 : vector<16x128xf32>
      %cst_30 = arith.constant 0.000000e+00 : f32
      %42 = vector.broadcast %cst_30 : f32 to vector<16x128xf32>
      %43 = arith.maximumf %41, %42 : vector<16x128xf32>
      %c0_31 = arith.constant 0 : index
      %c0_32 = arith.constant 0 : index
      %c0_33 = arith.constant 0 : index
      %44 = vector.load %arg8[%c0_31, %c0_32, %c0_33] : memref<1x16x128xf32, #tpu.memory_space<vmem>>, vector<1x16x128xf32>
      %45 = vector.shape_cast %44 : vector<1x16x128xf32> to vector<16x128xf32>
      %46 = arith.addf %43, %45 : vector<16x128xf32>
      %cst_34 = arith.constant 0.000000e+00 : f32
      %47 = vector.broadcast %cst_34 : f32 to vector<16x128xf32>
      %48 = arith.maximumf %46, %47 : vector<16x128xf32>
      %c0_35 = arith.constant 0 : index
      %c0_36 = arith.constant 0 : index
      %c0_37 = arith.constant 0 : index
      %49 = vector.load %arg9[%c0_35, %c0_36, %c0_37] : memref<1x16x128xf32, #tpu.memory_space<vmem>>, vector<1x16x128xf32>
      %50 = vector.shape_cast %49 : vector<1x16x128xf32> to vector<16x128xf32>
      %51 = vector.shape_cast %48 : vector<16x128xf32> to vector<1x16x128xf32>
      tpu.vector_store %arg9[%c0_35, %c0_36, %c0_37], %51 {strides = array<i32>} : memref<1x16x128xf32, #tpu.memory_space<vmem>>, vector<1x16x128xf32>,
    } else {
    }
    return
  }
  func.func @transform_0(%arg0: i32, %arg1: i32) -> (i32, i32, i32) {
    %c0_i32 = arith.constant 0 : i32
    %c0_i32_0 = arith.constant 0 : i32
    return %arg0, %c0_i32, %arg1 : i32, i32, i32
  }
  func.func @transform_1(%arg0: i32, %arg1: i32) -> (i32, i32) {
    %c0_i32 = arith.constant 0 : i32
    %c0_i32_0 = arith.constant 0 : i32
    return %arg1, %c0_i32 : i32, i32
  }
  func.func @transform_2(%arg0: i32, %arg1: i32) -> (i32, i32) {
    %c0_i32 = arith.constant 0 : i32
    %c0_i32_0 = arith.constant 0 : i32
    %c0_i32_1 = arith.constant 0 : i32
    return %c0_i32, %c0_i32_0 : i32, i32
  }
  func.func @transform_3(%arg0: i32, %arg1: i32) -> (i32, i32) {
    %c0_i32 = arith.constant 0 : i32
    %c0_i32_0 = arith.constant 0 : i32
    %c0_i32_1 = arith.constant 0 : i32
    return %c0_i32, %c0_i32_0 : i32, i32
  }
  func.func @transform_4(%arg0: i32, %arg1: i32) -> (i32, i32) {
    %c0_i32 = arith.constant 0 : i32
    %c0_i32_0 = arith.constant 0 : i32
    %c0_i32_1 = arith.constant 0 : i32
    return %c0_i32, %c0_i32_0 : i32, i32
  }
  func.func @transform_5(%arg0: i32, %arg1: i32) -> (i32, i32) {
    %c0_i32 = arith.constant 0 : i32
    %c0_i32_0 = arith.constant 0 : i32
    %c0_i32_1 = arith.constant 0 : i32
    return %c0_i32, %c0_i32_0 : i32, i32
  }
  func.func @transform_6(%arg0: i32, %arg1: i32) -> (i32, i32, i32) {
    %c0_i32 = arith.constant 0 : i32
    %c0_i32_0 = arith.constant 0 : i32
    %c0_i32_1 = arith.constant 0 : i32
    return %arg0, %c0_i32, %c0_i32_0 : i32, i32, i32
  }
  func.func @transform_7(%arg0: i32, %arg1: i32) -> (i32, i32, i32) {
    %c0_i32 = arith.constant 0 : i32
    %c0_i32_0 = arith.constant 0 : i32
    %c0_i32_1 = arith.constant 0 : i32
    return %arg0, %c0_i32, %c0_i32_0 : i32, i32, i32
  }
}

module attributes {stable_mosaic.version = 11 : i64} {
  func.func @_conv_gn_kernel(%arg0: i32, %arg1: i32, %arg2: memref<1x4x1152xbf16, #tpu.memory_space<vmem>>, %arg3: memref<1152x128xbf16, #tpu.memory_space<vmem>>, %arg4: memref<1x128xf32, #tpu.memory_space<vmem>>, %arg5: memref<128x128xf32, #tpu.memory_space<vmem>>, %arg6: memref<1x128xf32, #tpu.memory_space<vmem>>, %arg7: memref<1x128xf32, #tpu.memory_space<vmem>>, %arg8: memref<1x4x128xf32, #tpu.memory_space<vmem>>, %arg9: memref<4x128xf32, #tpu.memory_space<vmem>>) attributes {dimension_semantics = [#tpu.dimension_semantics<parallel>, #tpu.dimension_semantics<arbitrary>], iteration_bounds = array<i64: 2, 1>, scalar_prefetch = 0 : i64, scratch_operands = 1 : i64, tpu.core_type = #tpu.core_type<tc>, window_params = [{transform_indices = @transform_0, window_bounds = array<i64: 1, 4, 1152>}, {transform_indices = @transform_1, window_bounds = array<i64: 1152, 128>}, {pipeline_mode = #tpu.pipeline_mode<synchronous>, transform_indices = @transform_2, window_bounds = array<i64: 1, 128>}, {pipeline_mode = #tpu.pipeline_mode<synchronous>, transform_indices = @transform_3, window_bounds = array<i64: 128, 128>}, {pipeline_mode = #tpu.pipeline_mode<synchronous>, transform_indices = @transform_4, window_bounds = array<i64: 1, 128>}, {pipeline_mode = #tpu.pipeline_mode<synchronous>, transform_indices = @transform_5, window_bounds = array<i64: 1, 128>}, {transform_indices = @transform_6, window_bounds = array<i64: 1, 4, 128>}]} {
    %c0_i32 = arith.constant 0 : i32
    %0 = arith.cmpi eq, %arg1, %c0_i32 : i32
    %1 = arith.extui %0 : i1 to i32
    %c0_i32_0 = arith.constant 0 : i32
    %2 = arith.cmpi ne, %1, %c0_i32_0 : i32
    scf.if %2 {
      %cst_11 = arith.constant 0.000000e+00 : f32
      %13 = vector.broadcast %cst_11 : f32 to vector<4x128xf32>
      %c0_12 = arith.constant 0 : index
      %c0_13 = arith.constant 0 : index
      %14 = vector.load %arg9[%c0_12, %c0_13] : memref<4x128xf32, #tpu.memory_space<vmem>>, vector<4x128xf32>
      tpu.vector_store %arg9[%c0_12, %c0_13], %13 {strides = array<i32>} : memref<4x128xf32, #tpu.memory_space<vmem>>, vector<4x128xf32>,
    } else {
    }
    %c0 = arith.constant 0 : index
    %c0_1 = arith.constant 0 : index
    %3 = vector.load %arg9[%c0, %c0_1] : memref<4x128xf32, #tpu.memory_space<vmem>>, vector<4x128xf32>
    %c0_2 = arith.constant 0 : index
    %c0_3 = arith.constant 0 : index
    %c0_4 = arith.constant 0 : index
    %4 = vector.load %arg2[%c0_2, %c0_3, %c0_4] : memref<1x4x1152xbf16, #tpu.memory_space<vmem>>, vector<1x4x1152xbf16>
    %5 = vector.shape_cast %4 : vector<1x4x1152xbf16> to vector<4x1152xbf16>
    %c0_5 = arith.constant 0 : index
    %c0_6 = arith.constant 0 : index
    %6 = vector.load %arg3[%c0_5, %c0_6] : memref<1152x128xbf16, #tpu.memory_space<vmem>>, vector<1152x128xbf16>
    %cst = arith.constant dense<0.000000e+00> : vector<4x128xf32>
    %7 = tpu.matmul %5, %6, %cst {dimension_numbers = #tpu.dot_dimension_numbers<[1], [0], [0], [1], [0, 0, 1, 1], [], []>} : vector<4x1152xbf16>, vector<1152x128xbf16>, vector<4x128xf32> -> vector<4x128xf32>
    %8 = arith.addf %3, %7 : vector<4x128xf32>
    %c0_7 = arith.constant 0 : index
    %c0_8 = arith.constant 0 : index
    %9 = vector.load %arg9[%c0_7, %c0_8] : memref<4x128xf32, #tpu.memory_space<vmem>>, vector<4x128xf32>
    tpu.vector_store %arg9[%c0_7, %c0_8], %8 {strides = array<i32>} : memref<4x128xf32, #tpu.memory_space<vmem>>, vector<4x128xf32>,
    %c0_i32_9 = arith.constant 0 : i32
    %10 = arith.cmpi eq, %arg1, %c0_i32_9 : i32
    %11 = arith.extui %10 : i1 to i32
    %c0_i32_10 = arith.constant 0 : i32
    %12 = arith.cmpi ne, %11, %c0_i32_10 : i32
    scf.if %12 {
      %c0_11 = arith.constant 0 : index
      %c0_12 = arith.constant 0 : index
      %13 = vector.load %arg9[%c0_11, %c0_12] : memref<4x128xf32, #tpu.memory_space<vmem>>, vector<4x128xf32>
      %c0_13 = arith.constant 0 : index
      %c0_14 = arith.constant 0 : index
      %14 = vector.load %arg4[%c0_13, %c0_14] : memref<1x128xf32, #tpu.memory_space<vmem>>, vector<1x128xf32>
      %15 = vector.broadcast %14 : vector<1x128xf32> to vector<4x128xf32>
      %16 = arith.addf %13, %15 : vector<4x128xf32>
      %cst_15 = arith.constant dense<0.000000e+00> : vector<128xf32>
      %17 = vector.multi_reduction <add>, %16, %cst_15 [0] : vector<4x128xf32> to vector<128xf32>
      %18 = vector.shape_cast %17 : vector<128xf32> to vector<1x128xf32>
      %c0_16 = arith.constant 0 : index
      %c0_17 = arith.constant 0 : index
      %19 = vector.load %arg5[%c0_16, %c0_17] : memref<128x128xf32, #tpu.memory_space<vmem>>, vector<128x128xf32>
      %cst_18 = arith.constant dense<0.000000e+00> : vector<1x128xf32>
      %20 = tpu.matmul %18, %19, %cst_18 {dimension_numbers = #tpu.dot_dimension_numbers<[1], [0], [0], [1], [0, 0, 1, 1], [], []>} : vector<1x128xf32>, vector<128x128xf32>, vector<1x128xf32> -> vector<1x128xf32>
      %cst_19 = arith.constant 3.125000e-02 : f32
      %21 = vector.broadcast %cst_19 : f32 to vector<1x128xf32>
      %22 = arith.mulf %20, %21 : vector<1x128xf32>
      %23 = vector.broadcast %22 : vector<1x128xf32> to vector<4x128xf32>
      %24 = arith.subf %16, %23 : vector<4x128xf32>
      %25 = arith.mulf %24, %24 : vector<4x128xf32>
      %cst_20 = arith.constant dense<0.000000e+00> : vector<128xf32>
      %26 = vector.multi_reduction <add>, %25, %cst_20 [0] : vector<4x128xf32> to vector<128xf32>
      %27 = vector.shape_cast %26 : vector<128xf32> to vector<1x128xf32>
      %c0_21 = arith.constant 0 : index
      %c0_22 = arith.constant 0 : index
      %28 = vector.load %arg5[%c0_21, %c0_22] : memref<128x128xf32, #tpu.memory_space<vmem>>, vector<128x128xf32>
      %cst_23 = arith.constant dense<0.000000e+00> : vector<1x128xf32>
      %29 = tpu.matmul %27, %28, %cst_23 {dimension_numbers = #tpu.dot_dimension_numbers<[1], [0], [0], [1], [0, 0, 1, 1], [], []>} : vector<1x128xf32>, vector<128x128xf32>, vector<1x128xf32> -> vector<1x128xf32>
      %cst_24 = arith.constant 3.125000e-02 : f32
      %30 = vector.broadcast %cst_24 : f32 to vector<1x128xf32>
      %31 = arith.mulf %29, %30 : vector<1x128xf32>
      %cst_25 = arith.constant 9.99999974E-6 : f32
      %32 = vector.broadcast %cst_25 : f32 to vector<1x128xf32>
      %33 = arith.addf %31, %32 : vector<1x128xf32>
      %34 = math.rsqrt %33 : vector<1x128xf32>
      %c0_26 = arith.constant 0 : index
      %c0_27 = arith.constant 0 : index
      %35 = vector.load %arg6[%c0_26, %c0_27] : memref<1x128xf32, #tpu.memory_space<vmem>>, vector<1x128xf32>
      %36 = arith.mulf %34, %35 : vector<1x128xf32>
      %37 = vector.broadcast %36 : vector<1x128xf32> to vector<4x128xf32>
      %38 = arith.mulf %24, %37 : vector<4x128xf32>
      %c0_28 = arith.constant 0 : index
      %c0_29 = arith.constant 0 : index
      %39 = vector.load %arg7[%c0_28, %c0_29] : memref<1x128xf32, #tpu.memory_space<vmem>>, vector<1x128xf32>
      %40 = vector.broadcast %39 : vector<1x128xf32> to vector<4x128xf32>
      %41 = arith.addf %38, %40 : vector<4x128xf32>
      %cst_30 = arith.constant 0.000000e+00 : f32
      %42 = vector.broadcast %cst_30 : f32 to vector<4x128xf32>
      %43 = arith.maximumf %41, %42 : vector<4x128xf32>
      %c0_31 = arith.constant 0 : index
      %c0_32 = arith.constant 0 : index
      %c0_33 = arith.constant 0 : index
      %44 = vector.load %arg8[%c0_31, %c0_32, %c0_33] : memref<1x4x128xf32, #tpu.memory_space<vmem>>, vector<1x4x128xf32>
      %45 = vector.shape_cast %44 : vector<1x4x128xf32> to vector<4x128xf32>
      %46 = vector.shape_cast %43 : vector<4x128xf32> to vector<1x4x128xf32>
      tpu.vector_store %arg8[%c0_31, %c0_32, %c0_33], %46 {strides = array<i32>} : memref<1x4x128xf32, #tpu.memory_space<vmem>>, vector<1x4x128xf32>,
    } else {
    }
    return
  }
  func.func @transform_0(%arg0: i32, %arg1: i32) -> (i32, i32, i32) {
    %c0_i32 = arith.constant 0 : i32
    %c0_i32_0 = arith.constant 0 : i32
    return %arg0, %c0_i32, %arg1 : i32, i32, i32
  }
  func.func @transform_1(%arg0: i32, %arg1: i32) -> (i32, i32) {
    %c0_i32 = arith.constant 0 : i32
    %c0_i32_0 = arith.constant 0 : i32
    return %arg1, %c0_i32 : i32, i32
  }
  func.func @transform_2(%arg0: i32, %arg1: i32) -> (i32, i32) {
    %c0_i32 = arith.constant 0 : i32
    %c0_i32_0 = arith.constant 0 : i32
    %c0_i32_1 = arith.constant 0 : i32
    return %c0_i32, %c0_i32_0 : i32, i32
  }
  func.func @transform_3(%arg0: i32, %arg1: i32) -> (i32, i32) {
    %c0_i32 = arith.constant 0 : i32
    %c0_i32_0 = arith.constant 0 : i32
    %c0_i32_1 = arith.constant 0 : i32
    return %c0_i32, %c0_i32_0 : i32, i32
  }
  func.func @transform_4(%arg0: i32, %arg1: i32) -> (i32, i32) {
    %c0_i32 = arith.constant 0 : i32
    %c0_i32_0 = arith.constant 0 : i32
    %c0_i32_1 = arith.constant 0 : i32
    return %c0_i32, %c0_i32_0 : i32, i32
  }
  func.func @transform_5(%arg0: i32, %arg1: i32) -> (i32, i32) {
    %c0_i32 = arith.constant 0 : i32
    %c0_i32_0 = arith.constant 0 : i32
    %c0_i32_1 = arith.constant 0 : i32
    return %c0_i32, %c0_i32_0 : i32, i32
  }
  func.func @transform_6(%arg0: i32, %arg1: i32) -> (i32, i32, i32) {
    %c0_i32 = arith.constant 0 : i32
    %c0_i32_0 = arith.constant 0 : i32
    %c0_i32_1 = arith.constant 0 : i32
    return %arg0, %c0_i32, %c0_i32_0 : i32, i32, i32
  }
}

module attributes {stable_mosaic.version = 11 : i64} {
  func.func @_conv_gn_kernel(%arg0: i32, %arg1: i32, %arg2: memref<1x4x1152xbf16, #tpu.memory_space<vmem>>, %arg3: memref<1152x128xbf16, #tpu.memory_space<vmem>>, %arg4: memref<1x128xf32, #tpu.memory_space<vmem>>, %arg5: memref<128x128xf32, #tpu.memory_space<vmem>>, %arg6: memref<1x128xf32, #tpu.memory_space<vmem>>, %arg7: memref<1x128xf32, #tpu.memory_space<vmem>>, %arg8: memref<1x4x128xf32, #tpu.memory_space<vmem>>, %arg9: memref<1x4x128xf32, #tpu.memory_space<vmem>>, %arg10: memref<4x128xf32, #tpu.memory_space<vmem>>) attributes {dimension_semantics = [#tpu.dimension_semantics<parallel>, #tpu.dimension_semantics<arbitrary>], iteration_bounds = array<i64: 2, 1>, scalar_prefetch = 0 : i64, scratch_operands = 1 : i64, tpu.core_type = #tpu.core_type<tc>, window_params = [{transform_indices = @transform_0, window_bounds = array<i64: 1, 4, 1152>}, {transform_indices = @transform_1, window_bounds = array<i64: 1152, 128>}, {pipeline_mode = #tpu.pipeline_mode<synchronous>, transform_indices = @transform_2, window_bounds = array<i64: 1, 128>}, {pipeline_mode = #tpu.pipeline_mode<synchronous>, transform_indices = @transform_3, window_bounds = array<i64: 128, 128>}, {pipeline_mode = #tpu.pipeline_mode<synchronous>, transform_indices = @transform_4, window_bounds = array<i64: 1, 128>}, {pipeline_mode = #tpu.pipeline_mode<synchronous>, transform_indices = @transform_5, window_bounds = array<i64: 1, 128>}, {transform_indices = @transform_6, window_bounds = array<i64: 1, 4, 128>}, {transform_indices = @transform_7, window_bounds = array<i64: 1, 4, 128>}]} {
    %c0_i32 = arith.constant 0 : i32
    %0 = arith.cmpi eq, %arg1, %c0_i32 : i32
    %1 = arith.extui %0 : i1 to i32
    %c0_i32_0 = arith.constant 0 : i32
    %2 = arith.cmpi ne, %1, %c0_i32_0 : i32
    scf.if %2 {
      %cst_11 = arith.constant 0.000000e+00 : f32
      %13 = vector.broadcast %cst_11 : f32 to vector<4x128xf32>
      %c0_12 = arith.constant 0 : index
      %c0_13 = arith.constant 0 : index
      %14 = vector.load %arg10[%c0_12, %c0_13] : memref<4x128xf32, #tpu.memory_space<vmem>>, vector<4x128xf32>
      tpu.vector_store %arg10[%c0_12, %c0_13], %13 {strides = array<i32>} : memref<4x128xf32, #tpu.memory_space<vmem>>, vector<4x128xf32>,
    } else {
    }
    %c0 = arith.constant 0 : index
    %c0_1 = arith.constant 0 : index
    %3 = vector.load %arg10[%c0, %c0_1] : memref<4x128xf32, #tpu.memory_space<vmem>>, vector<4x128xf32>
    %c0_2 = arith.constant 0 : index
    %c0_3 = arith.constant 0 : index
    %c0_4 = arith.constant 0 : index
    %4 = vector.load %arg2[%c0_2, %c0_3, %c0_4] : memref<1x4x1152xbf16, #tpu.memory_space<vmem>>, vector<1x4x1152xbf16>
    %5 = vector.shape_cast %4 : vector<1x4x1152xbf16> to vector<4x1152xbf16>
    %c0_5 = arith.constant 0 : index
    %c0_6 = arith.constant 0 : index
    %6 = vector.load %arg3[%c0_5, %c0_6] : memref<1152x128xbf16, #tpu.memory_space<vmem>>, vector<1152x128xbf16>
    %cst = arith.constant dense<0.000000e+00> : vector<4x128xf32>
    %7 = tpu.matmul %5, %6, %cst {dimension_numbers = #tpu.dot_dimension_numbers<[1], [0], [0], [1], [0, 0, 1, 1], [], []>} : vector<4x1152xbf16>, vector<1152x128xbf16>, vector<4x128xf32> -> vector<4x128xf32>
    %8 = arith.addf %3, %7 : vector<4x128xf32>
    %c0_7 = arith.constant 0 : index
    %c0_8 = arith.constant 0 : index
    %9 = vector.load %arg10[%c0_7, %c0_8] : memref<4x128xf32, #tpu.memory_space<vmem>>, vector<4x128xf32>
    tpu.vector_store %arg10[%c0_7, %c0_8], %8 {strides = array<i32>} : memref<4x128xf32, #tpu.memory_space<vmem>>, vector<4x128xf32>,
    %c0_i32_9 = arith.constant 0 : i32
    %10 = arith.cmpi eq, %arg1, %c0_i32_9 : i32
    %11 = arith.extui %10 : i1 to i32
    %c0_i32_10 = arith.constant 0 : i32
    %12 = arith.cmpi ne, %11, %c0_i32_10 : i32
    scf.if %12 {
      %c0_11 = arith.constant 0 : index
      %c0_12 = arith.constant 0 : index
      %13 = vector.load %arg10[%c0_11, %c0_12] : memref<4x128xf32, #tpu.memory_space<vmem>>, vector<4x128xf32>
      %c0_13 = arith.constant 0 : index
      %c0_14 = arith.constant 0 : index
      %14 = vector.load %arg4[%c0_13, %c0_14] : memref<1x128xf32, #tpu.memory_space<vmem>>, vector<1x128xf32>
      %15 = vector.broadcast %14 : vector<1x128xf32> to vector<4x128xf32>
      %16 = arith.addf %13, %15 : vector<4x128xf32>
      %cst_15 = arith.constant dense<0.000000e+00> : vector<128xf32>
      %17 = vector.multi_reduction <add>, %16, %cst_15 [0] : vector<4x128xf32> to vector<128xf32>
      %18 = vector.shape_cast %17 : vector<128xf32> to vector<1x128xf32>
      %c0_16 = arith.constant 0 : index
      %c0_17 = arith.constant 0 : index
      %19 = vector.load %arg5[%c0_16, %c0_17] : memref<128x128xf32, #tpu.memory_space<vmem>>, vector<128x128xf32>
      %cst_18 = arith.constant dense<0.000000e+00> : vector<1x128xf32>
      %20 = tpu.matmul %18, %19, %cst_18 {dimension_numbers = #tpu.dot_dimension_numbers<[1], [0], [0], [1], [0, 0, 1, 1], [], []>} : vector<1x128xf32>, vector<128x128xf32>, vector<1x128xf32> -> vector<1x128xf32>
      %cst_19 = arith.constant 3.125000e-02 : f32
      %21 = vector.broadcast %cst_19 : f32 to vector<1x128xf32>
      %22 = arith.mulf %20, %21 : vector<1x128xf32>
      %23 = vector.broadcast %22 : vector<1x128xf32> to vector<4x128xf32>
      %24 = arith.subf %16, %23 : vector<4x128xf32>
      %25 = arith.mulf %24, %24 : vector<4x128xf32>
      %cst_20 = arith.constant dense<0.000000e+00> : vector<128xf32>
      %26 = vector.multi_reduction <add>, %25, %cst_20 [0] : vector<4x128xf32> to vector<128xf32>
      %27 = vector.shape_cast %26 : vector<128xf32> to vector<1x128xf32>
      %c0_21 = arith.constant 0 : index
      %c0_22 = arith.constant 0 : index
      %28 = vector.load %arg5[%c0_21, %c0_22] : memref<128x128xf32, #tpu.memory_space<vmem>>, vector<128x128xf32>
      %cst_23 = arith.constant dense<0.000000e+00> : vector<1x128xf32>
      %29 = tpu.matmul %27, %28, %cst_23 {dimension_numbers = #tpu.dot_dimension_numbers<[1], [0], [0], [1], [0, 0, 1, 1], [], []>} : vector<1x128xf32>, vector<128x128xf32>, vector<1x128xf32> -> vector<1x128xf32>
      %cst_24 = arith.constant 3.125000e-02 : f32
      %30 = vector.broadcast %cst_24 : f32 to vector<1x128xf32>
      %31 = arith.mulf %29, %30 : vector<1x128xf32>
      %cst_25 = arith.constant 9.99999974E-6 : f32
      %32 = vector.broadcast %cst_25 : f32 to vector<1x128xf32>
      %33 = arith.addf %31, %32 : vector<1x128xf32>
      %34 = math.rsqrt %33 : vector<1x128xf32>
      %c0_26 = arith.constant 0 : index
      %c0_27 = arith.constant 0 : index
      %35 = vector.load %arg6[%c0_26, %c0_27] : memref<1x128xf32, #tpu.memory_space<vmem>>, vector<1x128xf32>
      %36 = arith.mulf %34, %35 : vector<1x128xf32>
      %37 = vector.broadcast %36 : vector<1x128xf32> to vector<4x128xf32>
      %38 = arith.mulf %24, %37 : vector<4x128xf32>
      %c0_28 = arith.constant 0 : index
      %c0_29 = arith.constant 0 : index
      %39 = vector.load %arg7[%c0_28, %c0_29] : memref<1x128xf32, #tpu.memory_space<vmem>>, vector<1x128xf32>
      %40 = vector.broadcast %39 : vector<1x128xf32> to vector<4x128xf32>
      %41 = arith.addf %38, %40 : vector<4x128xf32>
      %cst_30 = arith.constant 0.000000e+00 : f32
      %42 = vector.broadcast %cst_30 : f32 to vector<4x128xf32>
      %43 = arith.maximumf %41, %42 : vector<4x128xf32>
      %c0_31 = arith.constant 0 : index
      %c0_32 = arith.constant 0 : index
      %c0_33 = arith.constant 0 : index
      %44 = vector.load %arg8[%c0_31, %c0_32, %c0_33] : memref<1x4x128xf32, #tpu.memory_space<vmem>>, vector<1x4x128xf32>
      %45 = vector.shape_cast %44 : vector<1x4x128xf32> to vector<4x128xf32>
      %46 = arith.addf %43, %45 : vector<4x128xf32>
      %cst_34 = arith.constant 0.000000e+00 : f32
      %47 = vector.broadcast %cst_34 : f32 to vector<4x128xf32>
      %48 = arith.maximumf %46, %47 : vector<4x128xf32>
      %c0_35 = arith.constant 0 : index
      %c0_36 = arith.constant 0 : index
      %c0_37 = arith.constant 0 : index
      %49 = vector.load %arg9[%c0_35, %c0_36, %c0_37] : memref<1x4x128xf32, #tpu.memory_space<vmem>>, vector<1x4x128xf32>
      %50 = vector.shape_cast %49 : vector<1x4x128xf32> to vector<4x128xf32>
      %51 = vector.shape_cast %48 : vector<4x128xf32> to vector<1x4x128xf32>
      tpu.vector_store %arg9[%c0_35, %c0_36, %c0_37], %51 {strides = array<i32>} : memref<1x4x128xf32, #tpu.memory_space<vmem>>, vector<1x4x128xf32>,
    } else {
    }
    return
  }
  func.func @transform_0(%arg0: i32, %arg1: i32) -> (i32, i32, i32) {
    %c0_i32 = arith.constant 0 : i32
    %c0_i32_0 = arith.constant 0 : i32
    return %arg0, %c0_i32, %arg1 : i32, i32, i32
  }
  func.func @transform_1(%arg0: i32, %arg1: i32) -> (i32, i32) {
    %c0_i32 = arith.constant 0 : i32
    %c0_i32_0 = arith.constant 0 : i32
    return %arg1, %c0_i32 : i32, i32
  }
  func.func @transform_2(%arg0: i32, %arg1: i32) -> (i32, i32) {
    %c0_i32 = arith.constant 0 : i32
    %c0_i32_0 = arith.constant 0 : i32
    %c0_i32_1 = arith.constant 0 : i32
    return %c0_i32, %c0_i32_0 : i32, i32
  }
  func.func @transform_3(%arg0: i32, %arg1: i32) -> (i32, i32) {
    %c0_i32 = arith.constant 0 : i32
    %c0_i32_0 = arith.constant 0 : i32
    %c0_i32_1 = arith.constant 0 : i32
    return %c0_i32, %c0_i32_0 : i32, i32
  }
  func.func @transform_4(%arg0: i32, %arg1: i32) -> (i32, i32) {
    %c0_i32 = arith.constant 0 : i32
    %c0_i32_0 = arith.constant 0 : i32
    %c0_i32_1 = arith.constant 0 : i32
    return %c0_i32, %c0_i32_0 : i32, i32
  }
  func.func @transform_5(%arg0: i32, %arg1: i32) -> (i32, i32) {
    %c0_i32 = arith.constant 0 : i32
    %c0_i32_0 = arith.constant 0 : i32
    %c0_i32_1 = arith.constant 0 : i32
    return %c0_i32, %c0_i32_0 : i32, i32
  }
  func.func @transform_6(%arg0: i32, %arg1: i32) -> (i32, i32, i32) {
    %c0_i32 = arith.constant 0 : i32
    %c0_i32_0 = arith.constant 0 : i32
    %c0_i32_1 = arith.constant 0 : i32
    return %arg0, %c0_i32, %c0_i32_0 : i32, i32, i32
  }
  func.func @transform_7(%arg0: i32, %arg1: i32) -> (i32, i32, i32) {
    %c0_i32 = arith.constant 0 : i32
    %c0_i32_0 = arith.constant 0 : i32
    %c0_i32_1 = arith.constant 0 : i32
    return %arg0, %c0_i32, %c0_i32_0 : i32, i32, i32
  }
}

module attributes {stable_mosaic.version = 11 : i64} {
  func.func @_conv_gn_kernel(%arg0: i32, %arg1: i32, %arg2: memref<1x4x128xbf16, #tpu.memory_space<vmem>>, %arg3: memref<128x128xbf16, #tpu.memory_space<vmem>>, %arg4: memref<1x128xf32, #tpu.memory_space<vmem>>, %arg5: memref<128x128xf32, #tpu.memory_space<vmem>>, %arg6: memref<1x128xf32, #tpu.memory_space<vmem>>, %arg7: memref<1x128xf32, #tpu.memory_space<vmem>>, %arg8: memref<1x4x128xf32, #tpu.memory_space<vmem>>, %arg9: memref<4x128xf32, #tpu.memory_space<vmem>>) attributes {dimension_semantics = [#tpu.dimension_semantics<parallel>, #tpu.dimension_semantics<arbitrary>], iteration_bounds = array<i64: 2, 1>, scalar_prefetch = 0 : i64, scratch_operands = 1 : i64, tpu.core_type = #tpu.core_type<tc>, window_params = [{transform_indices = @transform_0, window_bounds = array<i64: 1, 4, 128>}, {transform_indices = @transform_1, window_bounds = array<i64: 128, 128>}, {pipeline_mode = #tpu.pipeline_mode<synchronous>, transform_indices = @transform_2, window_bounds = array<i64: 1, 128>}, {pipeline_mode = #tpu.pipeline_mode<synchronous>, transform_indices = @transform_3, window_bounds = array<i64: 128, 128>}, {pipeline_mode = #tpu.pipeline_mode<synchronous>, transform_indices = @transform_4, window_bounds = array<i64: 1, 128>}, {pipeline_mode = #tpu.pipeline_mode<synchronous>, transform_indices = @transform_5, window_bounds = array<i64: 1, 128>}, {transform_indices = @transform_6, window_bounds = array<i64: 1, 4, 128>}]} {
    %c0_i32 = arith.constant 0 : i32
    %0 = arith.cmpi eq, %arg1, %c0_i32 : i32
    %1 = arith.extui %0 : i1 to i32
    %c0_i32_0 = arith.constant 0 : i32
    %2 = arith.cmpi ne, %1, %c0_i32_0 : i32
    scf.if %2 {
      %cst_11 = arith.constant 0.000000e+00 : f32
      %13 = vector.broadcast %cst_11 : f32 to vector<4x128xf32>
      %c0_12 = arith.constant 0 : index
      %c0_13 = arith.constant 0 : index
      %14 = vector.load %arg9[%c0_12, %c0_13] : memref<4x128xf32, #tpu.memory_space<vmem>>, vector<4x128xf32>
      tpu.vector_store %arg9[%c0_12, %c0_13], %13 {strides = array<i32>} : memref<4x128xf32, #tpu.memory_space<vmem>>, vector<4x128xf32>,
    } else {
    }
    %c0 = arith.constant 0 : index
    %c0_1 = arith.constant 0 : index
    %3 = vector.load %arg9[%c0, %c0_1] : memref<4x128xf32, #tpu.memory_space<vmem>>, vector<4x128xf32>
    %c0_2 = arith.constant 0 : index
    %c0_3 = arith.constant 0 : index
    %c0_4 = arith.constant 0 : index
    %4 = vector.load %arg2[%c0_2, %c0_3, %c0_4] : memref<1x4x128xbf16, #tpu.memory_space<vmem>>, vector<1x4x128xbf16>
    %5 = vector.shape_cast %4 : vector<1x4x128xbf16> to vector<4x128xbf16>
    %c0_5 = arith.constant 0 : index
    %c0_6 = arith.constant 0 : index
    %6 = vector.load %arg3[%c0_5, %c0_6] : memref<128x128xbf16, #tpu.memory_space<vmem>>, vector<128x128xbf16>
    %cst = arith.constant dense<0.000000e+00> : vector<4x128xf32>
    %7 = tpu.matmul %5, %6, %cst {dimension_numbers = #tpu.dot_dimension_numbers<[1], [0], [0], [1], [0, 0, 1, 1], [], []>} : vector<4x128xbf16>, vector<128x128xbf16>, vector<4x128xf32> -> vector<4x128xf32>
    %8 = arith.addf %3, %7 : vector<4x128xf32>
    %c0_7 = arith.constant 0 : index
    %c0_8 = arith.constant 0 : index
    %9 = vector.load %arg9[%c0_7, %c0_8] : memref<4x128xf32, #tpu.memory_space<vmem>>, vector<4x128xf32>
    tpu.vector_store %arg9[%c0_7, %c0_8], %8 {strides = array<i32>} : memref<4x128xf32, #tpu.memory_space<vmem>>, vector<4x128xf32>,
    %c0_i32_9 = arith.constant 0 : i32
    %10 = arith.cmpi eq, %arg1, %c0_i32_9 : i32
    %11 = arith.extui %10 : i1 to i32
    %c0_i32_10 = arith.constant 0 : i32
    %12 = arith.cmpi ne, %11, %c0_i32_10 : i32
    scf.if %12 {
      %c0_11 = arith.constant 0 : index
      %c0_12 = arith.constant 0 : index
      %13 = vector.load %arg9[%c0_11, %c0_12] : memref<4x128xf32, #tpu.memory_space<vmem>>, vector<4x128xf32>
      %c0_13 = arith.constant 0 : index
      %c0_14 = arith.constant 0 : index
      %14 = vector.load %arg4[%c0_13, %c0_14] : memref<1x128xf32, #tpu.memory_space<vmem>>, vector<1x128xf32>
      %15 = vector.broadcast %14 : vector<1x128xf32> to vector<4x128xf32>
      %16 = arith.addf %13, %15 : vector<4x128xf32>
      %cst_15 = arith.constant dense<0.000000e+00> : vector<128xf32>
      %17 = vector.multi_reduction <add>, %16, %cst_15 [0] : vector<4x128xf32> to vector<128xf32>
      %18 = vector.shape_cast %17 : vector<128xf32> to vector<1x128xf32>
      %c0_16 = arith.constant 0 : index
      %c0_17 = arith.constant 0 : index
      %19 = vector.load %arg5[%c0_16, %c0_17] : memref<128x128xf32, #tpu.memory_space<vmem>>, vector<128x128xf32>
      %cst_18 = arith.constant dense<0.000000e+00> : vector<1x128xf32>
      %20 = tpu.matmul %18, %19, %cst_18 {dimension_numbers = #tpu.dot_dimension_numbers<[1], [0], [0], [1], [0, 0, 1, 1], [], []>} : vector<1x128xf32>, vector<128x128xf32>, vector<1x128xf32> -> vector<1x128xf32>
      %cst_19 = arith.constant 3.125000e-02 : f32
      %21 = vector.broadcast %cst_19 : f32 to vector<1x128xf32>
      %22 = arith.mulf %20, %21 : vector<1x128xf32>
      %23 = vector.broadcast %22 : vector<1x128xf32> to vector<4x128xf32>
      %24 = arith.subf %16, %23 : vector<4x128xf32>
      %25 = arith.mulf %24, %24 : vector<4x128xf32>
      %cst_20 = arith.constant dense<0.000000e+00> : vector<128xf32>
      %26 = vector.multi_reduction <add>, %25, %cst_20 [0] : vector<4x128xf32> to vector<128xf32>
      %27 = vector.shape_cast %26 : vector<128xf32> to vector<1x128xf32>
      %c0_21 = arith.constant 0 : index
      %c0_22 = arith.constant 0 : index
      %28 = vector.load %arg5[%c0_21, %c0_22] : memref<128x128xf32, #tpu.memory_space<vmem>>, vector<128x128xf32>
      %cst_23 = arith.constant dense<0.000000e+00> : vector<1x128xf32>
      %29 = tpu.matmul %27, %28, %cst_23 {dimension_numbers = #tpu.dot_dimension_numbers<[1], [0], [0], [1], [0, 0, 1, 1], [], []>} : vector<1x128xf32>, vector<128x128xf32>, vector<1x128xf32> -> vector<1x128xf32>
      %cst_24 = arith.constant 3.125000e-02 : f32
      %30 = vector.broadcast %cst_24 : f32 to vector<1x128xf32>
      %31 = arith.mulf %29, %30 : vector<1x128xf32>
      %cst_25 = arith.constant 9.99999974E-6 : f32
      %32 = vector.broadcast %cst_25 : f32 to vector<1x128xf32>
      %33 = arith.addf %31, %32 : vector<1x128xf32>
      %34 = math.rsqrt %33 : vector<1x128xf32>
      %c0_26 = arith.constant 0 : index
      %c0_27 = arith.constant 0 : index
      %35 = vector.load %arg6[%c0_26, %c0_27] : memref<1x128xf32, #tpu.memory_space<vmem>>, vector<1x128xf32>
      %36 = arith.mulf %34, %35 : vector<1x128xf32>
      %37 = vector.broadcast %36 : vector<1x128xf32> to vector<4x128xf32>
      %38 = arith.mulf %24, %37 : vector<4x128xf32>
      %c0_28 = arith.constant 0 : index
      %c0_29 = arith.constant 0 : index
      %39 = vector.load %arg7[%c0_28, %c0_29] : memref<1x128xf32, #tpu.memory_space<vmem>>, vector<1x128xf32>
      %40 = vector.broadcast %39 : vector<1x128xf32> to vector<4x128xf32>
      %41 = arith.addf %38, %40 : vector<4x128xf32>
      %c0_30 = arith.constant 0 : index
      %c0_31 = arith.constant 0 : index
      %c0_32 = arith.constant 0 : index
      %42 = vector.load %arg8[%c0_30, %c0_31, %c0_32] : memref<1x4x128xf32, #tpu.memory_space<vmem>>, vector<1x4x128xf32>
      %43 = vector.shape_cast %42 : vector<1x4x128xf32> to vector<4x128xf32>
      %44 = vector.shape_cast %41 : vector<4x128xf32> to vector<1x4x128xf32>
      tpu.vector_store %arg8[%c0_30, %c0_31, %c0_32], %44 {strides = array<i32>} : memref<1x4x128xf32, #tpu.memory_space<vmem>>, vector<1x4x128xf32>,
    } else {
    }
    return
  }
  func.func @transform_0(%arg0: i32, %arg1: i32) -> (i32, i32, i32) {
    %c0_i32 = arith.constant 0 : i32
    %c0_i32_0 = arith.constant 0 : i32
    return %arg0, %c0_i32, %arg1 : i32, i32, i32
  }
  func.func @transform_1(%arg0: i32, %arg1: i32) -> (i32, i32) {
    %c0_i32 = arith.constant 0 : i32
    %c0_i32_0 = arith.constant 0 : i32
    return %arg1, %c0_i32 : i32, i32
  }
  func.func @transform_2(%arg0: i32, %arg1: i32) -> (i32, i32) {
    %c0_i32 = arith.constant 0 : i32
    %c0_i32_0 = arith.constant 0 : i32
    %c0_i32_1 = arith.constant 0 : i32
    return %c0_i32, %c0_i32_0 : i32, i32
  }
  func.func @transform_3(%arg0: i32, %arg1: i32) -> (i32, i32) {
    %c0_i32 = arith.constant 0 : i32
    %c0_i32_0 = arith.constant 0 : i32
    %c0_i32_1 = arith.constant 0 : i32
    return %c0_i32, %c0_i32_0 : i32, i32
  }
  func.func @transform_4(%arg0: i32, %arg1: i32) -> (i32, i32) {
    %c0_i32 = arith.constant 0 : i32
    %c0_i32_0 = arith.constant 0 : i32
    %c0_i32_1 = arith.constant 0 : i32
    return %c0_i32, %c0_i32_0 : i32, i32
  }
  func.func @transform_5(%arg0: i32, %arg1: i32) -> (i32, i32) {
    %c0_i32 = arith.constant 0 : i32
    %c0_i32_0 = arith.constant 0 : i32
    %c0_i32_1 = arith.constant 0 : i32
    return %c0_i32, %c0_i32_0 : i32, i32
  }
  func.func @transform_6(%arg0: i32, %arg1: i32) -> (i32, i32, i32) {
    %c0_i32 = arith.constant 0 : i32
    %c0_i32_0 = arith.constant 0 : i32
    %c0_i32_1 = arith.constant 0 : i32
    return %arg0, %c0_i32, %c0_i32_0 : i32, i32, i32
  }
}

module attributes {stable_mosaic.version = 11 : i64} {
  func.func @_conv_gn_kernel(%arg0: i32, %arg1: i32, %arg2: memref<1x4x1152xbf16, #tpu.memory_space<vmem>>, %arg3: memref<1152x128xbf16, #tpu.memory_space<vmem>>, %arg4: memref<1x128xf32, #tpu.memory_space<vmem>>, %arg5: memref<128x128xf32, #tpu.memory_space<vmem>>, %arg6: memref<1x128xf32, #tpu.memory_space<vmem>>, %arg7: memref<1x128xf32, #tpu.memory_space<vmem>>, %arg8: memref<1x4x128xf32, #tpu.memory_space<vmem>>, %arg9: memref<1x4x128xf32, #tpu.memory_space<vmem>>, %arg10: memref<4x128xf32, #tpu.memory_space<vmem>>) attributes {dimension_semantics = [#tpu.dimension_semantics<parallel>, #tpu.dimension_semantics<arbitrary>], iteration_bounds = array<i64: 2, 1>, scalar_prefetch = 0 : i64, scratch_operands = 1 : i64, tpu.core_type = #tpu.core_type<tc>, window_params = [{transform_indices = @transform_0, window_bounds = array<i64: 1, 4, 1152>}, {transform_indices = @transform_1, window_bounds = array<i64: 1152, 128>}, {pipeline_mode = #tpu.pipeline_mode<synchronous>, transform_indices = @transform_2, window_bounds = array<i64: 1, 128>}, {pipeline_mode = #tpu.pipeline_mode<synchronous>, transform_indices = @transform_3, window_bounds = array<i64: 128, 128>}, {pipeline_mode = #tpu.pipeline_mode<synchronous>, transform_indices = @transform_4, window_bounds = array<i64: 1, 128>}, {pipeline_mode = #tpu.pipeline_mode<synchronous>, transform_indices = @transform_5, window_bounds = array<i64: 1, 128>}, {transform_indices = @transform_6, window_bounds = array<i64: 1, 4, 128>}, {transform_indices = @transform_7, window_bounds = array<i64: 1, 4, 128>}]} {
    %c0_i32 = arith.constant 0 : i32
    %0 = arith.cmpi eq, %arg1, %c0_i32 : i32
    %1 = arith.extui %0 : i1 to i32
    %c0_i32_0 = arith.constant 0 : i32
    %2 = arith.cmpi ne, %1, %c0_i32_0 : i32
    scf.if %2 {
      %cst_11 = arith.constant 0.000000e+00 : f32
      %13 = vector.broadcast %cst_11 : f32 to vector<4x128xf32>
      %c0_12 = arith.constant 0 : index
      %c0_13 = arith.constant 0 : index
      %14 = vector.load %arg10[%c0_12, %c0_13] : memref<4x128xf32, #tpu.memory_space<vmem>>, vector<4x128xf32>
      tpu.vector_store %arg10[%c0_12, %c0_13], %13 {strides = array<i32>} : memref<4x128xf32, #tpu.memory_space<vmem>>, vector<4x128xf32>,
    } else {
    }
    %c0 = arith.constant 0 : index
    %c0_1 = arith.constant 0 : index
    %3 = vector.load %arg10[%c0, %c0_1] : memref<4x128xf32, #tpu.memory_space<vmem>>, vector<4x128xf32>
    %c0_2 = arith.constant 0 : index
    %c0_3 = arith.constant 0 : index
    %c0_4 = arith.constant 0 : index
    %4 = vector.load %arg2[%c0_2, %c0_3, %c0_4] : memref<1x4x1152xbf16, #tpu.memory_space<vmem>>, vector<1x4x1152xbf16>
    %5 = vector.shape_cast %4 : vector<1x4x1152xbf16> to vector<4x1152xbf16>
    %c0_5 = arith.constant 0 : index
    %c0_6 = arith.constant 0 : index
    %6 = vector.load %arg3[%c0_5, %c0_6] : memref<1152x128xbf16, #tpu.memory_space<vmem>>, vector<1152x128xbf16>
    %cst = arith.constant dense<0.000000e+00> : vector<4x128xf32>
    %7 = tpu.matmul %5, %6, %cst {dimension_numbers = #tpu.dot_dimension_numbers<[1], [0], [0], [1], [0, 0, 1, 1], [], []>} : vector<4x1152xbf16>, vector<1152x128xbf16>, vector<4x128xf32> -> vector<4x128xf32>
    %8 = arith.addf %3, %7 : vector<4x128xf32>
    %c0_7 = arith.constant 0 : index
    %c0_8 = arith.constant 0 : index
    %9 = vector.load %arg10[%c0_7, %c0_8] : memref<4x128xf32, #tpu.memory_space<vmem>>, vector<4x128xf32>
    tpu.vector_store %arg10[%c0_7, %c0_8], %8 {strides = array<i32>} : memref<4x128xf32, #tpu.memory_space<vmem>>, vector<4x128xf32>,
    %c0_i32_9 = arith.constant 0 : i32
    %10 = arith.cmpi eq, %arg1, %c0_i32_9 : i32
    %11 = arith.extui %10 : i1 to i32
    %c0_i32_10 = arith.constant 0 : i32
    %12 = arith.cmpi ne, %11, %c0_i32_10 : i32
    scf.if %12 {
      %c0_11 = arith.constant 0 : index
      %c0_12 = arith.constant 0 : index
      %13 = vector.load %arg10[%c0_11, %c0_12] : memref<4x128xf32, #tpu.memory_space<vmem>>, vector<4x128xf32>
      %c0_13 = arith.constant 0 : index
      %c0_14 = arith.constant 0 : index
      %14 = vector.load %arg4[%c0_13, %c0_14] : memref<1x128xf32, #tpu.memory_space<vmem>>, vector<1x128xf32>
      %15 = vector.broadcast %14 : vector<1x128xf32> to vector<4x128xf32>
      %16 = arith.addf %13, %15 : vector<4x128xf32>
      %cst_15 = arith.constant dense<0.000000e+00> : vector<128xf32>
      %17 = vector.multi_reduction <add>, %16, %cst_15 [0] : vector<4x128xf32> to vector<128xf32>
      %18 = vector.shape_cast %17 : vector<128xf32> to vector<1x128xf32>
      %c0_16 = arith.constant 0 : index
      %c0_17 = arith.constant 0 : index
      %19 = vector.load %arg5[%c0_16, %c0_17] : memref<128x128xf32, #tpu.memory_space<vmem>>, vector<128x128xf32>
      %cst_18 = arith.constant dense<0.000000e+00> : vector<1x128xf32>
      %20 = tpu.matmul %18, %19, %cst_18 {dimension_numbers = #tpu.dot_dimension_numbers<[1], [0], [0], [1], [0, 0, 1, 1], [], []>} : vector<1x128xf32>, vector<128x128xf32>, vector<1x128xf32> -> vector<1x128xf32>
      %cst_19 = arith.constant 3.125000e-02 : f32
      %21 = vector.broadcast %cst_19 : f32 to vector<1x128xf32>
      %22 = arith.mulf %20, %21 : vector<1x128xf32>
      %23 = vector.broadcast %22 : vector<1x128xf32> to vector<4x128xf32>
      %24 = arith.subf %16, %23 : vector<4x128xf32>
      %25 = arith.mulf %24, %24 : vector<4x128xf32>
      %cst_20 = arith.constant dense<0.000000e+00> : vector<128xf32>
      %26 = vector.multi_reduction <add>, %25, %cst_20 [0] : vector<4x128xf32> to vector<128xf32>
      %27 = vector.shape_cast %26 : vector<128xf32> to vector<1x128xf32>
      %c0_21 = arith.constant 0 : index
      %c0_22 = arith.constant 0 : index
      %28 = vector.load %arg5[%c0_21, %c0_22] : memref<128x128xf32, #tpu.memory_space<vmem>>, vector<128x128xf32>
      %cst_23 = arith.constant dense<0.000000e+00> : vector<1x128xf32>
      %29 = tpu.matmul %27, %28, %cst_23 {dimension_numbers = #tpu.dot_dimension_numbers<[1], [0], [0], [1], [0, 0, 1, 1], [], []>} : vector<1x128xf32>, vector<128x128xf32>, vector<1x128xf32> -> vector<1x128xf32>
      %cst_24 = arith.constant 3.125000e-02 : f32
      %30 = vector.broadcast %cst_24 : f32 to vector<1x128xf32>
      %31 = arith.mulf %29, %30 : vector<1x128xf32>
      %cst_25 = arith.constant 9.99999974E-6 : f32
      %32 = vector.broadcast %cst_25 : f32 to vector<1x128xf32>
      %33 = arith.addf %31, %32 : vector<1x128xf32>
      %34 = math.rsqrt %33 : vector<1x128xf32>
      %c0_26 = arith.constant 0 : index
      %c0_27 = arith.constant 0 : index
      %35 = vector.load %arg6[%c0_26, %c0_27] : memref<1x128xf32, #tpu.memory_space<vmem>>, vector<1x128xf32>
      %36 = arith.mulf %34, %35 : vector<1x128xf32>
      %37 = vector.broadcast %36 : vector<1x128xf32> to vector<4x128xf32>
      %38 = arith.mulf %24, %37 : vector<4x128xf32>
      %c0_28 = arith.constant 0 : index
      %c0_29 = arith.constant 0 : index
      %39 = vector.load %arg7[%c0_28, %c0_29] : memref<1x128xf32, #tpu.memory_space<vmem>>, vector<1x128xf32>
      %40 = vector.broadcast %39 : vector<1x128xf32> to vector<4x128xf32>
      %41 = arith.addf %38, %40 : vector<4x128xf32>
      %cst_30 = arith.constant 0.000000e+00 : f32
      %42 = vector.broadcast %cst_30 : f32 to vector<4x128xf32>
      %43 = arith.maximumf %41, %42 : vector<4x128xf32>
      %c0_31 = arith.constant 0 : index
      %c0_32 = arith.constant 0 : index
      %c0_33 = arith.constant 0 : index
      %44 = vector.load %arg8[%c0_31, %c0_32, %c0_33] : memref<1x4x128xf32, #tpu.memory_space<vmem>>, vector<1x4x128xf32>
      %45 = vector.shape_cast %44 : vector<1x4x128xf32> to vector<4x128xf32>
      %46 = arith.addf %43, %45 : vector<4x128xf32>
      %cst_34 = arith.constant 0.000000e+00 : f32
      %47 = vector.broadcast %cst_34 : f32 to vector<4x128xf32>
      %48 = arith.maximumf %46, %47 : vector<4x128xf32>
      %c0_35 = arith.constant 0 : index
      %c0_36 = arith.constant 0 : index
      %c0_37 = arith.constant 0 : index
      %49 = vector.load %arg9[%c0_35, %c0_36, %c0_37] : memref<1x4x128xf32, #tpu.memory_space<vmem>>, vector<1x4x128xf32>
      %50 = vector.shape_cast %49 : vector<1x4x128xf32> to vector<4x128xf32>
      %51 = vector.shape_cast %48 : vector<4x128xf32> to vector<1x4x128xf32>
      tpu.vector_store %arg9[%c0_35, %c0_36, %c0_37], %51 {strides = array<i32>} : memref<1x4x128xf32, #tpu.memory_space<vmem>>, vector<1x4x128xf32>,
    } else {
    }
    return
  }
  func.func @transform_0(%arg0: i32, %arg1: i32) -> (i32, i32, i32) {
    %c0_i32 = arith.constant 0 : i32
    %c0_i32_0 = arith.constant 0 : i32
    return %arg0, %c0_i32, %arg1 : i32, i32, i32
  }
  func.func @transform_1(%arg0: i32, %arg1: i32) -> (i32, i32) {
    %c0_i32 = arith.constant 0 : i32
    %c0_i32_0 = arith.constant 0 : i32
    return %arg1, %c0_i32 : i32, i32
  }
  func.func @transform_2(%arg0: i32, %arg1: i32) -> (i32, i32) {
    %c0_i32 = arith.constant 0 : i32
    %c0_i32_0 = arith.constant 0 : i32
    %c0_i32_1 = arith.constant 0 : i32
    return %c0_i32, %c0_i32_0 : i32, i32
  }
  func.func @transform_3(%arg0: i32, %arg1: i32) -> (i32, i32) {
    %c0_i32 = arith.constant 0 : i32
    %c0_i32_0 = arith.constant 0 : i32
    %c0_i32_1 = arith.constant 0 : i32
    return %c0_i32, %c0_i32_0 : i32, i32
  }
  func.func @transform_4(%arg0: i32, %arg1: i32) -> (i32, i32) {
    %c0_i32 = arith.constant 0 : i32
    %c0_i32_0 = arith.constant 0 : i32
    %c0_i32_1 = arith.constant 0 : i32
    return %c0_i32, %c0_i32_0 : i32, i32
  }
  func.func @transform_5(%arg0: i32, %arg1: i32) -> (i32, i32) {
    %c0_i32 = arith.constant 0 : i32
    %c0_i32_0 = arith.constant 0 : i32
    %c0_i32_1 = arith.constant 0 : i32
    return %c0_i32, %c0_i32_0 : i32, i32
  }
  func.func @transform_6(%arg0: i32, %arg1: i32) -> (i32, i32, i32) {
    %c0_i32 = arith.constant 0 : i32
    %c0_i32_0 = arith.constant 0 : i32
    %c0_i32_1 = arith.constant 0 : i32
    return %arg0, %c0_i32, %c0_i32_0 : i32, i32, i32
  }
  func.func @transform_7(%arg0: i32, %arg1: i32) -> (i32, i32, i32) {
    %c0_i32 = arith.constant 0 : i32
    %c0_i32_0 = arith.constant 0 : i32
    %c0_i32_1 = arith.constant 0 : i32
    return %arg0, %c0_i32, %c0_i32_0 : i32, i32, i32
  }
}

</mosaic_0001>

<bundles_post_ra>
// kernel: unet_extractor_forward.16
= control target key start
LH: loop header
LB: loop body
LE: loop exit
PB: predicated region body
PF: predicated region fallthrough
CT: control target
= control target key end

     0   :  { %s1176_s21 = smov 0   ;;  %s1178_s22 = smov 0   ;;  %s1294_s0 = inlined_call_operand.vmem [shape: bf16[2,64,128], index: 0, kind: input, shape index: {}]   ;;  %s1295_s1 = inlined_call_operand.vmem [shape: bf16[128,128], index: 1, kind: input, shape index: {}]   ;;  %s1296_s2 = inlined_call_operand.vmem [shape: f32[1,128], index: 2, kind: input, shape index: {}, may-alias: {2,5}]   ;;  %s1297_s3 = inlined_call_operand.vmem [shape: f32[128,128], index: 3, kind: input, shape index: {}]   ;;  %s1298_s4 = inlined_call_operand.vmem [shape: f32[1,128], index: 4, kind: input, shape index: {}]   ;;  %s1299_s5 = inlined_call_operand.vmem [shape: f32[1,128], index: 5, kind: input, shape index: {}, may-alias: {2,5}]   ;;  %s1300_s6 = inlined_call_operand.vmem [shape: f32[2,64,128], index: 6, kind: output, shape index: {}]  }
   0x1   :  { %s1180_s23 = smov 0  }
   0x2 LB: > { %s28_s24 = sadd.s32 1, %s1132_s22  ;;  %p862_p0 = scmp.ge.s32.totalorder %s1136_s23, 1  ;;  %s1136_s23 = sphi %s1180_s23, %s16_s23   ;;  %s1132_s22 = sphi %s1178_s22, %s1302_s22   ;;  %s1128_s21 = sphi %s1176_s21, %s1301_s21  }
   0x3   : > { %p30_p1 = scmp.ge.s32.totalorder %s28_s24, 2  ;;  %p240_p2 = scmp.lt.s32.totalorder %s1136_s23, 3 }
   0x5   : > { %s1304_s24 = smov (%p30_p1, %s28_s24), 0  ;;  %p241_p3 = pnand %p862_p0, %p240_p2 }
   0x6   : > { %v1100_v0 = vld [vmem:[%s1295_s1] sm:$0xff] (!%p241_p3)   ;;  %p278_p4 = scmp.lt.s32.totalorder (!%p241_p3), %s1128_s21, 1  ;;  %v1101_v1 = vld [vmem:[%s1295_s1 + $0x8] sm:$0xff] (!%p241_p3)   ;;  %v1102_v2 = vld [vmem:[%s1295_s1 + $0x10] sm:$0xff] (!%p241_p3)   ;;  %v1138_v15 = vmov (!%p241_p3), 0.0|0.0   ;;  %vm1139_vm0 = vmmov (!%p241_p3), 0  }
   0x7   : > { %244 = sbr.rel (%p241_p3) target bundleno = 769 (0x301), region = 44  ;;  %931 = vmatprep.subr.bf16.mxu0 (!%p241_p3), %v1100_v0  ;;  %v1103_v3 = vld [vmem:[%s1295_s1 + $0x18] sm:$0xff] (!%p241_p3)   ;;  %v1104_v5 = vld [vmem:[%s1295_s1 + $0x20] sm:$0xff] (!%p241_p3)   ;;  %v1105_v6 = vld [vmem:[%s1295_s1 + $0x28] sm:$0xff] (!%p241_p3)   ;;  %1025 = vmatprep.subr.bf16.mxu1 (!%p241_p3), %v1138_v15  ;;  %v1140_v34 = vmov (!%p241_p3), 0.0  }
   0x8   : > { %932 = vmatpush3.bf16.msra.mxu0 (!%p241_p3), %v1100_v0  ;;  %v1106_v7 = vld [vmem:[%s1295_s1 + $0x30] sm:$0xff] (!%p241_p3)   ;;  %v1107_v8 = vld [vmem:[%s1295_s1 + $0x38] sm:$0xff] (!%p241_p3)   ;;  %v534_v12 = vld [vmem:[%s1297_s3] sm:$0xff] (!%p241_p3)  ;;  %987 = vmatprep.mubr.msk.f32.mxu1 (!%p241_p3), %vm1139_vm0, %v1140_v34 }
   0x9   : > { %933 = vmatprep.subr.bf16.mxu0 (!%p241_p3), %v1101_v1  ;;  %v535_v13 = vld [vmem:[%s1297_s3 + $0x8] sm:$0xff] (!%p241_p3)  ;;  %v536_v16 = vld [vmem:[%s1297_s3 + $0x10] sm:$0xff] (!%p241_p3)  ;;  %v537_v17 = vld [vmem:[%s1297_s3 + $0x18] sm:$0xff] (!%p241_p3) }
   0xa   : > { %v1026_v14 = vpack.c.bf16 (!%p241_p3), %v535_v13, %v534_v12  ;;  %v1029_v18 = vpack.c.bf16 (!%p241_p3), %v537_v17, %v536_v16  ;;  %v538_v19 = vld [vmem:[%s1297_s3 + $0x20] sm:$0xff] (!%p241_p3)  ;;  %v539_v20 = vld [vmem:[%s1297_s3 + $0x28] sm:$0xff] (!%p241_p3)  ;;  %v540_v22 = vld [vmem:[%s1297_s3 + $0x30] sm:$0xff] (!%p241_p3) }
   0xb   : > { %v1032_v21 = vpack.c.bf16 (!%p241_p3), %v539_v20, %v538_v19  ;;  %v541_v23 = vld [vmem:[%s1297_s3 + $0x38] sm:$0xff] (!%p241_p3)  ;;  %v542_v25 = vld [vmem:[%s1297_s3 + $0x40] sm:$0xff] (!%p241_p3)  ;;  %v543_v26 = vld [vmem:[%s1297_s3 + $0x48] sm:$0xff] (!%p241_p3) }
   0xc   : > { %934 = vmatpush3.bf16.msra.mxu0 (!%p241_p3), %v1101_v1  ;;  %1027 = vmatpush3.bf16.msra.mxu1 (!%p241_p3), %v1026_v14  ;;  %v1035_v24 = vpack.c.bf16 (!%p241_p3), %v541_v23, %v540_v22  ;;  %v1038_v27 = vpack.c.bf16 (!%p241_p3), %v543_v26, %v542_v25  ;;  %v544_v28 = vld [vmem:[%s1297_s3 + $0x50] sm:$0xff] (!%p241_p3)  ;;  %v545_v29 = vld [vmem:[%s1297_s3 + $0x58] sm:$0xff] (!%p241_p3)  ;;  %v546_v31 = vld [vmem:[%s1297_s3 + $0x60] sm:$0xff] (!%p241_p3) }
   0xd   : > { %935 = vmatprep.subr.bf16.mxu0 (!%p241_p3), %v1102_v2  ;;  %1028 = vmatprep.subr.bf16.mxu1 (!%p241_p3), %v1138_v15  ;;  %v1041_v30 = vpack.c.bf16 (!%p241_p3), %v545_v29, %v544_v28  ;;  %v547_v32 = vld [vmem:[%s1297_s3 + $0x68] sm:$0xff] (!%p241_p3)  ;;  %v548_v35 = vld [vmem:[%s1297_s3 + $0x70] sm:$0xff] (!%p241_p3)  ;;  %v549_v36 = vld [vmem:[%s1297_s3 + $0x78] sm:$0xff] (!%p241_p3) }
   0xe   : > { %s1306_s21 = smov (!%p278_p4, %s1128_s21), 1  ;;  %v1044_v33 = vpack.c.bf16 %v547_v32, %v546_v31  ;;  %v1047_v37 = vpack.c.bf16 %v549_v36, %v548_v35  ;;  %v879_v39 = vld [vmem:[%s1296_s2] ss:$0 sm:$0xff] }
   0xf   : > { %s883_s7 = sshll.u32 %s1306_s21, 5  ;;  %s884_s19 = sshll.u32 %s1306_s21, 6 }
  0x10   : > { %s285_s10 = scalar_lea.vmem %s1294_s0, %s883_s7  ;;  %936 = vmatpush3.bf16.msra.mxu0 %v1102_v2  ;;  %1030 = vmatpush3.bf16.msra.mxu1 %v1029_v18  ;;  %s296_s26 = scalar_lea.vmem %s1300_s6, %s884_s19 }
  0x11   : > { %v1108_v4 = vld [vmem:[%s285_s10] sm:$0xff]   ;;  %937 = vmatprep.subr.bf16.mxu0 %v1103_v3  ;;  %v1109_v9 = vld [vmem:[%s285_s10 + $0x8] sm:$0xff]   ;;  %v1110_v10 = vld [vmem:[%s285_s10 + $0x10] sm:$0xff]   ;;  %1031 = vmatprep.subr.bf16.mxu1 %v1138_v15 }
  0x12   : > { %947 = vmatprep.mubr.bf16.mxu0 %v1108_v4  ;;  %v1111_v11 = vld [vmem:[%s285_s10 + $0x18] sm:$0xff]   ;;  %v621_v4 = vlaneseq }
  0x14   : > { %938 = vmatpush3.bf16.msra.mxu0 %v1103_v3  ;;  %1033 = vmatpush3.bf16.msra.mxu1 %v1032_v21 }
  0x15   : > { %939 = vmatprep.subr.bf16.mxu0 %v1104_v5  ;;  %1034 = vmatprep.subr.bf16.mxu1 %v1138_v15 }
  0x18   : > { %940 = vmatpush3.bf16.msra.mxu0 %v1104_v5  ;;  %1036 = vmatpush3.bf16.msra.mxu1 %v1035_v24  ;;  %v622_v5 = vshrl.u32 %v621_v4, 7 }
  0x19   : > { %941 = vmatprep.subr.bf16.mxu0 %v1105_v6  ;;  %1037 = vmatprep.subr.bf16.mxu1 %v1138_v15 }
  0x1c   : > { %942 = vmatpush3.bf16.msra.mxu0 %v1105_v6  ;;  %1039 = vmatpush3.bf16.msra.mxu1 %v1038_v27  ;;  %v623_v6 = vsub.s32 0, %v622_v5 }
  0x1d   : > { %943 = vmatprep.subr.bf16.mxu0 %v1106_v7  ;;  %1040 = vmatprep.subr.bf16.mxu1 %v1138_v15 }
  0x20   : > { %944 = vmatpush3.bf16.msra.mxu0 %v1106_v7  ;;  %1042 = vmatpush3.bf16.msra.mxu1 %v1041_v30 }
  0x21   : > { %945 = vmatprep.subr.bf16.mxu0 %v1107_v8  ;;  %1043 = vmatprep.subr.bf16.mxu1 %v1138_v15 }
  0x24   : > { %946 = vmatpush3.bf16.msra.mxu0 %v1107_v8  ;;  %1045 = vmatpush3.bf16.msra.mxu1 %v1044_v33 }
  0x25   : > { %1049 = vmatprep.subr.bf16.mxu0 %v1138_v15  ;;  %1046 = vmatprep.subr.bf16.mxu1 %v1138_v15 }
  0x27   : > { %948 = vmatmul.mubr.bf16.vlgmr.msra.gmra.mrb[0].mxu0 %v1109_v9 }
  0x28   : > { %951 = vmatprep.mubr.bf16.mxu0 %v1110_v10  ;;  %1051 = vmatpush3.bf16.msra.mxu0 %v1026_v14 }
  0x29   : > { %1052 = vmatprep.subr.bf16.mxu0 %v1138_v15  ;;  %1048 = vmatpush3.bf16.msra.mxu1 %v1047_v37 }
  0x2c   : > { %1054 = vmatpush3.bf16.msra.mxu0 %v1029_v18 }
  0x2d   : > { %1055 = vmatprep.subr.bf16.mxu0 %v1138_v15 }
  0x2f   : > { %952 = vmatmul.mubr.bf16.gmra.mrb[4].mxu0 %v1111_v11 }
  0x30   : > { %1057 = vmatpush3.bf16.msra.mxu0 %v1032_v21  ;;  %1022 = vmatprep.mubr.msk.f32.mxu0 %vm1139_vm0, %v1140_v34 }
  0x31   : > { %1058 = vmatprep.subr.bf16.mxu0 %v1138_v15 }
  0x34   : > { %1060 = vmatpush3.bf16.msra.mxu0 %v1035_v24 }
  0x35   : > { %1061 = vmatprep.subr.bf16.mxu0 %v1138_v15 }
  0x38   : > { %1063 = vmatpush3.bf16.msra.mxu0 %v1038_v27 }
  0x39   : > { %1064 = vmatprep.subr.bf16.mxu0 %v1138_v15 }
  0x3c   : > { %1066 = vmatpush3.bf16.msra.mxu0 %v1041_v30 }
  0x3d   : > { %1067 = vmatprep.subr.bf16.mxu0 %v1138_v15 }
  0x40   : > { %1069 = vmatpush3.bf16.msra.mxu0 %v1044_v33 }
  0x41   : > { %1070 = vmatprep.subr.bf16.mxu0 %v1138_v15 }
  0x44   : > { %1072 = vmatpush3.bf16.msra.mxu0 %v1047_v37 }
  0xfa   : > { %v949_v38 = vpop.f32.mrb[0].mxu0 }
  0xfb   : > { %v448_v40 = vpop.f32.mrb[1].mxu0  ;;  %v515_v45 = vadd.f32 %v949_v38, %v879_v39 }
  0xfc   : > { %v950_v41 = vpop.f32.mrb[2].mxu0  ;;  %v513_v43 = vadd.f32 %v879_v39, %v448_v40 }
  0xfd   : > { %v451_v42 = vpop.f32.mrb[3].mxu0  ;;  %v516_v47 = vadd.f32 %v950_v41, %v879_v39 }
  0xfe   : > { %v514_v44 = vadd.f32 %v879_v39, %v451_v42 }
 0x100   : > { %v521_v46 = vadd.f32 %v514_v44, %v513_v43 }
 0x102   : > { %v522_v48 = vadd.f32 %v521_v46, %v515_v45  ;;  %v953_v49 = vpop.f32.mrb[4].mxu0 }
 0x103   : > { %v464_v50 = vpop.f32.mrb[5].mxu0  ;;  %v519_v57 = vadd.f32 %v953_v49, %v879_v39 }
 0x104   : > { %v517_v51 = vadd.f32 %v879_v39, %v464_v50  ;;  %v523_v52 = vadd.f32 %v522_v48, %v516_v47  ;;  %v954_v53 = vpop.f32.mrb[6].mxu0  ;;  %v880_v48 = vld [vmem:[%s1299_s5] ss:$0 sm:$0xff] }
 0x105   : > { %v467_v54 = vpop.f32.mrb[7].mxu0  ;;  %v520_v59 = vadd.f32 %v954_v53, %v879_v39 }
 0x106   : > { %v524_v55 = vadd.f32 %v523_v52, %v517_v51  ;;  %v518_v56 = vadd.f32 %v879_v39, %v467_v54 }
 0x108   : > { %v525_v58 = vadd.f32 %v524_v55, %v518_v56 }
 0x10a   : > { %v526_v60 = vadd.f32 %v525_v58, %v519_v57 }
 0x10c   : > { %v527_v61 = vadd.f32 %v526_v60, %v520_v59 }
 0x10e   : > { %v528_v62 = vrot.slane %v527_v61, 4 }
 0x110   : > { %v529_v63 = vadd.f32 %v528_v62, %v527_v61 }
 0x112   : > { %v530_v0 = vrot.slane %v529_v63, 2 }
 0x114   : > { %v531_v1 = vadd.f32 %v530_v0, %v529_v63 }
 0x116   : > { %v532_v2 = vrot.slane %v531_v1, 1 }
 0x118   : > { %v533_v3 = vadd.f32 %v532_v2, %v531_v1 }
 0x11a   : > { %988 = vmatmul.mubr.f32.vlgmr.msra.gmra.mrb[0].mxu1 %v533_v3 }
 0x1ed   : > { %v616_v7 = vpop.f32.mrb[0].mxu1 }
 0x1ee   : > { %v620_v8 = vmul.f32 0.00390625, %v616_v7  ;;  %v989_v9 = vpop.f32.mrb[1].mxu1 }
 0x1f0   : > { %v624_v10 = vrot.slane %v620_v8, %v623_v6 }
 0x1f2   : > { %v625_v11 = vsub.f32 %v513_v43, %v624_v10  ;;  %v626_v12 = vsub.f32 %v514_v44, %v624_v10  ;;  %v627_v13 = vsub.f32 %v515_v45, %v624_v10  ;;  %v628_v14 = vsub.f32 %v516_v47, %v624_v10  ;;  %v727_v44 = vld [vmem:[%s1298_s4] sm:$0x1] }
 0x1f3   : > { %v629_v17 = vsub.f32 %v517_v51, %v624_v10  ;;  %v630_v20 = vsub.f32 %v518_v56, %v624_v10  ;;  %v631_v23 = vsub.f32 %v519_v57, %v624_v10  ;;  %v632_v26 = vsub.f32 %v520_v59, %v624_v10 }
 0x1f4   : > { %v633_v15 = vmul.f32 %v625_v11, %v625_v11  ;;  %v634_v16 = vmul.f32 %v626_v12, %v626_v12  ;;  %v635_v18 = vmul.f32 %v627_v13, %v627_v13  ;;  %v636_v21 = vmul.f32 %v628_v14, %v628_v14 }
 0x1f5   : > { %v637_v24 = vmul.f32 %v629_v17, %v629_v17  ;;  %v638_v27 = vmul.f32 %v630_v20, %v630_v20  ;;  %v639_v29 = vmul.f32 %v631_v23, %v631_v23  ;;  %v640_v31 = vmul.f32 %v632_v26, %v632_v26 }
 0x1f6   : > { %v641_v19 = vadd.f32 %v634_v16, %v633_v15 }
 0x1f8   : > { %v642_v22 = vadd.f32 %v641_v19, %v635_v18 }
 0x1fa   : > { %v643_v25 = vadd.f32 %v642_v22, %v636_v21 }
 0x1fc   : > { %v644_v28 = vadd.f32 %v643_v25, %v637_v24 }
 0x1fe   : > { %v645_v30 = vadd.f32 %v644_v28, %v638_v27 }
 0x200   : > { %v646_v32 = vadd.f32 %v645_v30, %v639_v29 }
 0x202   : > { %v647_v33 = vadd.f32 %v646_v32, %v640_v31 }
 0x204   : > { %v648_v34 = vrot.slane %v647_v33, 4 }
 0x206   : > { %v649_v35 = vadd.f32 %v648_v34, %v647_v33 }
 0x208   : > { %v650_v36 = vrot.slane %v649_v35, 2 }
 0x20a   : > { %v651_v37 = vadd.f32 %v650_v36, %v649_v35 }
 0x20c   : > { %v652_v38 = vrot.slane %v651_v37, 1 }
 0x20e   : > { %v653_v39 = vadd.f32 %v652_v38, %v651_v37 }
 0x210   : > { %1023 = vmatmul.mubr.f32.vlgmr.msra.gmra.mrb[8].mxu0 %v653_v39 }
 0x2e3   : > { %v720_v40 = vpop.f32.mrb[8].mxu0 }
 0x2e4   : > { %v724_v41 = vmul.f32 0.00390625, %v720_v40  ;;  %v1024_v42 = vpop.f32.mrb[9].mxu0 }
 0x2e6   : > { %v725_v43 = vadd.f32 1e-05, %v724_v41 }
 0x2e8   : > { %1112 = vrsqrt.f32 %v725_v43 }
 0x2f2   : > { %v1113_v45 = vpop.eup %1112 }
 0x2f3   : > { %v728_v46 = vmul.f32 %v1113_v45, %v727_v44 }
 0x2f5   : > { %v732_v47 = vrot.slane %v728_v46, %v623_v6 }
 0x2f7   : > { %v733_v49 = vmul.f32 %v732_v47, %v625_v11  ;;  %v734_v50 = vmul.f32 %v732_v47, %v626_v12  ;;  %v735_v51 = vmul.f32 %v732_v47, %v627_v13  ;;  %v736_v52 = vmul.f32 %v732_v47, %v628_v14 }
 0x2f8   : > { %v737_v53 = vmul.f32 %v732_v47, %v629_v17  ;;  %v738_v54 = vmul.f32 %v732_v47, %v630_v20  ;;  %v739_v55 = vmul.f32 %v732_v47, %v631_v23  ;;  %v740_v56 = vmul.f32 %v732_v47, %v632_v26 }
 0x2f9   : > { %v748_v57 = vadd.f32 %v880_v48, %v733_v49  ;;  %v749_v58 = vadd.f32 %v880_v48, %v734_v50  ;;  %v750_v59 = vadd.f32 %v880_v48, %v735_v51  ;;  %v751_v60 = vadd.f32 %v880_v48, %v736_v52 }
 0x2fa   : > { %v752_v61 = vadd.f32 %v880_v48, %v737_v53  ;;  %v753_v62 = vadd.f32 %v880_v48, %v738_v54  ;;  %v754_v63 = vadd.f32 %v880_v48, %v739_v55  ;;  %v755_v0 = vadd.f32 %v880_v48, %v740_v56 }
 0x2fb   : > { %v756_v1 = vmax.f32 %v748_v57, 0.0  ;;  %v757_v2 = vmax.f32 %v749_v58, 0.0  ;;  %v758_v3 = vmax.f32 %v750_v59, 0.0  ;;  %v759_v4 = vmax.f32 %v751_v60, 0.0 }
 0x2fc   : > { %v760_v5 = vmax.f32 %v752_v61, 0.0  ;;  %v761_v6 = vmax.f32 %v753_v62, 0.0  ;;  %v762_v7 = vmax.f32 %v754_v63, 0.0  ;;  %v763_v8 = vmax.f32 %v755_v0, 0.0 }
 0x2fd   : > { %764 = vst [vmem:[%s296_s26] sm:$0xff] %v756_v1  ;;  %765 = vst [vmem:[%s296_s26 + $0x8] sm:$0xff] %v757_v2 }
 0x2fe   : > { %766 = vst [vmem:[%s296_s26 + $0x10] sm:$0xff] %v758_v3  ;;  %767 = vst [vmem:[%s296_s26 + $0x18] sm:$0xff] %v759_v4 }
 0x2ff   : > { %768 = vst [vmem:[%s296_s26 + $0x20] sm:$0xff] %v760_v5  ;;  %769 = vst [vmem:[%s296_s26 + $0x28] sm:$0xff] %v761_v6 }
 0x300   : > { %770 = vst [vmem:[%s296_s26 + $0x30] sm:$0xff] %v762_v7  ;;  %771 = vst [vmem:[%s296_s26 + $0x38] sm:$0xff] %v763_v8 }
 0x301 PF: > { %s16_s23 = sadd.s32 1, %s1136_s23   ;;  %s1301_s21 = smov %s1132_s22 }
 0x302   : > { %p13_p5 = scmp.ge.s32.totalorder %s16_s23, 4   ;;  %s1302_s22 = smov %s1304_s24 }
 0x304   :  { %15 = sbr.rel (!%p13_p5) target bundleno = 2 (0x2), region = 85 }

// kernel: unet_extractor_forward.18
= control target key start
LH: loop header
LB: loop body
LE: loop exit
PB: predicated region body
PF: predicated region fallthrough
CT: control target
= control target key end

     0   :  { %s1168_s21 = smov 0   ;;  %s1170_s22 = smov 0   ;;  %s1286_s0 = inlined_call_operand.vmem [shape: bf16[2,64,128], index: 0, kind: input, shape index: {}]   ;;  %s1287_s1 = inlined_call_operand.vmem [shape: bf16[128,128], index: 1, kind: input, shape index: {}]   ;;  %s1288_s2 = inlined_call_operand.vmem [shape: f32[1,128], index: 2, kind: input, shape index: {}, may-alias: {2,5}]   ;;  %s1289_s3 = inlined_call_operand.vmem [shape: f32[128,128], index: 3, kind: input, shape index: {}]   ;;  %s1290_s4 = inlined_call_operand.vmem [shape: f32[1,128], index: 4, kind: input, shape index: {}]   ;;  %s1291_s5 = inlined_call_operand.vmem [shape: f32[1,128], index: 5, kind: input, shape index: {}, may-alias: {2,5}]   ;;  %s1292_s6 = inlined_call_operand.vmem [shape: f32[2,64,128], index: 6, kind: output, shape index: {}]  }
   0x1   :  { %s1172_s23 = smov 0  }
   0x2 LB: > { %s28_s24 = sadd.s32 1, %s1124_s22  ;;  %p854_p0 = scmp.ge.s32.totalorder %s1128_s23, 1  ;;  %s1128_s23 = sphi %s1172_s23, %s16_s23   ;;  %s1124_s22 = sphi %s1170_s22, %s1294_s22   ;;  %s1120_s21 = sphi %s1168_s21, %s1293_s21  }
   0x3   : > { %p30_p1 = scmp.ge.s32.totalorder %s28_s24, 2  ;;  %p240_p2 = scmp.lt.s32.totalorder %s1128_s23, 3 }
   0x5   : > { %s1296_s24 = smov (%p30_p1, %s28_s24), 0  ;;  %p241_p3 = pnand %p854_p0, %p240_p2 }
   0x6   : > { %v1092_v0 = vld [vmem:[%s1287_s1] sm:$0xff] (!%p241_p3)   ;;  %p278_p4 = scmp.lt.s32.totalorder (!%p241_p3), %s1120_s21, 1  ;;  %v1093_v1 = vld [vmem:[%s1287_s1 + $0x8] sm:$0xff] (!%p241_p3)   ;;  %v1094_v2 = vld [vmem:[%s1287_s1 + $0x10] sm:$0xff] (!%p241_p3)   ;;  %v1130_v15 = vmov (!%p241_p3), 0.0|0.0   ;;  %vm1131_vm0 = vmmov (!%p241_p3), 0  }
   0x7   : > { %244 = sbr.rel (%p241_p3) target bundleno = 767 (0x2ff), region = 44  ;;  %923 = vmatprep.subr.bf16.mxu0 (!%p241_p3), %v1092_v0  ;;  %v1095_v3 = vld [vmem:[%s1287_s1 + $0x18] sm:$0xff] (!%p241_p3)   ;;  %v1096_v5 = vld [vmem:[%s1287_s1 + $0x20] sm:$0xff] (!%p241_p3)   ;;  %v1097_v6 = vld [vmem:[%s1287_s1 + $0x28] sm:$0xff] (!%p241_p3)   ;;  %1017 = vmatprep.subr.bf16.mxu1 (!%p241_p3), %v1130_v15  ;;  %v1132_v34 = vmov (!%p241_p3), 0.0  }
   0x8   : > { %924 = vmatpush3.bf16.msra.mxu0 (!%p241_p3), %v1092_v0  ;;  %v1098_v7 = vld [vmem:[%s1287_s1 + $0x30] sm:$0xff] (!%p241_p3)   ;;  %v1099_v8 = vld [vmem:[%s1287_s1 + $0x38] sm:$0xff] (!%p241_p3)   ;;  %v534_v12 = vld [vmem:[%s1289_s3] sm:$0xff] (!%p241_p3)  ;;  %979 = vmatprep.mubr.msk.f32.mxu1 (!%p241_p3), %vm1131_vm0, %v1132_v34 }
   0x9   : > { %925 = vmatprep.subr.bf16.mxu0 (!%p241_p3), %v1093_v1  ;;  %v535_v13 = vld [vmem:[%s1289_s3 + $0x8] sm:$0xff] (!%p241_p3)  ;;  %v536_v16 = vld [vmem:[%s1289_s3 + $0x10] sm:$0xff] (!%p241_p3)  ;;  %v537_v17 = vld [vmem:[%s1289_s3 + $0x18] sm:$0xff] (!%p241_p3) }
   0xa   : > { %v1018_v14 = vpack.c.bf16 (!%p241_p3), %v535_v13, %v534_v12  ;;  %v1021_v18 = vpack.c.bf16 (!%p241_p3), %v537_v17, %v536_v16  ;;  %v538_v19 = vld [vmem:[%s1289_s3 + $0x20] sm:$0xff] (!%p241_p3)  ;;  %v539_v20 = vld [vmem:[%s1289_s3 + $0x28] sm:$0xff] (!%p241_p3)  ;;  %v540_v22 = vld [vmem:[%s1289_s3 + $0x30] sm:$0xff] (!%p241_p3) }
   0xb   : > { %v1024_v21 = vpack.c.bf16 (!%p241_p3), %v539_v20, %v538_v19  ;;  %v541_v23 = vld [vmem:[%s1289_s3 + $0x38] sm:$0xff] (!%p241_p3)  ;;  %v542_v25 = vld [vmem:[%s1289_s3 + $0x40] sm:$0xff] (!%p241_p3)  ;;  %v543_v26 = vld [vmem:[%s1289_s3 + $0x48] sm:$0xff] (!%p241_p3) }
   0xc   : > { %926 = vmatpush3.bf16.msra.mxu0 (!%p241_p3), %v1093_v1  ;;  %1019 = vmatpush3.bf16.msra.mxu1 (!%p241_p3), %v1018_v14  ;;  %v1027_v24 = vpack.c.bf16 (!%p241_p3), %v541_v23, %v540_v22  ;;  %v1030_v27 = vpack.c.bf16 (!%p241_p3), %v543_v26, %v542_v25  ;;  %v544_v28 = vld [vmem:[%s1289_s3 + $0x50] sm:$0xff] (!%p241_p3)  ;;  %v545_v29 = vld [vmem:[%s1289_s3 + $0x58] sm:$0xff] (!%p241_p3)  ;;  %v546_v31 = vld [vmem:[%s1289_s3 + $0x60] sm:$0xff] (!%p241_p3) }
   0xd   : > { %927 = vmatprep.subr.bf16.mxu0 (!%p241_p3), %v1094_v2  ;;  %1020 = vmatprep.subr.bf16.mxu1 (!%p241_p3), %v1130_v15  ;;  %v1033_v30 = vpack.c.bf16 (!%p241_p3), %v545_v29, %v544_v28  ;;  %v547_v32 = vld [vmem:[%s1289_s3 + $0x68] sm:$0xff] (!%p241_p3)  ;;  %v548_v35 = vld [vmem:[%s1289_s3 + $0x70] sm:$0xff] (!%p241_p3)  ;;  %v549_v36 = vld [vmem:[%s1289_s3 + $0x78] sm:$0xff] (!%p241_p3) }
   0xe   : > { %s1298_s21 = smov (!%p278_p4, %s1120_s21), 1  ;;  %v1036_v33 = vpack.c.bf16 %v547_v32, %v546_v31  ;;  %v1039_v37 = vpack.c.bf16 %v549_v36, %v548_v35  ;;  %v871_v39 = vld [vmem:[%s1288_s2] ss:$0 sm:$0xff] }
   0xf   : > { %s875_s7 = sshll.u32 %s1298_s21, 5  ;;  %s876_s17 = sshll.u32 %s1298_s21, 6 }
  0x10   : > { %s285_s10 = scalar_lea.vmem %s1286_s0, %s875_s7  ;;  %928 = vmatpush3.bf16.msra.mxu0 %v1094_v2  ;;  %1022 = vmatpush3.bf16.msra.mxu1 %v1021_v18  ;;  %s296_s26 = scalar_lea.vmem %s1292_s6, %s876_s17 }
  0x11   : > { %v1100_v4 = vld [vmem:[%s285_s10] sm:$0xff]   ;;  %929 = vmatprep.subr.bf16.mxu0 %v1095_v3  ;;  %v1101_v9 = vld [vmem:[%s285_s10 + $0x8] sm:$0xff]   ;;  %v1102_v10 = vld [vmem:[%s285_s10 + $0x10] sm:$0xff]   ;;  %1023 = vmatprep.subr.bf16.mxu1 %v1130_v15 }
  0x12   : > { %939 = vmatprep.mubr.bf16.mxu0 %v1100_v4  ;;  %v1103_v11 = vld [vmem:[%s285_s10 + $0x18] sm:$0xff]   ;;  %v621_v4 = vlaneseq }
  0x14   : > { %930 = vmatpush3.bf16.msra.mxu0 %v1095_v3  ;;  %1025 = vmatpush3.bf16.msra.mxu1 %v1024_v21 }
  0x15   : > { %931 = vmatprep.subr.bf16.mxu0 %v1096_v5  ;;  %1026 = vmatprep.subr.bf16.mxu1 %v1130_v15 }
  0x18   : > { %932 = vmatpush3.bf16.msra.mxu0 %v1096_v5  ;;  %1028 = vmatpush3.bf16.msra.mxu1 %v1027_v24  ;;  %v622_v5 = vshrl.u32 %v621_v4, 7 }
  0x19   : > { %933 = vmatprep.subr.bf16.mxu0 %v1097_v6  ;;  %1029 = vmatprep.subr.bf16.mxu1 %v1130_v15 }
  0x1c   : > { %934 = vmatpush3.bf16.msra.mxu0 %v1097_v6  ;;  %1031 = vmatpush3.bf16.msra.mxu1 %v1030_v27  ;;  %v623_v6 = vsub.s32 0, %v622_v5 }
  0x1d   : > { %935 = vmatprep.subr.bf16.mxu0 %v1098_v7  ;;  %1032 = vmatprep.subr.bf16.mxu1 %v1130_v15 }
  0x20   : > { %936 = vmatpush3.bf16.msra.mxu0 %v1098_v7  ;;  %1034 = vmatpush3.bf16.msra.mxu1 %v1033_v30 }
  0x21   : > { %937 = vmatprep.subr.bf16.mxu0 %v1099_v8  ;;  %1035 = vmatprep.subr.bf16.mxu1 %v1130_v15 }
  0x24   : > { %938 = vmatpush3.bf16.msra.mxu0 %v1099_v8  ;;  %1037 = vmatpush3.bf16.msra.mxu1 %v1036_v33 }
  0x25   : > { %1041 = vmatprep.subr.bf16.mxu0 %v1130_v15  ;;  %1038 = vmatprep.subr.bf16.mxu1 %v1130_v15 }
  0x27   : > { %940 = vmatmul.mubr.bf16.vlgmr.msra.gmra.mrb[0].mxu0 %v1101_v9 }
  0x28   : > { %943 = vmatprep.mubr.bf16.mxu0 %v1102_v10  ;;  %1043 = vmatpush3.bf16.msra.mxu0 %v1018_v14 }
  0x29   : > { %1044 = vmatprep.subr.bf16.mxu0 %v1130_v15  ;;  %1040 = vmatpush3.bf16.msra.mxu1 %v1039_v37 }
  0x2c   : > { %1046 = vmatpush3.bf16.msra.mxu0 %v1021_v18 }
  0x2d   : > { %1047 = vmatprep.subr.bf16.mxu0 %v1130_v15 }
  0x2f   : > { %944 = vmatmul.mubr.bf16.gmra.mrb[4].mxu0 %v1103_v11 }
  0x30   : > { %1049 = vmatpush3.bf16.msra.mxu0 %v1024_v21  ;;  %1014 = vmatprep.mubr.msk.f32.mxu0 %vm1131_vm0, %v1132_v34 }
  0x31   : > { %1050 = vmatprep.subr.bf16.mxu0 %v1130_v15 }
  0x34   : > { %1052 = vmatpush3.bf16.msra.mxu0 %v1027_v24 }
  0x35   : > { %1053 = vmatprep.subr.bf16.mxu0 %v1130_v15 }
  0x38   : > { %1055 = vmatpush3.bf16.msra.mxu0 %v1030_v27 }
  0x39   : > { %1056 = vmatprep.subr.bf16.mxu0 %v1130_v15 }
  0x3c   : > { %1058 = vmatpush3.bf16.msra.mxu0 %v1033_v30 }
  0x3d   : > { %1059 = vmatprep.subr.bf16.mxu0 %v1130_v15 }
  0x40   : > { %1061 = vmatpush3.bf16.msra.mxu0 %v1036_v33 }
  0x41   : > { %1062 = vmatprep.subr.bf16.mxu0 %v1130_v15 }
  0x44   : > { %1064 = vmatpush3.bf16.msra.mxu0 %v1039_v37 }
  0xfa   : > { %v941_v38 = vpop.f32.mrb[0].mxu0 }
  0xfb   : > { %v448_v40 = vpop.f32.mrb[1].mxu0  ;;  %v515_v45 = vadd.f32 %v941_v38, %v871_v39 }
  0xfc   : > { %v942_v41 = vpop.f32.mrb[2].mxu0  ;;  %v513_v43 = vadd.f32 %v871_v39, %v448_v40 }
  0xfd   : > { %v451_v42 = vpop.f32.mrb[3].mxu0  ;;  %v516_v47 = vadd.f32 %v942_v41, %v871_v39 }
  0xfe   : > { %v514_v44 = vadd.f32 %v871_v39, %v451_v42 }
 0x100   : > { %v521_v46 = vadd.f32 %v514_v44, %v513_v43 }
 0x102   : > { %v522_v48 = vadd.f32 %v521_v46, %v515_v45  ;;  %v945_v49 = vpop.f32.mrb[4].mxu0 }
 0x103   : > { %v464_v50 = vpop.f32.mrb[5].mxu0  ;;  %v519_v57 = vadd.f32 %v945_v49, %v871_v39 }
 0x104   : > { %v517_v51 = vadd.f32 %v871_v39, %v464_v50  ;;  %v523_v52 = vadd.f32 %v522_v48, %v516_v47  ;;  %v946_v53 = vpop.f32.mrb[6].mxu0  ;;  %v872_v48 = vld [vmem:[%s1291_s5] ss:$0 sm:$0xff] }
 0x105   : > { %v467_v54 = vpop.f32.mrb[7].mxu0  ;;  %v520_v59 = vadd.f32 %v946_v53, %v871_v39 }
 0x106   : > { %v524_v55 = vadd.f32 %v523_v52, %v517_v51  ;;  %v518_v56 = vadd.f32 %v871_v39, %v467_v54 }
 0x108   : > { %v525_v58 = vadd.f32 %v524_v55, %v518_v56 }
 0x10a   : > { %v526_v60 = vadd.f32 %v525_v58, %v519_v57 }
 0x10c   : > { %v527_v61 = vadd.f32 %v526_v60, %v520_v59 }
 0x10e   : > { %v528_v62 = vrot.slane %v527_v61, 4 }
 0x110   : > { %v529_v63 = vadd.f32 %v528_v62, %v527_v61 }
 0x112   : > { %v530_v0 = vrot.slane %v529_v63, 2 }
 0x114   : > { %v531_v1 = vadd.f32 %v530_v0, %v529_v63 }
 0x116   : > { %v532_v2 = vrot.slane %v531_v1, 1 }
 0x118   : > { %v533_v3 = vadd.f32 %v532_v2, %v531_v1 }
 0x11a   : > { %980 = vmatmul.mubr.f32.vlgmr.msra.gmra.mrb[0].mxu1 %v533_v3 }
 0x1ed   : > { %v616_v7 = vpop.f32.mrb[0].mxu1 }
 0x1ee   : > { %v620_v8 = vmul.f32 0.001953125, %v616_v7  ;;  %v981_v9 = vpop.f32.mrb[1].mxu1 }
 0x1f0   : > { %v624_v10 = vrot.slane %v620_v8, %v623_v6 }
 0x1f2   : > { %v625_v11 = vsub.f32 %v513_v43, %v624_v10  ;;  %v626_v12 = vsub.f32 %v514_v44, %v624_v10  ;;  %v627_v13 = vsub.f32 %v515_v45, %v624_v10  ;;  %v628_v14 = vsub.f32 %v516_v47, %v624_v10  ;;  %v727_v44 = vld [vmem:[%s1290_s4] sm:$0x1] }
 0x1f3   : > { %v629_v17 = vsub.f32 %v517_v51, %v624_v10  ;;  %v630_v20 = vsub.f32 %v518_v56, %v624_v10  ;;  %v631_v23 = vsub.f32 %v519_v57, %v624_v10  ;;  %v632_v26 = vsub.f32 %v520_v59, %v624_v10 }
 0x1f4   : > { %v633_v15 = vmul.f32 %v625_v11, %v625_v11  ;;  %v634_v16 = vmul.f32 %v626_v12, %v626_v12  ;;  %v635_v18 = vmul.f32 %v627_v13, %v627_v13  ;;  %v636_v21 = vmul.f32 %v628_v14, %v628_v14 }
 0x1f5   : > { %v637_v24 = vmul.f32 %v629_v17, %v629_v17  ;;  %v638_v27 = vmul.f32 %v630_v20, %v630_v20  ;;  %v639_v29 = vmul.f32 %v631_v23, %v631_v23  ;;  %v640_v31 = vmul.f32 %v632_v26, %v632_v26 }
 0x1f6   : > { %v641_v19 = vadd.f32 %v634_v16, %v633_v15 }
 0x1f8   : > { %v642_v22 = vadd.f32 %v641_v19, %v635_v18 }
 0x1fa   : > { %v643_v25 = vadd.f32 %v642_v22, %v636_v21 }
 0x1fc   : > { %v644_v28 = vadd.f32 %v643_v25, %v637_v24 }
 0x1fe   : > { %v645_v30 = vadd.f32 %v644_v28, %v638_v27 }
 0x200   : > { %v646_v32 = vadd.f32 %v645_v30, %v639_v29 }
 0x202   : > { %v647_v33 = vadd.f32 %v646_v32, %v640_v31 }
 0x204   : > { %v648_v34 = vrot.slane %v647_v33, 4 }
 0x206   : > { %v649_v35 = vadd.f32 %v648_v34, %v647_v33 }
 0x208   : > { %v650_v36 = vrot.slane %v649_v35, 2 }
 0x20a   : > { %v651_v37 = vadd.f32 %v650_v36, %v649_v35 }
 0x20c   : > { %v652_v38 = vrot.slane %v651_v37, 1 }
 0x20e   : > { %v653_v39 = vadd.f32 %v652_v38, %v651_v37 }
 0x210   : > { %1015 = vmatmul.mubr.f32.vlgmr.msra.gmra.mrb[8].mxu0 %v653_v39 }
 0x2e3   : > { %v720_v40 = vpop.f32.mrb[8].mxu0 }
 0x2e4   : > { %v724_v41 = vmul.f32 0.001953125, %v720_v40  ;;  %v1016_v42 = vpop.f32.mrb[9].mxu0 }
 0x2e6   : > { %v725_v43 = vadd.f32 1e-05, %v724_v41 }
 0x2e8   : > { %1104 = vrsqrt.f32 %v725_v43 }
 0x2f2   : > { %v1105_v45 = vpop.eup %1104 }
 0x2f3   : > { %v728_v46 = vmul.f32 %v1105_v45, %v727_v44 }
 0x2f5   : > { %v732_v47 = vrot.slane %v728_v46, %v623_v6 }
 0x2f7   : > { %v733_v49 = vmul.f32 %v732_v47, %v625_v11  ;;  %v734_v50 = vmul.f32 %v732_v47, %v626_v12  ;;  %v735_v51 = vmul.f32 %v732_v47, %v627_v13  ;;  %v736_v52 = vmul.f32 %v732_v47, %v628_v14 }
 0x2f8   : > { %v737_v53 = vmul.f32 %v732_v47, %v629_v17  ;;  %v738_v54 = vmul.f32 %v732_v47, %v630_v20  ;;  %v739_v55 = vmul.f32 %v732_v47, %v631_v23  ;;  %v740_v56 = vmul.f32 %v732_v47, %v632_v26 }
 0x2f9   : > { %v748_v57 = vadd.f32 %v872_v48, %v733_v49  ;;  %v749_v58 = vadd.f32 %v872_v48, %v734_v50  ;;  %v750_v59 = vadd.f32 %v872_v48, %v735_v51  ;;  %v751_v60 = vadd.f32 %v872_v48, %v736_v52 }
 0x2fa   : > { %v752_v61 = vadd.f32 %v872_v48, %v737_v53  ;;  %v753_v62 = vadd.f32 %v872_v48, %v738_v54  ;;  %v754_v63 = vadd.f32 %v872_v48, %v739_v55  ;;  %v755_v0 = vadd.f32 %v872_v48, %v740_v56 }
 0x2fb   : > { %756 = vst [vmem:[%s296_s26] sm:$0xff] %v748_v57  ;;  %757 = vst [vmem:[%s296_s26 + $0x8] sm:$0xff] %v749_v58 }
 0x2fc   : > { %758 = vst [vmem:[%s296_s26 + $0x10] sm:$0xff] %v750_v59  ;;  %759 = vst [vmem:[%s296_s26 + $0x18] sm:$0xff] %v751_v60 }
 0x2fd   : > { %760 = vst [vmem:[%s296_s26 + $0x20] sm:$0xff] %v752_v61  ;;  %761 = vst [vmem:[%s296_s26 + $0x28] sm:$0xff] %v753_v62 }
 0x2fe   : > { %762 = vst [vmem:[%s296_s26 + $0x30] sm:$0xff] %v754_v63  ;;  %763 = vst [vmem:[%s296_s26 + $0x38] sm:$0xff] %v755_v0 }
 0x2ff PF: > { %s16_s23 = sadd.s32 1, %s1128_s23   ;;  %s1293_s21 = smov %s1124_s22 }
 0x300   : > { %p13_p5 = scmp.ge.s32.totalorder %s16_s23, 4   ;;  %s1294_s22 = smov %s1296_s24 }
 0x302   :  { %15 = sbr.rel (!%p13_p5) target bundleno = 2 (0x2), region = 85 }

// kernel: unet_extractor_forward.17
= control target key start
LH: loop header
LB: loop body
LE: loop exit
PB: predicated region body
PF: predicated region fallthrough
CT: control target
= control target key end

     0   :  { %s2512_s21 = smov 0   ;;  %s2514_s22 = smov 0   ;;  %s2864_s0 = inlined_call_operand.vmem [shape: bf16[2,64,1152], index: 0, kind: input, shape index: {}]   ;;  %s2865_s1 = inlined_call_operand.vmem [shape: bf16[1152,128], index: 1, kind: input, shape index: {}]   ;;  %s2866_s2 = inlined_call_operand.vmem [shape: f32[1,128], index: 2, kind: input, shape index: {}, may-alias: {2,5}]   ;;  %s2867_s3 = inlined_call_operand.vmem [shape: f32[128,128], index: 3, kind: input, shape index: {}]   ;;  %s2868_s4 = inlined_call_operand.vmem [shape: f32[1,128], index: 4, kind: input, shape index: {}]   ;;  %s2869_s5 = inlined_call_operand.vmem [shape: f32[1,128], index: 5, kind: input, shape index: {}, may-alias: {2,5}]   ;;  %s2870_s6 = inlined_call_operand.vmem [shape: f32[2,64,128], index: 6, kind: output, shape index: {}]  }
   0x1   :  { %s2516_s23 = smov 0  }
   0x2 LB: > { %s28_s24 = sadd.s32 1, %s2468_s22  ;;  %p1831_p0 = scmp.ge.s32.totalorder %s2472_s23, 1  ;;  %s2472_s23 = sphi %s2516_s23, %s16_s23   ;;  %s2468_s22 = sphi %s2514_s22, %s2872_s22   ;;  %s2464_s21 = sphi %s2512_s21, %s2871_s21  }
   0x3   : > { %p30_p1 = scmp.ge.s32.totalorder %s28_s24, 2  ;;  %p242_p2 = scmp.lt.s32.totalorder %s2472_s23, 3 }
   0x5   : > { %s2874_s24 = smov (%p30_p1, %s28_s24), 0  ;;  %p243_p3 = pnand %p1831_p0, %p242_p2 }
   0x6   : > { %v2324_v0 = vld [vmem:[%s2865_s1 + $0x40] sm:$0xff] (!%p243_p3)   ;;  %v2328_v4 = vld [vmem:[%s2865_s1 + $0x48] sm:$0xff] (!%p243_p3)   ;;  %v2332_v8 = vld [vmem:[%s2865_s1 + $0x50] sm:$0xff] (!%p243_p3)   ;;  %p282_p4 = scmp.lt.s32.totalorder (!%p243_p3), %s2464_s21, 1  ;;  %vm2475_vm0 = vmmov (!%p243_p3), 0  }
   0x7   : > { %246 = sbr.rel (%p243_p3) target bundleno = 836 (0x344), region = 44  ;;  %v2325_v1 = vld [vmem:[%s2865_s1 + $0xc0] sm:$0xff] (!%p243_p3)   ;;  %1948 = vmatprep.subr.bf16.mxu0 (!%p243_p3), %v2324_v0  ;;  %v2329_v5 = vld [vmem:[%s2865_s1 + $0xc8] sm:$0xff] (!%p243_p3)   ;;  %v2333_v9 = vld [vmem:[%s2865_s1 + $0xd0] sm:$0xff] (!%p243_p3)  }
   0x8   : > { %v2326_v2 = vld [vmem:[%s2865_s1] sm:$0xff] (!%p243_p3)   ;;  %1988 = vmatprep.subr.bf16.mxu1 (!%p243_p3), %v2325_v1  ;;  %v2330_v6 = vld [vmem:[%s2865_s1 + $0x8] sm:$0xff] (!%p243_p3)   ;;  %v2334_v10 = vld [vmem:[%s2865_s1 + $0x10] sm:$0xff] (!%p243_p3)  }
   0x9   : > { %v2327_v3 = vld [vmem:[%s2865_s1 + $0x80] sm:$0xff] (!%p243_p3)   ;;  %1949 = vmatpush3.bf16.msra.mxu0 (!%p243_p3), %v2326_v2  ;;  %v2331_v7 = vld [vmem:[%s2865_s1 + $0x88] sm:$0xff] (!%p243_p3)   ;;  %v2335_v11 = vld [vmem:[%s2865_s1 + $0x90] sm:$0xff] (!%p243_p3)  }
   0xa   : > { %1989 = vmatpush3.bf16.msra.mxu1 (!%p243_p3), %v2327_v3  ;;  %1950 = vmatprep.subr.bf16.mxu0 (!%p243_p3), %v2328_v4  ;;  %v2336_v12 = vld [vmem:[%s2865_s1 + $0x58] sm:$0xff] (!%p243_p3)   ;;  %v2340_v16 = vld [vmem:[%s2865_s1 + $0x60] sm:$0xff] (!%p243_p3)   ;;  %v2344_v20 = vld [vmem:[%s2865_s1 + $0x68] sm:$0xff] (!%p243_p3)  }
   0xb   : > { %1990 = vmatprep.subr.bf16.mxu1 (!%p243_p3), %v2329_v5  ;;  %v2337_v13 = vld [vmem:[%s2865_s1 + $0xd8] sm:$0xff] (!%p243_p3)   ;;  %v2341_v17 = vld [vmem:[%s2865_s1 + $0xe0] sm:$0xff] (!%p243_p3)   ;;  %v2345_v21 = vld [vmem:[%s2865_s1 + $0xe8] sm:$0xff] (!%p243_p3)  }
   0xc   : > { %v2338_v14 = vld [vmem:[%s2865_s1 + $0x18] sm:$0xff] (!%p243_p3)   ;;  %v2342_v18 = vld [vmem:[%s2865_s1 + $0x20] sm:$0xff] (!%p243_p3)   ;;  %v2346_v22 = vld [vmem:[%s2865_s1 + $0x28] sm:$0xff] (!%p243_p3)  }
   0xd   : > { %1951 = vmatpush3.bf16.msra.mxu0 (!%p243_p3), %v2330_v6  ;;  %v2339_v15 = vld [vmem:[%s2865_s1 + $0x98] sm:$0xff] (!%p243_p3)   ;;  %v2343_v19 = vld [vmem:[%s2865_s1 + $0xa0] sm:$0xff] (!%p243_p3)   ;;  %v2347_v23 = vld [vmem:[%s2865_s1 + $0xa8] sm:$0xff] (!%p243_p3)  }
   0xe   : > { %1991 = vmatpush3.bf16.msra.mxu1 %v2331_v7  ;;  %1952 = vmatprep.subr.bf16.mxu0 %v2332_v8  ;;  %s2876_s21 = smov (!%p282_p4, %s2464_s21), 1  ;;  %v2348_v24 = vld [vmem:[%s2865_s1 + $0x70] sm:$0xff]   ;;  %v2352_v28 = vld [vmem:[%s2865_s1 + $0x78] sm:$0xff]   ;;  %v2362_v36 = vld [vmem:[%s2865_s1 + $0x140] sm:$0xff]  }
   0xf   : > { %1992 = vmatprep.subr.bf16.mxu1 %v2333_v9  ;;  %v2349_v25 = vld [vmem:[%s2865_s1 + $0xf0] sm:$0xff]   ;;  %s2296_s13 = smul.u32 288, %s2876_s21  ;;  %v2353_v29 = vld [vmem:[%s2865_s1 + $0xf8] sm:$0xff]   ;;  %v2363_v37 = vld [vmem:[%s2865_s1 + $0x100] sm:$0xff]   ;;  %s1947_s11 = sshll.u32 %s2876_s21, 6 }
  0x10   : > { %v2350_v26 = vld [vmem:[%s2865_s1 + $0x30] sm:$0xff]   ;;  %v2354_v30 = vld [vmem:[%s2865_s1 + $0x38] sm:$0xff]   ;;  %v2364_v38 = vld [vmem:[%s2865_s1 + $0x1c0] sm:$0xff]   ;;  %s301_s14 = scalar_lea.vmem %s2870_s6, %s1947_s11 }
  0x11   : > { %1953 = vmatpush3.bf16.msra.mxu0 %v2334_v10  ;;  %v2351_v27 = vld [vmem:[%s2865_s1 + $0xb0] sm:$0xff]   ;;  %s2630_s28 = scalar_lea.vmem %s2864_s0, %s2296_s13  ;;  %v2355_v31 = vld [vmem:[%s2865_s1 + $0xb8] sm:$0xff]   ;;  %v2365_v39 = vld [vmem:[%s2865_s1 + $0x180] sm:$0xff]  }
  0x12   : > { %1993 = vmatpush3.bf16.msra.mxu1 %v2335_v11  ;;  %1954 = vmatprep.subr.bf16.mxu0 %v2336_v12  ;;  %v2356_v32 = vld [vmem:[%s2630_s28] ss:$36 sps:$4 sm:$0xff]   ;;  %v2359_v34 = vld [vmem:[%s2630_s28 + $0x8] ss:$36 sps:$4 sm:$0xff]   ;;  %v2371_v44 = vld [vmem:[%s2630_s28 + $0x54] ss:$36 sps:$4 sm:$0xff]  }
  0x13   : > { %1994 = vmatprep.subr.bf16.mxu1 %v2337_v13  ;;  %v2358_v33 = vld [vmem:[%s2630_s28 + $0x4] ss:$36 sps:$4 sm:$0xff]   ;;  %v2361_v35 = vld [vmem:[%s2630_s28 + $0xc] ss:$36 sps:$4 sm:$0xff]   ;;  %v2380_v52 = vld [vmem:[%s2865_s1 + $0x158] sm:$0xff]  }
  0x14   : > { %1155 = vmatprep.mubr.bf16.mxu0 %v2358_v33  ;;  %1220 = vmatprep.mubr.bf16.mxu1 %v2361_v35  ;;  %v2366_v40 = vld [vmem:[%s2865_s1 + $0x148] sm:$0xff]   ;;  %v2375_v47 = vld [vmem:[%s2630_s28 + $0x50] ss:$36 sps:$4 sm:$0xff]   ;;  %v2381_v53 = vld [vmem:[%s2865_s1 + $0x118] sm:$0xff]  }
  0x15   : > { %1955 = vmatpush3.bf16.msra.mxu0 %v2338_v14  ;;  %v2367_v41 = vld [vmem:[%s2865_s1 + $0x108] sm:$0xff]   ;;  %v2376_v48 = vld [vmem:[%s2865_s1 + $0x150] sm:$0xff]   ;;  %v2382_v54 = vld [vmem:[%s2865_s1 + $0x1d8] sm:$0xff]  }
  0x16   : > { %1995 = vmatpush3.bf16.msra.mxu1 %v2339_v15  ;;  %1956 = vmatprep.subr.bf16.mxu0 %v2340_v16  ;;  %v2368_v42 = vld [vmem:[%s2865_s1 + $0x1c8] sm:$0xff]   ;;  %v2377_v49 = vld [vmem:[%s2865_s1 + $0x110] sm:$0xff]   ;;  %v2385_v56 = vld [vmem:[%s2630_s28 + $0x9c] ss:$36 sps:$4 sm:$0xff]  }
  0x17   : > { %1996 = vmatprep.subr.bf16.mxu1 %v2341_v17  ;;  %v2369_v43 = vld [vmem:[%s2630_s28 + $0x4c] ss:$36 sps:$4 sm:$0xff]   ;;  %v2383_v55 = vld [vmem:[%s2630_s28 + $0x94] ss:$36 sps:$4 sm:$0xff]   ;;  %v2390_v60 = vld [vmem:[%s2865_s1 + $0x160] sm:$0xff]  }
  0x18   : > { %v2373_v45 = vld [vmem:[%s2865_s1 + $0x188] sm:$0xff]   ;;  %v2378_v50 = vld [vmem:[%s2865_s1 + $0x1d0] sm:$0xff]   ;;  %v2387_v57 = vld [vmem:[%s2865_s1 + $0x198] sm:$0xff]  }
  0x19   : > { %1957 = vmatpush3.bf16.msra.mxu0 %v2342_v18  ;;  %v2374_v46 = vld [vmem:[%s2630_s28 + $0x48] ss:$36 sps:$4 sm:$0xff]   ;;  %v2379_v51 = vld [vmem:[%s2865_s1 + $0x190] sm:$0xff]   ;;  %v2389_v59 = vld [vmem:[%s2630_s28 + $0x98] ss:$36 sps:$4 sm:$0xff]  }
  0x1a   : > { %1997 = vmatpush3.bf16.msra.mxu1 %v2343_v19  ;;  %1958 = vmatprep.subr.bf16.mxu0 %v2344_v20  ;;  %v2388_v58 = vld [vmem:[%s2630_s28 + $0x90] ss:$36 sps:$4 sm:$0xff]   ;;  %v2391_v61 = vld [vmem:[%s2865_s1 + $0x120] sm:$0xff]   ;;  %v2394_v0 = vld [vmem:[%s2865_s1 + $0x168] sm:$0xff]  }
  0x1b   : > { %1998 = vmatprep.subr.bf16.mxu1 %v2345_v21  ;;  %v2392_v62 = vld [vmem:[%s2865_s1 + $0x1e0] sm:$0xff]   ;;  %v2395_v1 = vld [vmem:[%s2865_s1 + $0x128] sm:$0xff]   ;;  %v2402_v6 = vld [vmem:[%s2630_s28 + $0xd8] ss:$36 sps:$4 sm:$0xff]  }
  0x1c   : > { %v2393_v63 = vld [vmem:[%s2865_s1 + $0x1a0] sm:$0xff]   ;;  %v2396_v2 = vld [vmem:[%s2865_s1 + $0x1e8] sm:$0xff]   ;;  %v2404_v8 = vld [vmem:[%s2865_s1 + $0x170] sm:$0xff]  }
  0x1d   : > { %1959 = vmatpush3.bf16.msra.mxu0 %v2346_v22  ;;  %v2397_v3 = vld [vmem:[%s2630_s28 + $0xdc] ss:$36 sps:$4 sm:$0xff]   ;;  %v2399_v4 = vld [vmem:[%s2630_s28 + $0xe4] ss:$36 sps:$4 sm:$0xff]   ;;  %v2405_v9 = vld [vmem:[%s2865_s1 + $0x130] sm:$0xff]  }
  0x1e   : > { %1999 = vmatpush3.bf16.msra.mxu1 %v2347_v23  ;;  %1960 = vmatprep.subr.bf16.mxu0 %v2348_v24  ;;  %v2401_v5 = vld [vmem:[%s2865_s1 + $0x1a8] sm:$0xff]   ;;  %v2403_v7 = vld [vmem:[%s2630_s28 + $0xe0] ss:$36 sps:$4 sm:$0xff]   ;;  %v2406_v10 = vld [vmem:[%s2865_s1 + $0x1f0] sm:$0xff]  }
  0x1f   : > { %2000 = vmatprep.subr.bf16.mxu1 %v2349_v25  ;;  %v2407_v11 = vld [vmem:[%s2865_s1 + $0x1b0] sm:$0xff]   ;;  %v2408_v12 = vld [vmem:[%s2865_s1 + $0x178] sm:$0xff]   ;;  %v2415_v18 = vld [vmem:[%s2865_s1 + $0x200] sm:$0xff]  }
  0x20   : > { %v2409_v13 = vld [vmem:[%s2865_s1 + $0x138] sm:$0xff]   ;;  %v2411_v15 = vld [vmem:[%s2630_s28 + $0x10] ss:$36 sps:$4 sm:$0xff]   ;;  %v2419_v21 = vld [vmem:[%s2865_s1 + $0x208] sm:$0xff]  }
  0x21   : > { %1961 = vmatpush3.bf16.msra.mxu0 %v2350_v26  ;;  %v2410_v14 = vld [vmem:[%s2865_s1 + $0x1f8] sm:$0xff]   ;;  %v2423_v24 = vld [vmem:[%s2865_s1 + $0x210] sm:$0xff]   ;;  %v2424_v25 = vld [vmem:[%s2630_s28 + $0x64] ss:$36 sps:$4 sm:$0xff]  }
  0x22   : > { %2001 = vmatpush3.bf16.msra.mxu1 %v2351_v27  ;;  %1962 = vmatprep.subr.bf16.mxu0 %v2352_v28  ;;  %v2413_v16 = vld [vmem:[%s2630_s28 + $0x14] ss:$36 sps:$4 sm:$0xff]   ;;  %v2418_v20 = vld [vmem:[%s2630_s28 + $0x1c] ss:$36 sps:$4 sm:$0xff]   ;;  %v2428_v27 = vld [vmem:[%s2630_s28 + $0xa4] ss:$36 sps:$4 sm:$0xff]  }
  0x23   : > { %2002 = vmatprep.subr.bf16.mxu1 %v2353_v29  ;;  %v2414_v17 = vld [vmem:[%s2865_s1 + $0x1b8] sm:$0xff]   ;;  %v2426_v28 = vld [vmem:[%s2630_s28 + $0x60] ss:$36 sps:$4 sm:$0xff]   ;;  %v2432_v29 = vld [vmem:[%s2630_s28 + $0xac] ss:$36 sps:$4 sm:$0xff]  }
  0x24   : > { %v2416_v19 = vld [vmem:[%s2630_s28 + $0x18] ss:$36 sps:$4 sm:$0xff]   ;;  %v2435_v33 = vld [vmem:[%s2865_s1 + $0x228] sm:$0xff]  }
  0x25   : > { %1963 = vmatpush3.bf16.msra.mxu0 %v2354_v30  ;;  %v2420_v22 = vld [vmem:[%s2630_s28 + $0x5c] ss:$36 sps:$4 sm:$0xff]   ;;  %v2440_v35 = vld [vmem:[%s2630_s28 + $0xf4] ss:$36 sps:$4 sm:$0xff]  }
  0x26   : > { %2003 = vmatpush3.bf16.msra.mxu1 %v2355_v31  ;;  %2028 = vmatprep.subr.bf16.mxu0 %v2362_v36  ;;  %v2422_v23 = vld [vmem:[%s2630_s28 + $0x58] ss:$36 sps:$4 sm:$0xff]   ;;  %v2431_v30 = vld [vmem:[%s2865_s1 + $0x220] sm:$0xff]   ;;  %v2439_v36 = vld [vmem:[%s2865_s1 + $0x230] sm:$0xff]  }
  0x27   : > { %2068 = vmatprep.subr.bf16.mxu1 %v2364_v38  ;;  %v2427_v26 = vld [vmem:[%s2865_s1 + $0x218] sm:$0xff]   ;;  %v2430_v31 = vld [vmem:[%s2630_s28 + $0xa0] ss:$36 sps:$4 sm:$0xff]  }
  0x28   : > { %1156 = vmatmul.mubr.bf16.vlgmr.msra.gmra.mrb[0].mxu0 %v2356_v32  ;;  %v2436_v32 = vld [vmem:[%s2630_s28 + $0xec] ss:$36 sps:$4 sm:$0xff]   ;;  %v2444_v38 = vld [vmem:[%s2630_s28 + $0x20] ss:$36 sps:$4 sm:$0xff]  }
  0x29   : > { %1221 = vmatmul.mubr.bf16.vlgmr.msra.gmra.mrb[0].mxu1 %v2359_v34  ;;  %2029 = vmatpush3.bf16.msra.mxu0 %v2363_v37  ;;  %v2434_v34 = vld [vmem:[%s2630_s28 + $0xa8] ss:$36 sps:$4 sm:$0xff]  }
  0x2a   : > { %2069 = vmatpush3.bf16.msra.mxu1 %v2365_v39  ;;  %2030 = vmatprep.subr.bf16.mxu0 %v2366_v40  ;;  %v2438_v37 = vld [vmem:[%s2630_s28 + $0xe8] ss:$36 sps:$4 sm:$0xff]   ;;  %v2443_v39 = vld [vmem:[%s2865_s1 + $0x238] sm:$0xff]   ;;  %v2442_v40 = vld [vmem:[%s2630_s28 + $0xf0] ss:$36 sps:$4 sm:$0xff]  }
  0x2b   : > { %2070 = vmatprep.subr.bf16.mxu1 %v2368_v42  ;;  %1163 = vmatprep.mubr.bf16.mxu0 %v2369_v43  ;;  %v2446_v42 = vld [vmem:[%s2630_s28 + $0xb0] ss:$36 sps:$4 sm:$0xff]   ;;  %v2447_v43 = vld [vmem:[%s2630_s28 + $0xf8] ss:$36 sps:$4 sm:$0xff]  }
  0x2c   : > { %1228 = vmatprep.mubr.bf16.mxu1 %v2371_v44  ;;  %v1503_v44 = vld [vmem:[%s2867_s3] sm:$0xff] }
  0x2d   : > { %2031 = vmatpush3.bf16.msra.mxu0 %v2367_v41  ;;  %v2445_v41 = vld [vmem:[%s2630_s28 + $0x68] ss:$36 sps:$4 sm:$0xff]  }
  0x2e   : > { %2071 = vmatpush3.bf16.msra.mxu1 %v2373_v45  ;;  %2032 = vmatprep.subr.bf16.mxu0 %v2376_v48  ;;  %v1504_v45 = vld [vmem:[%s2867_s3 + $0x8] sm:$0xff]  ;;  %v1505_v48 = vld [vmem:[%s2867_s3 + $0x10] sm:$0xff] }
  0x2f   : > { %2072 = vmatprep.subr.bf16.mxu1 %v2378_v50 }
  0x30   : > { %1164 = vmatmul.mubr.bf16.gmra.mrb[4].mxu0 %v2374_v46  ;;  %v2249_v46 = vpack.c.bf16 %v1504_v45, %v1503_v44 }
  0x31   : > { %1229 = vmatmul.mubr.bf16.gmra.mrb[4].mxu1 %v2375_v47  ;;  %2033 = vmatpush3.bf16.msra.mxu0 %v2377_v49  ;;  %v2474_v47 = vmov 0.0|0.0   ;;  %v1506_v49 = vld [vmem:[%s2867_s3 + $0x18] sm:$0xff] }
  0x32   : > { %2073 = vmatpush3.bf16.msra.mxu1 %v2379_v51  ;;  %2034 = vmatprep.subr.bf16.mxu0 %v2380_v52  ;;  %v2252_v50 = vpack.c.bf16 %v1506_v49, %v1505_v48  ;;  %v1507_v51 = vld [vmem:[%s2867_s3 + $0x20] sm:$0xff]  ;;  %v1508_v52 = vld [vmem:[%s2867_s3 + $0x28] sm:$0xff] }
  0x33   : > { %2074 = vmatprep.subr.bf16.mxu1 %v2382_v54  ;;  %1171 = vmatprep.mubr.bf16.mxu0 %v2383_v55  ;;  %v1509_v54 = vld [vmem:[%s2867_s3 + $0x30] sm:$0xff]  ;;  %v1510_v55 = vld [vmem:[%s2867_s3 + $0x38] sm:$0xff] }
  0x34   : > { %1236 = vmatprep.mubr.bf16.mxu1 %v2385_v56  ;;  %v2258_v56 = vpack.c.bf16 %v1510_v55, %v1509_v54 }
  0x35   : > { %2035 = vmatpush3.bf16.msra.mxu0 %v2381_v53  ;;  %v2255_v53 = vpack.c.bf16 %v1508_v52, %v1507_v51 }
  0x36   : > { %2075 = vmatpush3.bf16.msra.mxu1 %v2387_v57  ;;  %2036 = vmatprep.subr.bf16.mxu0 %v2390_v60  ;;  %v1511_v57 = vld [vmem:[%s2867_s3 + $0x40] sm:$0xff]  ;;  %v1513_v60 = vld [vmem:[%s2867_s3 + $0x50] sm:$0xff] }
  0x37   : > { %2076 = vmatprep.subr.bf16.mxu1 %v2392_v62 }
  0x38   : > { %1172 = vmatmul.mubr.bf16.gmra.mrb[8].mxu0 %v2388_v58  ;;  %v1512_v58 = vld [vmem:[%s2867_s3 + $0x48] sm:$0xff] }
  0x39   : > { %1237 = vmatmul.mubr.bf16.gmra.mrb[8].mxu1 %v2389_v59  ;;  %2037 = vmatpush3.bf16.msra.mxu0 %v2391_v61  ;;  %v2261_v59 = vpack.c.bf16 %v1512_v58, %v1511_v57  ;;  %v1514_v61 = vld [vmem:[%s2867_s3 + $0x58] sm:$0xff] }
  0x3a   : > { %2077 = vmatpush3.bf16.msra.mxu1 %v2393_v63  ;;  %2038 = vmatprep.subr.bf16.mxu0 %v2394_v0  ;;  %v2264_v62 = vpack.c.bf16 %v1514_v61, %v1513_v60  ;;  %v1515_v63 = vld [vmem:[%s2867_s3 + $0x60] sm:$0xff]  ;;  %v1516_v0 = vld [vmem:[%s2867_s3 + $0x68] sm:$0xff] }
  0x3b   : > { %2078 = vmatprep.subr.bf16.mxu1 %v2396_v2  ;;  %1179 = vmatprep.mubr.bf16.mxu0 %v2397_v3  ;;  %v1517_v2 = vld [vmem:[%s2867_s3 + $0x70] sm:$0xff]  ;;  %v1518_v3 = vld [vmem:[%s2867_s3 + $0x78] sm:$0xff] }
  0x3c   : > { %1244 = vmatprep.mubr.bf16.mxu1 %v2399_v4  ;;  %v2270_v4 = vpack.c.bf16 %v1518_v3, %v1517_v2 }
  0x3d   : > { %2039 = vmatpush3.bf16.msra.mxu0 %v2395_v1  ;;  %v2267_v1 = vpack.c.bf16 %v1516_v0, %v1515_v63 }
  0x3e   : > { %2079 = vmatpush3.bf16.msra.mxu1 %v2401_v5  ;;  %2040 = vmatprep.subr.bf16.mxu0 %v2404_v8  ;;  %v2476_v5 = vmov 0.0  }
  0x3f   : > { %2080 = vmatprep.subr.bf16.mxu1 %v2406_v10 }
  0x40   : > { %1180 = vmatmul.mubr.bf16.gmra.mrb[12].mxu0 %v2402_v6 }
  0x41   : > { %1245 = vmatmul.mubr.bf16.gmra.mrb[12].mxu1 %v2403_v7  ;;  %2041 = vmatpush3.bf16.msra.mxu0 %v2405_v9 }
  0x42   : > { %2081 = vmatpush3.bf16.msra.mxu1 %v2407_v11  ;;  %2042 = vmatprep.subr.bf16.mxu0 %v2408_v12 }
  0x43   : > { %2082 = vmatprep.subr.bf16.mxu1 %v2410_v14  ;;  %1285 = vmatprep.mubr.bf16.mxu0 %v2413_v16 }
  0x44   : > { %1350 = vmatprep.mubr.bf16.mxu1 %v2418_v20 }
  0x45   : > { %2043 = vmatpush3.bf16.msra.mxu0 %v2409_v13 }
  0x46   : > { %2083 = vmatpush3.bf16.msra.mxu1 %v2414_v17  ;;  %2154 = vmatprep.subr.bf16.mxu0 %v2415_v18 }
  0x47   : > { %2248 = vmatprep.subr.bf16.mxu1 %v2474_v47 }
  0x48   : > { %1286 = vmatmul.mubr.bf16.vlgmr.msra.gmra.mrb[16].mxu0 %v2411_v15 }
  0x49   : > { %2155 = vmatpush3.bf16.msra.mxu0 %v2415_v18  ;;  %1351 = vmatmul.mubr.bf16.vlgmr.msra.gmra.mrb[16].mxu1 %v2416_v19 }
  0x4a   : > { %2156 = vmatprep.subr.bf16.mxu0 %v2419_v21  ;;  %1293 = vmatprep.mubr.bf16.mxu0 %v2420_v22 }
  0x4b   : > { %1358 = vmatprep.mubr.bf16.mxu1 %v2424_v25  ;;  %2250 = vmatpush3.bf16.msra.mxu1 %v2249_v46 }
  0x4c   : > { %2251 = vmatprep.subr.bf16.mxu1 %v2474_v47 }
  0x4d   : > { %2157 = vmatpush3.bf16.msra.mxu0 %v2419_v21 }
  0x4e   : > { %2158 = vmatprep.subr.bf16.mxu0 %v2423_v24 }
  0x4f   : > { %2253 = vmatpush3.bf16.msra.mxu1 %v2252_v50 }
  0x50   : > { %1294 = vmatmul.mubr.bf16.gmra.mrb[20].mxu0 %v2422_v23  ;;  %2254 = vmatprep.subr.bf16.mxu1 %v2474_v47 }
  0x51   : > { %1301 = vmatprep.mubr.bf16.mxu0 %v2428_v27  ;;  %2159 = vmatpush3.bf16.msra.mxu0 %v2423_v24 }
  0x52   : > { %2160 = vmatprep.subr.bf16.mxu0 %v2427_v26  ;;  %1359 = vmatmul.mubr.bf16.gmra.mrb[20].mxu1 %v2426_v28 }
  0x53   : > { %1366 = vmatprep.mubr.bf16.mxu1 %v2432_v29  ;;  %2256 = vmatpush3.bf16.msra.mxu1 %v2255_v53 }
  0x54   : > { %2257 = vmatprep.subr.bf16.mxu1 %v2474_v47 }
  0x55   : > { %2161 = vmatpush3.bf16.msra.mxu0 %v2427_v26 }
  0x56   : > { %2162 = vmatprep.subr.bf16.mxu0 %v2431_v30 }
  0x57   : > { %2259 = vmatpush3.bf16.msra.mxu1 %v2258_v56 }
  0x58   : > { %1302 = vmatmul.mubr.bf16.gmra.mrb[24].mxu0 %v2430_v31  ;;  %2260 = vmatprep.subr.bf16.mxu1 %v2474_v47 }
  0x59   : > { %1309 = vmatprep.mubr.bf16.mxu0 %v2436_v32  ;;  %2163 = vmatpush3.bf16.msra.mxu0 %v2431_v30 }
  0x5a   : > { %2164 = vmatprep.subr.bf16.mxu0 %v2435_v33  ;;  %1367 = vmatmul.mubr.bf16.gmra.mrb[24].mxu1 %v2434_v34 }
  0x5b   : > { %1374 = vmatprep.mubr.bf16.mxu1 %v2440_v35  ;;  %2262 = vmatpush3.bf16.msra.mxu1 %v2261_v59 }
  0x5c   : > { %2263 = vmatprep.subr.bf16.mxu1 %v2474_v47 }
  0x5d   : > { %2165 = vmatpush3.bf16.msra.mxu0 %v2435_v33 }
  0x5e   : > { %2166 = vmatprep.subr.bf16.mxu0 %v2439_v36 }
  0x5f   : > { %2265 = vmatpush3.bf16.msra.mxu1 %v2264_v62 }
  0x60   : > { %1310 = vmatmul.mubr.bf16.gmra.mrb[28].mxu0 %v2438_v37  ;;  %2266 = vmatprep.subr.bf16.mxu1 %v2474_v47 }
  0x61   : > { %2170 = vmatprep.mubr.bf16.mxu0 %v2444_v38  ;;  %2167 = vmatpush3.bf16.msra.mxu0 %v2439_v36 }
  0x62   : > { %2168 = vmatprep.subr.bf16.mxu0 %v2443_v39  ;;  %1375 = vmatmul.mubr.bf16.gmra.mrb[28].mxu1 %v2442_v40 }
  0x63   : > { %2268 = vmatpush3.bf16.msra.mxu1 %v2267_v1  ;;  %2210 = vmatprep.mubr.msk.f32.mxu1 %vm2475_vm0, %v2476_v5 }
  0x64   : > { %2269 = vmatprep.subr.bf16.mxu1 %v2474_v47 }
  0x65   : > { %2169 = vmatpush3.bf16.msra.mxu0 %v2443_v39 }
  0x66   : > { %2272 = vmatprep.subr.bf16.mxu0 %v2474_v47 }
  0x67   : > { %2271 = vmatpush3.bf16.msra.mxu1 %v2270_v4 }
  0x68   : > { %2171 = vmatmul.mubr.bf16.vlgmr.msra.gmra.mrb[32].mxu0 %v2445_v41 }
  0x69   : > { %2174 = vmatprep.mubr.bf16.mxu0 %v2446_v42  ;;  %2274 = vmatpush3.bf16.msra.mxu0 %v2249_v46 }
  0x6a   : > { %2275 = vmatprep.subr.bf16.mxu0 %v2474_v47 }
  0x6d   : > { %2277 = vmatpush3.bf16.msra.mxu0 %v2252_v50 }
  0x6e   : > { %2278 = vmatprep.subr.bf16.mxu0 %v2474_v47 }
  0x70   : > { %2175 = vmatmul.mubr.bf16.gmra.mrb[36].mxu0 %v2447_v43 }
  0x71   : > { %2280 = vmatpush3.bf16.msra.mxu0 %v2255_v53  ;;  %2245 = vmatprep.mubr.msk.f32.mxu0 %vm2475_vm0, %v2476_v5 }
  0x72   : > { %2281 = vmatprep.subr.bf16.mxu0 %v2474_v47 }
  0x75   : > { %2283 = vmatpush3.bf16.msra.mxu0 %v2258_v56 }
  0x76   : > { %2284 = vmatprep.subr.bf16.mxu0 %v2474_v47 }
  0x79   : > { %2286 = vmatpush3.bf16.msra.mxu0 %v2261_v59 }
  0x7a   : > { %2287 = vmatprep.subr.bf16.mxu0 %v2474_v47 }
  0x7d   : > { %2289 = vmatpush3.bf16.msra.mxu0 %v2264_v62 }
  0x7e   : > { %2290 = vmatprep.subr.bf16.mxu0 %v2474_v47 }
  0x81   : > { %2292 = vmatpush3.bf16.msra.mxu0 %v2267_v1 }
  0x82   : > { %2293 = vmatprep.subr.bf16.mxu0 %v2474_v47 }
  0x85   : > { %2295 = vmatpush3.bf16.msra.mxu0 %v2270_v4 }
  0xfb   : > { %v1964_v6 = vpop.f32.mrb[0].mxu0 }
  0xfc   : > { %v2004_v7 = vpop.f32.mrb[0].mxu1  ;;  %v1965_v8 = vpop.f32.mrb[1].mxu0 }
  0xfd   : > { %v1966_v9 = vadd.f32 %v1965_v8, %v1964_v6  ;;  %v2005_v10 = vpop.f32.mrb[1].mxu1  ;;  %v1967_v11 = vpop.f32.mrb[2].mxu0 }
  0xfe   : > { %v2006_v12 = vadd.f32 %v2005_v10, %v2004_v7  ;;  %v2007_v13 = vpop.f32.mrb[2].mxu1  ;;  %v1968_v14 = vpop.f32.mrb[3].mxu0 }
  0xff   : > { %v1969_v15 = vadd.f32 %v1968_v14, %v1967_v11  ;;  %v2008_v16 = vpop.f32.mrb[3].mxu1 }
 0x100   : > { %v1223_v17 = vadd.f32 %v2006_v12, %v1966_v9  ;;  %v2009_v18 = vadd.f32 %v2008_v16, %v2007_v13 }
 0x102   : > { %v1226_v19 = vadd.f32 %v2009_v18, %v1969_v15 }
 0x103   : > { %v1970_v20 = vpop.f32.mrb[4].mxu0 }
 0x104   : > { %v2010_v21 = vpop.f32.mrb[4].mxu1  ;;  %v1971_v22 = vpop.f32.mrb[5].mxu0 }
 0x105   : > { %v1972_v23 = vadd.f32 %v1971_v22, %v1970_v20  ;;  %v2011_v24 = vpop.f32.mrb[5].mxu1  ;;  %v1973_v25 = vpop.f32.mrb[6].mxu0 }
 0x106   : > { %v2012_v26 = vadd.f32 %v2011_v24, %v2010_v21  ;;  %v2013_v27 = vpop.f32.mrb[6].mxu1  ;;  %v1974_v28 = vpop.f32.mrb[7].mxu0 }
 0x107   : > { %v1975_v29 = vadd.f32 %v1974_v28, %v1973_v25  ;;  %v2014_v30 = vpop.f32.mrb[7].mxu1 }
 0x108   : > { %v1231_v31 = vadd.f32 %v2012_v26, %v1972_v23  ;;  %v2015_v32 = vadd.f32 %v2014_v30, %v2013_v27 }
 0x10a   : > { %v1234_v33 = vadd.f32 %v2015_v32, %v1975_v29 }
 0x10b   : > { %v1976_v34 = vpop.f32.mrb[8].mxu0 }
 0x10c   : > { %v2016_v35 = vpop.f32.mrb[8].mxu1  ;;  %v1977_v36 = vpop.f32.mrb[9].mxu0 }
 0x10d   : > { %v1978_v37 = vadd.f32 %v1977_v36, %v1976_v34  ;;  %v2017_v38 = vpop.f32.mrb[9].mxu1  ;;  %v1979_v39 = vpop.f32.mrb[10].mxu0 }
 0x10e   : > { %v2018_v40 = vadd.f32 %v2017_v38, %v2016_v35  ;;  %v2019_v41 = vpop.f32.mrb[10].mxu1  ;;  %v1980_v42 = vpop.f32.mrb[11].mxu0 }
 0x10f   : > { %v1981_v43 = vadd.f32 %v1980_v42, %v1979_v39  ;;  %v2020_v44 = vpop.f32.mrb[11].mxu1 }
 0x110   : > { %v1239_v45 = vadd.f32 %v2018_v40, %v1978_v37  ;;  %v2021_v46 = vadd.f32 %v2020_v44, %v2019_v41 }
 0x112   : > { %v1242_v47 = vadd.f32 %v2021_v46, %v1981_v43 }
 0x113   : > { %v1982_v48 = vpop.f32.mrb[12].mxu0 }
 0x114   : > { %v2022_v49 = vpop.f32.mrb[12].mxu1  ;;  %v1983_v50 = vpop.f32.mrb[13].mxu0 }
 0x115   : > { %v2023_v51 = vpop.f32.mrb[13].mxu1  ;;  %v1984_v52 = vadd.f32 %v1983_v50, %v1982_v48  ;;  %v1985_v54 = vpop.f32.mrb[14].mxu0 }
 0x116   : > { %v2024_v53 = vadd.f32 %v2023_v51, %v2022_v49  ;;  %v2025_v55 = vpop.f32.mrb[14].mxu1  ;;  %v1986_v56 = vpop.f32.mrb[15].mxu0 }
 0x117   : > { %v2026_v57 = vpop.f32.mrb[15].mxu1  ;;  %v1987_v59 = vadd.f32 %v1986_v56, %v1985_v54 }
 0x118   : > { %v1247_v58 = vadd.f32 %v2024_v53, %v1984_v52  ;;  %v2027_v60 = vadd.f32 %v2026_v57, %v2025_v55 }
 0x11a   : > { %v1250_v61 = vadd.f32 %v2027_v60, %v1987_v59 }
 0x11b   : > { %v2044_v62 = vpop.f32.mrb[16].mxu0 }
 0x11c   : > { %v2045_v63 = vpop.f32.mrb[17].mxu0  ;;  %v2084_v4 = vpop.f32.mrb[16].mxu1 }
 0x11d   : > { %v2046_v0 = vadd.f32 %v2045_v63, %v2044_v62  ;;  %v2047_v1 = vpop.f32.mrb[18].mxu0  ;;  %v2085_v6 = vpop.f32.mrb[17].mxu1 }
 0x11e   : > { %v2048_v2 = vpop.f32.mrb[19].mxu0  ;;  %v2086_v8 = vadd.f32 %v2085_v6, %v2084_v4  ;;  %v2087_v9 = vpop.f32.mrb[18].mxu1 }
 0x11f   : > { %v1288_v3 = vadd.f32 %v2046_v0, %v1223_v17  ;;  %v2049_v5 = vadd.f32 %v2048_v2, %v2047_v1  ;;  %v2088_v10 = vpop.f32.mrb[19].mxu1 }
 0x120   : > { %v2089_v11 = vadd.f32 %v2088_v10, %v2087_v9 }
 0x121   : > { %v1291_v7 = vadd.f32 %v2049_v5, %v1226_v19  ;;  %v1353_v13 = vadd.f32 %v2086_v8, %v1288_v3  ;;  %v1943_v5 = vld [vmem:[%s2866_s2] ss:$0 sm:$0xff] }
 0x123   : > { %v2050_v12 = vpop.f32.mrb[20].mxu0  ;;  %v1356_v18 = vadd.f32 %v2089_v11, %v1291_v7 }
 0x124   : > { %v2051_v14 = vpop.f32.mrb[21].mxu0 }
 0x125   : > { %v2052_v15 = vadd.f32 %v2051_v14, %v2050_v12  ;;  %v2053_v16 = vpop.f32.mrb[22].mxu0  ;;  %v2090_v22 = vpop.f32.mrb[20].mxu1 }
 0x126   : > { %v2054_v20 = vpop.f32.mrb[23].mxu0  ;;  %v2091_v24 = vpop.f32.mrb[21].mxu1 }
 0x127   : > { %v1296_v21 = vadd.f32 %v2052_v15, %v1231_v31  ;;  %v2055_v23 = vadd.f32 %v2054_v20, %v2053_v16  ;;  %v2092_v25 = vadd.f32 %v2091_v24, %v2090_v22  ;;  %v2093_v26 = vpop.f32.mrb[22].mxu1 }
 0x128   : > { %v2094_v27 = vpop.f32.mrb[23].mxu1 }
 0x129   : > { %v1299_v17 = vadd.f32 %v2055_v23, %v1234_v33  ;;  %v2095_v19 = vadd.f32 %v2094_v27, %v2093_v26  ;;  %v1361_v29 = vadd.f32 %v2092_v25, %v1296_v21 }
 0x12b   : > { %v2056_v28 = vpop.f32.mrb[24].mxu0  ;;  %v1364_v35 = vadd.f32 %v2095_v19, %v1299_v17 }
 0x12c   : > { %v2057_v30 = vpop.f32.mrb[25].mxu0 }
 0x12d   : > { %v2058_v32 = vadd.f32 %v2057_v30, %v2056_v28  ;;  %v2059_v34 = vpop.f32.mrb[26].mxu0  ;;  %v2096_v38 = vpop.f32.mrb[24].mxu1 }
 0x12e   : > { %v2060_v36 = vpop.f32.mrb[27].mxu0  ;;  %v2097_v40 = vpop.f32.mrb[25].mxu1 }
 0x12f   : > { %v1304_v37 = vadd.f32 %v2058_v32, %v1239_v45  ;;  %v2061_v39 = vadd.f32 %v2060_v36, %v2059_v34  ;;  %v2098_v41 = vadd.f32 %v2097_v40, %v2096_v38  ;;  %v2099_v42 = vpop.f32.mrb[26].mxu1  ;;  %v1590_v38 = vlaneseq }
 0x130   : > { %v2100_v43 = vpop.f32.mrb[27].mxu1 }
 0x131   : > { %v1307_v31 = vadd.f32 %v2061_v39, %v1242_v47  ;;  %v2101_v33 = vadd.f32 %v2100_v43, %v2099_v42  ;;  %v1369_v46 = vadd.f32 %v2098_v41, %v1304_v37  ;;  %v1591_v39 = vshrl.u32 %v1590_v38, 7 }
 0x133   : > { %v2062_v44 = vpop.f32.mrb[28].mxu0  ;;  %v1372_v51 = vadd.f32 %v2101_v33, %v1307_v31  ;;  %v1592_v40 = vsub.s32 0, %v1591_v39 }
 0x134   : > { %v2063_v48 = vpop.f32.mrb[29].mxu0 }
 0x135   : > { %v2064_v49 = vadd.f32 %v2063_v48, %v2062_v44  ;;  %v2065_v50 = vpop.f32.mrb[30].mxu0  ;;  %v2102_v54 = vpop.f32.mrb[28].mxu1 }
 0x136   : > { %v2066_v52 = vpop.f32.mrb[31].mxu0  ;;  %v2103_v56 = vpop.f32.mrb[29].mxu1 }
 0x137   : > { %v1312_v53 = vadd.f32 %v2064_v49, %v1247_v58  ;;  %v2067_v55 = vadd.f32 %v2066_v52, %v2065_v50  ;;  %v2104_v57 = vadd.f32 %v2103_v56, %v2102_v54  ;;  %v2105_v59 = vpop.f32.mrb[30].mxu1 }
 0x138   : > { %v2106_v60 = vpop.f32.mrb[31].mxu1 }
 0x139   : > { %v1315_v45 = vadd.f32 %v2067_v55, %v1250_v61  ;;  %v2107_v47 = vadd.f32 %v2106_v60, %v2105_v59  ;;  %v1377_v62 = vadd.f32 %v2104_v57, %v1312_v53 }
 0x13b   : > { %v2172_v63 = vpop.f32.mrb[32].mxu0  ;;  %v1380_v2 = vadd.f32 %v2107_v47, %v1315_v45 }
 0x13c   : > { %v1426_v0 = vadd.f32 %v2172_v63, %v1361_v29  ;;  %v1417_v1 = vpop.f32.mrb[33].mxu0 }
 0x13d   : > { %v1418_v3 = vadd.f32 %v1417_v1, %v1353_v13  ;;  %v2173_v4 = vpop.f32.mrb[34].mxu0 }
 0x13e   : > { %v1429_v58 = vadd.f32 %v2173_v4, %v1364_v35  ;;  %v1420_v6 = vpop.f32.mrb[35].mxu0  ;;  %v1484_v9 = vadd.f32 %v1943_v5, %v1426_v0 }
 0x13f   : > { %v1421_v7 = vadd.f32 %v1420_v6, %v1356_v18  ;;  %v1482_v8 = vadd.f32 %v1943_v5, %v1418_v3 }
 0x140   : > { %v1485_v15 = vadd.f32 %v1943_v5, %v1429_v58 }
 0x141   : > { %v1483_v61 = vadd.f32 %v1943_v5, %v1421_v7 }
 0x143   : > { %v1490_v10 = vadd.f32 %v1483_v61, %v1482_v8  ;;  %v2176_v11 = vpop.f32.mrb[36].mxu0 }
 0x144   : > { %v1442_v12 = vadd.f32 %v2176_v11, %v1377_v62  ;;  %v1433_v14 = vpop.f32.mrb[37].mxu0 }
 0x145   : > { %v1491_v16 = vadd.f32 %v1490_v10, %v1484_v9  ;;  %v1434_v20 = vadd.f32 %v1433_v14, %v1369_v46  ;;  %v2177_v21 = vpop.f32.mrb[38].mxu0 }
 0x146   : > { %v1445_v13 = vadd.f32 %v2177_v21, %v1380_v2  ;;  %v1436_v22 = vpop.f32.mrb[39].mxu0  ;;  %v1488_v27 = vadd.f32 %v1943_v5, %v1442_v12  ;;  %v1696_v12 = vld [vmem:[%s2868_s4] sm:$0x1] }
 0x147   : > { %v1486_v23 = vadd.f32 %v1943_v5, %v1434_v20  ;;  %v1492_v24 = vadd.f32 %v1491_v16, %v1485_v15  ;;  %v1437_v17 = vadd.f32 %v1436_v22, %v1372_v51  ;;  %v1944_v20 = vld [vmem:[%s2869_s5] ss:$0 sm:$0xff] }
 0x148   : > { %v1489_v19 = vadd.f32 %v1943_v5, %v1445_v13 }
 0x149   : > { %v1493_v25 = vadd.f32 %v1492_v24, %v1486_v23  ;;  %v1487_v26 = vadd.f32 %v1943_v5, %v1437_v17 }
 0x14b   : > { %v1494_v18 = vadd.f32 %v1493_v25, %v1487_v26 }
 0x14d   : > { %v1495_v28 = vadd.f32 %v1494_v18, %v1488_v27 }
 0x14f   : > { %v1496_v29 = vadd.f32 %v1495_v28, %v1489_v19 }
 0x151   : > { %v1497_v30 = vrot.slane %v1496_v29, 4 }
 0x153   : > { %v1498_v32 = vadd.f32 %v1497_v30, %v1496_v29 }
 0x155   : > { %v1499_v34 = vrot.slane %v1498_v32, 2 }
 0x157   : > { %v1500_v35 = vadd.f32 %v1499_v34, %v1498_v32 }
 0x159   : > { %v1501_v36 = vrot.slane %v1500_v35, 1 }
 0x15b   : > { %v1502_v37 = vadd.f32 %v1501_v36, %v1500_v35 }
 0x15d   : > { %2211 = vmatmul.mubr.f32.vlgmr.msra.gmra.mrb[32].mxu1 %v1502_v37 }
 0x230   : > { %v1585_v31 = vpop.f32.mrb[32].mxu1 }
 0x231   : > { %v1589_v41 = vmul.f32 0.001953125, %v1585_v31  ;;  %v2212_v42 = vpop.f32.mrb[33].mxu1 }
 0x233   : > { %v1593_v43 = vrot.slane %v1589_v41, %v1592_v40 }
 0x235   : > { %v1594_v33 = vsub.f32 %v1482_v8, %v1593_v43  ;;  %v1595_v44 = vsub.f32 %v1483_v61, %v1593_v43  ;;  %v1596_v46 = vsub.f32 %v1484_v9, %v1593_v43  ;;  %v1597_v48 = vsub.f32 %v1485_v15, %v1593_v43 }
 0x236   : > { %v1598_v51 = vsub.f32 %v1486_v23, %v1593_v43  ;;  %v1599_v54 = vsub.f32 %v1487_v26, %v1593_v43  ;;  %v1600_v45 = vsub.f32 %v1488_v27, %v1593_v43  ;;  %v1601_v60 = vsub.f32 %v1489_v19, %v1593_v43 }
 0x237   : > { %v1602_v49 = vmul.f32 %v1594_v33, %v1594_v33  ;;  %v1603_v50 = vmul.f32 %v1595_v44, %v1595_v44  ;;  %v1604_v52 = vmul.f32 %v1596_v46, %v1596_v46  ;;  %v1605_v55 = vmul.f32 %v1597_v48, %v1597_v48 }
 0x238   : > { %v1606_v57 = vmul.f32 %v1598_v51, %v1598_v51  ;;  %v1607_v47 = vmul.f32 %v1599_v54, %v1599_v54  ;;  %v1608_v63 = vmul.f32 %v1600_v45, %v1600_v45  ;;  %v1609_v1 = vmul.f32 %v1601_v60, %v1601_v60 }
 0x239   : > { %v1610_v53 = vadd.f32 %v1603_v50, %v1602_v49 }
 0x23b   : > { %v1611_v56 = vadd.f32 %v1610_v53, %v1604_v52 }
 0x23d   : > { %v1612_v59 = vadd.f32 %v1611_v56, %v1605_v55 }
 0x23f   : > { %v1613_v62 = vadd.f32 %v1612_v59, %v1606_v57 }
 0x241   : > { %v1614_v0 = vadd.f32 %v1613_v62, %v1607_v47 }
 0x243   : > { %v1615_v2 = vadd.f32 %v1614_v0, %v1608_v63 }
 0x245   : > { %v1616_v3 = vadd.f32 %v1615_v2, %v1609_v1 }
 0x247   : > { %v1617_v4 = vrot.slane %v1616_v3, 4 }
 0x249   : > { %v1618_v5 = vadd.f32 %v1617_v4, %v1616_v3 }
 0x24b   : > { %v1619_v58 = vrot.slane %v1618_v5, 2 }
 0x24d   : > { %v1620_v6 = vadd.f32 %v1619_v58, %v1618_v5 }
 0x24f   : > { %v1621_v7 = vrot.slane %v1620_v6, 1 }
 0x251   : > { %v1622_v8 = vadd.f32 %v1621_v7, %v1620_v6 }
 0x253   : > { %2246 = vmatmul.mubr.f32.vlgmr.msra.gmra.mrb[40].mxu0 %v1622_v8 }
 0x326   : > { %v1689_v61 = vpop.f32.mrb[40].mxu0 }
 0x327   : > { %v1693_v9 = vmul.f32 0.001953125, %v1689_v61  ;;  %v2247_v10 = vpop.f32.mrb[41].mxu0 }
 0x329   : > { %v1694_v11 = vadd.f32 1e-05, %v1693_v9 }
 0x32b   : > { %2448 = vrsqrt.f32 %v1694_v11 }
 0x335   : > { %v2449_v14 = vpop.eup %2448 }
 0x336   : > { %v1697_v15 = vmul.f32 %v2449_v14, %v1696_v12 }
 0x338   : > { %v1701_v16 = vrot.slane %v1697_v15, %v1592_v40 }
 0x33a   : > { %v1702_v21 = vmul.f32 %v1701_v16, %v1594_v33  ;;  %v1703_v13 = vmul.f32 %v1701_v16, %v1595_v44  ;;  %v1704_v22 = vmul.f32 %v1701_v16, %v1596_v46  ;;  %v1705_v23 = vmul.f32 %v1701_v16, %v1597_v48 }
 0x33b   : > { %v1706_v24 = vmul.f32 %v1701_v16, %v1598_v51  ;;  %v1707_v17 = vmul.f32 %v1701_v16, %v1599_v54  ;;  %v1708_v25 = vmul.f32 %v1701_v16, %v1600_v45  ;;  %v1709_v26 = vmul.f32 %v1701_v16, %v1601_v60 }
 0x33c   : > { %v1717_v27 = vadd.f32 %v1944_v20, %v1702_v21  ;;  %v1718_v18 = vadd.f32 %v1944_v20, %v1703_v13  ;;  %v1719_v19 = vadd.f32 %v1944_v20, %v1704_v22  ;;  %v1720_v28 = vadd.f32 %v1944_v20, %v1705_v23 }
 0x33d   : > { %v1721_v29 = vadd.f32 %v1944_v20, %v1706_v24  ;;  %v1722_v30 = vadd.f32 %v1944_v20, %v1707_v17  ;;  %v1723_v32 = vadd.f32 %v1944_v20, %v1708_v25  ;;  %v1724_v34 = vadd.f32 %v1944_v20, %v1709_v26 }
 0x33e   : > { %v1725_v35 = vmax.f32 %v1717_v27, 0.0  ;;  %v1726_v36 = vmax.f32 %v1718_v18, 0.0  ;;  %v1727_v37 = vmax.f32 %v1719_v19, 0.0  ;;  %v1728_v38 = vmax.f32 %v1720_v28, 0.0 }
 0x33f   : > { %v1729_v39 = vmax.f32 %v1721_v29, 0.0  ;;  %v1730_v40 = vmax.f32 %v1722_v30, 0.0  ;;  %v1731_v31 = vmax.f32 %v1723_v32, 0.0  ;;  %v1732_v41 = vmax.f32 %v1724_v34, 0.0 }
 0x340   : > { %1733 = vst [vmem:[%s301_s14] sm:$0xff] %v1725_v35  ;;  %1734 = vst [vmem:[%s301_s14 + $0x8] sm:$0xff] %v1726_v36 }
 0x341   : > { %1735 = vst [vmem:[%s301_s14 + $0x10] sm:$0xff] %v1727_v37  ;;  %1736 = vst [vmem:[%s301_s14 + $0x18] sm:$0xff] %v1728_v38 }
 0x342   : > { %1737 = vst [vmem:[%s301_s14 + $0x20] sm:$0xff] %v1729_v39  ;;  %1738 = vst [vmem:[%s301_s14 + $0x28] sm:$0xff] %v1730_v40 }
 0x343   : > { %1739 = vst [vmem:[%s301_s14 + $0x30] sm:$0xff] %v1731_v31  ;;  %1740 = vst [vmem:[%s301_s14 + $0x38] sm:$0xff] %v1732_v41 }
 0x344 PF: > { %s16_s23 = sadd.s32 1, %s2472_s23   ;;  %s2871_s21 = smov %s2468_s22 }
 0x345   : > { %p13_p5 = scmp.ge.s32.totalorder %s16_s23, 4   ;;  %s2872_s22 = smov %s2874_s24 }
 0x347   :  { %15 = sbr.rel (!%p13_p5) target bundleno = 2 (0x2), region = 85 }

// kernel: unet_extractor_forward.19
= control target key start
LH: loop header
LB: loop body
LE: loop exit
PB: predicated region body
PF: predicated region fallthrough
CT: control target
= control target key end

     0   :  { %s2603_s24 = smov 0   ;;  %s2605_s25 = smov 0   ;;  %s2962_s0 = inlined_call_operand.vmem [shape: bf16[2,64,1152], index: 0, kind: input, shape index: {}]   ;;  %s2963_s1 = inlined_call_operand.vmem [shape: bf16[1152,128], index: 1, kind: input, shape index: {}]   ;;  %s2964_s2 = inlined_call_operand.vmem [shape: f32[1,128], index: 2, kind: input, shape index: {}, may-alias: {2,5}]   ;;  %s2965_s3 = inlined_call_operand.vmem [shape: f32[128,128], index: 3, kind: input, shape index: {}]   ;;  %s2966_s4 = inlined_call_operand.vmem [shape: f32[1,128], index: 4, kind: input, shape index: {}]   ;;  %s2967_s5 = inlined_call_operand.vmem [shape: f32[1,128], index: 5, kind: input, shape index: {}, may-alias: {2,5}]   ;;  %s2968_s6 = inlined_call_operand.vmem [shape: f32[2,64,128], index: 6, kind: input, shape index: {}]   ;;  %s2969_s7 = inlined_call_operand.vmem [shape: f32[2,64,128], index: 7, kind: output, shape index: {}]  }
   0x1   :  { %s2607_s26 = smov 0  }
   0x2 LB: > { %s29_s27 = sadd.s32 1, %s2554_s25  ;;  %p1914_p0 = scmp.ge.s32.totalorder %s2558_s26, 1  ;;  %s2558_s26 = sphi %s2607_s26, %s17_s26   ;;  %s2554_s25 = sphi %s2605_s25, %s2971_s25   ;;  %s2550_s24 = sphi %s2603_s24, %s2970_s24  }
   0x3   : > { %p31_p1 = scmp.ge.s32.totalorder %s29_s27, 2  ;;  %p277_p2 = scmp.lt.s32.totalorder %s2558_s26, 3 }
   0x5   : > { %s2973_s27 = smov (%p31_p1, %s29_s27), 0  ;;  %p278_p3 = pnand %p1914_p0, %p277_p2 }
   0x6   : > { %v2410_v0 = vld [vmem:[%s2963_s1 + $0x40] sm:$0xff] (!%p278_p3)   ;;  %v2414_v4 = vld [vmem:[%s2963_s1 + $0x48] sm:$0xff] (!%p278_p3)   ;;  %v2418_v8 = vld [vmem:[%s2963_s1 + $0x50] sm:$0xff] (!%p278_p3)   ;;  %p324_p4 = scmp.lt.s32.totalorder (!%p278_p3), %s2550_s24, 1  ;;  %vm2561_vm0 = vmmov (!%p278_p3), 0  }
   0x7   : > { %281 = sbr.rel (%p278_p3) target bundleno = 840 (0x348), region = 48  ;;  %v2411_v1 = vld [vmem:[%s2963_s1 + $0xc0] sm:$0xff] (!%p278_p3)   ;;  %2034 = vmatprep.subr.bf16.mxu0 (!%p278_p3), %v2410_v0  ;;  %v2415_v5 = vld [vmem:[%s2963_s1 + $0xc8] sm:$0xff] (!%p278_p3)   ;;  %v2419_v9 = vld [vmem:[%s2963_s1 + $0xd0] sm:$0xff] (!%p278_p3)  }
   0x8   : > { %v2412_v2 = vld [vmem:[%s2963_s1] sm:$0xff] (!%p278_p3)   ;;  %2074 = vmatprep.subr.bf16.mxu1 (!%p278_p3), %v2411_v1  ;;  %v2416_v6 = vld [vmem:[%s2963_s1 + $0x8] sm:$0xff] (!%p278_p3)   ;;  %v2420_v10 = vld [vmem:[%s2963_s1 + $0x10] sm:$0xff] (!%p278_p3)  }
   0x9   : > { %v2413_v3 = vld [vmem:[%s2963_s1 + $0x80] sm:$0xff] (!%p278_p3)   ;;  %2035 = vmatpush3.bf16.msra.mxu0 (!%p278_p3), %v2412_v2  ;;  %v2417_v7 = vld [vmem:[%s2963_s1 + $0x88] sm:$0xff] (!%p278_p3)   ;;  %v2421_v11 = vld [vmem:[%s2963_s1 + $0x90] sm:$0xff] (!%p278_p3)  }
   0xa   : > { %2075 = vmatpush3.bf16.msra.mxu1 (!%p278_p3), %v2413_v3  ;;  %2036 = vmatprep.subr.bf16.mxu0 (!%p278_p3), %v2414_v4  ;;  %v2422_v12 = vld [vmem:[%s2963_s1 + $0x58] sm:$0xff] (!%p278_p3)   ;;  %v2426_v16 = vld [vmem:[%s2963_s1 + $0x60] sm:$0xff] (!%p278_p3)   ;;  %v2430_v20 = vld [vmem:[%s2963_s1 + $0x68] sm:$0xff] (!%p278_p3)  }
   0xb   : > { %2076 = vmatprep.subr.bf16.mxu1 (!%p278_p3), %v2415_v5  ;;  %v2423_v13 = vld [vmem:[%s2963_s1 + $0xd8] sm:$0xff] (!%p278_p3)   ;;  %v2427_v17 = vld [vmem:[%s2963_s1 + $0xe0] sm:$0xff] (!%p278_p3)   ;;  %v2431_v21 = vld [vmem:[%s2963_s1 + $0xe8] sm:$0xff] (!%p278_p3)  }
   0xc   : > { %v2424_v14 = vld [vmem:[%s2963_s1 + $0x18] sm:$0xff] (!%p278_p3)   ;;  %v2428_v18 = vld [vmem:[%s2963_s1 + $0x20] sm:$0xff] (!%p278_p3)   ;;  %v2432_v22 = vld [vmem:[%s2963_s1 + $0x28] sm:$0xff] (!%p278_p3)  }
   0xd   : > { %2037 = vmatpush3.bf16.msra.mxu0 (!%p278_p3), %v2416_v6  ;;  %v2425_v15 = vld [vmem:[%s2963_s1 + $0x98] sm:$0xff] (!%p278_p3)   ;;  %v2429_v19 = vld [vmem:[%s2963_s1 + $0xa0] sm:$0xff] (!%p278_p3)   ;;  %v2433_v23 = vld [vmem:[%s2963_s1 + $0xa8] sm:$0xff] (!%p278_p3)  }
   0xe   : > { %2077 = vmatpush3.bf16.msra.mxu1 %v2417_v7  ;;  %2038 = vmatprep.subr.bf16.mxu0 %v2418_v8  ;;  %s2975_s24 = smov (!%p324_p4, %s2550_s24), 1  ;;  %v2434_v24 = vld [vmem:[%s2963_s1 + $0x70] sm:$0xff]   ;;  %v2438_v28 = vld [vmem:[%s2963_s1 + $0x78] sm:$0xff]   ;;  %v2448_v36 = vld [vmem:[%s2963_s1 + $0x140] sm:$0xff]  }
   0xf   : > { %2078 = vmatprep.subr.bf16.mxu1 %v2419_v9  ;;  %v2435_v25 = vld [vmem:[%s2963_s1 + $0xf0] sm:$0xff]   ;;  %s2382_s19 = smul.u32 288, %s2975_s24  ;;  %v2439_v29 = vld [vmem:[%s2963_s1 + $0xf8] sm:$0xff]   ;;  %v2449_v37 = vld [vmem:[%s2963_s1 + $0x100] sm:$0xff]   ;;  %s2032_s22 = sshll.u32 %s2975_s24, 6 }
  0x10   : > { %v2436_v26 = vld [vmem:[%s2963_s1 + $0x30] sm:$0xff]   ;;  %v2440_v30 = vld [vmem:[%s2963_s1 + $0x38] sm:$0xff]   ;;  %v2450_v38 = vld [vmem:[%s2963_s1 + $0x1c0] sm:$0xff]   ;;  %s343_s29 = scalar_lea.vmem %s2968_s6, %s2032_s22 }
  0x11   : > { %2039 = vmatpush3.bf16.msra.mxu0 %v2420_v10  ;;  %v2437_v27 = vld [vmem:[%s2963_s1 + $0xb0] sm:$0xff]   ;;  %s2721_s11 = scalar_lea.vmem %s2962_s0, %s2382_s19  ;;  %v2441_v31 = vld [vmem:[%s2963_s1 + $0xb8] sm:$0xff]   ;;  %v2451_v39 = vld [vmem:[%s2963_s1 + $0x180] sm:$0xff]  }
  0x12   : > { %2079 = vmatpush3.bf16.msra.mxu1 %v2421_v11  ;;  %2040 = vmatprep.subr.bf16.mxu0 %v2422_v12  ;;  %v2442_v32 = vld [vmem:[%s2721_s11] ss:$36 sps:$4 sm:$0xff]   ;;  %v2445_v34 = vld [vmem:[%s2721_s11 + $0x8] ss:$36 sps:$4 sm:$0xff]   ;;  %v2457_v44 = vld [vmem:[%s2721_s11 + $0x54] ss:$36 sps:$4 sm:$0xff]  }
  0x13   : > { %2080 = vmatprep.subr.bf16.mxu1 %v2423_v13  ;;  %v2444_v33 = vld [vmem:[%s2721_s11 + $0x4] ss:$36 sps:$4 sm:$0xff]   ;;  %v2447_v35 = vld [vmem:[%s2721_s11 + $0xc] ss:$36 sps:$4 sm:$0xff]   ;;  %v2466_v52 = vld [vmem:[%s2963_s1 + $0x158] sm:$0xff]  }
  0x14   : > { %1202 = vmatprep.mubr.bf16.mxu0 %v2444_v33  ;;  %1267 = vmatprep.mubr.bf16.mxu1 %v2447_v35  ;;  %v2452_v40 = vld [vmem:[%s2963_s1 + $0x148] sm:$0xff]   ;;  %v2461_v47 = vld [vmem:[%s2721_s11 + $0x50] ss:$36 sps:$4 sm:$0xff]   ;;  %v2467_v53 = vld [vmem:[%s2963_s1 + $0x118] sm:$0xff]  }
  0x15   : > { %2041 = vmatpush3.bf16.msra.mxu0 %v2424_v14  ;;  %v2453_v41 = vld [vmem:[%s2963_s1 + $0x108] sm:$0xff]   ;;  %v2462_v48 = vld [vmem:[%s2963_s1 + $0x150] sm:$0xff]   ;;  %v2468_v54 = vld [vmem:[%s2963_s1 + $0x1d8] sm:$0xff]  }
  0x16   : > { %2081 = vmatpush3.bf16.msra.mxu1 %v2425_v15  ;;  %2042 = vmatprep.subr.bf16.mxu0 %v2426_v16  ;;  %v2454_v42 = vld [vmem:[%s2963_s1 + $0x1c8] sm:$0xff]   ;;  %v2463_v49 = vld [vmem:[%s2963_s1 + $0x110] sm:$0xff]   ;;  %v2471_v56 = vld [vmem:[%s2721_s11 + $0x9c] ss:$36 sps:$4 sm:$0xff]  }
  0x17   : > { %2082 = vmatprep.subr.bf16.mxu1 %v2427_v17  ;;  %v2455_v43 = vld [vmem:[%s2721_s11 + $0x4c] ss:$36 sps:$4 sm:$0xff]   ;;  %v2469_v55 = vld [vmem:[%s2721_s11 + $0x94] ss:$36 sps:$4 sm:$0xff]   ;;  %v2476_v60 = vld [vmem:[%s2963_s1 + $0x160] sm:$0xff]  }
  0x18   : > { %v2459_v45 = vld [vmem:[%s2963_s1 + $0x188] sm:$0xff]   ;;  %v2464_v50 = vld [vmem:[%s2963_s1 + $0x1d0] sm:$0xff]   ;;  %v2473_v57 = vld [vmem:[%s2963_s1 + $0x198] sm:$0xff]  }
  0x19   : > { %2043 = vmatpush3.bf16.msra.mxu0 %v2428_v18  ;;  %v2460_v46 = vld [vmem:[%s2721_s11 + $0x48] ss:$36 sps:$4 sm:$0xff]   ;;  %v2465_v51 = vld [vmem:[%s2963_s1 + $0x190] sm:$0xff]   ;;  %v2475_v59 = vld [vmem:[%s2721_s11 + $0x98] ss:$36 sps:$4 sm:$0xff]  }
  0x1a   : > { %2083 = vmatpush3.bf16.msra.mxu1 %v2429_v19  ;;  %2044 = vmatprep.subr.bf16.mxu0 %v2430_v20  ;;  %v2474_v58 = vld [vmem:[%s2721_s11 + $0x90] ss:$36 sps:$4 sm:$0xff]   ;;  %v2477_v61 = vld [vmem:[%s2963_s1 + $0x120] sm:$0xff]   ;;  %v2480_v0 = vld [vmem:[%s2963_s1 + $0x168] sm:$0xff]  }
  0x1b   : > { %2084 = vmatprep.subr.bf16.mxu1 %v2431_v21  ;;  %v2478_v62 = vld [vmem:[%s2963_s1 + $0x1e0] sm:$0xff]   ;;  %v2481_v1 = vld [vmem:[%s2963_s1 + $0x128] sm:$0xff]   ;;  %v2488_v6 = vld [vmem:[%s2721_s11 + $0xd8] ss:$36 sps:$4 sm:$0xff]  }
  0x1c   : > { %v2479_v63 = vld [vmem:[%s2963_s1 + $0x1a0] sm:$0xff]   ;;  %v2482_v2 = vld [vmem:[%s2963_s1 + $0x1e8] sm:$0xff]   ;;  %v2490_v8 = vld [vmem:[%s2963_s1 + $0x170] sm:$0xff]  }
  0x1d   : > { %2045 = vmatpush3.bf16.msra.mxu0 %v2432_v22  ;;  %v2483_v3 = vld [vmem:[%s2721_s11 + $0xdc] ss:$36 sps:$4 sm:$0xff]   ;;  %v2485_v4 = vld [vmem:[%s2721_s11 + $0xe4] ss:$36 sps:$4 sm:$0xff]   ;;  %v2491_v9 = vld [vmem:[%s2963_s1 + $0x130] sm:$0xff]  }
  0x1e   : > { %2085 = vmatpush3.bf16.msra.mxu1 %v2433_v23  ;;  %2046 = vmatprep.subr.bf16.mxu0 %v2434_v24  ;;  %v2487_v5 = vld [vmem:[%s2963_s1 + $0x1a8] sm:$0xff]   ;;  %v2489_v7 = vld [vmem:[%s2721_s11 + $0xe0] ss:$36 sps:$4 sm:$0xff]   ;;  %v2492_v10 = vld [vmem:[%s2963_s1 + $0x1f0] sm:$0xff]  }
  0x1f   : > { %2086 = vmatprep.subr.bf16.mxu1 %v2435_v25  ;;  %v2493_v11 = vld [vmem:[%s2963_s1 + $0x1b0] sm:$0xff]   ;;  %v2494_v12 = vld [vmem:[%s2963_s1 + $0x178] sm:$0xff]   ;;  %v2501_v18 = vld [vmem:[%s2963_s1 + $0x200] sm:$0xff]  }
  0x20   : > { %v2495_v13 = vld [vmem:[%s2963_s1 + $0x138] sm:$0xff]   ;;  %v2497_v15 = vld [vmem:[%s2721_s11 + $0x10] ss:$36 sps:$4 sm:$0xff]   ;;  %v2505_v21 = vld [vmem:[%s2963_s1 + $0x208] sm:$0xff]  }
  0x21   : > { %2047 = vmatpush3.bf16.msra.mxu0 %v2436_v26  ;;  %v2496_v14 = vld [vmem:[%s2963_s1 + $0x1f8] sm:$0xff]   ;;  %v2509_v24 = vld [vmem:[%s2963_s1 + $0x210] sm:$0xff]   ;;  %v2510_v25 = vld [vmem:[%s2721_s11 + $0x64] ss:$36 sps:$4 sm:$0xff]  }
  0x22   : > { %2087 = vmatpush3.bf16.msra.mxu1 %v2437_v27  ;;  %2048 = vmatprep.subr.bf16.mxu0 %v2438_v28  ;;  %v2499_v16 = vld [vmem:[%s2721_s11 + $0x14] ss:$36 sps:$4 sm:$0xff]   ;;  %v2504_v20 = vld [vmem:[%s2721_s11 + $0x1c] ss:$36 sps:$4 sm:$0xff]   ;;  %v2514_v27 = vld [vmem:[%s2721_s11 + $0xa4] ss:$36 sps:$4 sm:$0xff]  }
  0x23   : > { %2088 = vmatprep.subr.bf16.mxu1 %v2439_v29  ;;  %v2500_v17 = vld [vmem:[%s2963_s1 + $0x1b8] sm:$0xff]   ;;  %v2512_v28 = vld [vmem:[%s2721_s11 + $0x60] ss:$36 sps:$4 sm:$0xff]   ;;  %v2518_v29 = vld [vmem:[%s2721_s11 + $0xac] ss:$36 sps:$4 sm:$0xff]  }
  0x24   : > { %v2502_v19 = vld [vmem:[%s2721_s11 + $0x18] ss:$36 sps:$4 sm:$0xff]   ;;  %v2521_v33 = vld [vmem:[%s2963_s1 + $0x228] sm:$0xff]  }
  0x25   : > { %2049 = vmatpush3.bf16.msra.mxu0 %v2440_v30  ;;  %v2506_v22 = vld [vmem:[%s2721_s11 + $0x5c] ss:$36 sps:$4 sm:$0xff]   ;;  %v2526_v35 = vld [vmem:[%s2721_s11 + $0xf4] ss:$36 sps:$4 sm:$0xff]  }
  0x26   : > { %2089 = vmatpush3.bf16.msra.mxu1 %v2441_v31  ;;  %2114 = vmatprep.subr.bf16.mxu0 %v2448_v36  ;;  %v2508_v23 = vld [vmem:[%s2721_s11 + $0x58] ss:$36 sps:$4 sm:$0xff]   ;;  %v2517_v30 = vld [vmem:[%s2963_s1 + $0x220] sm:$0xff]   ;;  %v2525_v36 = vld [vmem:[%s2963_s1 + $0x230] sm:$0xff]  }
  0x27   : > { %2154 = vmatprep.subr.bf16.mxu1 %v2450_v38  ;;  %v2513_v26 = vld [vmem:[%s2963_s1 + $0x218] sm:$0xff]   ;;  %v2516_v31 = vld [vmem:[%s2721_s11 + $0xa0] ss:$36 sps:$4 sm:$0xff]  }
  0x28   : > { %1203 = vmatmul.mubr.bf16.vlgmr.msra.gmra.mrb[0].mxu0 %v2442_v32  ;;  %v2522_v32 = vld [vmem:[%s2721_s11 + $0xec] ss:$36 sps:$4 sm:$0xff]   ;;  %v2530_v38 = vld [vmem:[%s2721_s11 + $0x20] ss:$36 sps:$4 sm:$0xff]  }
  0x29   : > { %1268 = vmatmul.mubr.bf16.vlgmr.msra.gmra.mrb[0].mxu1 %v2445_v34  ;;  %2115 = vmatpush3.bf16.msra.mxu0 %v2449_v37  ;;  %v2520_v34 = vld [vmem:[%s2721_s11 + $0xa8] ss:$36 sps:$4 sm:$0xff]  }
  0x2a   : > { %2155 = vmatpush3.bf16.msra.mxu1 %v2451_v39  ;;  %2116 = vmatprep.subr.bf16.mxu0 %v2452_v40  ;;  %v2524_v37 = vld [vmem:[%s2721_s11 + $0xe8] ss:$36 sps:$4 sm:$0xff]   ;;  %v2529_v39 = vld [vmem:[%s2963_s1 + $0x238] sm:$0xff]   ;;  %v2528_v40 = vld [vmem:[%s2721_s11 + $0xf0] ss:$36 sps:$4 sm:$0xff]  }
  0x2b   : > { %2156 = vmatprep.subr.bf16.mxu1 %v2454_v42  ;;  %1210 = vmatprep.mubr.bf16.mxu0 %v2455_v43  ;;  %v2532_v42 = vld [vmem:[%s2721_s11 + $0xb0] ss:$36 sps:$4 sm:$0xff]   ;;  %v2533_v43 = vld [vmem:[%s2721_s11 + $0xf8] ss:$36 sps:$4 sm:$0xff]  }
  0x2c   : > { %1275 = vmatprep.mubr.bf16.mxu1 %v2457_v44  ;;  %v1550_v44 = vld [vmem:[%s2965_s3] sm:$0xff] }
  0x2d   : > { %2117 = vmatpush3.bf16.msra.mxu0 %v2453_v41  ;;  %v2531_v41 = vld [vmem:[%s2721_s11 + $0x68] ss:$36 sps:$4 sm:$0xff]   ;;  %s348_s11 = scalar_lea.vmem %s2969_s7, %s2032_s22 }
  0x2e   : > { %2157 = vmatpush3.bf16.msra.mxu1 %v2459_v45  ;;  %2118 = vmatprep.subr.bf16.mxu0 %v2462_v48  ;;  %v1551_v45 = vld [vmem:[%s2965_s3 + $0x8] sm:$0xff]  ;;  %v1552_v48 = vld [vmem:[%s2965_s3 + $0x10] sm:$0xff] }
  0x2f   : > { %2158 = vmatprep.subr.bf16.mxu1 %v2464_v50 }
  0x30   : > { %1211 = vmatmul.mubr.bf16.gmra.mrb[4].mxu0 %v2460_v46  ;;  %v2335_v46 = vpack.c.bf16 %v1551_v45, %v1550_v44 }
  0x31   : > { %1276 = vmatmul.mubr.bf16.gmra.mrb[4].mxu1 %v2461_v47  ;;  %2119 = vmatpush3.bf16.msra.mxu0 %v2463_v49  ;;  %v2560_v47 = vmov 0.0|0.0   ;;  %v1553_v49 = vld [vmem:[%s2965_s3 + $0x18] sm:$0xff] }
  0x32   : > { %2159 = vmatpush3.bf16.msra.mxu1 %v2465_v51  ;;  %2120 = vmatprep.subr.bf16.mxu0 %v2466_v52  ;;  %v2338_v50 = vpack.c.bf16 %v1553_v49, %v1552_v48  ;;  %v1554_v51 = vld [vmem:[%s2965_s3 + $0x20] sm:$0xff]  ;;  %v1555_v52 = vld [vmem:[%s2965_s3 + $0x28] sm:$0xff] }
  0x33   : > { %2160 = vmatprep.subr.bf16.mxu1 %v2468_v54  ;;  %1218 = vmatprep.mubr.bf16.mxu0 %v2469_v55  ;;  %v1556_v54 = vld [vmem:[%s2965_s3 + $0x30] sm:$0xff]  ;;  %v1557_v55 = vld [vmem:[%s2965_s3 + $0x38] sm:$0xff] }
  0x34   : > { %1283 = vmatprep.mubr.bf16.mxu1 %v2471_v56  ;;  %v2344_v56 = vpack.c.bf16 %v1557_v55, %v1556_v54 }
  0x35   : > { %2121 = vmatpush3.bf16.msra.mxu0 %v2467_v53  ;;  %v2341_v53 = vpack.c.bf16 %v1555_v52, %v1554_v51 }
  0x36   : > { %2161 = vmatpush3.bf16.msra.mxu1 %v2473_v57  ;;  %2122 = vmatprep.subr.bf16.mxu0 %v2476_v60  ;;  %v1558_v57 = vld [vmem:[%s2965_s3 + $0x40] sm:$0xff]  ;;  %v1560_v60 = vld [vmem:[%s2965_s3 + $0x50] sm:$0xff] }
  0x37   : > { %2162 = vmatprep.subr.bf16.mxu1 %v2478_v62 }
  0x38   : > { %1219 = vmatmul.mubr.bf16.gmra.mrb[8].mxu0 %v2474_v58  ;;  %v1559_v58 = vld [vmem:[%s2965_s3 + $0x48] sm:$0xff] }
  0x39   : > { %1284 = vmatmul.mubr.bf16.gmra.mrb[8].mxu1 %v2475_v59  ;;  %2123 = vmatpush3.bf16.msra.mxu0 %v2477_v61  ;;  %v2347_v59 = vpack.c.bf16 %v1559_v58, %v1558_v57  ;;  %v1561_v61 = vld [vmem:[%s2965_s3 + $0x58] sm:$0xff] }
  0x3a   : > { %2163 = vmatpush3.bf16.msra.mxu1 %v2479_v63  ;;  %2124 = vmatprep.subr.bf16.mxu0 %v2480_v0  ;;  %v2350_v62 = vpack.c.bf16 %v1561_v61, %v1560_v60  ;;  %v1562_v63 = vld [vmem:[%s2965_s3 + $0x60] sm:$0xff]  ;;  %v1563_v0 = vld [vmem:[%s2965_s3 + $0x68] sm:$0xff] }
  0x3b   : > { %2164 = vmatprep.subr.bf16.mxu1 %v2482_v2  ;;  %1226 = vmatprep.mubr.bf16.mxu0 %v2483_v3  ;;  %v1564_v2 = vld [vmem:[%s2965_s3 + $0x70] sm:$0xff]  ;;  %v1565_v3 = vld [vmem:[%s2965_s3 + $0x78] sm:$0xff] }
  0x3c   : > { %1291 = vmatprep.mubr.bf16.mxu1 %v2485_v4  ;;  %v2356_v4 = vpack.c.bf16 %v1565_v3, %v1564_v2 }
  0x3d   : > { %2125 = vmatpush3.bf16.msra.mxu0 %v2481_v1  ;;  %v2353_v1 = vpack.c.bf16 %v1563_v0, %v1562_v63 }
  0x3e   : > { %2165 = vmatpush3.bf16.msra.mxu1 %v2487_v5  ;;  %2126 = vmatprep.subr.bf16.mxu0 %v2490_v8  ;;  %v2562_v5 = vmov 0.0  }
  0x3f   : > { %2166 = vmatprep.subr.bf16.mxu1 %v2492_v10 }
  0x40   : > { %1227 = vmatmul.mubr.bf16.gmra.mrb[12].mxu0 %v2488_v6 }
  0x41   : > { %1292 = vmatmul.mubr.bf16.gmra.mrb[12].mxu1 %v2489_v7  ;;  %2127 = vmatpush3.bf16.msra.mxu0 %v2491_v9 }
  0x42   : > { %2167 = vmatpush3.bf16.msra.mxu1 %v2493_v11  ;;  %2128 = vmatprep.subr.bf16.mxu0 %v2494_v12 }
  0x43   : > { %2168 = vmatprep.subr.bf16.mxu1 %v2496_v14  ;;  %1332 = vmatprep.mubr.bf16.mxu0 %v2499_v16 }
  0x44   : > { %1397 = vmatprep.mubr.bf16.mxu1 %v2504_v20 }
  0x45   : > { %2129 = vmatpush3.bf16.msra.mxu0 %v2495_v13 }
  0x46   : > { %2169 = vmatpush3.bf16.msra.mxu1 %v2500_v17  ;;  %2240 = vmatprep.subr.bf16.mxu0 %v2501_v18 }
  0x47   : > { %2334 = vmatprep.subr.bf16.mxu1 %v2560_v47 }
  0x48   : > { %1333 = vmatmul.mubr.bf16.vlgmr.msra.gmra.mrb[16].mxu0 %v2497_v15 }
  0x49   : > { %2241 = vmatpush3.bf16.msra.mxu0 %v2501_v18  ;;  %1398 = vmatmul.mubr.bf16.vlgmr.msra.gmra.mrb[16].mxu1 %v2502_v19 }
  0x4a   : > { %2242 = vmatprep.subr.bf16.mxu0 %v2505_v21  ;;  %1340 = vmatprep.mubr.bf16.mxu0 %v2506_v22 }
  0x4b   : > { %1405 = vmatprep.mubr.bf16.mxu1 %v2510_v25  ;;  %2336 = vmatpush3.bf16.msra.mxu1 %v2335_v46 }
  0x4c   : > { %2337 = vmatprep.subr.bf16.mxu1 %v2560_v47 }
  0x4d   : > { %2243 = vmatpush3.bf16.msra.mxu0 %v2505_v21 }
  0x4e   : > { %2244 = vmatprep.subr.bf16.mxu0 %v2509_v24 }
  0x4f   : > { %2339 = vmatpush3.bf16.msra.mxu1 %v2338_v50 }
  0x50   : > { %1341 = vmatmul.mubr.bf16.gmra.mrb[20].mxu0 %v2508_v23  ;;  %2340 = vmatprep.subr.bf16.mxu1 %v2560_v47 }
  0x51   : > { %1348 = vmatprep.mubr.bf16.mxu0 %v2514_v27  ;;  %2245 = vmatpush3.bf16.msra.mxu0 %v2509_v24 }
  0x52   : > { %2246 = vmatprep.subr.bf16.mxu0 %v2513_v26  ;;  %1406 = vmatmul.mubr.bf16.gmra.mrb[20].mxu1 %v2512_v28 }
  0x53   : > { %1413 = vmatprep.mubr.bf16.mxu1 %v2518_v29  ;;  %2342 = vmatpush3.bf16.msra.mxu1 %v2341_v53 }
  0x54   : > { %2343 = vmatprep.subr.bf16.mxu1 %v2560_v47 }
  0x55   : > { %2247 = vmatpush3.bf16.msra.mxu0 %v2513_v26 }
  0x56   : > { %2248 = vmatprep.subr.bf16.mxu0 %v2517_v30 }
  0x57   : > { %2345 = vmatpush3.bf16.msra.mxu1 %v2344_v56 }
  0x58   : > { %1349 = vmatmul.mubr.bf16.gmra.mrb[24].mxu0 %v2516_v31  ;;  %2346 = vmatprep.subr.bf16.mxu1 %v2560_v47 }
  0x59   : > { %1356 = vmatprep.mubr.bf16.mxu0 %v2522_v32  ;;  %2249 = vmatpush3.bf16.msra.mxu0 %v2517_v30 }
  0x5a   : > { %2250 = vmatprep.subr.bf16.mxu0 %v2521_v33  ;;  %1414 = vmatmul.mubr.bf16.gmra.mrb[24].mxu1 %v2520_v34 }
  0x5b   : > { %1421 = vmatprep.mubr.bf16.mxu1 %v2526_v35  ;;  %2348 = vmatpush3.bf16.msra.mxu1 %v2347_v59 }
  0x5c   : > { %2349 = vmatprep.subr.bf16.mxu1 %v2560_v47 }
  0x5d   : > { %2251 = vmatpush3.bf16.msra.mxu0 %v2521_v33 }
  0x5e   : > { %2252 = vmatprep.subr.bf16.mxu0 %v2525_v36 }
  0x5f   : > { %2351 = vmatpush3.bf16.msra.mxu1 %v2350_v62 }
  0x60   : > { %1357 = vmatmul.mubr.bf16.gmra.mrb[28].mxu0 %v2524_v37  ;;  %2352 = vmatprep.subr.bf16.mxu1 %v2560_v47 }
  0x61   : > { %2256 = vmatprep.mubr.bf16.mxu0 %v2530_v38  ;;  %2253 = vmatpush3.bf16.msra.mxu0 %v2525_v36 }
  0x62   : > { %2254 = vmatprep.subr.bf16.mxu0 %v2529_v39  ;;  %1422 = vmatmul.mubr.bf16.gmra.mrb[28].mxu1 %v2528_v40 }
  0x63   : > { %2354 = vmatpush3.bf16.msra.mxu1 %v2353_v1  ;;  %2296 = vmatprep.mubr.msk.f32.mxu1 %vm2561_vm0, %v2562_v5 }
  0x64   : > { %2355 = vmatprep.subr.bf16.mxu1 %v2560_v47 }
  0x65   : > { %2255 = vmatpush3.bf16.msra.mxu0 %v2529_v39 }
  0x66   : > { %2358 = vmatprep.subr.bf16.mxu0 %v2560_v47 }
  0x67   : > { %2357 = vmatpush3.bf16.msra.mxu1 %v2356_v4 }
  0x68   : > { %2257 = vmatmul.mubr.bf16.vlgmr.msra.gmra.mrb[32].mxu0 %v2531_v41 }
  0x69   : > { %2260 = vmatprep.mubr.bf16.mxu0 %v2532_v42  ;;  %2360 = vmatpush3.bf16.msra.mxu0 %v2335_v46 }
  0x6a   : > { %2361 = vmatprep.subr.bf16.mxu0 %v2560_v47 }
  0x6d   : > { %2363 = vmatpush3.bf16.msra.mxu0 %v2338_v50 }
  0x6e   : > { %2364 = vmatprep.subr.bf16.mxu0 %v2560_v47 }
  0x70   : > { %2261 = vmatmul.mubr.bf16.gmra.mrb[36].mxu0 %v2533_v43 }
  0x71   : > { %2366 = vmatpush3.bf16.msra.mxu0 %v2341_v53  ;;  %2331 = vmatprep.mubr.msk.f32.mxu0 %vm2561_vm0, %v2562_v5 }
  0x72   : > { %2367 = vmatprep.subr.bf16.mxu0 %v2560_v47 }
  0x75   : > { %2369 = vmatpush3.bf16.msra.mxu0 %v2344_v56 }
  0x76   : > { %2370 = vmatprep.subr.bf16.mxu0 %v2560_v47 }
  0x79   : > { %2372 = vmatpush3.bf16.msra.mxu0 %v2347_v59 }
  0x7a   : > { %2373 = vmatprep.subr.bf16.mxu0 %v2560_v47 }
  0x7d   : > { %2375 = vmatpush3.bf16.msra.mxu0 %v2350_v62 }
  0x7e   : > { %2376 = vmatprep.subr.bf16.mxu0 %v2560_v47 }
  0x81   : > { %2378 = vmatpush3.bf16.msra.mxu0 %v2353_v1 }
  0x82   : > { %2379 = vmatprep.subr.bf16.mxu0 %v2560_v47 }
  0x85   : > { %2381 = vmatpush3.bf16.msra.mxu0 %v2356_v4 }
  0xfb   : > { %v2050_v6 = vpop.f32.mrb[0].mxu0 }
  0xfc   : > { %v2090_v7 = vpop.f32.mrb[0].mxu1  ;;  %v2051_v8 = vpop.f32.mrb[1].mxu0 }
  0xfd   : > { %v2052_v9 = vadd.f32 %v2051_v8, %v2050_v6  ;;  %v2091_v10 = vpop.f32.mrb[1].mxu1  ;;  %v2053_v11 = vpop.f32.mrb[2].mxu0 }
  0xfe   : > { %v2092_v12 = vadd.f32 %v2091_v10, %v2090_v7  ;;  %v2093_v13 = vpop.f32.mrb[2].mxu1  ;;  %v2054_v14 = vpop.f32.mrb[3].mxu0 }
  0xff   : > { %v2055_v15 = vadd.f32 %v2054_v14, %v2053_v11  ;;  %v2094_v16 = vpop.f32.mrb[3].mxu1 }
 0x100   : > { %v1270_v17 = vadd.f32 %v2092_v12, %v2052_v9  ;;  %v2095_v18 = vadd.f32 %v2094_v16, %v2093_v13 }
 0x102   : > { %v1273_v19 = vadd.f32 %v2095_v18, %v2055_v15 }
 0x103   : > { %v2056_v20 = vpop.f32.mrb[4].mxu0 }
 0x104   : > { %v2096_v21 = vpop.f32.mrb[4].mxu1  ;;  %v2057_v22 = vpop.f32.mrb[5].mxu0 }
 0x105   : > { %v2058_v23 = vadd.f32 %v2057_v22, %v2056_v20  ;;  %v2097_v24 = vpop.f32.mrb[5].mxu1  ;;  %v2059_v25 = vpop.f32.mrb[6].mxu0 }
 0x106   : > { %v2098_v26 = vadd.f32 %v2097_v24, %v2096_v21  ;;  %v2099_v27 = vpop.f32.mrb[6].mxu1  ;;  %v2060_v28 = vpop.f32.mrb[7].mxu0 }
 0x107   : > { %v2061_v29 = vadd.f32 %v2060_v28, %v2059_v25  ;;  %v2100_v30 = vpop.f32.mrb[7].mxu1 }
 0x108   : > { %v1278_v31 = vadd.f32 %v2098_v26, %v2058_v23  ;;  %v2101_v32 = vadd.f32 %v2100_v30, %v2099_v27 }
 0x10a   : > { %v1281_v33 = vadd.f32 %v2101_v32, %v2061_v29 }
 0x10b   : > { %v2062_v34 = vpop.f32.mrb[8].mxu0 }
 0x10c   : > { %v2102_v35 = vpop.f32.mrb[8].mxu1  ;;  %v2063_v36 = vpop.f32.mrb[9].mxu0 }
 0x10d   : > { %v2064_v37 = vadd.f32 %v2063_v36, %v2062_v34  ;;  %v2103_v38 = vpop.f32.mrb[9].mxu1  ;;  %v2065_v39 = vpop.f32.mrb[10].mxu0 }
 0x10e   : > { %v2104_v40 = vadd.f32 %v2103_v38, %v2102_v35  ;;  %v2105_v41 = vpop.f32.mrb[10].mxu1  ;;  %v2066_v42 = vpop.f32.mrb[11].mxu0 }
 0x10f   : > { %v2067_v43 = vadd.f32 %v2066_v42, %v2065_v39  ;;  %v2106_v44 = vpop.f32.mrb[11].mxu1 }
 0x110   : > { %v1286_v45 = vadd.f32 %v2104_v40, %v2064_v37  ;;  %v2107_v46 = vadd.f32 %v2106_v44, %v2105_v41 }
 0x112   : > { %v1289_v47 = vadd.f32 %v2107_v46, %v2067_v43 }
 0x113   : > { %v2068_v48 = vpop.f32.mrb[12].mxu0 }
 0x114   : > { %v2108_v49 = vpop.f32.mrb[12].mxu1  ;;  %v2069_v50 = vpop.f32.mrb[13].mxu0 }
 0x115   : > { %v2109_v51 = vpop.f32.mrb[13].mxu1  ;;  %v2070_v52 = vadd.f32 %v2069_v50, %v2068_v48  ;;  %v2071_v54 = vpop.f32.mrb[14].mxu0 }
 0x116   : > { %v2110_v53 = vadd.f32 %v2109_v51, %v2108_v49  ;;  %v2111_v55 = vpop.f32.mrb[14].mxu1  ;;  %v2072_v56 = vpop.f32.mrb[15].mxu0 }
 0x117   : > { %v2112_v57 = vpop.f32.mrb[15].mxu1  ;;  %v2073_v59 = vadd.f32 %v2072_v56, %v2071_v54 }
 0x118   : > { %v1294_v58 = vadd.f32 %v2110_v53, %v2070_v52  ;;  %v2113_v60 = vadd.f32 %v2112_v57, %v2111_v55 }
 0x11a   : > { %v1297_v61 = vadd.f32 %v2113_v60, %v2073_v59 }
 0x11b   : > { %v2130_v62 = vpop.f32.mrb[16].mxu0 }
 0x11c   : > { %v2131_v63 = vpop.f32.mrb[17].mxu0  ;;  %v2170_v4 = vpop.f32.mrb[16].mxu1 }
 0x11d   : > { %v2132_v0 = vadd.f32 %v2131_v63, %v2130_v62  ;;  %v2133_v1 = vpop.f32.mrb[18].mxu0  ;;  %v2171_v6 = vpop.f32.mrb[17].mxu1 }
 0x11e   : > { %v2134_v2 = vpop.f32.mrb[19].mxu0  ;;  %v2172_v8 = vadd.f32 %v2171_v6, %v2170_v4  ;;  %v2173_v9 = vpop.f32.mrb[18].mxu1 }
 0x11f   : > { %v1335_v3 = vadd.f32 %v2132_v0, %v1270_v17  ;;  %v2135_v5 = vadd.f32 %v2134_v2, %v2133_v1  ;;  %v2174_v10 = vpop.f32.mrb[19].mxu1 }
 0x120   : > { %v2175_v11 = vadd.f32 %v2174_v10, %v2173_v9 }
 0x121   : > { %v1338_v7 = vadd.f32 %v2135_v5, %v1273_v19  ;;  %v1400_v13 = vadd.f32 %v2172_v8, %v1335_v3  ;;  %v2028_v5 = vld [vmem:[%s2964_s2] ss:$0 sm:$0xff] }
 0x123   : > { %v2136_v12 = vpop.f32.mrb[20].mxu0  ;;  %v1403_v18 = vadd.f32 %v2175_v11, %v1338_v7 }
 0x124   : > { %v2137_v14 = vpop.f32.mrb[21].mxu0 }
 0x125   : > { %v2138_v15 = vadd.f32 %v2137_v14, %v2136_v12  ;;  %v2139_v16 = vpop.f32.mrb[22].mxu0  ;;  %v2176_v22 = vpop.f32.mrb[20].mxu1 }
 0x126   : > { %v2140_v20 = vpop.f32.mrb[23].mxu0  ;;  %v2177_v24 = vpop.f32.mrb[21].mxu1 }
 0x127   : > { %v1343_v21 = vadd.f32 %v2138_v15, %v1278_v31  ;;  %v2141_v23 = vadd.f32 %v2140_v20, %v2139_v16  ;;  %v2178_v25 = vadd.f32 %v2177_v24, %v2176_v22  ;;  %v2179_v26 = vpop.f32.mrb[22].mxu1 }
 0x128   : > { %v2180_v27 = vpop.f32.mrb[23].mxu1 }
 0x129   : > { %v1346_v17 = vadd.f32 %v2141_v23, %v1281_v33  ;;  %v2181_v19 = vadd.f32 %v2180_v27, %v2179_v26  ;;  %v1408_v29 = vadd.f32 %v2178_v25, %v1343_v21 }
 0x12b   : > { %v2142_v28 = vpop.f32.mrb[24].mxu0  ;;  %v1411_v35 = vadd.f32 %v2181_v19, %v1346_v17 }
 0x12c   : > { %v2143_v30 = vpop.f32.mrb[25].mxu0 }
 0x12d   : > { %v2144_v32 = vadd.f32 %v2143_v30, %v2142_v28  ;;  %v2145_v34 = vpop.f32.mrb[26].mxu0  ;;  %v2182_v38 = vpop.f32.mrb[24].mxu1 }
 0x12e   : > { %v2146_v36 = vpop.f32.mrb[27].mxu0  ;;  %v2183_v40 = vpop.f32.mrb[25].mxu1 }
 0x12f   : > { %v1351_v37 = vadd.f32 %v2144_v32, %v1286_v45  ;;  %v2147_v39 = vadd.f32 %v2146_v36, %v2145_v34  ;;  %v2184_v41 = vadd.f32 %v2183_v40, %v2182_v38  ;;  %v2185_v42 = vpop.f32.mrb[26].mxu1  ;;  %v1637_v38 = vlaneseq }
 0x130   : > { %v2186_v43 = vpop.f32.mrb[27].mxu1 }
 0x131   : > { %v1354_v31 = vadd.f32 %v2147_v39, %v1289_v47  ;;  %v2187_v33 = vadd.f32 %v2186_v43, %v2185_v42  ;;  %v1416_v46 = vadd.f32 %v2184_v41, %v1351_v37  ;;  %v1638_v39 = vshrl.u32 %v1637_v38, 7  ;;  %v1783_v38 = vld [vmem:[%s343_s29 + $0x18] sm:$0xff] }
 0x133   : > { %v2148_v44 = vpop.f32.mrb[28].mxu0  ;;  %v1419_v51 = vadd.f32 %v2187_v33, %v1354_v31  ;;  %v1639_v40 = vsub.s32 0, %v1638_v39  ;;  %v1784_v39 = vld [vmem:[%s343_s29 + $0x20] sm:$0xff] }
 0x134   : > { %v2149_v48 = vpop.f32.mrb[29].mxu0 }
 0x135   : > { %v2150_v49 = vadd.f32 %v2149_v48, %v2148_v44  ;;  %v2151_v50 = vpop.f32.mrb[30].mxu0  ;;  %v2188_v54 = vpop.f32.mrb[28].mxu1 }
 0x136   : > { %v2152_v52 = vpop.f32.mrb[31].mxu0  ;;  %v2189_v56 = vpop.f32.mrb[29].mxu1 }
 0x137   : > { %v1359_v53 = vadd.f32 %v2150_v49, %v1294_v58  ;;  %v2153_v55 = vadd.f32 %v2152_v52, %v2151_v50  ;;  %v2190_v57 = vadd.f32 %v2189_v56, %v2188_v54  ;;  %v2191_v59 = vpop.f32.mrb[30].mxu1 }
 0x138   : > { %v2192_v60 = vpop.f32.mrb[31].mxu1 }
 0x139   : > { %v1362_v45 = vadd.f32 %v2153_v55, %v1297_v61  ;;  %v2193_v47 = vadd.f32 %v2192_v60, %v2191_v59  ;;  %v1424_v62 = vadd.f32 %v2190_v57, %v1359_v53 }
 0x13b   : > { %v2258_v63 = vpop.f32.mrb[32].mxu0  ;;  %v1427_v2 = vadd.f32 %v2193_v47, %v1362_v45 }
 0x13c   : > { %v1473_v0 = vadd.f32 %v2258_v63, %v1408_v29  ;;  %v1464_v1 = vpop.f32.mrb[33].mxu0 }
 0x13d   : > { %v1465_v3 = vadd.f32 %v1464_v1, %v1400_v13  ;;  %v2259_v4 = vpop.f32.mrb[34].mxu0 }
 0x13e   : > { %v1476_v58 = vadd.f32 %v2259_v4, %v1411_v35  ;;  %v1467_v6 = vpop.f32.mrb[35].mxu0  ;;  %v1531_v9 = vadd.f32 %v2028_v5, %v1473_v0 }
 0x13f   : > { %v1468_v7 = vadd.f32 %v1467_v6, %v1403_v18  ;;  %v1529_v8 = vadd.f32 %v2028_v5, %v1465_v3 }
 0x140   : > { %v1532_v15 = vadd.f32 %v2028_v5, %v1476_v58 }
 0x141   : > { %v1530_v61 = vadd.f32 %v2028_v5, %v1468_v7 }
 0x143   : > { %v1537_v10 = vadd.f32 %v1530_v61, %v1529_v8  ;;  %v2262_v11 = vpop.f32.mrb[36].mxu0 }
 0x144   : > { %v1489_v12 = vadd.f32 %v2262_v11, %v1424_v62  ;;  %v1480_v14 = vpop.f32.mrb[37].mxu0 }
 0x145   : > { %v1538_v16 = vadd.f32 %v1537_v10, %v1531_v9  ;;  %v1481_v20 = vadd.f32 %v1480_v14, %v1416_v46  ;;  %v2263_v21 = vpop.f32.mrb[38].mxu0 }
 0x146   : > { %v1492_v13 = vadd.f32 %v2263_v21, %v1427_v2  ;;  %v1483_v22 = vpop.f32.mrb[39].mxu0  ;;  %v1535_v27 = vadd.f32 %v2028_v5, %v1489_v12  ;;  %v1743_v12 = vld [vmem:[%s2966_s4] sm:$0x1] }
 0x147   : > { %v1533_v23 = vadd.f32 %v2028_v5, %v1481_v20  ;;  %v1539_v24 = vadd.f32 %v1538_v16, %v1532_v15  ;;  %v1484_v17 = vadd.f32 %v1483_v22, %v1419_v51  ;;  %v2029_v20 = vld [vmem:[%s2967_s5] ss:$0 sm:$0xff] }
 0x148   : > { %v1536_v19 = vadd.f32 %v2028_v5, %v1492_v13 }
 0x149   : > { %v1540_v25 = vadd.f32 %v1539_v24, %v1533_v23  ;;  %v1534_v26 = vadd.f32 %v2028_v5, %v1484_v17 }
 0x14b   : > { %v1541_v18 = vadd.f32 %v1540_v25, %v1534_v26 }
 0x14d   : > { %v1542_v28 = vadd.f32 %v1541_v18, %v1535_v27 }
 0x14f   : > { %v1543_v29 = vadd.f32 %v1542_v28, %v1536_v19 }
 0x151   : > { %v1544_v30 = vrot.slane %v1543_v29, 4 }
 0x153   : > { %v1545_v32 = vadd.f32 %v1544_v30, %v1543_v29  ;;  %v1780_v29 = vld [vmem:[%s343_s29] sm:$0xff]  ;;  %v1781_v30 = vld [vmem:[%s343_s29 + $0x8] sm:$0xff] }
 0x155   : > { %v1546_v34 = vrot.slane %v1545_v32, 2 }
 0x157   : > { %v1547_v35 = vadd.f32 %v1546_v34, %v1545_v32  ;;  %v1782_v32 = vld [vmem:[%s343_s29 + $0x10] sm:$0xff] }
 0x159   : > { %v1548_v36 = vrot.slane %v1547_v35, 1 }
 0x15b   : > { %v1549_v37 = vadd.f32 %v1548_v36, %v1547_v35 }
 0x15d   : > { %2297 = vmatmul.mubr.f32.vlgmr.msra.gmra.mrb[32].mxu1 %v1549_v37 }
 0x230   : > { %v1632_v31 = vpop.f32.mrb[32].mxu1 }
 0x231   : > { %v1636_v41 = vmul.f32 0.001953125, %v1632_v31  ;;  %v2298_v42 = vpop.f32.mrb[33].mxu1 }
 0x233   : > { %v1640_v43 = vrot.slane %v1636_v41, %v1639_v40 }
 0x235   : > { %v1641_v33 = vsub.f32 %v1529_v8, %v1640_v43  ;;  %v1642_v44 = vsub.f32 %v1530_v61, %v1640_v43  ;;  %v1643_v46 = vsub.f32 %v1531_v9, %v1640_v43  ;;  %v1644_v48 = vsub.f32 %v1532_v15, %v1640_v43 }
 0x236   : > { %v1645_v51 = vsub.f32 %v1533_v23, %v1640_v43  ;;  %v1646_v54 = vsub.f32 %v1534_v26, %v1640_v43  ;;  %v1647_v45 = vsub.f32 %v1535_v27, %v1640_v43  ;;  %v1648_v60 = vsub.f32 %v1536_v19, %v1640_v43 }
 0x237   : > { %v1649_v49 = vmul.f32 %v1641_v33, %v1641_v33  ;;  %v1650_v50 = vmul.f32 %v1642_v44, %v1642_v44  ;;  %v1651_v52 = vmul.f32 %v1643_v46, %v1643_v46  ;;  %v1652_v55 = vmul.f32 %v1644_v48, %v1644_v48 }
 0x238   : > { %v1653_v57 = vmul.f32 %v1645_v51, %v1645_v51  ;;  %v1654_v47 = vmul.f32 %v1646_v54, %v1646_v54  ;;  %v1655_v63 = vmul.f32 %v1647_v45, %v1647_v45  ;;  %v1656_v1 = vmul.f32 %v1648_v60, %v1648_v60 }
 0x239   : > { %v1657_v53 = vadd.f32 %v1650_v50, %v1649_v49 }
 0x23b   : > { %v1658_v56 = vadd.f32 %v1657_v53, %v1651_v52 }
 0x23d   : > { %v1659_v59 = vadd.f32 %v1658_v56, %v1652_v55 }
 0x23f   : > { %v1660_v62 = vadd.f32 %v1659_v59, %v1653_v57 }
 0x241   : > { %v1661_v0 = vadd.f32 %v1660_v62, %v1654_v47 }
 0x243   : > { %v1662_v2 = vadd.f32 %v1661_v0, %v1655_v63 }
 0x245   : > { %v1663_v3 = vadd.f32 %v1662_v2, %v1656_v1 }
 0x247   : > { %v1664_v4 = vrot.slane %v1663_v3, 4 }
 0x249   : > { %v1665_v5 = vadd.f32 %v1664_v4, %v1663_v3 }
 0x24b   : > { %v1666_v58 = vrot.slane %v1665_v5, 2 }
 0x24d   : > { %v1667_v6 = vadd.f32 %v1666_v58, %v1665_v5 }
 0x24f   : > { %v1668_v7 = vrot.slane %v1667_v6, 1 }
 0x251   : > { %v1669_v8 = vadd.f32 %v1668_v7, %v1667_v6 }
 0x253   : > { %2332 = vmatmul.mubr.f32.vlgmr.msra.gmra.mrb[40].mxu0 %v1669_v8 }
 0x326   : > { %v1736_v61 = vpop.f32.mrb[40].mxu0 }
 0x327   : > { %v1740_v9 = vmul.f32 0.001953125, %v1736_v61  ;;  %v2333_v10 = vpop.f32.mrb[41].mxu0 }
 0x329   : > { %v1741_v11 = vadd.f32 1e-05, %v1740_v9 }
 0x32b   : > { %2534 = vrsqrt.f32 %v1741_v11 }
 0x335   : > { %v2535_v14 = vpop.eup %2534 }
 0x336   : > { %v1744_v15 = vmul.f32 %v2535_v14, %v1743_v12 }
 0x338   : > { %v1748_v16 = vrot.slane %v1744_v15, %v1639_v40  ;;  %v1785_v40 = vld [vmem:[%s343_s29 + $0x28] sm:$0xff] }
 0x33a   : > { %v1749_v21 = vmul.f32 %v1748_v16, %v1641_v33  ;;  %v1750_v13 = vmul.f32 %v1748_v16, %v1642_v44  ;;  %v1751_v22 = vmul.f32 %v1748_v16, %v1643_v46  ;;  %v1752_v23 = vmul.f32 %v1748_v16, %v1644_v48  ;;  %v1786_v33 = vld [vmem:[%s343_s29 + $0x30] sm:$0xff]  ;;  %v1787_v44 = vld [vmem:[%s343_s29 + $0x38] sm:$0xff] }
 0x33b   : > { %v1753_v24 = vmul.f32 %v1748_v16, %v1645_v51  ;;  %v1754_v17 = vmul.f32 %v1748_v16, %v1646_v54  ;;  %v1755_v25 = vmul.f32 %v1748_v16, %v1647_v45  ;;  %v1756_v26 = vmul.f32 %v1748_v16, %v1648_v60 }
 0x33c   : > { %v1764_v27 = vadd.f32 %v2029_v20, %v1749_v21  ;;  %v1765_v18 = vadd.f32 %v2029_v20, %v1750_v13  ;;  %v1766_v19 = vadd.f32 %v2029_v20, %v1751_v22  ;;  %v1767_v28 = vadd.f32 %v2029_v20, %v1752_v23 }
 0x33d   : > { %v1768_v34 = vadd.f32 %v2029_v20, %v1753_v24  ;;  %v1769_v35 = vadd.f32 %v2029_v20, %v1754_v17  ;;  %v1770_v36 = vadd.f32 %v2029_v20, %v1755_v25  ;;  %v1771_v37 = vadd.f32 %v2029_v20, %v1756_v26 }
 0x33e   : > { %v1772_v31 = vmax.f32 %v1764_v27, 0.0  ;;  %v1773_v41 = vmax.f32 %v1765_v18, 0.0  ;;  %v1774_v42 = vmax.f32 %v1766_v19, 0.0  ;;  %v1775_v43 = vmax.f32 %v1767_v28, 0.0 }
 0x33f   : > { %v1776_v46 = vmax.f32 %v1768_v34, 0.0  ;;  %v1777_v48 = vmax.f32 %v1769_v35, 0.0  ;;  %v1778_v49 = vmax.f32 %v1770_v36, 0.0  ;;  %v1779_v50 = vmax.f32 %v1771_v37, 0.0 }
 0x340   : > { %v1788_v51 = vadd.f32 %v1780_v29, %v1772_v31  ;;  %v1789_v52 = vadd.f32 %v1781_v30, %v1773_v41  ;;  %v1790_v53 = vadd.f32 %v1782_v32, %v1774_v42  ;;  %v1791_v54 = vadd.f32 %v1783_v38, %v1775_v43 }
 0x341   : > { %v1792_v55 = vadd.f32 %v1784_v39, %v1776_v46  ;;  %v1793_v56 = vadd.f32 %v1785_v40, %v1777_v48  ;;  %v1794_v45 = vadd.f32 %v1786_v33, %v1778_v49  ;;  %v1795_v57 = vadd.f32 %v1787_v44, %v1779_v50 }
 0x342   : > { %v1796_v59 = vmax.f32 %v1788_v51, 0.0  ;;  %v1797_v60 = vmax.f32 %v1789_v52, 0.0  ;;  %v1798_v47 = vmax.f32 %v1790_v53, 0.0  ;;  %v1799_v62 = vmax.f32 %v1791_v54, 0.0 }
 0x343   : > { %v1800_v63 = vmax.f32 %v1792_v55, 0.0  ;;  %v1801_v0 = vmax.f32 %v1793_v56, 0.0  ;;  %v1802_v1 = vmax.f32 %v1794_v45, 0.0  ;;  %v1803_v2 = vmax.f32 %v1795_v57, 0.0 }
 0x344   : > { %1804 = vst [vmem:[%s348_s11] sm:$0xff] %v1796_v59  ;;  %1805 = vst [vmem:[%s348_s11 + $0x8] sm:$0xff] %v1797_v60 }
 0x345   : > { %1806 = vst [vmem:[%s348_s11 + $0x10] sm:$0xff] %v1798_v47  ;;  %1807 = vst [vmem:[%s348_s11 + $0x18] sm:$0xff] %v1799_v62 }
 0x346   : > { %1808 = vst [vmem:[%s348_s11 + $0x20] sm:$0xff] %v1800_v63  ;;  %1809 = vst [vmem:[%s348_s11 + $0x28] sm:$0xff] %v1801_v0 }
 0x347   : > { %1810 = vst [vmem:[%s348_s11 + $0x30] sm:$0xff] %v1802_v1  ;;  %1811 = vst [vmem:[%s348_s11 + $0x38] sm:$0xff] %v1803_v2 }
 0x348 PF: > { %s17_s26 = sadd.s32 1, %s2558_s26   ;;  %s2970_s24 = smov %s2554_s25 }
 0x349   : > { %p14_p5 = scmp.ge.s32.totalorder %s17_s26, 4   ;;  %s2971_s25 = smov %s2973_s27 }
 0x34b   :  { %16 = sbr.rel (!%p14_p5) target bundleno = 2 (0x2), region = 92 }

// kernel: unet_extractor_forward.22
= control target key start
LH: loop header
LB: loop body
LE: loop exit
PB: predicated region body
PF: predicated region fallthrough
CT: control target
= control target key end

     0   :  { %s1995_s21 = smov 0   ;;  %s1997_s22 = smov 0   ;;  %s2323_s0 = inlined_call_operand.vmem [shape: bf16[2,16,1152], index: 0, kind: input, shape index: {}]   ;;  %s2324_s1 = inlined_call_operand.vmem [shape: bf16[1152,128], index: 1, kind: input, shape index: {}]   ;;  %s2325_s2 = inlined_call_operand.vmem [shape: f32[1,128], index: 2, kind: input, shape index: {}, may-alias: {2,5}]   ;;  %s2326_s3 = inlined_call_operand.vmem [shape: f32[128,128], index: 3, kind: input, shape index: {}]   ;;  %s2327_s4 = inlined_call_operand.vmem [shape: f32[1,128], index: 4, kind: input, shape index: {}]   ;;  %s2328_s5 = inlined_call_operand.vmem [shape: f32[1,128], index: 5, kind: input, shape index: {}, may-alias: {2,5}]   ;;  %s2329_s6 = inlined_call_operand.vmem [shape: f32[2,16,128], index: 6, kind: output, shape index: {}]  }
   0x1   :  { %s1999_s23 = smov 0  }
   0x2 LB: > { %s28_s24 = sadd.s32 1, %s1951_s22  ;;  %p1459_p0 = scmp.ge.s32.totalorder %s1955_s23, 1  ;;  %s1955_s23 = sphi %s1999_s23, %s16_s23   ;;  %s1951_s22 = sphi %s1997_s22, %s2331_s22   ;;  %s1947_s21 = sphi %s1995_s21, %s2330_s21  }
   0x3   : > { %p30_p1 = scmp.ge.s32.totalorder %s28_s24, 2  ;;  %p242_p2 = scmp.lt.s32.totalorder %s1955_s23, 3 }
   0x5   : > { %s2333_s24 = smov (%p30_p1, %s28_s24), 0  ;;  %p243_p3 = pnand %p1459_p0, %p242_p2 }
   0x6   : > { %v1846_v0 = vld [vmem:[%s2324_s1 + $0x40] sm:$0xff] (!%p243_p3)   ;;  %v1850_v4 = vld [vmem:[%s2324_s1 + $0x48] sm:$0xff] (!%p243_p3)   ;;  %v1854_v8 = vld [vmem:[%s2324_s1 + $0x50] sm:$0xff] (!%p243_p3)   ;;  %p282_p4 = scmp.lt.s32.totalorder (!%p243_p3), %s1947_s21, 1  ;;  %vm1958_vm0 = vmmov (!%p243_p3), 0  }
   0x7   : > { %246 = sbr.rel (%p243_p3) target bundleno = 808 (0x328), region = 44  ;;  %v1847_v1 = vld [vmem:[%s2324_s1 + $0xc0] sm:$0xff] (!%p243_p3)   ;;  %1549 = vmatprep.subr.bf16.mxu0 (!%p243_p3), %v1846_v0  ;;  %v1851_v5 = vld [vmem:[%s2324_s1 + $0xc8] sm:$0xff] (!%p243_p3)   ;;  %v1855_v9 = vld [vmem:[%s2324_s1 + $0xd0] sm:$0xff] (!%p243_p3)  }
   0x8   : > { %v1848_v2 = vld [vmem:[%s2324_s1] sm:$0xff] (!%p243_p3)   ;;  %1571 = vmatprep.subr.bf16.mxu1 (!%p243_p3), %v1847_v1  ;;  %v1852_v6 = vld [vmem:[%s2324_s1 + $0x8] sm:$0xff] (!%p243_p3)   ;;  %v1856_v10 = vld [vmem:[%s2324_s1 + $0x10] sm:$0xff] (!%p243_p3)  }
   0x9   : > { %v1849_v3 = vld [vmem:[%s2324_s1 + $0x80] sm:$0xff] (!%p243_p3)   ;;  %1550 = vmatpush3.bf16.msra.mxu0 (!%p243_p3), %v1848_v2  ;;  %v1853_v7 = vld [vmem:[%s2324_s1 + $0x88] sm:$0xff] (!%p243_p3)   ;;  %v1857_v11 = vld [vmem:[%s2324_s1 + $0x90] sm:$0xff] (!%p243_p3)  }
   0xa   : > { %1572 = vmatpush3.bf16.msra.mxu1 (!%p243_p3), %v1849_v3  ;;  %1551 = vmatprep.subr.bf16.mxu0 (!%p243_p3), %v1850_v4  ;;  %v1858_v12 = vld [vmem:[%s2324_s1 + $0x58] sm:$0xff] (!%p243_p3)   ;;  %v1862_v16 = vld [vmem:[%s2324_s1 + $0x60] sm:$0xff] (!%p243_p3)   ;;  %v1866_v20 = vld [vmem:[%s2324_s1 + $0x68] sm:$0xff] (!%p243_p3)  }
   0xb   : > { %1573 = vmatprep.subr.bf16.mxu1 (!%p243_p3), %v1851_v5  ;;  %v1859_v13 = vld [vmem:[%s2324_s1 + $0xd8] sm:$0xff] (!%p243_p3)   ;;  %v1863_v17 = vld [vmem:[%s2324_s1 + $0xe0] sm:$0xff] (!%p243_p3)   ;;  %v1867_v21 = vld [vmem:[%s2324_s1 + $0xe8] sm:$0xff] (!%p243_p3)  }
   0xc   : > { %v1860_v14 = vld [vmem:[%s2324_s1 + $0x18] sm:$0xff] (!%p243_p3)   ;;  %v1864_v18 = vld [vmem:[%s2324_s1 + $0x20] sm:$0xff] (!%p243_p3)   ;;  %v1868_v22 = vld [vmem:[%s2324_s1 + $0x28] sm:$0xff] (!%p243_p3)  }
   0xd   : > { %1552 = vmatpush3.bf16.msra.mxu0 (!%p243_p3), %v1852_v6  ;;  %v1861_v15 = vld [vmem:[%s2324_s1 + $0x98] sm:$0xff] (!%p243_p3)   ;;  %v1865_v19 = vld [vmem:[%s2324_s1 + $0xa0] sm:$0xff] (!%p243_p3)   ;;  %v1869_v23 = vld [vmem:[%s2324_s1 + $0xa8] sm:$0xff] (!%p243_p3)   ;;  %v1957_v6 = vmov (!%p243_p3), 0.0  }
   0xe   : > { %1574 = vmatpush3.bf16.msra.mxu1 %v1853_v7  ;;  %1553 = vmatprep.subr.bf16.mxu0 %v1854_v8  ;;  %s2335_s21 = smov (!%p282_p4, %s1947_s21), 1  ;;  %v1870_v24 = vld [vmem:[%s2324_s1 + $0x70] sm:$0xff]   ;;  %v1874_v28 = vld [vmem:[%s2324_s1 + $0x78] sm:$0xff]   ;;  %v1884_v36 = vld [vmem:[%s2324_s1 + $0x140] sm:$0xff]  }
   0xf   : > { %1575 = vmatprep.subr.bf16.mxu1 %v1855_v9  ;;  %v1871_v25 = vld [vmem:[%s2324_s1 + $0xf0] sm:$0xff]   ;;  %s1818_s13 = smul.u32 72, %s2335_s21  ;;  %v1875_v29 = vld [vmem:[%s2324_s1 + $0xf8] sm:$0xff]   ;;  %v1885_v37 = vld [vmem:[%s2324_s1 + $0x100] sm:$0xff]   ;;  %s1548_s11 = sshll.u32 %s2335_s21, 4 }
  0x10   : > { %v1872_v26 = vld [vmem:[%s2324_s1 + $0x30] sm:$0xff]   ;;  %v1876_v30 = vld [vmem:[%s2324_s1 + $0x38] sm:$0xff]   ;;  %v1886_v38 = vld [vmem:[%s2324_s1 + $0x1c0] sm:$0xff]   ;;  %s301_s14 = scalar_lea.vmem %s2329_s6, %s1548_s11 }
  0x11   : > { %1554 = vmatpush3.bf16.msra.mxu0 %v1856_v10  ;;  %v1873_v27 = vld [vmem:[%s2324_s1 + $0xb0] sm:$0xff]   ;;  %s2113_s28 = scalar_lea.vmem %s2323_s0, %s1818_s13  ;;  %v1877_v31 = vld [vmem:[%s2324_s1 + $0xb8] sm:$0xff]   ;;  %v1887_v39 = vld [vmem:[%s2324_s1 + $0x180] sm:$0xff]  }
  0x12   : > { %1576 = vmatpush3.bf16.msra.mxu1 %v1857_v11  ;;  %1555 = vmatprep.subr.bf16.mxu0 %v1858_v12  ;;  %v1878_v32 = vld [vmem:[%s2113_s28] ss:$36 sps:$4 sm:$0xff]   ;;  %v1881_v34 = vld [vmem:[%s2113_s28 + $0x8] ss:$36 sps:$4 sm:$0xff]   ;;  %v1892_v44 = vld [vmem:[%s2324_s1 + $0x150] sm:$0xff]  }
  0x13   : > { %1577 = vmatprep.subr.bf16.mxu1 %v1859_v13  ;;  %v1880_v33 = vld [vmem:[%s2113_s28 + $0x4] ss:$36 sps:$4 sm:$0xff]   ;;  %v1883_v35 = vld [vmem:[%s2113_s28 + $0xc] ss:$36 sps:$4 sm:$0xff]   ;;  %v1896_v48 = vld [vmem:[%s2324_s1 + $0x158] sm:$0xff]  }
  0x14   : > { %975 = vmatprep.mubr.bf16.mxu0 %v1880_v33  ;;  %1016 = vmatprep.mubr.bf16.mxu1 %v1883_v35  ;;  %v1888_v40 = vld [vmem:[%s2324_s1 + $0x148] sm:$0xff]   ;;  %v1893_v45 = vld [vmem:[%s2324_s1 + $0x110] sm:$0xff]   ;;  %v1897_v49 = vld [vmem:[%s2324_s1 + $0x118] sm:$0xff]  }
  0x15   : > { %1556 = vmatpush3.bf16.msra.mxu0 %v1860_v14  ;;  %v1889_v41 = vld [vmem:[%s2324_s1 + $0x108] sm:$0xff]   ;;  %v1894_v46 = vld [vmem:[%s2324_s1 + $0x1d0] sm:$0xff]   ;;  %v1898_v50 = vld [vmem:[%s2324_s1 + $0x1d8] sm:$0xff]  }
  0x16   : > { %1578 = vmatpush3.bf16.msra.mxu1 %v1861_v15  ;;  %1557 = vmatprep.subr.bf16.mxu0 %v1862_v16  ;;  %v1890_v42 = vld [vmem:[%s2324_s1 + $0x1c8] sm:$0xff]   ;;  %v1895_v47 = vld [vmem:[%s2324_s1 + $0x190] sm:$0xff]   ;;  %v1899_v51 = vld [vmem:[%s2324_s1 + $0x198] sm:$0xff]  }
  0x17   : > { %1579 = vmatprep.subr.bf16.mxu1 %v1863_v17  ;;  %v1891_v43 = vld [vmem:[%s2324_s1 + $0x188] sm:$0xff]   ;;  %v1900_v52 = vld [vmem:[%s2324_s1 + $0x160] sm:$0xff]   ;;  %v1908_v60 = vld [vmem:[%s2324_s1 + $0x170] sm:$0xff]  }
  0x18   : > { %v1901_v53 = vld [vmem:[%s2324_s1 + $0x120] sm:$0xff]   ;;  %v1904_v56 = vld [vmem:[%s2324_s1 + $0x168] sm:$0xff]   ;;  %v1909_v61 = vld [vmem:[%s2324_s1 + $0x130] sm:$0xff]  }
  0x19   : > { %1558 = vmatpush3.bf16.msra.mxu0 %v1864_v18  ;;  %v1902_v54 = vld [vmem:[%s2324_s1 + $0x1e0] sm:$0xff]   ;;  %v1905_v57 = vld [vmem:[%s2324_s1 + $0x128] sm:$0xff]   ;;  %v1910_v62 = vld [vmem:[%s2324_s1 + $0x1f0] sm:$0xff]  }
  0x1a   : > { %1580 = vmatpush3.bf16.msra.mxu1 %v1865_v19  ;;  %1559 = vmatprep.subr.bf16.mxu0 %v1866_v20  ;;  %v1903_v55 = vld [vmem:[%s2324_s1 + $0x1a0] sm:$0xff]   ;;  %v1906_v58 = vld [vmem:[%s2324_s1 + $0x1e8] sm:$0xff]   ;;  %v1911_v63 = vld [vmem:[%s2324_s1 + $0x1b0] sm:$0xff]  }
  0x1b   : > { %1581 = vmatprep.subr.bf16.mxu1 %v1867_v21  ;;  %v1907_v59 = vld [vmem:[%s2324_s1 + $0x1a8] sm:$0xff]   ;;  %v1912_v0 = vld [vmem:[%s2324_s1 + $0x178] sm:$0xff]   ;;  %v1915_v3 = vld [vmem:[%s2113_s28 + $0x10] ss:$36 sps:$4 sm:$0xff]   ;;  %v1959_v21 = vmov 0.0|0.0  }
  0x1c   : > { %v1913_v1 = vld [vmem:[%s2324_s1 + $0x138] sm:$0xff]   ;;  %v1922_v9 = vld [vmem:[%s2324_s1 + $0x200] sm:$0xff]   ;;  %v1923_v10 = vld [vmem:[%s2324_s1 + $0x208] sm:$0xff]  }
  0x1d   : > { %1560 = vmatpush3.bf16.msra.mxu0 %v1868_v22  ;;  %v1914_v2 = vld [vmem:[%s2324_s1 + $0x1f8] sm:$0xff]   ;;  %v1924_v11 = vld [vmem:[%s2324_s1 + $0x210] sm:$0xff]   ;;  %v1926_v13 = vld [vmem:[%s2324_s1 + $0x220] sm:$0xff]  }
  0x1e   : > { %1582 = vmatpush3.bf16.msra.mxu1 %v1869_v23  ;;  %1561 = vmatprep.subr.bf16.mxu0 %v1870_v24  ;;  %v1917_v4 = vld [vmem:[%s2113_s28 + $0x14] ss:$36 sps:$4 sm:$0xff]   ;;  %v1921_v8 = vld [vmem:[%s2113_s28 + $0x1c] ss:$36 sps:$4 sm:$0xff]   ;;  %v1927_v14 = vld [vmem:[%s2324_s1 + $0x228] sm:$0xff]  }
  0x1f   : > { %1583 = vmatprep.subr.bf16.mxu1 %v1871_v25  ;;  %v1918_v5 = vld [vmem:[%s2324_s1 + $0x1b8] sm:$0xff]   ;;  %v1928_v15 = vld [vmem:[%s2324_s1 + $0x230] sm:$0xff]   ;;  %v1930_v17 = vld [vmem:[%s2113_s28 + $0x20] ss:$36 sps:$4 sm:$0xff]  }
  0x20   : > { %v1919_v7 = vld [vmem:[%s2113_s28 + $0x18] ss:$36 sps:$4 sm:$0xff]   ;;  %v1173_v18 = vld [vmem:[%s2326_s3] sm:$0xff]  ;;  %v1174_v19 = vld [vmem:[%s2326_s3 + $0x8] sm:$0xff] }
  0x21   : > { %1562 = vmatpush3.bf16.msra.mxu0 %v1872_v26  ;;  %v1925_v12 = vld [vmem:[%s2324_s1 + $0x218] sm:$0xff]   ;;  %v1175_v20 = vld [vmem:[%s2326_s3 + $0x10] sm:$0xff]  ;;  %v1771_v22 = vpack.c.bf16 %v1174_v19, %v1173_v18  ;;  %v1177_v25 = vld [vmem:[%s2326_s3 + $0x20] sm:$0xff] }
  0x22   : > { %1584 = vmatpush3.bf16.msra.mxu1 %v1873_v27  ;;  %1563 = vmatprep.subr.bf16.mxu0 %v1874_v28  ;;  %v1929_v16 = vld [vmem:[%s2324_s1 + $0x238] sm:$0xff]   ;;  %v1178_v26 = vld [vmem:[%s2326_s3 + $0x28] sm:$0xff]  ;;  %v1179_v28 = vld [vmem:[%s2326_s3 + $0x30] sm:$0xff] }
  0x23   : > { %1585 = vmatprep.subr.bf16.mxu1 %v1875_v29  ;;  %v1176_v23 = vld [vmem:[%s2326_s3 + $0x18] sm:$0xff]  ;;  %v1777_v27 = vpack.c.bf16 %v1178_v26, %v1177_v25  ;;  %v1260_v25 = vlaneseq }
  0x24   : > { %v1774_v24 = vpack.c.bf16 %v1176_v23, %v1175_v20  ;;  %v1180_v29 = vld [vmem:[%s2326_s3 + $0x38] sm:$0xff] }
  0x25   : > { %1564 = vmatpush3.bf16.msra.mxu0 %v1876_v30  ;;  %v1780_v30 = vpack.c.bf16 %v1180_v29, %v1179_v28  ;;  %v1184_v35 = vld [vmem:[%s2326_s3 + $0x58] sm:$0xff]  ;;  %v1261_v26 = vshrl.u32 %v1260_v25, 7 }
  0x26   : > { %1586 = vmatpush3.bf16.msra.mxu1 %v1877_v31  ;;  %1593 = vmatprep.subr.bf16.mxu0 %v1884_v36  ;;  %v1181_v31 = vld [vmem:[%s2326_s3 + $0x40] sm:$0xff] }
  0x27   : > { %1615 = vmatprep.subr.bf16.mxu1 %v1886_v38  ;;  %v1186_v38 = vld [vmem:[%s2326_s3 + $0x68] sm:$0xff] }
  0x28   : > { %976 = vmatmul.mubr.bf16.vlgmr.msra.gmra.mrb[0].mxu0 %v1878_v32  ;;  %v1182_v32 = vld [vmem:[%s2326_s3 + $0x48] sm:$0xff] }
  0x29   : > { %1017 = vmatmul.mubr.bf16.vlgmr.msra.gmra.mrb[0].mxu1 %v1881_v34  ;;  %1594 = vmatpush3.bf16.msra.mxu0 %v1885_v37  ;;  %v1783_v33 = vpack.c.bf16 %v1182_v32, %v1181_v31  ;;  %v1183_v34 = vld [vmem:[%s2326_s3 + $0x50] sm:$0xff]  ;;  %v1185_v37 = vld [vmem:[%s2326_s3 + $0x60] sm:$0xff] }
  0x2a   : > { %1616 = vmatpush3.bf16.msra.mxu1 %v1887_v39  ;;  %1595 = vmatprep.subr.bf16.mxu0 %v1888_v40  ;;  %v1786_v36 = vpack.c.bf16 %v1184_v35, %v1183_v34  ;;  %v1789_v39 = vpack.c.bf16 %v1186_v38, %v1185_v37  ;;  %v1187_v40 = vld [vmem:[%s2326_s3 + $0x70] sm:$0xff] }
  0x2b   : > { %1617 = vmatprep.subr.bf16.mxu1 %v1890_v42  ;;  %1057 = vmatprep.mubr.bf16.mxu0 %v1917_v4 }
  0x2c   : > { %1098 = vmatprep.mubr.bf16.mxu1 %v1921_v8 }
  0x2d   : > { %1596 = vmatpush3.bf16.msra.mxu0 %v1889_v41  ;;  %v1188_v41 = vld [vmem:[%s2326_s3 + $0x78] sm:$0xff] }
  0x2e   : > { %1618 = vmatpush3.bf16.msra.mxu1 %v1891_v43  ;;  %1597 = vmatprep.subr.bf16.mxu0 %v1892_v44  ;;  %v1792_v42 = vpack.c.bf16 %v1188_v41, %v1187_v40 }
  0x2f   : > { %1619 = vmatprep.subr.bf16.mxu1 %v1894_v46 }
  0x31   : > { %1598 = vmatpush3.bf16.msra.mxu0 %v1893_v45 }
  0x32   : > { %1620 = vmatpush3.bf16.msra.mxu1 %v1895_v47  ;;  %1599 = vmatprep.subr.bf16.mxu0 %v1896_v48 }
  0x33   : > { %1621 = vmatprep.subr.bf16.mxu1 %v1898_v50 }
  0x35   : > { %1600 = vmatpush3.bf16.msra.mxu0 %v1897_v49 }
  0x36   : > { %1622 = vmatpush3.bf16.msra.mxu1 %v1899_v51  ;;  %1601 = vmatprep.subr.bf16.mxu0 %v1900_v52 }
  0x37   : > { %1623 = vmatprep.subr.bf16.mxu1 %v1902_v54 }
  0x39   : > { %1602 = vmatpush3.bf16.msra.mxu0 %v1901_v53 }
  0x3a   : > { %1624 = vmatpush3.bf16.msra.mxu1 %v1903_v55  ;;  %1603 = vmatprep.subr.bf16.mxu0 %v1904_v56 }
  0x3b   : > { %1625 = vmatprep.subr.bf16.mxu1 %v1906_v58 }
  0x3d   : > { %1604 = vmatpush3.bf16.msra.mxu0 %v1905_v57 }
  0x3e   : > { %1626 = vmatpush3.bf16.msra.mxu1 %v1907_v59  ;;  %1605 = vmatprep.subr.bf16.mxu0 %v1908_v60 }
  0x3f   : > { %1627 = vmatprep.subr.bf16.mxu1 %v1910_v62 }
  0x41   : > { %1606 = vmatpush3.bf16.msra.mxu0 %v1909_v61 }
  0x42   : > { %1628 = vmatpush3.bf16.msra.mxu1 %v1911_v63  ;;  %1607 = vmatprep.subr.bf16.mxu0 %v1912_v0 }
  0x43   : > { %1629 = vmatprep.subr.bf16.mxu1 %v1914_v2 }
  0x45   : > { %1608 = vmatpush3.bf16.msra.mxu0 %v1913_v1 }
  0x46   : > { %1680 = vmatprep.subr.bf16.mxu0 %v1957_v6  ;;  %1630 = vmatpush3.bf16.msra.mxu1 %v1918_v5 }
  0x47   : > { %1770 = vmatprep.subr.bf16.mxu1 %v1959_v21 }
  0x48   : > { %1058 = vmatmul.mubr.bf16.vlgmr.msra.gmra.mrb[4].mxu0 %v1915_v3 }
  0x49   : > { %1696 = vmatprep.mubr.msk.bf16.mxu0 %vm1958_vm0, %v1957_v6  ;;  %1681 = vmatpush3.bf16.msra.mxu0 %v1922_v9 }
  0x4a   : > { %1099 = vmatmul.mubr.bf16.vlgmr.msra.gmra.mrb[4].mxu1 %v1919_v7  ;;  %1682 = vmatprep.subr.bf16.mxu0 %v1957_v6 }
  0x4b   : > { %1732 = vmatprep.mubr.msk.f32.mxu1 %vm1958_vm0, %v1957_v6  ;;  %1772 = vmatpush3.bf16.msra.mxu1 %v1771_v22 }
  0x4c   : > { %1773 = vmatprep.subr.bf16.mxu1 %v1959_v21 }
  0x4d   : > { %1683 = vmatpush3.bf16.msra.mxu0 %v1923_v10 }
  0x4e   : > { %1684 = vmatprep.subr.bf16.mxu0 %v1957_v6 }
  0x4f   : > { %1775 = vmatpush3.bf16.msra.mxu1 %v1774_v24 }
  0x50   : > { %1776 = vmatprep.subr.bf16.mxu1 %v1959_v21 }
  0x51   : > { %1685 = vmatpush3.bf16.msra.mxu0 %v1924_v11 }
  0x52   : > { %1686 = vmatprep.subr.bf16.mxu0 %v1957_v6 }
  0x53   : > { %1778 = vmatpush3.bf16.msra.mxu1 %v1777_v27 }
  0x54   : > { %1779 = vmatprep.subr.bf16.mxu1 %v1959_v21 }
  0x55   : > { %1687 = vmatpush3.bf16.msra.mxu0 %v1925_v12  ;;  %v1544_v12 = vld [vmem:[%s2325_s2] ss:$0 sm:$0xff] }
  0x56   : > { %1688 = vmatprep.subr.bf16.mxu0 %v1957_v6 }
  0x57   : > { %1781 = vmatpush3.bf16.msra.mxu1 %v1780_v30 }
  0x58   : > { %1782 = vmatprep.subr.bf16.mxu1 %v1959_v21 }
  0x59   : > { %1689 = vmatpush3.bf16.msra.mxu0 %v1926_v13 }
  0x5a   : > { %1690 = vmatprep.subr.bf16.mxu0 %v1957_v6 }
  0x5b   : > { %1784 = vmatpush3.bf16.msra.mxu1 %v1783_v33 }
  0x5c   : > { %1785 = vmatprep.subr.bf16.mxu1 %v1959_v21 }
  0x5d   : > { %1691 = vmatpush3.bf16.msra.mxu0 %v1927_v14 }
  0x5e   : > { %1692 = vmatprep.subr.bf16.mxu0 %v1957_v6 }
  0x5f   : > { %1787 = vmatpush3.bf16.msra.mxu1 %v1786_v36 }
  0x60   : > { %1788 = vmatprep.subr.bf16.mxu1 %v1959_v21 }
  0x61   : > { %1693 = vmatpush3.bf16.msra.mxu0 %v1928_v15 }
  0x62   : > { %1694 = vmatprep.subr.bf16.mxu0 %v1957_v6 }
  0x63   : > { %1790 = vmatpush3.bf16.msra.mxu1 %v1789_v39 }
  0x64   : > { %1791 = vmatprep.subr.bf16.mxu1 %v1959_v21 }
  0x65   : > { %1695 = vmatpush3.bf16.msra.mxu0 %v1929_v16 }
  0x66   : > { %1794 = vmatprep.subr.bf16.mxu0 %v1959_v21 }
  0x67   : > { %1793 = vmatpush3.bf16.msra.mxu1 %v1792_v42 }
  0x68   : > { %1697 = vmatmul.mubr.bf16.vlgmr.msra.gmra.mrb[8].mxu0 %v1930_v17 }
  0x69   : > { %1767 = vmatprep.mubr.msk.f32.mxu0 %vm1958_vm0, %v1957_v6  ;;  %1796 = vmatpush3.bf16.msra.mxu0 %v1771_v22 }
  0x6a   : > { %1797 = vmatprep.subr.bf16.mxu0 %v1959_v21 }
  0x6d   : > { %1799 = vmatpush3.bf16.msra.mxu0 %v1774_v24 }
  0x6e   : > { %1800 = vmatprep.subr.bf16.mxu0 %v1959_v21 }
  0x71   : > { %1802 = vmatpush3.bf16.msra.mxu0 %v1777_v27  ;;  %v1262_v27 = vsub.s32 0, %v1261_v26 }
  0x72   : > { %1803 = vmatprep.subr.bf16.mxu0 %v1959_v21 }
  0x75   : > { %1805 = vmatpush3.bf16.msra.mxu0 %v1780_v30 }
  0x76   : > { %1806 = vmatprep.subr.bf16.mxu0 %v1959_v21 }
  0x79   : > { %1808 = vmatpush3.bf16.msra.mxu0 %v1783_v33 }
  0x7a   : > { %1809 = vmatprep.subr.bf16.mxu0 %v1959_v21 }
  0x7d   : > { %1811 = vmatpush3.bf16.msra.mxu0 %v1786_v36 }
  0x7e   : > { %1812 = vmatprep.subr.bf16.mxu0 %v1959_v21 }
  0x81   : > { %1814 = vmatpush3.bf16.msra.mxu0 %v1789_v39 }
  0x82   : > { %1815 = vmatprep.subr.bf16.mxu0 %v1959_v21 }
  0x85   : > { %1817 = vmatpush3.bf16.msra.mxu0 %v1792_v42 }
  0xfb   : > { %v1565_v43 = vpop.f32.mrb[0].mxu0 }
  0xfc   : > { %v1587_v44 = vpop.f32.mrb[0].mxu1  ;;  %v1566_v45 = vpop.f32.mrb[1].mxu0 }
  0xfd   : > { %v1567_v46 = vadd.f32 %v1566_v45, %v1565_v43  ;;  %v1588_v47 = vpop.f32.mrb[1].mxu1  ;;  %v1568_v48 = vpop.f32.mrb[2].mxu0 }
  0xfe   : > { %v1589_v49 = vadd.f32 %v1588_v47, %v1587_v44  ;;  %v1590_v50 = vpop.f32.mrb[2].mxu1  ;;  %v1569_v51 = vpop.f32.mrb[3].mxu0  ;;  %v1348_v47 = vld [vmem:[%s2327_s4] sm:$0x1] }
  0xff   : > { %v1570_v52 = vadd.f32 %v1569_v51, %v1568_v48  ;;  %v1591_v53 = vpop.f32.mrb[3].mxu1  ;;  %v1545_v51 = vld [vmem:[%s2328_s5] ss:$0 sm:$0xff] }
 0x100   : > { %v1019_v54 = vadd.f32 %v1589_v49, %v1567_v46  ;;  %v1592_v55 = vadd.f32 %v1591_v53, %v1590_v50 }
 0x102   : > { %v1022_v56 = vadd.f32 %v1592_v55, %v1570_v52 }
 0x11b   : > { %v1609_v57 = vpop.f32.mrb[4].mxu0 }
 0x11c   : > { %v1610_v58 = vpop.f32.mrb[5].mxu0 }
 0x11d   : > { %v1611_v59 = vadd.f32 %v1610_v58, %v1609_v57  ;;  %v1612_v60 = vpop.f32.mrb[6].mxu0  ;;  %v1631_v61 = vpop.f32.mrb[4].mxu1 }
 0x11e   : > { %v1613_v62 = vpop.f32.mrb[7].mxu0  ;;  %v1632_v1 = vpop.f32.mrb[5].mxu1 }
 0x11f   : > { %v1060_v63 = vadd.f32 %v1611_v59, %v1019_v54  ;;  %v1614_v0 = vadd.f32 %v1613_v62, %v1612_v60  ;;  %v1633_v2 = vadd.f32 %v1632_v1, %v1631_v61  ;;  %v1634_v3 = vpop.f32.mrb[6].mxu1 }
 0x120   : > { %v1635_v5 = vpop.f32.mrb[7].mxu1 }
 0x121   : > { %v1063_v4 = vadd.f32 %v1614_v0, %v1022_v56  ;;  %v1636_v6 = vadd.f32 %v1635_v5, %v1634_v3  ;;  %v1101_v7 = vadd.f32 %v1633_v2, %v1060_v63 }
 0x123   : > { %v1104_v8 = vadd.f32 %v1636_v6, %v1063_v4 }
 0x13b   : > { %v1141_v9 = vpop.f32.mrb[8].mxu0 }
 0x13c   : > { %v1142_v10 = vadd.f32 %v1141_v9, %v1101_v7  ;;  %v1698_v11 = vpop.f32.mrb[9].mxu0 }
 0x13d   : > { %v1144_v13 = vpop.f32.mrb[10].mxu0 }
 0x13e   : > { %v1145_v14 = vadd.f32 %v1144_v13, %v1104_v8  ;;  %v1699_v15 = vpop.f32.mrb[11].mxu0  ;;  %v1164_v16 = vadd.f32 %v1544_v12, %v1142_v10 }
 0x140   : > { %v1165_v17 = vadd.f32 %v1544_v12, %v1145_v14 }
 0x142   : > { %v1166_v18 = vadd.f32 %v1165_v17, %v1164_v16 }
 0x144   : > { %v1167_v19 = vrot.slane %v1166_v18, 4 }
 0x146   : > { %v1168_v20 = vadd.f32 %v1167_v19, %v1166_v18 }
 0x148   : > { %v1169_v21 = vrot.slane %v1168_v20, 2 }
 0x14a   : > { %v1170_v22 = vadd.f32 %v1169_v21, %v1168_v20 }
 0x14c   : > { %v1171_v23 = vrot.slane %v1170_v22, 1 }
 0x14e   : > { %v1172_v24 = vadd.f32 %v1171_v23, %v1170_v22 }
 0x150   : > { %1733 = vmatmul.mubr.f32.vlgmr.msra.gmra.mrb[8].mxu1 %v1172_v24 }
 0x223   : > { %v1255_v28 = vpop.f32.mrb[8].mxu1 }
 0x224   : > { %v1259_v29 = vmul.f32 0.0078125, %v1255_v28  ;;  %v1734_v30 = vpop.f32.mrb[9].mxu1 }
 0x226   : > { %v1263_v31 = vrot.slane %v1259_v29, %v1262_v27 }
 0x228   : > { %v1264_v32 = vsub.f32 %v1164_v16, %v1263_v31  ;;  %v1265_v33 = vsub.f32 %v1165_v17, %v1263_v31 }
 0x22a   : > { %v1266_v34 = vmul.f32 %v1264_v32, %v1264_v32  ;;  %v1267_v35 = vmul.f32 %v1265_v33, %v1265_v33 }
 0x22c   : > { %v1268_v36 = vadd.f32 %v1267_v35, %v1266_v34 }
 0x22e   : > { %v1269_v37 = vrot.slane %v1268_v36, 4 }
 0x230   : > { %v1270_v38 = vadd.f32 %v1269_v37, %v1268_v36 }
 0x232   : > { %v1271_v39 = vrot.slane %v1270_v38, 2 }
 0x234   : > { %v1272_v40 = vadd.f32 %v1271_v39, %v1270_v38 }
 0x236   : > { %v1273_v41 = vrot.slane %v1272_v40, 1 }
 0x238   : > { %v1274_v42 = vadd.f32 %v1273_v41, %v1272_v40 }
 0x23a   : > { %1768 = vmatmul.mubr.f32.vlgmr.msra.gmra.mrb[12].mxu0 %v1274_v42 }
 0x30d   : > { %v1341_v43 = vpop.f32.mrb[12].mxu0 }
 0x30e   : > { %v1345_v44 = vmul.f32 0.0078125, %v1341_v43  ;;  %v1769_v45 = vpop.f32.mrb[13].mxu0 }
 0x310   : > { %v1346_v46 = vadd.f32 1e-05, %v1345_v44 }
 0x312   : > { %1931 = vrsqrt.f32 %v1346_v46 }
 0x31c   : > { %v1932_v48 = vpop.eup %1931 }
 0x31d   : > { %v1349_v49 = vmul.f32 %v1932_v48, %v1348_v47 }
 0x31f   : > { %v1353_v50 = vrot.slane %v1349_v49, %v1262_v27 }
 0x321   : > { %v1354_v52 = vmul.f32 %v1353_v50, %v1264_v32  ;;  %v1355_v53 = vmul.f32 %v1353_v50, %v1265_v33 }
 0x323   : > { %v1363_v54 = vadd.f32 %v1545_v51, %v1354_v52  ;;  %v1364_v55 = vadd.f32 %v1545_v51, %v1355_v53 }
 0x325   : > { %v1365_v56 = vmax.f32 %v1363_v54, 0.0  ;;  %v1366_v57 = vmax.f32 %v1364_v55, 0.0 }
 0x327   : > { %1367 = vst [vmem:[%s301_s14] sm:$0xff] %v1365_v56  ;;  %1368 = vst [vmem:[%s301_s14 + $0x8] sm:$0xff] %v1366_v57 }
 0x328 PF: > { %s16_s23 = sadd.s32 1, %s1955_s23   ;;  %s2330_s21 = smov %s1951_s22 }
 0x329   : > { %p13_p5 = scmp.ge.s32.totalorder %s16_s23, 4   ;;  %s2331_s22 = smov %s2333_s24 }
 0x32b   :  { %15 = sbr.rel (!%p13_p5) target bundleno = 2 (0x2), region = 85 }

// kernel: unet_extractor_forward.23
= control target key start
LH: loop header
LB: loop body
LE: loop exit
PB: predicated region body
PF: predicated region fallthrough
CT: control target
= control target key end

     0   :  { %s1029_s21 = smov 0   ;;  %s1031_s22 = smov 0   ;;  %s1169_s0 = inlined_call_operand.vmem [shape: bf16[2,16,128], index: 0, kind: input, shape index: {}]   ;;  %s1170_s1 = inlined_call_operand.vmem [shape: bf16[128,128], index: 1, kind: input, shape index: {}]   ;;  %s1171_s2 = inlined_call_operand.vmem [shape: f32[1,128], index: 2, kind: input, shape index: {}, may-alias: {2,5}]   ;;  %s1172_s3 = inlined_call_operand.vmem [shape: f32[128,128], index: 3, kind: input, shape index: {}]   ;;  %s1173_s4 = inlined_call_operand.vmem [shape: f32[1,128], index: 4, kind: input, shape index: {}]   ;;  %s1174_s5 = inlined_call_operand.vmem [shape: f32[1,128], index: 5, kind: input, shape index: {}, may-alias: {2,5}]   ;;  %s1175_s6 = inlined_call_operand.vmem [shape: f32[2,16,128], index: 6, kind: output, shape index: {}]  }
   0x1   :  { %s1033_s23 = smov 0  }
   0x2 LB: > { %s28_s24 = sadd.s32 1, %s985_s22  ;;  %p728_p0 = scmp.ge.s32.totalorder %s989_s23, 1  ;;  %s989_s23 = sphi %s1033_s23, %s16_s23   ;;  %s985_s22 = sphi %s1031_s22, %s1177_s22   ;;  %s981_s21 = sphi %s1029_s21, %s1176_s21  }
   0x3   : > { %p30_p1 = scmp.ge.s32.totalorder %s28_s24, 2  ;;  %p240_p2 = scmp.lt.s32.totalorder %s989_s23, 3 }
   0x5   : > { %s1179_s24 = smov (%p30_p1, %s28_s24), 0  ;;  %p241_p3 = pnand %p728_p0, %p240_p2 }
   0x6   : > { %v956_v0 = vld [vmem:[%s1170_s1] sm:$0xff] (!%p241_p3)   ;;  %v991_v1 = vmov (!%p241_p3), 0.0   ;;  %v957_v2 = vld [vmem:[%s1170_s1 + $0x8] sm:$0xff] (!%p241_p3)   ;;  %vm992_vm0 = vmmov (!%p241_p3), 0   ;;  %p278_p4 = scmp.lt.s32.totalorder (!%p241_p3), %s981_s21, 1  ;;  %v993_v3 = vmov (!%p241_p3), 0.0|0.0   ;;  %v531_v49 = vlaneseq (!%p241_p3) }
   0x7   : > { %244 = sbr.rel (%p241_p3) target bundleno = 739 (0x2e3), region = 44  ;;  %791 = vmatprep.subr.bf16.mxu0 (!%p241_p3), %v991_v1  ;;  %807 = vmatprep.mubr.msk.bf16.mxu0 (!%p241_p3), %vm992_vm0, %v991_v1  ;;  %v958_v4 = vld [vmem:[%s1170_s1 + $0x10] sm:$0xff] (!%p241_p3)   ;;  %v444_v5 = vld [vmem:[%s1172_s3] sm:$0xff] (!%p241_p3)  ;;  %v445_v6 = vld [vmem:[%s1172_s3 + $0x8] sm:$0xff] (!%p241_p3) }
   0x8   : > { %792 = vmatpush3.bf16.msra.mxu0 (!%p241_p3), %v956_v0  ;;  %843 = vmatprep.mubr.msk.f32.mxu1 (!%p241_p3), %vm992_vm0, %v991_v1  ;;  %v446_v7 = vld [vmem:[%s1172_s3 + $0x10] sm:$0xff] (!%p241_p3)  ;;  %v959_v8 = vld [vmem:[%s1170_s1 + $0x18] sm:$0xff] (!%p241_p3)   ;;  %v882_v9 = vpack.c.bf16 (!%p241_p3), %v445_v6, %v444_v5  ;;  %v448_v12 = vld [vmem:[%s1172_s3 + $0x20] sm:$0xff] (!%p241_p3)  ;;  %v532_v50 = vshrl.u32 (!%p241_p3), %v531_v49, 7 }
   0x9   : > { %793 = vmatprep.subr.bf16.mxu0 (!%p241_p3), %v991_v1  ;;  %881 = vmatprep.subr.bf16.mxu1 (!%p241_p3), %v993_v3  ;;  %v447_v10 = vld [vmem:[%s1172_s3 + $0x18] sm:$0xff] (!%p241_p3)  ;;  %v449_v13 = vld [vmem:[%s1172_s3 + $0x28] sm:$0xff] (!%p241_p3)  ;;  %v960_v14 = vld [vmem:[%s1170_s1 + $0x20] sm:$0xff] (!%p241_p3)  }
   0xa   : > { %883 = vmatpush3.bf16.msra.mxu1 (!%p241_p3), %v882_v9  ;;  %v885_v11 = vpack.c.bf16 (!%p241_p3), %v447_v10, %v446_v7  ;;  %v888_v15 = vpack.c.bf16 (!%p241_p3), %v449_v13, %v448_v12  ;;  %v961_v16 = vld [vmem:[%s1170_s1 + $0x28] sm:$0xff] (!%p241_p3)   ;;  %v962_v17 = vld [vmem:[%s1170_s1 + $0x30] sm:$0xff] (!%p241_p3)   ;;  %v963_v18 = vld [vmem:[%s1170_s1 + $0x38] sm:$0xff] (!%p241_p3)   ;;  %v533_v51 = vsub.s32 (!%p241_p3), 0, %v532_v50 }
   0xb   : > { %884 = vmatprep.subr.bf16.mxu1 (!%p241_p3), %v993_v3  ;;  %v450_v20 = vld [vmem:[%s1172_s3 + $0x30] sm:$0xff] (!%p241_p3)  ;;  %v451_v21 = vld [vmem:[%s1172_s3 + $0x38] sm:$0xff] (!%p241_p3)  ;;  %v452_v23 = vld [vmem:[%s1172_s3 + $0x40] sm:$0xff] (!%p241_p3) }
   0xc   : > { %794 = vmatpush3.bf16.msra.mxu0 (!%p241_p3), %v957_v2  ;;  %v891_v22 = vpack.c.bf16 (!%p241_p3), %v451_v21, %v450_v20  ;;  %v453_v24 = vld [vmem:[%s1172_s3 + $0x48] sm:$0xff] (!%p241_p3)  ;;  %v454_v26 = vld [vmem:[%s1172_s3 + $0x50] sm:$0xff] (!%p241_p3)  ;;  %v455_v27 = vld [vmem:[%s1172_s3 + $0x58] sm:$0xff] (!%p241_p3) }
   0xd   : > { %795 = vmatprep.subr.bf16.mxu0 (!%p241_p3), %v991_v1  ;;  %v894_v25 = vpack.c.bf16 (!%p241_p3), %v453_v24, %v452_v23  ;;  %v897_v28 = vpack.c.bf16 (!%p241_p3), %v455_v27, %v454_v26  ;;  %v456_v29 = vld [vmem:[%s1172_s3 + $0x60] sm:$0xff] (!%p241_p3)  ;;  %v457_v30 = vld [vmem:[%s1172_s3 + $0x68] sm:$0xff] (!%p241_p3)  ;;  %v458_v32 = vld [vmem:[%s1172_s3 + $0x70] sm:$0xff] (!%p241_p3) }
   0xe   : > { %s1181_s21 = smov (!%p278_p4, %s981_s21), 1  ;;  %886 = vmatpush3.bf16.msra.mxu1 %v885_v11  ;;  %v900_v31 = vpack.c.bf16 %v457_v30, %v456_v29  ;;  %v459_v33 = vld [vmem:[%s1172_s3 + $0x78] sm:$0xff]  ;;  %v742_v36 = vld [vmem:[%s1171_s2] ss:$0 sm:$0xff] }
   0xf   : > { %s746_s7 = sshll.u32 %s1181_s21, 3  ;;  %887 = vmatprep.subr.bf16.mxu1 %v993_v3  ;;  %v903_v34 = vpack.c.bf16 %v459_v33, %v458_v32  ;;  %v619_v7 = vld [vmem:[%s1173_s4] sm:$0x1]  ;;  %s747_s17 = sshll.u32 %s1181_s21, 4 }
  0x10   : > { %s1065_s10 = scalar_lea.vmem %s1169_s0, %s746_s7  ;;  %796 = vmatpush3.bf16.msra.mxu0 %v958_v4  ;;  %s296_s26 = scalar_lea.vmem %s1175_s6, %s747_s17 }
  0x11   : > { %797 = vmatprep.subr.bf16.mxu0 %v991_v1  ;;  %v964_v19 = vld [vmem:[%s1065_s10] sm:$0xff]  }
  0x12   : > { %889 = vmatpush3.bf16.msra.mxu1 %v888_v15 }
  0x13   : > { %890 = vmatprep.subr.bf16.mxu1 %v993_v3 }
  0x14   : > { %798 = vmatpush3.bf16.msra.mxu0 %v959_v8 }
  0x15   : > { %799 = vmatprep.subr.bf16.mxu0 %v991_v1 }
  0x16   : > { %892 = vmatpush3.bf16.msra.mxu1 %v891_v22 }
  0x17   : > { %893 = vmatprep.subr.bf16.mxu1 %v993_v3 }
  0x18   : > { %800 = vmatpush3.bf16.msra.mxu0 %v960_v14 }
  0x19   : > { %801 = vmatprep.subr.bf16.mxu0 %v991_v1 }
  0x1a   : > { %895 = vmatpush3.bf16.msra.mxu1 %v894_v25 }
  0x1b   : > { %896 = vmatprep.subr.bf16.mxu1 %v993_v3 }
  0x1c   : > { %802 = vmatpush3.bf16.msra.mxu0 %v961_v16 }
  0x1d   : > { %803 = vmatprep.subr.bf16.mxu0 %v991_v1 }
  0x1e   : > { %898 = vmatpush3.bf16.msra.mxu1 %v897_v28 }
  0x1f   : > { %899 = vmatprep.subr.bf16.mxu1 %v993_v3 }
  0x20   : > { %804 = vmatpush3.bf16.msra.mxu0 %v962_v17 }
  0x21   : > { %805 = vmatprep.subr.bf16.mxu0 %v991_v1 }
  0x22   : > { %901 = vmatpush3.bf16.msra.mxu1 %v900_v31 }
  0x23   : > { %902 = vmatprep.subr.bf16.mxu1 %v993_v3 }
  0x24   : > { %806 = vmatpush3.bf16.msra.mxu0 %v963_v18 }
  0x25   : > { %905 = vmatprep.subr.bf16.mxu0 %v993_v3 }
  0x26   : > { %904 = vmatpush3.bf16.msra.mxu1 %v903_v34 }
  0x27   : > { %808 = vmatmul.mubr.bf16.vlgmr.msra.gmra.mrb[0].mxu0 %v964_v19 }
  0x28   : > { %907 = vmatpush3.bf16.msra.mxu0 %v882_v9  ;;  %878 = vmatprep.mubr.msk.f32.mxu0 %vm992_vm0, %v991_v1 }
  0x29   : > { %908 = vmatprep.subr.bf16.mxu0 %v993_v3 }
  0x2c   : > { %910 = vmatpush3.bf16.msra.mxu0 %v885_v11  ;;  %v743_v11 = vld [vmem:[%s1174_s5] ss:$0 sm:$0xff] }
  0x2d   : > { %911 = vmatprep.subr.bf16.mxu0 %v993_v3 }
  0x30   : > { %913 = vmatpush3.bf16.msra.mxu0 %v888_v15 }
  0x31   : > { %914 = vmatprep.subr.bf16.mxu0 %v993_v3 }
  0x34   : > { %916 = vmatpush3.bf16.msra.mxu0 %v891_v22 }
  0x35   : > { %917 = vmatprep.subr.bf16.mxu0 %v993_v3 }
  0x38   : > { %919 = vmatpush3.bf16.msra.mxu0 %v894_v25 }
  0x39   : > { %920 = vmatprep.subr.bf16.mxu0 %v993_v3 }
  0x3c   : > { %922 = vmatpush3.bf16.msra.mxu0 %v897_v28 }
  0x3d   : > { %923 = vmatprep.subr.bf16.mxu0 %v993_v3 }
  0x40   : > { %925 = vmatpush3.bf16.msra.mxu0 %v900_v31 }
  0x41   : > { %926 = vmatprep.subr.bf16.mxu0 %v993_v3 }
  0x44   : > { %928 = vmatpush3.bf16.msra.mxu0 %v903_v34 }
  0xfa   : > { %v412_v35 = vpop.f32.mrb[0].mxu0 }
  0xfb   : > { %v809_v37 = vpop.f32.mrb[1].mxu0  ;;  %v435_v39 = vadd.f32 %v742_v36, %v412_v35 }
  0xfc   : > { %v415_v38 = vpop.f32.mrb[2].mxu0 }
  0xfd   : > { %v436_v40 = vadd.f32 %v742_v36, %v415_v38  ;;  %v810_v41 = vpop.f32.mrb[3].mxu0 }
  0xff   : > { %v437_v42 = vadd.f32 %v436_v40, %v435_v39 }
 0x101   : > { %v438_v43 = vrot.slane %v437_v42, 4 }
 0x103   : > { %v439_v44 = vadd.f32 %v438_v43, %v437_v42 }
 0x105   : > { %v440_v45 = vrot.slane %v439_v44, 2 }
 0x107   : > { %v441_v46 = vadd.f32 %v440_v45, %v439_v44 }
 0x109   : > { %v442_v47 = vrot.slane %v441_v46, 1 }
 0x10b   : > { %v443_v48 = vadd.f32 %v442_v47, %v441_v46 }
 0x10d   : > { %844 = vmatmul.mubr.f32.vlgmr.msra.gmra.mrb[0].mxu1 %v443_v48 }
 0x1e0   : > { %v526_v52 = vpop.f32.mrb[0].mxu1 }
 0x1e1   : > { %v530_v53 = vmul.f32 0.0078125, %v526_v52  ;;  %v845_v54 = vpop.f32.mrb[1].mxu1 }
 0x1e3   : > { %v534_v55 = vrot.slane %v530_v53, %v533_v51 }
 0x1e5   : > { %v535_v56 = vsub.f32 %v435_v39, %v534_v55  ;;  %v536_v57 = vsub.f32 %v436_v40, %v534_v55 }
 0x1e7   : > { %v537_v58 = vmul.f32 %v535_v56, %v535_v56  ;;  %v538_v59 = vmul.f32 %v536_v57, %v536_v57 }
 0x1e9   : > { %v539_v60 = vadd.f32 %v538_v59, %v537_v58 }
 0x1eb   : > { %v540_v61 = vrot.slane %v539_v60, 4 }
 0x1ed   : > { %v541_v62 = vadd.f32 %v540_v61, %v539_v60 }
 0x1ef   : > { %v542_v63 = vrot.slane %v541_v62, 2 }
 0x1f1   : > { %v543_v0 = vadd.f32 %v542_v63, %v541_v62 }
 0x1f3   : > { %v544_v1 = vrot.slane %v543_v0, 1 }
 0x1f5   : > { %v545_v2 = vadd.f32 %v544_v1, %v543_v0 }
 0x1f7   : > { %879 = vmatmul.mubr.f32.vlgmr.msra.gmra.mrb[4].mxu0 %v545_v2 }
 0x2ca   : > { %v612_v3 = vpop.f32.mrb[4].mxu0 }
 0x2cb   : > { %v616_v4 = vmul.f32 0.0078125, %v612_v3  ;;  %v880_v5 = vpop.f32.mrb[5].mxu0 }
 0x2cd   : > { %v617_v6 = vadd.f32 1e-05, %v616_v4 }
 0x2cf   : > { %965 = vrsqrt.f32 %v617_v6 }
 0x2d9   : > { %v966_v8 = vpop.eup %965 }
 0x2da   : > { %v620_v9 = vmul.f32 %v966_v8, %v619_v7 }
 0x2dc   : > { %v624_v10 = vrot.slane %v620_v9, %v533_v51 }
 0x2de   : > { %v625_v12 = vmul.f32 %v624_v10, %v535_v56  ;;  %v626_v13 = vmul.f32 %v624_v10, %v536_v57 }
 0x2e0   : > { %v634_v14 = vadd.f32 %v743_v11, %v625_v12  ;;  %v635_v15 = vadd.f32 %v743_v11, %v626_v13 }
 0x2e2   : > { %636 = vst [vmem:[%s296_s26] sm:$0xff] %v634_v14  ;;  %637 = vst [vmem:[%s296_s26 + $0x8] sm:$0xff] %v635_v15 }
 0x2e3 PF: > { %s16_s23 = sadd.s32 1, %s989_s23   ;;  %s1176_s21 = smov %s985_s22 }
 0x2e4   : > { %p13_p5 = scmp.ge.s32.totalorder %s16_s23, 4   ;;  %s1177_s22 = smov %s1179_s24 }
 0x2e6   :  { %15 = sbr.rel (!%p13_p5) target bundleno = 2 (0x2), region = 85 }

// kernel: unet_extractor_forward.24
= control target key start
LH: loop header
LB: loop body
LE: loop exit
PB: predicated region body
PF: predicated region fallthrough
CT: control target
= control target key end

     0   :  { %s2068_s24 = smov 0   ;;  %s2070_s25 = smov 0   ;;  %s2399_s0 = inlined_call_operand.vmem [shape: bf16[2,16,1152], index: 0, kind: input, shape index: {}]   ;;  %s2400_s1 = inlined_call_operand.vmem [shape: bf16[1152,128], index: 1, kind: input, shape index: {}]   ;;  %s2401_s2 = inlined_call_operand.vmem [shape: f32[1,128], index: 2, kind: input, shape index: {}, may-alias: {2,5}]   ;;  %s2402_s3 = inlined_call_operand.vmem [shape: f32[128,128], index: 3, kind: input, shape index: {}]   ;;  %s2403_s4 = inlined_call_operand.vmem [shape: f32[1,128], index: 4, kind: input, shape index: {}]   ;;  %s2404_s5 = inlined_call_operand.vmem [shape: f32[1,128], index: 5, kind: input, shape index: {}, may-alias: {2,5}]   ;;  %s2405_s6 = inlined_call_operand.vmem [shape: f32[2,16,128], index: 6, kind: input, shape index: {}]   ;;  %s2406_s7 = inlined_call_operand.vmem [shape: f32[2,16,128], index: 7, kind: output, shape index: {}]  }
   0x1   :  { %s2072_s26 = smov 0  }
   0x2 LB: > { %s29_s27 = sadd.s32 1, %s2019_s25  ;;  %p1524_p0 = scmp.ge.s32.totalorder %s2023_s26, 1  ;;  %s2023_s26 = sphi %s2072_s26, %s17_s26   ;;  %s2019_s25 = sphi %s2070_s25, %s2408_s25   ;;  %s2015_s24 = sphi %s2068_s24, %s2407_s24  }
   0x3   : > { %p31_p1 = scmp.ge.s32.totalorder %s29_s27, 2  ;;  %p277_p2 = scmp.lt.s32.totalorder %s2023_s26, 3 }
   0x5   : > { %s2410_s27 = smov (%p31_p1, %s29_s27), 0  ;;  %p278_p3 = pnand %p1524_p0, %p277_p2 }
   0x6   : > { %v1914_v0 = vld [vmem:[%s2400_s1 + $0x40] sm:$0xff] (!%p278_p3)   ;;  %v1918_v4 = vld [vmem:[%s2400_s1 + $0x48] sm:$0xff] (!%p278_p3)   ;;  %v1922_v8 = vld [vmem:[%s2400_s1 + $0x50] sm:$0xff] (!%p278_p3)   ;;  %p324_p4 = scmp.lt.s32.totalorder (!%p278_p3), %s2015_s24, 1  ;;  %vm2026_vm0 = vmmov (!%p278_p3), 0  }
   0x7   : > { %281 = sbr.rel (%p278_p3) target bundleno = 812 (0x32c), region = 48  ;;  %v1915_v1 = vld [vmem:[%s2400_s1 + $0xc0] sm:$0xff] (!%p278_p3)   ;;  %1617 = vmatprep.subr.bf16.mxu0 (!%p278_p3), %v1914_v0  ;;  %v1919_v5 = vld [vmem:[%s2400_s1 + $0xc8] sm:$0xff] (!%p278_p3)   ;;  %v1923_v9 = vld [vmem:[%s2400_s1 + $0xd0] sm:$0xff] (!%p278_p3)  }
   0x8   : > { %v1916_v2 = vld [vmem:[%s2400_s1] sm:$0xff] (!%p278_p3)   ;;  %1639 = vmatprep.subr.bf16.mxu1 (!%p278_p3), %v1915_v1  ;;  %v1920_v6 = vld [vmem:[%s2400_s1 + $0x8] sm:$0xff] (!%p278_p3)   ;;  %v1924_v10 = vld [vmem:[%s2400_s1 + $0x10] sm:$0xff] (!%p278_p3)  }
   0x9   : > { %v1917_v3 = vld [vmem:[%s2400_s1 + $0x80] sm:$0xff] (!%p278_p3)   ;;  %1618 = vmatpush3.bf16.msra.mxu0 (!%p278_p3), %v1916_v2  ;;  %v1921_v7 = vld [vmem:[%s2400_s1 + $0x88] sm:$0xff] (!%p278_p3)   ;;  %v1925_v11 = vld [vmem:[%s2400_s1 + $0x90] sm:$0xff] (!%p278_p3)  }
   0xa   : > { %1640 = vmatpush3.bf16.msra.mxu1 (!%p278_p3), %v1917_v3  ;;  %1619 = vmatprep.subr.bf16.mxu0 (!%p278_p3), %v1918_v4  ;;  %v1926_v12 = vld [vmem:[%s2400_s1 + $0x58] sm:$0xff] (!%p278_p3)   ;;  %v1930_v16 = vld [vmem:[%s2400_s1 + $0x60] sm:$0xff] (!%p278_p3)   ;;  %v1934_v20 = vld [vmem:[%s2400_s1 + $0x68] sm:$0xff] (!%p278_p3)  }
   0xb   : > { %1641 = vmatprep.subr.bf16.mxu1 (!%p278_p3), %v1919_v5  ;;  %v1927_v13 = vld [vmem:[%s2400_s1 + $0xd8] sm:$0xff] (!%p278_p3)   ;;  %v1931_v17 = vld [vmem:[%s2400_s1 + $0xe0] sm:$0xff] (!%p278_p3)   ;;  %v1935_v21 = vld [vmem:[%s2400_s1 + $0xe8] sm:$0xff] (!%p278_p3)  }
   0xc   : > { %v1928_v14 = vld [vmem:[%s2400_s1 + $0x18] sm:$0xff] (!%p278_p3)   ;;  %v1932_v18 = vld [vmem:[%s2400_s1 + $0x20] sm:$0xff] (!%p278_p3)   ;;  %v1936_v22 = vld [vmem:[%s2400_s1 + $0x28] sm:$0xff] (!%p278_p3)  }
   0xd   : > { %1620 = vmatpush3.bf16.msra.mxu0 (!%p278_p3), %v1920_v6  ;;  %v1929_v15 = vld [vmem:[%s2400_s1 + $0x98] sm:$0xff] (!%p278_p3)   ;;  %v1933_v19 = vld [vmem:[%s2400_s1 + $0xa0] sm:$0xff] (!%p278_p3)   ;;  %v1937_v23 = vld [vmem:[%s2400_s1 + $0xa8] sm:$0xff] (!%p278_p3)   ;;  %v2025_v6 = vmov (!%p278_p3), 0.0  }
   0xe   : > { %1642 = vmatpush3.bf16.msra.mxu1 %v1921_v7  ;;  %1621 = vmatprep.subr.bf16.mxu0 %v1922_v8  ;;  %s2412_s24 = smov (!%p324_p4, %s2015_s24), 1  ;;  %v1938_v24 = vld [vmem:[%s2400_s1 + $0x70] sm:$0xff]   ;;  %v1942_v28 = vld [vmem:[%s2400_s1 + $0x78] sm:$0xff]   ;;  %v1952_v36 = vld [vmem:[%s2400_s1 + $0x140] sm:$0xff]  }
   0xf   : > { %1643 = vmatprep.subr.bf16.mxu1 %v1923_v9  ;;  %v1939_v25 = vld [vmem:[%s2400_s1 + $0xf0] sm:$0xff]   ;;  %s1886_s19 = smul.u32 72, %s2412_s24  ;;  %v1943_v29 = vld [vmem:[%s2400_s1 + $0xf8] sm:$0xff]   ;;  %v1953_v37 = vld [vmem:[%s2400_s1 + $0x100] sm:$0xff]   ;;  %s1615_s22 = sshll.u32 %s2412_s24, 4 }
  0x10   : > { %v1940_v26 = vld [vmem:[%s2400_s1 + $0x30] sm:$0xff]   ;;  %v1944_v30 = vld [vmem:[%s2400_s1 + $0x38] sm:$0xff]   ;;  %v1954_v38 = vld [vmem:[%s2400_s1 + $0x1c0] sm:$0xff]   ;;  %s343_s8 = scalar_lea.vmem %s2405_s6, %s1615_s22  ;;  %s348_s10 = scalar_lea.vmem %s2406_s7, %s1615_s22 }
  0x11   : > { %1622 = vmatpush3.bf16.msra.mxu0 %v1924_v10  ;;  %v1941_v27 = vld [vmem:[%s2400_s1 + $0xb0] sm:$0xff]   ;;  %s2186_s11 = scalar_lea.vmem %s2399_s0, %s1886_s19  ;;  %v1945_v31 = vld [vmem:[%s2400_s1 + $0xb8] sm:$0xff]   ;;  %v1955_v39 = vld [vmem:[%s2400_s1 + $0x180] sm:$0xff]  }
  0x12   : > { %1644 = vmatpush3.bf16.msra.mxu1 %v1925_v11  ;;  %1623 = vmatprep.subr.bf16.mxu0 %v1926_v12  ;;  %v1946_v32 = vld [vmem:[%s2186_s11] ss:$36 sps:$4 sm:$0xff]   ;;  %v1949_v34 = vld [vmem:[%s2186_s11 + $0x8] ss:$36 sps:$4 sm:$0xff]   ;;  %v1960_v44 = vld [vmem:[%s2400_s1 + $0x150] sm:$0xff]  }
  0x13   : > { %1645 = vmatprep.subr.bf16.mxu1 %v1927_v13  ;;  %v1948_v33 = vld [vmem:[%s2186_s11 + $0x4] ss:$36 sps:$4 sm:$0xff]   ;;  %v1951_v35 = vld [vmem:[%s2186_s11 + $0xc] ss:$36 sps:$4 sm:$0xff]   ;;  %v1964_v48 = vld [vmem:[%s2400_s1 + $0x158] sm:$0xff]  }
  0x14   : > { %1022 = vmatprep.mubr.bf16.mxu0 %v1948_v33  ;;  %1063 = vmatprep.mubr.bf16.mxu1 %v1951_v35  ;;  %v1956_v40 = vld [vmem:[%s2400_s1 + $0x148] sm:$0xff]   ;;  %v1961_v45 = vld [vmem:[%s2400_s1 + $0x110] sm:$0xff]   ;;  %v1965_v49 = vld [vmem:[%s2400_s1 + $0x118] sm:$0xff]  }
  0x15   : > { %1624 = vmatpush3.bf16.msra.mxu0 %v1928_v14  ;;  %v1957_v41 = vld [vmem:[%s2400_s1 + $0x108] sm:$0xff]   ;;  %v1962_v46 = vld [vmem:[%s2400_s1 + $0x1d0] sm:$0xff]   ;;  %v1966_v50 = vld [vmem:[%s2400_s1 + $0x1d8] sm:$0xff]  }
  0x16   : > { %1646 = vmatpush3.bf16.msra.mxu1 %v1929_v15  ;;  %1625 = vmatprep.subr.bf16.mxu0 %v1930_v16  ;;  %v1958_v42 = vld [vmem:[%s2400_s1 + $0x1c8] sm:$0xff]   ;;  %v1963_v47 = vld [vmem:[%s2400_s1 + $0x190] sm:$0xff]   ;;  %v1967_v51 = vld [vmem:[%s2400_s1 + $0x198] sm:$0xff]  }
  0x17   : > { %1647 = vmatprep.subr.bf16.mxu1 %v1931_v17  ;;  %v1959_v43 = vld [vmem:[%s2400_s1 + $0x188] sm:$0xff]   ;;  %v1968_v52 = vld [vmem:[%s2400_s1 + $0x160] sm:$0xff]   ;;  %v1976_v60 = vld [vmem:[%s2400_s1 + $0x170] sm:$0xff]  }
  0x18   : > { %v1969_v53 = vld [vmem:[%s2400_s1 + $0x120] sm:$0xff]   ;;  %v1972_v56 = vld [vmem:[%s2400_s1 + $0x168] sm:$0xff]   ;;  %v1977_v61 = vld [vmem:[%s2400_s1 + $0x130] sm:$0xff]  }
  0x19   : > { %1626 = vmatpush3.bf16.msra.mxu0 %v1932_v18  ;;  %v1970_v54 = vld [vmem:[%s2400_s1 + $0x1e0] sm:$0xff]   ;;  %v1973_v57 = vld [vmem:[%s2400_s1 + $0x128] sm:$0xff]   ;;  %v1978_v62 = vld [vmem:[%s2400_s1 + $0x1f0] sm:$0xff]  }
  0x1a   : > { %1648 = vmatpush3.bf16.msra.mxu1 %v1933_v19  ;;  %1627 = vmatprep.subr.bf16.mxu0 %v1934_v20  ;;  %v1971_v55 = vld [vmem:[%s2400_s1 + $0x1a0] sm:$0xff]   ;;  %v1974_v58 = vld [vmem:[%s2400_s1 + $0x1e8] sm:$0xff]   ;;  %v1979_v63 = vld [vmem:[%s2400_s1 + $0x1b0] sm:$0xff]  }
  0x1b   : > { %1649 = vmatprep.subr.bf16.mxu1 %v1935_v21  ;;  %v1975_v59 = vld [vmem:[%s2400_s1 + $0x1a8] sm:$0xff]   ;;  %v1980_v0 = vld [vmem:[%s2400_s1 + $0x178] sm:$0xff]   ;;  %v1983_v3 = vld [vmem:[%s2186_s11 + $0x10] ss:$36 sps:$4 sm:$0xff]   ;;  %v2027_v21 = vmov 0.0|0.0  }
  0x1c   : > { %v1981_v1 = vld [vmem:[%s2400_s1 + $0x138] sm:$0xff]   ;;  %v1990_v9 = vld [vmem:[%s2400_s1 + $0x200] sm:$0xff]   ;;  %v1991_v10 = vld [vmem:[%s2400_s1 + $0x208] sm:$0xff]  }
  0x1d   : > { %1628 = vmatpush3.bf16.msra.mxu0 %v1936_v22  ;;  %v1982_v2 = vld [vmem:[%s2400_s1 + $0x1f8] sm:$0xff]   ;;  %v1992_v11 = vld [vmem:[%s2400_s1 + $0x210] sm:$0xff]   ;;  %v1994_v13 = vld [vmem:[%s2400_s1 + $0x220] sm:$0xff]  }
  0x1e   : > { %1650 = vmatpush3.bf16.msra.mxu1 %v1937_v23  ;;  %1629 = vmatprep.subr.bf16.mxu0 %v1938_v24  ;;  %v1985_v4 = vld [vmem:[%s2186_s11 + $0x14] ss:$36 sps:$4 sm:$0xff]   ;;  %v1989_v8 = vld [vmem:[%s2186_s11 + $0x1c] ss:$36 sps:$4 sm:$0xff]   ;;  %v1995_v14 = vld [vmem:[%s2400_s1 + $0x228] sm:$0xff]  }
  0x1f   : > { %1651 = vmatprep.subr.bf16.mxu1 %v1939_v25  ;;  %v1986_v5 = vld [vmem:[%s2400_s1 + $0x1b8] sm:$0xff]   ;;  %v1996_v15 = vld [vmem:[%s2400_s1 + $0x230] sm:$0xff]   ;;  %v1998_v17 = vld [vmem:[%s2186_s11 + $0x20] ss:$36 sps:$4 sm:$0xff]  }
  0x20   : > { %v1987_v7 = vld [vmem:[%s2186_s11 + $0x18] ss:$36 sps:$4 sm:$0xff]   ;;  %v1220_v18 = vld [vmem:[%s2402_s3] sm:$0xff]  ;;  %v1221_v19 = vld [vmem:[%s2402_s3 + $0x8] sm:$0xff] }
  0x21   : > { %1630 = vmatpush3.bf16.msra.mxu0 %v1940_v26  ;;  %v1993_v12 = vld [vmem:[%s2400_s1 + $0x218] sm:$0xff]   ;;  %v1222_v20 = vld [vmem:[%s2402_s3 + $0x10] sm:$0xff]  ;;  %v1839_v22 = vpack.c.bf16 %v1221_v19, %v1220_v18  ;;  %v1224_v25 = vld [vmem:[%s2402_s3 + $0x20] sm:$0xff] }
  0x22   : > { %1652 = vmatpush3.bf16.msra.mxu1 %v1941_v27  ;;  %1631 = vmatprep.subr.bf16.mxu0 %v1942_v28  ;;  %v1997_v16 = vld [vmem:[%s2400_s1 + $0x238] sm:$0xff]   ;;  %v1225_v26 = vld [vmem:[%s2402_s3 + $0x28] sm:$0xff]  ;;  %v1226_v28 = vld [vmem:[%s2402_s3 + $0x30] sm:$0xff] }
  0x23   : > { %1653 = vmatprep.subr.bf16.mxu1 %v1943_v29  ;;  %v1223_v23 = vld [vmem:[%s2402_s3 + $0x18] sm:$0xff]  ;;  %v1845_v27 = vpack.c.bf16 %v1225_v26, %v1224_v25  ;;  %v1307_v25 = vlaneseq }
  0x24   : > { %v1842_v24 = vpack.c.bf16 %v1223_v23, %v1222_v20  ;;  %v1227_v29 = vld [vmem:[%s2402_s3 + $0x38] sm:$0xff] }
  0x25   : > { %1632 = vmatpush3.bf16.msra.mxu0 %v1944_v30  ;;  %v1848_v30 = vpack.c.bf16 %v1227_v29, %v1226_v28  ;;  %v1231_v35 = vld [vmem:[%s2402_s3 + $0x58] sm:$0xff]  ;;  %v1308_v26 = vshrl.u32 %v1307_v25, 7 }
  0x26   : > { %1654 = vmatpush3.bf16.msra.mxu1 %v1945_v31  ;;  %1661 = vmatprep.subr.bf16.mxu0 %v1952_v36  ;;  %v1228_v31 = vld [vmem:[%s2402_s3 + $0x40] sm:$0xff] }
  0x27   : > { %1683 = vmatprep.subr.bf16.mxu1 %v1954_v38  ;;  %v1233_v38 = vld [vmem:[%s2402_s3 + $0x68] sm:$0xff] }
  0x28   : > { %1023 = vmatmul.mubr.bf16.vlgmr.msra.gmra.mrb[0].mxu0 %v1946_v32  ;;  %v1229_v32 = vld [vmem:[%s2402_s3 + $0x48] sm:$0xff] }
  0x29   : > { %1064 = vmatmul.mubr.bf16.vlgmr.msra.gmra.mrb[0].mxu1 %v1949_v34  ;;  %1662 = vmatpush3.bf16.msra.mxu0 %v1953_v37  ;;  %v1851_v33 = vpack.c.bf16 %v1229_v32, %v1228_v31  ;;  %v1230_v34 = vld [vmem:[%s2402_s3 + $0x50] sm:$0xff]  ;;  %v1232_v37 = vld [vmem:[%s2402_s3 + $0x60] sm:$0xff] }
  0x2a   : > { %1684 = vmatpush3.bf16.msra.mxu1 %v1955_v39  ;;  %1663 = vmatprep.subr.bf16.mxu0 %v1956_v40  ;;  %v1854_v36 = vpack.c.bf16 %v1231_v35, %v1230_v34  ;;  %v1857_v39 = vpack.c.bf16 %v1233_v38, %v1232_v37  ;;  %v1234_v40 = vld [vmem:[%s2402_s3 + $0x70] sm:$0xff] }
  0x2b   : > { %1685 = vmatprep.subr.bf16.mxu1 %v1958_v42  ;;  %1104 = vmatprep.mubr.bf16.mxu0 %v1985_v4 }
  0x2c   : > { %1145 = vmatprep.mubr.bf16.mxu1 %v1989_v8 }
  0x2d   : > { %1664 = vmatpush3.bf16.msra.mxu0 %v1957_v41  ;;  %v1235_v41 = vld [vmem:[%s2402_s3 + $0x78] sm:$0xff] }
  0x2e   : > { %1686 = vmatpush3.bf16.msra.mxu1 %v1959_v43  ;;  %1665 = vmatprep.subr.bf16.mxu0 %v1960_v44  ;;  %v1860_v42 = vpack.c.bf16 %v1235_v41, %v1234_v40 }
  0x2f   : > { %1687 = vmatprep.subr.bf16.mxu1 %v1962_v46 }
  0x31   : > { %1666 = vmatpush3.bf16.msra.mxu0 %v1961_v45 }
  0x32   : > { %1688 = vmatpush3.bf16.msra.mxu1 %v1963_v47  ;;  %1667 = vmatprep.subr.bf16.mxu0 %v1964_v48 }
  0x33   : > { %1689 = vmatprep.subr.bf16.mxu1 %v1966_v50 }
  0x35   : > { %1668 = vmatpush3.bf16.msra.mxu0 %v1965_v49 }
  0x36   : > { %1690 = vmatpush3.bf16.msra.mxu1 %v1967_v51  ;;  %1669 = vmatprep.subr.bf16.mxu0 %v1968_v52 }
  0x37   : > { %1691 = vmatprep.subr.bf16.mxu1 %v1970_v54 }
  0x39   : > { %1670 = vmatpush3.bf16.msra.mxu0 %v1969_v53 }
  0x3a   : > { %1692 = vmatpush3.bf16.msra.mxu1 %v1971_v55  ;;  %1671 = vmatprep.subr.bf16.mxu0 %v1972_v56 }
  0x3b   : > { %1693 = vmatprep.subr.bf16.mxu1 %v1974_v58 }
  0x3d   : > { %1672 = vmatpush3.bf16.msra.mxu0 %v1973_v57 }
  0x3e   : > { %1694 = vmatpush3.bf16.msra.mxu1 %v1975_v59  ;;  %1673 = vmatprep.subr.bf16.mxu0 %v1976_v60 }
  0x3f   : > { %1695 = vmatprep.subr.bf16.mxu1 %v1978_v62 }
  0x41   : > { %1674 = vmatpush3.bf16.msra.mxu0 %v1977_v61 }
  0x42   : > { %1696 = vmatpush3.bf16.msra.mxu1 %v1979_v63  ;;  %1675 = vmatprep.subr.bf16.mxu0 %v1980_v0 }
  0x43   : > { %1697 = vmatprep.subr.bf16.mxu1 %v1982_v2 }
  0x45   : > { %1676 = vmatpush3.bf16.msra.mxu0 %v1981_v1 }
  0x46   : > { %1748 = vmatprep.subr.bf16.mxu0 %v2025_v6  ;;  %1698 = vmatpush3.bf16.msra.mxu1 %v1986_v5 }
  0x47   : > { %1838 = vmatprep.subr.bf16.mxu1 %v2027_v21 }
  0x48   : > { %1105 = vmatmul.mubr.bf16.vlgmr.msra.gmra.mrb[4].mxu0 %v1983_v3 }
  0x49   : > { %1764 = vmatprep.mubr.msk.bf16.mxu0 %vm2026_vm0, %v2025_v6  ;;  %1749 = vmatpush3.bf16.msra.mxu0 %v1990_v9 }
  0x4a   : > { %1146 = vmatmul.mubr.bf16.vlgmr.msra.gmra.mrb[4].mxu1 %v1987_v7  ;;  %1750 = vmatprep.subr.bf16.mxu0 %v2025_v6 }
  0x4b   : > { %1800 = vmatprep.mubr.msk.f32.mxu1 %vm2026_vm0, %v2025_v6  ;;  %1840 = vmatpush3.bf16.msra.mxu1 %v1839_v22 }
  0x4c   : > { %1841 = vmatprep.subr.bf16.mxu1 %v2027_v21 }
  0x4d   : > { %1751 = vmatpush3.bf16.msra.mxu0 %v1991_v10 }
  0x4e   : > { %1752 = vmatprep.subr.bf16.mxu0 %v2025_v6 }
  0x4f   : > { %1843 = vmatpush3.bf16.msra.mxu1 %v1842_v24 }
  0x50   : > { %1844 = vmatprep.subr.bf16.mxu1 %v2027_v21 }
  0x51   : > { %1753 = vmatpush3.bf16.msra.mxu0 %v1992_v11 }
  0x52   : > { %1754 = vmatprep.subr.bf16.mxu0 %v2025_v6 }
  0x53   : > { %1846 = vmatpush3.bf16.msra.mxu1 %v1845_v27 }
  0x54   : > { %1847 = vmatprep.subr.bf16.mxu1 %v2027_v21 }
  0x55   : > { %1755 = vmatpush3.bf16.msra.mxu0 %v1993_v12  ;;  %v1611_v12 = vld [vmem:[%s2401_s2] ss:$0 sm:$0xff] }
  0x56   : > { %1756 = vmatprep.subr.bf16.mxu0 %v2025_v6 }
  0x57   : > { %1849 = vmatpush3.bf16.msra.mxu1 %v1848_v30 }
  0x58   : > { %1850 = vmatprep.subr.bf16.mxu1 %v2027_v21 }
  0x59   : > { %1757 = vmatpush3.bf16.msra.mxu0 %v1994_v13 }
  0x5a   : > { %1758 = vmatprep.subr.bf16.mxu0 %v2025_v6 }
  0x5b   : > { %1852 = vmatpush3.bf16.msra.mxu1 %v1851_v33 }
  0x5c   : > { %1853 = vmatprep.subr.bf16.mxu1 %v2027_v21 }
  0x5d   : > { %1759 = vmatpush3.bf16.msra.mxu0 %v1995_v14 }
  0x5e   : > { %1760 = vmatprep.subr.bf16.mxu0 %v2025_v6 }
  0x5f   : > { %1855 = vmatpush3.bf16.msra.mxu1 %v1854_v36 }
  0x60   : > { %1856 = vmatprep.subr.bf16.mxu1 %v2027_v21 }
  0x61   : > { %1761 = vmatpush3.bf16.msra.mxu0 %v1996_v15 }
  0x62   : > { %1762 = vmatprep.subr.bf16.mxu0 %v2025_v6 }
  0x63   : > { %1858 = vmatpush3.bf16.msra.mxu1 %v1857_v39 }
  0x64   : > { %1859 = vmatprep.subr.bf16.mxu1 %v2027_v21 }
  0x65   : > { %1763 = vmatpush3.bf16.msra.mxu0 %v1997_v16 }
  0x66   : > { %1862 = vmatprep.subr.bf16.mxu0 %v2027_v21 }
  0x67   : > { %1861 = vmatpush3.bf16.msra.mxu1 %v1860_v42 }
  0x68   : > { %1765 = vmatmul.mubr.bf16.vlgmr.msra.gmra.mrb[8].mxu0 %v1998_v17 }
  0x69   : > { %1835 = vmatprep.mubr.msk.f32.mxu0 %vm2026_vm0, %v2025_v6  ;;  %1864 = vmatpush3.bf16.msra.mxu0 %v1839_v22 }
  0x6a   : > { %1865 = vmatprep.subr.bf16.mxu0 %v2027_v21 }
  0x6d   : > { %1867 = vmatpush3.bf16.msra.mxu0 %v1842_v24 }
  0x6e   : > { %1868 = vmatprep.subr.bf16.mxu0 %v2027_v21 }
  0x71   : > { %1870 = vmatpush3.bf16.msra.mxu0 %v1845_v27  ;;  %v1309_v27 = vsub.s32 0, %v1308_v26 }
  0x72   : > { %1871 = vmatprep.subr.bf16.mxu0 %v2027_v21 }
  0x75   : > { %1873 = vmatpush3.bf16.msra.mxu0 %v1848_v30 }
  0x76   : > { %1874 = vmatprep.subr.bf16.mxu0 %v2027_v21 }
  0x79   : > { %1876 = vmatpush3.bf16.msra.mxu0 %v1851_v33 }
  0x7a   : > { %1877 = vmatprep.subr.bf16.mxu0 %v2027_v21 }
  0x7d   : > { %1879 = vmatpush3.bf16.msra.mxu0 %v1854_v36 }
  0x7e   : > { %1880 = vmatprep.subr.bf16.mxu0 %v2027_v21 }
  0x81   : > { %1882 = vmatpush3.bf16.msra.mxu0 %v1857_v39 }
  0x82   : > { %1883 = vmatprep.subr.bf16.mxu0 %v2027_v21 }
  0x85   : > { %1885 = vmatpush3.bf16.msra.mxu0 %v1860_v42 }
  0xfb   : > { %v1633_v43 = vpop.f32.mrb[0].mxu0 }
  0xfc   : > { %v1655_v44 = vpop.f32.mrb[0].mxu1  ;;  %v1634_v45 = vpop.f32.mrb[1].mxu0 }
  0xfd   : > { %v1635_v46 = vadd.f32 %v1634_v45, %v1633_v43  ;;  %v1656_v47 = vpop.f32.mrb[1].mxu1  ;;  %v1636_v48 = vpop.f32.mrb[2].mxu0 }
  0xfe   : > { %v1657_v49 = vadd.f32 %v1656_v47, %v1655_v44  ;;  %v1658_v50 = vpop.f32.mrb[2].mxu1  ;;  %v1637_v51 = vpop.f32.mrb[3].mxu0  ;;  %v1395_v47 = vld [vmem:[%s2403_s4] sm:$0x1] }
  0xff   : > { %v1638_v52 = vadd.f32 %v1637_v51, %v1636_v48  ;;  %v1659_v53 = vpop.f32.mrb[3].mxu1  ;;  %v1612_v51 = vld [vmem:[%s2404_s5] ss:$0 sm:$0xff] }
 0x100   : > { %v1066_v54 = vadd.f32 %v1657_v49, %v1635_v46  ;;  %v1660_v55 = vadd.f32 %v1659_v53, %v1658_v50 }
 0x102   : > { %v1069_v56 = vadd.f32 %v1660_v55, %v1638_v52 }
 0x11b   : > { %v1677_v57 = vpop.f32.mrb[4].mxu0 }
 0x11c   : > { %v1678_v58 = vpop.f32.mrb[5].mxu0 }
 0x11d   : > { %v1679_v59 = vadd.f32 %v1678_v58, %v1677_v57  ;;  %v1680_v60 = vpop.f32.mrb[6].mxu0  ;;  %v1699_v61 = vpop.f32.mrb[4].mxu1  ;;  %v1415_v57 = vld [vmem:[%s343_s8 + $0x8] sm:$0xff] }
 0x11e   : > { %v1681_v62 = vpop.f32.mrb[7].mxu0  ;;  %v1700_v1 = vpop.f32.mrb[5].mxu1 }
 0x11f   : > { %v1107_v63 = vadd.f32 %v1679_v59, %v1066_v54  ;;  %v1682_v0 = vadd.f32 %v1681_v62, %v1680_v60  ;;  %v1701_v2 = vadd.f32 %v1700_v1, %v1699_v61  ;;  %v1702_v3 = vpop.f32.mrb[6].mxu1 }
 0x120   : > { %v1703_v5 = vpop.f32.mrb[7].mxu1 }
 0x121   : > { %v1110_v4 = vadd.f32 %v1682_v0, %v1069_v56  ;;  %v1704_v6 = vadd.f32 %v1703_v5, %v1702_v3  ;;  %v1148_v7 = vadd.f32 %v1701_v2, %v1107_v63  ;;  %v1414_v56 = vld [vmem:[%s343_s8] sm:$0xff] }
 0x123   : > { %v1151_v8 = vadd.f32 %v1704_v6, %v1110_v4 }
 0x13b   : > { %v1188_v9 = vpop.f32.mrb[8].mxu0 }
 0x13c   : > { %v1189_v10 = vadd.f32 %v1188_v9, %v1148_v7  ;;  %v1766_v11 = vpop.f32.mrb[9].mxu0 }
 0x13d   : > { %v1191_v13 = vpop.f32.mrb[10].mxu0 }
 0x13e   : > { %v1192_v14 = vadd.f32 %v1191_v13, %v1151_v8  ;;  %v1767_v15 = vpop.f32.mrb[11].mxu0  ;;  %v1211_v16 = vadd.f32 %v1611_v12, %v1189_v10 }
 0x140   : > { %v1212_v17 = vadd.f32 %v1611_v12, %v1192_v14 }
 0x142   : > { %v1213_v18 = vadd.f32 %v1212_v17, %v1211_v16 }
 0x144   : > { %v1214_v19 = vrot.slane %v1213_v18, 4 }
 0x146   : > { %v1215_v20 = vadd.f32 %v1214_v19, %v1213_v18 }
 0x148   : > { %v1216_v21 = vrot.slane %v1215_v20, 2 }
 0x14a   : > { %v1217_v22 = vadd.f32 %v1216_v21, %v1215_v20 }
 0x14c   : > { %v1218_v23 = vrot.slane %v1217_v22, 1 }
 0x14e   : > { %v1219_v24 = vadd.f32 %v1218_v23, %v1217_v22 }
 0x150   : > { %1801 = vmatmul.mubr.f32.vlgmr.msra.gmra.mrb[8].mxu1 %v1219_v24 }
 0x223   : > { %v1302_v28 = vpop.f32.mrb[8].mxu1 }
 0x224   : > { %v1306_v29 = vmul.f32 0.0078125, %v1302_v28  ;;  %v1802_v30 = vpop.f32.mrb[9].mxu1 }
 0x226   : > { %v1310_v31 = vrot.slane %v1306_v29, %v1309_v27 }
 0x228   : > { %v1311_v32 = vsub.f32 %v1211_v16, %v1310_v31  ;;  %v1312_v33 = vsub.f32 %v1212_v17, %v1310_v31 }
 0x22a   : > { %v1313_v34 = vmul.f32 %v1311_v32, %v1311_v32  ;;  %v1314_v35 = vmul.f32 %v1312_v33, %v1312_v33 }
 0x22c   : > { %v1315_v36 = vadd.f32 %v1314_v35, %v1313_v34 }
 0x22e   : > { %v1316_v37 = vrot.slane %v1315_v36, 4 }
 0x230   : > { %v1317_v38 = vadd.f32 %v1316_v37, %v1315_v36 }
 0x232   : > { %v1318_v39 = vrot.slane %v1317_v38, 2 }
 0x234   : > { %v1319_v40 = vadd.f32 %v1318_v39, %v1317_v38 }
 0x236   : > { %v1320_v41 = vrot.slane %v1319_v40, 1 }
 0x238   : > { %v1321_v42 = vadd.f32 %v1320_v41, %v1319_v40 }
 0x23a   : > { %1836 = vmatmul.mubr.f32.vlgmr.msra.gmra.mrb[12].mxu0 %v1321_v42 }
 0x30d   : > { %v1388_v43 = vpop.f32.mrb[12].mxu0 }
 0x30e   : > { %v1392_v44 = vmul.f32 0.0078125, %v1388_v43  ;;  %v1837_v45 = vpop.f32.mrb[13].mxu0 }
 0x310   : > { %v1393_v46 = vadd.f32 1e-05, %v1392_v44 }
 0x312   : > { %1999 = vrsqrt.f32 %v1393_v46 }
 0x31c   : > { %v2000_v48 = vpop.eup %1999 }
 0x31d   : > { %v1396_v49 = vmul.f32 %v2000_v48, %v1395_v47 }
 0x31f   : > { %v1400_v50 = vrot.slane %v1396_v49, %v1309_v27 }
 0x321   : > { %v1401_v52 = vmul.f32 %v1400_v50, %v1311_v32  ;;  %v1402_v53 = vmul.f32 %v1400_v50, %v1312_v33 }
 0x323   : > { %v1410_v54 = vadd.f32 %v1612_v51, %v1401_v52  ;;  %v1411_v55 = vadd.f32 %v1612_v51, %v1402_v53 }
 0x325   : > { %v1412_v58 = vmax.f32 %v1410_v54, 0.0  ;;  %v1413_v59 = vmax.f32 %v1411_v55, 0.0 }
 0x327   : > { %v1416_v60 = vadd.f32 %v1414_v56, %v1412_v58  ;;  %v1417_v61 = vadd.f32 %v1415_v57, %v1413_v59 }
 0x329   : > { %v1418_v62 = vmax.f32 %v1416_v60, 0.0  ;;  %v1419_v63 = vmax.f32 %v1417_v61, 0.0 }
 0x32b   : > { %1420 = vst [vmem:[%s348_s10] sm:$0xff] %v1418_v62  ;;  %1421 = vst [vmem:[%s348_s10 + $0x8] sm:$0xff] %v1419_v63 }
 0x32c PF: > { %s17_s26 = sadd.s32 1, %s2023_s26   ;;  %s2407_s24 = smov %s2019_s25 }
 0x32d   : > { %p14_p5 = scmp.ge.s32.totalorder %s17_s26, 4   ;;  %s2408_s25 = smov %s2410_s27 }
 0x32f   :  { %16 = sbr.rel (!%p14_p5) target bundleno = 2 (0x2), region = 92 }

// kernel: unet_extractor_forward.28
= control target key start
LH: loop header
LB: loop body
LE: loop exit
PB: predicated region body
PF: predicated region fallthrough
CT: control target
= control target key end

     0   :  { %s995_s21 = smov 0   ;;  %s997_s22 = smov 0   ;;  %s1138_s0 = inlined_call_operand.vmem [shape: bf16[2,4,128], index: 0, kind: input, shape index: {}]   ;;  %s1139_s1 = inlined_call_operand.vmem [shape: bf16[128,128], index: 1, kind: input, shape index: {}]   ;;  %s1140_s2 = inlined_call_operand.vmem [shape: f32[1,128], index: 2, kind: input, shape index: {}, may-alias: {2,5}]   ;;  %s1141_s3 = inlined_call_operand.vmem [shape: f32[128,128], index: 3, kind: input, shape index: {}]   ;;  %s1142_s4 = inlined_call_operand.vmem [shape: f32[1,128], index: 4, kind: input, shape index: {}]   ;;  %s1143_s5 = inlined_call_operand.vmem [shape: f32[1,128], index: 5, kind: input, shape index: {}, may-alias: {2,5}]   ;;  %s1144_s6 = inlined_call_operand.vmem [shape: f32[2,4,128], index: 6, kind: output, shape index: {}]  }
   0x1   :  { %s999_s23 = smov 0  }
   0x2 LB: > { %s28_s24 = sadd.s32 1, %s951_s22  ;;  %p700_p0 = scmp.ge.s32.totalorder %s955_s23, 1  ;;  %s955_s23 = sphi %s999_s23, %s16_s23   ;;  %s951_s22 = sphi %s997_s22, %s1146_s22   ;;  %s947_s21 = sphi %s995_s21, %s1145_s21  }
   0x3   : > { %p30_p1 = scmp.ge.s32.totalorder %s28_s24, 2  ;;  %p239_p2 = scmp.lt.s32.totalorder %s955_s23, 3 }
   0x5   : > { %s1148_s24 = smov (%p30_p1, %s28_s24), 0  ;;  %p240_p3 = pnand %p700_p0, %p239_p2 }
   0x6   : > { %v923_v0 = vld [vmem:[%s1139_s1] sm:$0xff] (!%p240_p3)   ;;  %v957_v1 = vmov (!%p240_p3), 0.0   ;;  %v924_v2 = vld [vmem:[%s1139_s1 + $0x8] sm:$0xff] (!%p240_p3)   ;;  %vm958_vm0 = vmmov (!%p240_p3), 0   ;;  %v959_v3 = vmov (!%p240_p3), 0.0|0.0   ;;  %v925_v4 = vld [vmem:[%s1139_s1 + $0x10] sm:$0xff] (!%p240_p3)   ;;  %v513_v51 = vlaneseq (!%p240_p3) }
   0x7   : > { %243 = sbr.rel (%p240_p3) target bundleno = 745 (0x2e9), region = 44  ;;  %758 = vmatprep.subr.bf16.mxu0 (!%p240_p3), %v957_v1  ;;  %297 = vst [vmem:[#allocation2] sm:$0xf] (!%p240_p3), %v957_v1  ;;  %774 = vmatprep.mubr.msk.bf16.mxu0 (!%p240_p3), %vm958_vm0, %v957_v1  ;;  %v426_v5 = vld [vmem:[%s1141_s3] sm:$0xff] (!%p240_p3)  ;;  %v427_v6 = vld [vmem:[%s1141_s3 + $0x8] sm:$0xff] (!%p240_p3)  ;;  %v428_v8 = vld [vmem:[%s1141_s3 + $0x10] sm:$0xff] (!%p240_p3) }
   0x8   : > { %759 = vmatpush3.bf16.msra.mxu0 (!%p240_p3), %v923_v0  ;;  %810 = vmatprep.mubr.msk.f32.mxu1 (!%p240_p3), %vm958_vm0, %v957_v1  ;;  %v849_v7 = vpack.c.bf16 (!%p240_p3), %v427_v6, %v426_v5  ;;  %v429_v9 = vld [vmem:[%s1141_s3 + $0x18] sm:$0xff] (!%p240_p3)  ;;  %v927_v12 = vld [vmem:[%s1139_s1 + $0x20] sm:$0xff] (!%p240_p3)   ;;  %p275_p4 = scmp.lt.s32.totalorder (!%p240_p3), %s947_s21, 1  ;;  %v928_v13 = vld [vmem:[%s1139_s1 + $0x28] sm:$0xff] (!%p240_p3)   ;;  %vm418_vm1 = vcmask (!%p240_p3), 1043456   ;;  %v514_v52 = vshrl.u32 (!%p240_p3), %v513_v51, 7 }
   0x9   : > { %760 = vmatprep.subr.bf16.mxu0 (!%p240_p3), %v957_v1  ;;  %848 = vmatprep.subr.bf16.mxu1 (!%p240_p3), %v959_v3  ;;  %v926_v10 = vld [vmem:[%s1139_s1 + $0x18] sm:$0xff] (!%p240_p3)   ;;  %v852_v11 = vpack.c.bf16 (!%p240_p3), %v429_v9, %v428_v8  ;;  %v929_v14 = vld [vmem:[%s1139_s1 + $0x30] sm:$0xff] (!%p240_p3)   ;;  %v430_v17 = vld [vmem:[%s1141_s3 + $0x20] sm:$0xff] (!%p240_p3) }
   0xa   : > { %850 = vmatpush3.bf16.msra.mxu1 (!%p240_p3), %v849_v7  ;;  %v930_v15 = vld [vmem:[%s1139_s1 + $0x38] sm:$0xff] (!%p240_p3)   ;;  %v431_v18 = vld [vmem:[%s1141_s3 + $0x28] sm:$0xff] (!%p240_p3)  ;;  %v432_v20 = vld [vmem:[%s1141_s3 + $0x30] sm:$0xff] (!%p240_p3)  ;;  %v515_v53 = vsub.s32 (!%p240_p3), 0, %v514_v52 }
   0xb   : > { %851 = vmatprep.subr.bf16.mxu1 (!%p240_p3), %v959_v3  ;;  %v855_v19 = vpack.c.bf16 (!%p240_p3), %v431_v18, %v430_v17  ;;  %v433_v21 = vld [vmem:[%s1141_s3 + $0x38] sm:$0xff] (!%p240_p3)  ;;  %v434_v23 = vld [vmem:[%s1141_s3 + $0x40] sm:$0xff] (!%p240_p3)  ;;  %v435_v24 = vld [vmem:[%s1141_s3 + $0x48] sm:$0xff] (!%p240_p3) }
   0xc   : > { %761 = vmatpush3.bf16.msra.mxu0 (!%p240_p3), %v924_v2  ;;  %v858_v22 = vpack.c.bf16 (!%p240_p3), %v433_v21, %v432_v20  ;;  %v861_v25 = vpack.c.bf16 (!%p240_p3), %v435_v24, %v434_v23  ;;  %v436_v26 = vld [vmem:[%s1141_s3 + $0x50] sm:$0xff] (!%p240_p3)  ;;  %v437_v27 = vld [vmem:[%s1141_s3 + $0x58] sm:$0xff] (!%p240_p3)  ;;  %v438_v29 = vld [vmem:[%s1141_s3 + $0x60] sm:$0xff] (!%p240_p3) }
   0xd   : > { %762 = vmatprep.subr.bf16.mxu0 (!%p240_p3), %v957_v1  ;;  %v864_v28 = vpack.c.bf16 (!%p240_p3), %v437_v27, %v436_v26  ;;  %v439_v30 = vld [vmem:[%s1141_s3 + $0x68] sm:$0xff] (!%p240_p3)  ;;  %v440_v32 = vld [vmem:[%s1141_s3 + $0x70] sm:$0xff] (!%p240_p3)  ;;  %v441_v33 = vld [vmem:[%s1141_s3 + $0x78] sm:$0xff] (!%p240_p3) }
   0xe   : > { %853 = vmatpush3.bf16.msra.mxu1 %v852_v11  ;;  %s1150_s21 = smov (!%p275_p4, %s947_s21), 1  ;;  %v867_v31 = vpack.c.bf16 %v439_v30, %v438_v29  ;;  %v870_v34 = vpack.c.bf16 %v441_v33, %v440_v32  ;;  %v298_v35 = vld [vmem:[#allocation2] sm:$0xf]  ;;  %v711_v41 = vld [vmem:[%s1140_s2] ss:$0 sm:$0xff] }
   0xf   : > { %854 = vmatprep.subr.bf16.mxu1 %v959_v3  ;;  %s701_s27 = sshll.u32 %s1150_s21, 1  ;;  %s702_s17 = sshll.u32 %s1150_s21, 2 }
  0x10   : > { %763 = vmatpush3.bf16.msra.mxu0 %v925_v4  ;;  %s281_s8 = scalar_lea.vmem %s1138_s0, %s701_s27  ;;  %s291_s26 = scalar_lea.vmem %s1144_s6, %s702_s17 }
  0x11   : > { %764 = vmatprep.subr.bf16.mxu0 %v957_v1  ;;  %v299_v16 = vld [vmem:[%s281_s8] sm:$0x3] }
  0x12   : > { %856 = vmatpush3.bf16.msra.mxu1 %v855_v19 }
  0x13   : > { %857 = vmatprep.subr.bf16.mxu1 %v959_v3 }
  0x14   : > { %765 = vmatpush3.bf16.msra.mxu0 %v926_v10 }
  0x15   : > { %766 = vmatprep.subr.bf16.mxu0 %v957_v1 }
  0x16   : > { %859 = vmatpush3.bf16.msra.mxu1 %v858_v22 }
  0x17   : > { %860 = vmatprep.subr.bf16.mxu1 %v959_v3 }
  0x18   : > { %767 = vmatpush3.bf16.msra.mxu0 %v927_v12 }
  0x19   : > { %768 = vmatprep.subr.bf16.mxu0 %v957_v1 }
  0x1a   : > { %862 = vmatpush3.bf16.msra.mxu1 %v861_v25 }
  0x1b   : > { %863 = vmatprep.subr.bf16.mxu1 %v959_v3 }
  0x1c   : > { %769 = vmatpush3.bf16.msra.mxu0 %v928_v13 }
  0x1d   : > { %770 = vmatprep.subr.bf16.mxu0 %v957_v1 }
  0x1e   : > { %865 = vmatpush3.bf16.msra.mxu1 %v864_v28 }
  0x1f   : > { %866 = vmatprep.subr.bf16.mxu1 %v959_v3 }
  0x20   : > { %771 = vmatpush3.bf16.msra.mxu0 %v929_v14 }
  0x21   : > { %772 = vmatprep.subr.bf16.mxu0 %v957_v1 }
  0x22   : > { %868 = vmatpush3.bf16.msra.mxu1 %v867_v31 }
  0x23   : > { %869 = vmatprep.subr.bf16.mxu1 %v959_v3 }
  0x24   : > { %773 = vmatpush3.bf16.msra.mxu0 %v930_v15 }
  0x25   : > { %872 = vmatprep.subr.bf16.mxu0 %v959_v3 }
  0x26   : > { %871 = vmatpush3.bf16.msra.mxu1 %v870_v34 }
  0x27   : > { %775 = vmatmul.mubr.bf16.vlgmr.msra.gmra.mrb[0].mxu0 %v299_v16 }
  0x28   : > { %874 = vmatpush3.bf16.msra.mxu0 %v849_v7  ;;  %845 = vmatprep.mubr.msk.f32.mxu0 %vm958_vm0, %v957_v1  ;;  %v599_v7 = vld [vmem:[%s1142_s4] sm:$0x1] }
  0x29   : > { %875 = vmatprep.subr.bf16.mxu0 %v959_v3 }
  0x2c   : > { %877 = vmatpush3.bf16.msra.mxu0 %v852_v11  ;;  %v712_v11 = vld [vmem:[%s1143_s5] ss:$0 sm:$0xff] }
  0x2d   : > { %878 = vmatprep.subr.bf16.mxu0 %v959_v3 }
  0x30   : > { %880 = vmatpush3.bf16.msra.mxu0 %v855_v19 }
  0x31   : > { %881 = vmatprep.subr.bf16.mxu0 %v959_v3 }
  0x34   : > { %883 = vmatpush3.bf16.msra.mxu0 %v858_v22 }
  0x35   : > { %884 = vmatprep.subr.bf16.mxu0 %v959_v3 }
  0x38   : > { %886 = vmatpush3.bf16.msra.mxu0 %v861_v25 }
  0x39   : > { %887 = vmatprep.subr.bf16.mxu0 %v959_v3 }
  0x3c   : > { %889 = vmatpush3.bf16.msra.mxu0 %v864_v28 }
  0x3d   : > { %890 = vmatprep.subr.bf16.mxu0 %v959_v3 }
  0x40   : > { %892 = vmatpush3.bf16.msra.mxu0 %v867_v31 }
  0x41   : > { %893 = vmatprep.subr.bf16.mxu0 %v959_v3 }
  0x44   : > { %895 = vmatpush3.bf16.msra.mxu0 %v870_v34 }
  0xfa   : > { %v398_v36 = vpop.f32.mrb[0].mxu0 }
  0xfb   : > { %v404_v37 = vadd.f32 %v398_v36, %v298_v35  ;;  %v776_v38 = vpop.f32.mrb[1].mxu0 }
  0xfc   : > { %v401_v39 = vpop.f32.mrb[2].mxu0 }
  0xfd   : > { %405 = vst [vmem:[#allocation2] sm:$0xf] %v404_v37  ;;  %v777_v40 = vpop.f32.mrb[3].mxu0 }
 0x104   : > { %v409_v42 = vld [vmem:[#allocation2] sm:$0xf] }
 0x105   : > { %v417_v43 = vadd.f32 %v711_v41, %v409_v42 }
 0x107   : > { %v419_v44 = vsel %vm418_vm1, %v417_v43, 0.0 }
 0x108   : > { %v420_v45 = vrot.slane %v419_v44, 4 }
 0x10a   : > { %v421_v46 = vadd.f32 %v420_v45, %v419_v44 }
 0x10c   : > { %v422_v47 = vrot.slane %v421_v46, 2 }
 0x10e   : > { %v423_v48 = vadd.f32 %v422_v47, %v421_v46 }
 0x110   : > { %v424_v49 = vrot.slane %v423_v48, 1 }
 0x112   : > { %v425_v50 = vadd.f32 %v424_v49, %v423_v48 }
 0x114   : > { %811 = vmatmul.mubr.f32.vlgmr.msra.gmra.mrb[0].mxu1 %v425_v50 }
 0x1e7   : > { %v508_v54 = vpop.f32.mrb[0].mxu1 }
 0x1e8   : > { %v512_v55 = vmul.f32 0.03125, %v508_v54  ;;  %v812_v56 = vpop.f32.mrb[1].mxu1 }
 0x1ea   : > { %v516_v57 = vrot.slane %v512_v55, %v515_v53 }
 0x1ec   : > { %v517_v58 = vsub.f32 %v417_v43, %v516_v57 }
 0x1ee   : > { %v518_v59 = vmul.f32 %v517_v58, %v517_v58 }
 0x1f0   : > { %v519_v60 = vsel %vm418_vm1, %v518_v59, 0.0 }
 0x1f1   : > { %v520_v61 = vrot.slane %v519_v60, 4 }
 0x1f3   : > { %v521_v62 = vadd.f32 %v520_v61, %v519_v60 }
 0x1f5   : > { %v522_v63 = vrot.slane %v521_v62, 2 }
 0x1f7   : > { %v523_v0 = vadd.f32 %v522_v63, %v521_v62 }
 0x1f9   : > { %v524_v1 = vrot.slane %v523_v0, 1 }
 0x1fb   : > { %v525_v2 = vadd.f32 %v524_v1, %v523_v0 }
 0x1fd   : > { %846 = vmatmul.mubr.f32.vlgmr.msra.gmra.mrb[4].mxu0 %v525_v2 }
 0x2d0   : > { %v592_v3 = vpop.f32.mrb[4].mxu0 }
 0x2d1   : > { %v596_v4 = vmul.f32 0.03125, %v592_v3  ;;  %v847_v5 = vpop.f32.mrb[5].mxu0 }
 0x2d3   : > { %v597_v6 = vadd.f32 1e-05, %v596_v4 }
 0x2d5   : > { %931 = vrsqrt.f32 %v597_v6 }
 0x2df   : > { %v932_v8 = vpop.eup %931 }
 0x2e0   : > { %v600_v9 = vmul.f32 %v932_v8, %v599_v7 }
 0x2e2   : > { %v604_v10 = vrot.slane %v600_v9, %v515_v53 }
 0x2e4   : > { %v605_v12 = vmul.f32 %v604_v10, %v517_v58 }
 0x2e6   : > { %v613_v13 = vadd.f32 %v712_v11, %v605_v12 }
 0x2e8   : > { %614 = vst [vmem:[%s291_s26] sm:$0xf] %v613_v13 }
 0x2e9 PF: > { %s16_s23 = sadd.s32 1, %s955_s23   ;;  %s1145_s21 = smov %s951_s22 }
 0x2ea   : > { %p13_p5 = scmp.ge.s32.totalorder %s16_s23, 4   ;;  %s1146_s22 = smov %s1148_s24 }
 0x2ec   :  { %15 = sbr.rel (!%p13_p5) target bundleno = 2 (0x2), region = 85 }

// kernel: unet_extractor_forward.29
= control target key start
LH: loop header
LB: loop body
LE: loop exit
PB: predicated region body
PF: predicated region fallthrough
CT: control target
= control target key end

     0   :  { %s2021_s24 = smov 0   ;;  %s2023_s25 = smov 0   ;;  %s2370_s0 = inlined_call_operand.vmem [shape: bf16[2,4,1152], index: 0, kind: input, shape index: {}]   ;;  %s2371_s1 = inlined_call_operand.vmem [shape: bf16[1152,128], index: 1, kind: input, shape index: {}]   ;;  %s2372_s2 = inlined_call_operand.vmem [shape: f32[1,128], index: 2, kind: input, shape index: {}, may-alias: {2,5}]   ;;  %s2373_s3 = inlined_call_operand.vmem [shape: f32[128,128], index: 3, kind: input, shape index: {}]   ;;  %s2374_s4 = inlined_call_operand.vmem [shape: f32[1,128], index: 4, kind: input, shape index: {}]   ;;  %s2375_s5 = inlined_call_operand.vmem [shape: f32[1,128], index: 5, kind: input, shape index: {}, may-alias: {2,5}]   ;;  %s2376_s6 = inlined_call_operand.vmem [shape: f32[2,4,128], index: 6, kind: input, shape index: {}]   ;;  %s2377_s7 = inlined_call_operand.vmem [shape: f32[2,4,128], index: 7, kind: output, shape index: {}]  }
   0x1   :  { %s2025_s26 = smov 0  }
   0x2 LB: > { %s29_s27 = sadd.s32 1, %s1971_s25  ;;  %p1498_p0 = scmp.ge.s32.totalorder %s1975_s26, 1  ;;  %s1975_s26 = sphi %s2025_s26, %s17_s26   ;;  %s1971_s25 = sphi %s2023_s25, %s2379_s25   ;;  %s1967_s24 = sphi %s2021_s24, %s2378_s24  }
   0x3   : > { %p31_p1 = scmp.ge.s32.totalorder %s29_s27, 2  ;;  %p276_p2 = scmp.lt.s32.totalorder %s1975_s26, 3 }
   0x5   : > { %s2381_s27 = smov (%p31_p1, %s29_s27), 0  ;;  %p277_p3 = pnand %p1498_p0, %p276_p2 }
   0x6   : > { %v1877_v0 = vld [vmem:[%s2371_s1 + $0x40] sm:$0xff] (!%p277_p3)   ;;  %v1977_v3 = vmov (!%p277_p3), 0.0   ;;  %v1881_v5 = vld [vmem:[%s2371_s1 + $0x48] sm:$0xff] (!%p277_p3)   ;;  %v1885_v9 = vld [vmem:[%s2371_s1 + $0x50] sm:$0xff] (!%p277_p3)   ;;  %p321_p4 = scmp.lt.s32.totalorder (!%p277_p3), %s1967_s24, 1  ;;  %v505_v30 = vlaneseq (!%p277_p3)  ;;  %vm1979_vm0 = vmmov (!%p277_p3), 0  }
   0x7   : > { %280 = sbr.rel (%p277_p3) target bundleno = 818 (0x332), region = 48  ;;  %v1878_v1 = vld [vmem:[%s2371_s1 + $0xc0] sm:$0xff] (!%p277_p3)   ;;  %1579 = vmatprep.subr.bf16.mxu0 (!%p277_p3), %v1877_v0  ;;  %349 = vst [vmem:[#allocation2] sm:$0xf] (!%p277_p3), %v1977_v3  ;;  %v1882_v6 = vld [vmem:[%s2371_s1 + $0xc8] sm:$0xff] (!%p277_p3)   ;;  %v1886_v10 = vld [vmem:[%s2371_s1 + $0xd0] sm:$0xff] (!%p277_p3)  }
   0x8   : > { %v1879_v2 = vld [vmem:[%s2371_s1] sm:$0xff] (!%p277_p3)   ;;  %1601 = vmatprep.subr.bf16.mxu1 (!%p277_p3), %v1878_v1  ;;  %v1883_v7 = vld [vmem:[%s2371_s1 + $0x8] sm:$0xff] (!%p277_p3)   ;;  %v1887_v11 = vld [vmem:[%s2371_s1 + $0x10] sm:$0xff] (!%p277_p3)   ;;  %v2149_v35 = vshrl.u32 (!%p277_p3), %v505_v30, 7  ;;  %v1978_v37 = vmov (!%p277_p3), 1983009808  }
   0x9   : > { %v1880_v4 = vld [vmem:[%s2371_s1 + $0x80] sm:$0xff] (!%p277_p3)   ;;  %1580 = vmatpush3.bf16.msra.mxu0 (!%p277_p3), %v1879_v2  ;;  %v1884_v8 = vld [vmem:[%s2371_s1 + $0x88] sm:$0xff] (!%p277_p3)   ;;  %v1888_v12 = vld [vmem:[%s2371_s1 + $0x90] sm:$0xff] (!%p277_p3)   ;;  %v503_v38 = vunpack.c.l.s4 (!%p277_p3), %v1978_v37  ;;  %vm1197_vm1 = vcmask (!%p277_p3), 1043456  }
   0xa   : > { %1602 = vmatpush3.bf16.msra.mxu1 (!%p277_p3), %v1880_v4  ;;  %1581 = vmatprep.subr.bf16.mxu0 (!%p277_p3), %v1881_v5  ;;  %v1889_v13 = vld [vmem:[%s2371_s1 + $0x58] sm:$0xff] (!%p277_p3)   ;;  %v1893_v17 = vld [vmem:[%s2371_s1 + $0x60] sm:$0xff] (!%p277_p3)   ;;  %v1897_v21 = vld [vmem:[%s2371_s1 + $0x68] sm:$0xff] (!%p277_p3)  }
   0xb   : > { %1603 = vmatprep.subr.bf16.mxu1 (!%p277_p3), %v1882_v6  ;;  %v1890_v14 = vld [vmem:[%s2371_s1 + $0xd8] sm:$0xff] (!%p277_p3)   ;;  %v1894_v18 = vld [vmem:[%s2371_s1 + $0xe0] sm:$0xff] (!%p277_p3)   ;;  %v1898_v22 = vld [vmem:[%s2371_s1 + $0xe8] sm:$0xff] (!%p277_p3)   ;;  %v504_v39 = vunpack.c.0.s8 (!%p277_p3), %v503_v38 }
   0xc   : > { %v1891_v15 = vld [vmem:[%s2371_s1 + $0x18] sm:$0xff] (!%p277_p3)   ;;  %v1895_v19 = vld [vmem:[%s2371_s1 + $0x20] sm:$0xff] (!%p277_p3)   ;;  %v1899_v23 = vld [vmem:[%s2371_s1 + $0x28] sm:$0xff] (!%p277_p3)  }
   0xd   : > { %1582 = vmatpush3.bf16.msra.mxu0 (!%p277_p3), %v1883_v7  ;;  %v1892_v16 = vld [vmem:[%s2371_s1 + $0x98] sm:$0xff] (!%p277_p3)   ;;  %v1896_v20 = vld [vmem:[%s2371_s1 + $0xa0] sm:$0xff] (!%p277_p3)   ;;  %v1900_v24 = vld [vmem:[%s2371_s1 + $0xa8] sm:$0xff] (!%p277_p3)   ;;  %v2158_v42 = vsub.s32 (!%p277_p3), %v504_v39, %v2149_v35 }
   0xe   : > { %1604 = vmatpush3.bf16.msra.mxu1 %v1884_v8  ;;  %1583 = vmatprep.subr.bf16.mxu0 %v1885_v9  ;;  %s2383_s24 = smov (!%p321_p4, %s1967_s24), 1  ;;  %v1901_v25 = vld [vmem:[%s2371_s1 + $0x70] sm:$0xff]   ;;  %v1905_v29 = vld [vmem:[%s2371_s1 + $0x78] sm:$0xff]   ;;  %v1910_v36 = vld [vmem:[%s2371_s1 + $0x140] sm:$0xff]  }
   0xf   : > { %1605 = vmatprep.subr.bf16.mxu1 %v1886_v10  ;;  %v1902_v26 = vld [vmem:[%s2371_s1 + $0xf0] sm:$0xff]   ;;  %s1848_s19 = smul.u32 18, %s2383_s24  ;;  %v1906_v31 = vld [vmem:[%s2371_s1 + $0xf8] sm:$0xff]   ;;  %v1912_v41 = vld [vmem:[%s2371_s1 + $0x1c0] sm:$0xff]   ;;  %s1500_s22 = sshll.u32 %s2383_s24, 2 }
  0x10   : > { %v1903_v27 = vld [vmem:[%s2371_s1 + $0x30] sm:$0xff]   ;;  %v1907_v32 = vld [vmem:[%s2371_s1 + $0x38] sm:$0xff]   ;;  %v1911_v45 = vld [vmem:[%s2371_s1 + $0x100] sm:$0xff]   ;;  %s339_s8 = scalar_lea.vmem %s2376_s6, %s1500_s22  ;;  %s343_s10 = scalar_lea.vmem %s2377_s7, %s1500_s22 }
  0x11   : > { %1584 = vmatpush3.bf16.msra.mxu0 %v1887_v11  ;;  %v1904_v28 = vld [vmem:[%s2371_s1 + $0xb0] sm:$0xff]   ;;  %s2140_s11 = scalar_lea.vmem %s2370_s0, %s1848_s19  ;;  %v1908_v33 = vld [vmem:[%s2371_s1 + $0xb8] sm:$0xff]   ;;  %v1913_v46 = vld [vmem:[%s2371_s1 + $0x180] sm:$0xff]  }
  0x12   : > { %1606 = vmatpush3.bf16.msra.mxu1 %v1888_v12  ;;  %1585 = vmatprep.subr.bf16.mxu0 %v1889_v13  ;;  %v351_v34 = vld [vmem:[%s2140_s11] sm:$0xff]  ;;  %v1914_v49 = vld [vmem:[%s2371_s1 + $0x148] sm:$0xff]   ;;  %v1918_v53 = vld [vmem:[%s2371_s1 + $0x150] sm:$0xff]  }
  0x13   : > { %1607 = vmatprep.subr.bf16.mxu1 %v1890_v14  ;;  %v501_v40 = vcombine.high %v351_v34, %v351_v34  ;;  %v508_v43 = vrot.slane %v351_v34, %v2158_v42  ;;  %v1916_v50 = vld [vmem:[%s2371_s1 + $0x1c8] sm:$0xff]   ;;  %v1920_v54 = vld [vmem:[%s2371_s1 + $0x1d0] sm:$0xff]   ;;  %v1922_v57 = vld [vmem:[%s2371_s1 + $0x158] sm:$0xff]  }
  0x14   : > { %v1915_v51 = vld [vmem:[%s2371_s1 + $0x108] sm:$0xff]   ;;  %v1919_v55 = vld [vmem:[%s2371_s1 + $0x110] sm:$0xff]   ;;  %v1924_v58 = vld [vmem:[%s2371_s1 + $0x1d8] sm:$0xff]  }
  0x15   : > { %1586 = vmatpush3.bf16.msra.mxu0 %v1891_v15  ;;  %v515_v44 = vrot.slane %v501_v40, %v2158_v42  ;;  %v516_v47 = vcombine.high %v508_v43, %v508_v43  ;;  %v1917_v52 = vld [vmem:[%s2371_s1 + $0x188] sm:$0xff]   ;;  %v1921_v56 = vld [vmem:[%s2371_s1 + $0x190] sm:$0xff]   ;;  %v1923_v59 = vld [vmem:[%s2371_s1 + $0x118] sm:$0xff]  }
  0x16   : > { %1608 = vmatpush3.bf16.msra.mxu1 %v1892_v16  ;;  %1587 = vmatprep.subr.bf16.mxu0 %v1893_v17  ;;  %v1925_v60 = vld [vmem:[%s2371_s1 + $0x198] sm:$0xff]   ;;  %v1926_v61 = vld [vmem:[%s2371_s1 + $0x160] sm:$0xff]   ;;  %v1930_v1 = vld [vmem:[%s2371_s1 + $0x168] sm:$0xff]  }
  0x17   : > { %1609 = vmatprep.subr.bf16.mxu1 %v1894_v18  ;;  %v517_v48 = vcombine.high %v515_v44, %v515_v44  ;;  %1015 = vmatprep.mubr.bf16.mxu0 %v516_v47  ;;  %v1928_v62 = vld [vmem:[%s2371_s1 + $0x1e0] sm:$0xff]   ;;  %v1932_v2 = vld [vmem:[%s2371_s1 + $0x1e8] sm:$0xff]   ;;  %v1934_v6 = vld [vmem:[%s2371_s1 + $0x170] sm:$0xff]  }
  0x18   : > { %v1927_v63 = vld [vmem:[%s2371_s1 + $0x120] sm:$0xff]   ;;  %v1931_v4 = vld [vmem:[%s2371_s1 + $0x128] sm:$0xff]   ;;  %v1936_v7 = vld [vmem:[%s2371_s1 + $0x1f0] sm:$0xff]  }
  0x19   : > { %1588 = vmatpush3.bf16.msra.mxu0 %v1895_v19  ;;  %1055 = vmatprep.mubr.bf16.mxu1 %v517_v48  ;;  %v1929_v0 = vld [vmem:[%s2371_s1 + $0x1a0] sm:$0xff]   ;;  %v1933_v5 = vld [vmem:[%s2371_s1 + $0x1a8] sm:$0xff]   ;;  %v1935_v8 = vld [vmem:[%s2371_s1 + $0x130] sm:$0xff]  }
  0x1a   : > { %1610 = vmatpush3.bf16.msra.mxu1 %v1896_v20  ;;  %1589 = vmatprep.subr.bf16.mxu0 %v1897_v21  ;;  %v352_v9 = vld [vmem:[%s2140_s11 + $0x8] sm:$0xff]  ;;  %v1937_v10 = vld [vmem:[%s2371_s1 + $0x1b0] sm:$0xff]   ;;  %v1938_v13 = vld [vmem:[%s2371_s1 + $0x178] sm:$0xff]  }
  0x1b   : > { %1611 = vmatprep.subr.bf16.mxu1 %v1898_v22  ;;  %v525_v11 = vrot.slane %v352_v9, %v2158_v42  ;;  %v518_v12 = vcombine.high %v352_v9, %v352_v9  ;;  %v1940_v14 = vld [vmem:[%s2371_s1 + $0x1f8] sm:$0xff]   ;;  %v1943_v20 = vld [vmem:[%s2371_s1 + $0x200] sm:$0xff]   ;;  %v1944_v21 = vld [vmem:[%s2371_s1 + $0x208] sm:$0xff]  }
  0x1c   : > { %v1939_v17 = vld [vmem:[%s2371_s1 + $0x138] sm:$0xff]   ;;  %v1945_v22 = vld [vmem:[%s2371_s1 + $0x210] sm:$0xff]   ;;  %v1206_v30 = vld [vmem:[%s2373_s3 + $0x8] sm:$0xff] }
  0x1d   : > { %1590 = vmatpush3.bf16.msra.mxu0 %v1899_v23  ;;  %v533_v15 = vcombine.high %v525_v11, %v525_v11  ;;  %v532_v16 = vrot.slane %v518_v12, %v2158_v42  ;;  %v1941_v19 = vld [vmem:[%s2371_s1 + $0x1b8] sm:$0xff]   ;;  %v1210_v37 = vld [vmem:[%s2373_s3 + $0x28] sm:$0xff]  ;;  %v1211_v39 = vld [vmem:[%s2373_s3 + $0x30] sm:$0xff] }
  0x1e   : > { %1612 = vmatpush3.bf16.msra.mxu1 %v1900_v24  ;;  %1591 = vmatprep.subr.bf16.mxu0 %v1901_v25  ;;  %v1946_v23 = vld [vmem:[%s2371_s1 + $0x218] sm:$0xff]   ;;  %v1947_v24 = vld [vmem:[%s2371_s1 + $0x220] sm:$0xff]   ;;  %v1948_v25 = vld [vmem:[%s2371_s1 + $0x228] sm:$0xff]  }
  0x1f   : > { %1613 = vmatprep.subr.bf16.mxu1 %v1902_v26  ;;  %v534_v18 = vcombine.high %v532_v16, %v532_v16  ;;  %v1949_v26 = vld [vmem:[%s2371_s1 + $0x230] sm:$0xff]   ;;  %v1212_v40 = vld [vmem:[%s2373_s3 + $0x38] sm:$0xff]  ;;  %v1213_v42 = vld [vmem:[%s2373_s3 + $0x40] sm:$0xff] }
  0x20   : > { %v1217_v48 = vld [vmem:[%s2373_s3 + $0x60] sm:$0xff] }
  0x21   : > { %1592 = vmatpush3.bf16.msra.mxu0 %v1903_v27  ;;  %v1950_v27 = vld [vmem:[%s2371_s1 + $0x238] sm:$0xff]  }
  0x22   : > { %1614 = vmatpush3.bf16.msra.mxu1 %v1904_v28  ;;  %1593 = vmatprep.subr.bf16.mxu0 %v1905_v29  ;;  %v1502_v28 = vld.sshfl [vmem:[%s2140_s11 + $0x10] sm:$0x3 pattern:$0x76325410]  ;;  %v1205_v29 = vld [vmem:[%s2373_s3] sm:$0xff] }
  0x23   : > { %1615 = vmatprep.subr.bf16.mxu1 %v1906_v31  ;;  %v1980_v31 = vmov 0.0|0.0  }
  0x25   : > { %1594 = vmatpush3.bf16.msra.mxu0 %v1907_v32  ;;  %v1801_v32 = vpack.c.bf16 %v1206_v30, %v1205_v29 }
  0x26   : > { %1616 = vmatpush3.bf16.msra.mxu1 %v1908_v33  ;;  %1623 = vmatprep.subr.bf16.mxu0 %v1910_v36  ;;  %v1208_v33 = vld [vmem:[%s2373_s3 + $0x18] sm:$0xff]  ;;  %v1209_v36 = vld [vmem:[%s2373_s3 + $0x20] sm:$0xff] }
  0x27   : > { %1645 = vmatprep.subr.bf16.mxu1 %v1912_v41  ;;  %v1807_v38 = vpack.c.bf16 %v1210_v37, %v1209_v36  ;;  %v1810_v41 = vpack.c.bf16 %v1212_v40, %v1211_v39 }
  0x28   : > { %1016 = vmatmul.mubr.bf16.vlgmr.msra.gmra.mrb[0].mxu0 %v508_v43  ;;  %v1214_v43 = vld [vmem:[%s2373_s3 + $0x48] sm:$0xff] }
  0x29   : > { %1056 = vmatmul.mubr.bf16.vlgmr.msra.gmra.mrb[0].mxu1 %v515_v44  ;;  %1624 = vmatpush3.bf16.msra.mxu0 %v1911_v45  ;;  %v1813_v44 = vpack.c.bf16 %v1214_v43, %v1213_v42  ;;  %v1215_v45 = vld [vmem:[%s2373_s3 + $0x50] sm:$0xff] }
  0x2a   : > { %1646 = vmatpush3.bf16.msra.mxu1 %v1913_v46  ;;  %1625 = vmatprep.subr.bf16.mxu0 %v1914_v49  ;;  %v1216_v46 = vld [vmem:[%s2373_s3 + $0x58] sm:$0xff]  ;;  %v1218_v49 = vld [vmem:[%s2373_s3 + $0x68] sm:$0xff] }
  0x2b   : > { %1647 = vmatprep.subr.bf16.mxu1 %v1916_v50  ;;  %1095 = vmatprep.mubr.bf16.mxu0 %v533_v15  ;;  %v1816_v47 = vpack.c.bf16 %v1216_v46, %v1215_v45  ;;  %v1819_v50 = vpack.c.bf16 %v1218_v49, %v1217_v48  ;;  %v1378_v48 = vld [vmem:[%s2374_s4] sm:$0x1] }
  0x2c   : > { %1135 = vmatprep.mubr.bf16.mxu1 %v534_v18 }
  0x2d   : > { %1626 = vmatpush3.bf16.msra.mxu0 %v1915_v51  ;;  %v1219_v51 = vld [vmem:[%s2373_s3 + $0x70] sm:$0xff] }
  0x2e   : > { %1648 = vmatpush3.bf16.msra.mxu1 %v1917_v52  ;;  %1627 = vmatprep.subr.bf16.mxu0 %v1918_v53  ;;  %v1220_v52 = vld [vmem:[%s2373_s3 + $0x78] sm:$0xff] }
  0x2f   : > { %1649 = vmatprep.subr.bf16.mxu1 %v1920_v54  ;;  %v1822_v53 = vpack.c.bf16 %v1220_v52, %v1219_v51  ;;  %v1576_v52 = vld [vmem:[%s2375_s5] ss:$0 sm:$0xff] }
  0x31   : > { %1628 = vmatpush3.bf16.msra.mxu0 %v1919_v55 }
  0x32   : > { %1650 = vmatpush3.bf16.msra.mxu1 %v1921_v56  ;;  %1629 = vmatprep.subr.bf16.mxu0 %v1922_v57 }
  0x33   : > { %1651 = vmatprep.subr.bf16.mxu1 %v1924_v58 }
  0x35   : > { %1630 = vmatpush3.bf16.msra.mxu0 %v1923_v59 }
  0x36   : > { %1652 = vmatpush3.bf16.msra.mxu1 %v1925_v60  ;;  %1631 = vmatprep.subr.bf16.mxu0 %v1926_v61 }
  0x37   : > { %1653 = vmatprep.subr.bf16.mxu1 %v1928_v62 }
  0x39   : > { %1632 = vmatpush3.bf16.msra.mxu0 %v1927_v63 }
  0x3a   : > { %1654 = vmatpush3.bf16.msra.mxu1 %v1929_v0  ;;  %1633 = vmatprep.subr.bf16.mxu0 %v1930_v1 }
  0x3b   : > { %1655 = vmatprep.subr.bf16.mxu1 %v1932_v2 }
  0x3d   : > { %1634 = vmatpush3.bf16.msra.mxu0 %v1931_v4 }
  0x3e   : > { %1656 = vmatpush3.bf16.msra.mxu1 %v1933_v5  ;;  %1635 = vmatprep.subr.bf16.mxu0 %v1934_v6 }
  0x3f   : > { %1657 = vmatprep.subr.bf16.mxu1 %v1936_v7 }
  0x41   : > { %1636 = vmatpush3.bf16.msra.mxu0 %v1935_v8 }
  0x42   : > { %1658 = vmatpush3.bf16.msra.mxu1 %v1937_v10  ;;  %1637 = vmatprep.subr.bf16.mxu0 %v1938_v13 }
  0x43   : > { %1659 = vmatprep.subr.bf16.mxu1 %v1940_v14  ;;  %v350_v14 = vld [vmem:[#allocation2] sm:$0xf] }
  0x45   : > { %1638 = vmatpush3.bf16.msra.mxu0 %v1939_v17 }
  0x46   : > { %1660 = vmatpush3.bf16.msra.mxu1 %v1941_v19  ;;  %1710 = vmatprep.subr.bf16.mxu0 %v1977_v3 }
  0x47   : > { %1800 = vmatprep.subr.bf16.mxu1 %v1980_v31 }
  0x48   : > { %1096 = vmatmul.mubr.bf16.vlgmr.msra.gmra.mrb[4].mxu0 %v525_v11 }
  0x49   : > { %1136 = vmatmul.mubr.bf16.vlgmr.msra.gmra.mrb[4].mxu1 %v532_v16  ;;  %1711 = vmatpush3.bf16.msra.mxu0 %v1943_v20 }
  0x4a   : > { %1726 = vmatprep.mubr.msk.bf16.mxu0 %vm1979_vm0, %v1977_v3  ;;  %1712 = vmatprep.subr.bf16.mxu0 %v1977_v3 }
  0x4b   : > { %1762 = vmatprep.mubr.msk.f32.mxu1 %vm1979_vm0, %v1977_v3  ;;  %1802 = vmatpush3.bf16.msra.mxu1 %v1801_v32 }
  0x4c   : > { %1803 = vmatprep.subr.bf16.mxu1 %v1980_v31 }
  0x4d   : > { %1713 = vmatpush3.bf16.msra.mxu0 %v1944_v21  ;;  %v1575_v21 = vld [vmem:[%s2372_s2] ss:$0 sm:$0xff] }
  0x4e   : > { %1714 = vmatprep.subr.bf16.mxu0 %v1977_v3 }
  0x51   : > { %1715 = vmatpush3.bf16.msra.mxu0 %v1945_v22 }
  0x52   : > { %1716 = vmatprep.subr.bf16.mxu0 %v1977_v3 }
  0x55   : > { %1717 = vmatpush3.bf16.msra.mxu0 %v1946_v23 }
  0x56   : > { %1718 = vmatprep.subr.bf16.mxu0 %v1977_v3 }
  0x59   : > { %1719 = vmatpush3.bf16.msra.mxu0 %v1947_v24 }
  0x5a   : > { %1720 = vmatprep.subr.bf16.mxu0 %v1977_v3 }
  0x5d   : > { %1721 = vmatpush3.bf16.msra.mxu0 %v1948_v25 }
  0x5e   : > { %1722 = vmatprep.subr.bf16.mxu0 %v1977_v3 }
  0x61   : > { %1723 = vmatpush3.bf16.msra.mxu0 %v1949_v26 }
  0x62   : > { %1724 = vmatprep.subr.bf16.mxu0 %v1977_v3 }
  0x65   : > { %1725 = vmatpush3.bf16.msra.mxu0 %v1950_v27 }
  0x66   : > { %1824 = vmatprep.subr.bf16.mxu0 %v1980_v31 }
  0x68   : > { %1727 = vmatmul.mubr.bf16.vlgmr.msra.gmra.mrb[8].mxu0 %v1502_v28 }
  0x69   : > { %1797 = vmatprep.mubr.msk.f32.mxu0 %vm1979_vm0, %v1977_v3  ;;  %1826 = vmatpush3.bf16.msra.mxu0 %v1801_v32  ;;  %v1207_v3 = vld [vmem:[%s2373_s3 + $0x10] sm:$0xff] }
  0x6a   : > { %1827 = vmatprep.subr.bf16.mxu0 %v1980_v31  ;;  %v1804_v34 = vpack.c.bf16 %v1208_v33, %v1207_v3 }
  0x6c   : > { %1805 = vmatpush3.bf16.msra.mxu1 %v1804_v34 }
  0x6d   : > { %1829 = vmatpush3.bf16.msra.mxu0 %v1804_v34  ;;  %1806 = vmatprep.subr.bf16.mxu1 %v1980_v31 }
  0x6e   : > { %1830 = vmatprep.subr.bf16.mxu0 %v1980_v31 }
  0x70   : > { %1808 = vmatpush3.bf16.msra.mxu1 %v1807_v38 }
  0x71   : > { %1832 = vmatpush3.bf16.msra.mxu0 %v1807_v38  ;;  %1809 = vmatprep.subr.bf16.mxu1 %v1980_v31 }
  0x72   : > { %1833 = vmatprep.subr.bf16.mxu0 %v1980_v31 }
  0x74   : > { %1811 = vmatpush3.bf16.msra.mxu1 %v1810_v41 }
  0x75   : > { %1835 = vmatpush3.bf16.msra.mxu0 %v1810_v41  ;;  %1812 = vmatprep.subr.bf16.mxu1 %v1980_v31 }
  0x76   : > { %1836 = vmatprep.subr.bf16.mxu0 %v1980_v31 }
  0x78   : > { %1814 = vmatpush3.bf16.msra.mxu1 %v1813_v44 }
  0x79   : > { %1838 = vmatpush3.bf16.msra.mxu0 %v1813_v44  ;;  %1815 = vmatprep.subr.bf16.mxu1 %v1980_v31 }
  0x7a   : > { %1839 = vmatprep.subr.bf16.mxu0 %v1980_v31 }
  0x7c   : > { %1817 = vmatpush3.bf16.msra.mxu1 %v1816_v47 }
  0x7d   : > { %1841 = vmatpush3.bf16.msra.mxu0 %v1816_v47  ;;  %1818 = vmatprep.subr.bf16.mxu1 %v1980_v31 }
  0x7e   : > { %1842 = vmatprep.subr.bf16.mxu0 %v1980_v31 }
  0x80   : > { %1820 = vmatpush3.bf16.msra.mxu1 %v1819_v50 }
  0x81   : > { %1844 = vmatpush3.bf16.msra.mxu0 %v1819_v50  ;;  %1821 = vmatprep.subr.bf16.mxu1 %v1980_v31 }
  0x82   : > { %1845 = vmatprep.subr.bf16.mxu0 %v1980_v31  ;;  %v1294_v31 = vsub.s32 0, %v2149_v35 }
  0x84   : > { %1823 = vmatpush3.bf16.msra.mxu1 %v1822_v53 }
  0x85   : > { %1847 = vmatpush3.bf16.msra.mxu0 %v1822_v53 }
  0xfb   : > { %v1595_v54 = vpop.f32.mrb[0].mxu0 }
  0xfc   : > { %v1617_v55 = vpop.f32.mrb[0].mxu1  ;;  %v1596_v56 = vpop.f32.mrb[1].mxu0 }
  0xfd   : > { %v1618_v57 = vpop.f32.mrb[1].mxu1  ;;  %v1597_v58 = vadd.f32 %v1596_v56, %v1595_v54  ;;  %v1598_v60 = vpop.f32.mrb[2].mxu0 }
  0xfe   : > { %v1619_v59 = vadd.f32 %v1618_v57, %v1617_v55  ;;  %v1620_v61 = vpop.f32.mrb[2].mxu1  ;;  %v1599_v62 = vpop.f32.mrb[3].mxu0  ;;  %v1394_v55 = vld [vmem:[%s339_s8] sm:$0xf] }
  0xff   : > { %v1621_v63 = vpop.f32.mrb[3].mxu1 }
 0x100   : > { %v1058_v0 = vadd.f32 %v1619_v59, %v1597_v58 }
 0x11b   : > { %v1639_v1 = vpop.f32.mrb[4].mxu0 }
 0x11c   : > { %v1661_v2 = vpop.f32.mrb[4].mxu1  ;;  %v1640_v4 = vpop.f32.mrb[5].mxu0 }
 0x11d   : > { %v1662_v5 = vpop.f32.mrb[5].mxu1  ;;  %v1641_v6 = vadd.f32 %v1640_v4, %v1639_v1  ;;  %v1642_v7 = vpop.f32.mrb[6].mxu0 }
 0x11e   : > { %v1663_v8 = vadd.f32 %v1662_v5, %v1661_v2  ;;  %v1664_v9 = vpop.f32.mrb[6].mxu1  ;;  %v1643_v10 = vpop.f32.mrb[7].mxu0 }
 0x11f   : > { %v1665_v11 = vpop.f32.mrb[7].mxu1  ;;  %v1098_v12 = vadd.f32 %v1641_v6, %v1058_v0 }
 0x121   : > { %v1138_v13 = vadd.f32 %v1663_v8, %v1098_v12 }
 0x13b   : > { %v1177_v15 = vpop.f32.mrb[8].mxu0 }
 0x13c   : > { %v1178_v16 = vadd.f32 %v1177_v15, %v1138_v13  ;;  %v1728_v17 = vpop.f32.mrb[9].mxu0 }
 0x13d   : > { %v1180_v18 = vpop.f32.mrb[10].mxu0 }
 0x13e   : > { %v1183_v19 = vadd.f32 %v1178_v16, %v350_v14  ;;  %v1729_v20 = vpop.f32.mrb[11].mxu0 }
 0x140   : > { %1184 = vst [vmem:[#allocation2] sm:$0xf] %v1183_v19 }
 0x147   : > { %v1188_v22 = vld [vmem:[#allocation2] sm:$0xf] }
 0x148   : > { %v1196_v23 = vadd.f32 %v1575_v21, %v1188_v22 }
 0x14a   : > { %v1198_v24 = vsel %vm1197_vm1, %v1196_v23, 0.0 }
 0x14b   : > { %v1199_v25 = vrot.slane %v1198_v24, 4 }
 0x14d   : > { %v1200_v26 = vadd.f32 %v1199_v25, %v1198_v24 }
 0x14f   : > { %v1201_v27 = vrot.slane %v1200_v26, 2 }
 0x151   : > { %v1202_v28 = vadd.f32 %v1201_v27, %v1200_v26 }
 0x153   : > { %v1203_v29 = vrot.slane %v1202_v28, 1 }
 0x155   : > { %v1204_v30 = vadd.f32 %v1203_v29, %v1202_v28 }
 0x157   : > { %1763 = vmatmul.mubr.f32.vlgmr.msra.gmra.mrb[8].mxu1 %v1204_v30 }
 0x22a   : > { %v1287_v32 = vpop.f32.mrb[8].mxu1 }
 0x22b   : > { %v1291_v3 = vmul.f32 0.03125, %v1287_v32  ;;  %v1764_v33 = vpop.f32.mrb[9].mxu1 }
 0x22d   : > { %v1295_v34 = vrot.slane %v1291_v3, %v1294_v31 }
 0x22f   : > { %v1296_v36 = vsub.f32 %v1196_v23, %v1295_v34 }
 0x231   : > { %v1297_v37 = vmul.f32 %v1296_v36, %v1296_v36 }
 0x233   : > { %v1298_v38 = vsel %vm1197_vm1, %v1297_v37, 0.0 }
 0x234   : > { %v1299_v39 = vrot.slane %v1298_v38, 4 }
 0x236   : > { %v1300_v40 = vadd.f32 %v1299_v39, %v1298_v38 }
 0x238   : > { %v1301_v41 = vrot.slane %v1300_v40, 2 }
 0x23a   : > { %v1302_v42 = vadd.f32 %v1301_v41, %v1300_v40 }
 0x23c   : > { %v1303_v43 = vrot.slane %v1302_v42, 1 }
 0x23e   : > { %v1304_v44 = vadd.f32 %v1303_v43, %v1302_v42 }
 0x240   : > { %1798 = vmatmul.mubr.f32.vlgmr.msra.gmra.mrb[12].mxu0 %v1304_v44 }
 0x313   : > { %v1371_v45 = vpop.f32.mrb[12].mxu0 }
 0x314   : > { %v1375_v46 = vmul.f32 0.03125, %v1371_v45  ;;  %v1799_v47 = vpop.f32.mrb[13].mxu0 }
 0x316   : > { %v1376_v35 = vadd.f32 1e-05, %v1375_v46 }
 0x318   : > { %1951 = vrsqrt.f32 %v1376_v35 }
 0x322   : > { %v1952_v49 = vpop.eup %1951 }
 0x323   : > { %v1379_v50 = vmul.f32 %v1952_v49, %v1378_v48 }
 0x325   : > { %v1383_v51 = vrot.slane %v1379_v50, %v1294_v31 }
 0x327   : > { %v1384_v53 = vmul.f32 %v1383_v51, %v1296_v36 }
 0x329   : > { %v1392_v54 = vadd.f32 %v1576_v52, %v1384_v53 }
 0x32b   : > { %v1393_v56 = vmax.f32 %v1392_v54, 0.0 }
 0x32d   : > { %v1395_v57 = vadd.f32 %v1394_v55, %v1393_v56 }
 0x32f   : > { %v1396_v58 = vmax.f32 %v1395_v57, 0.0 }
 0x331   : > { %1397 = vst [vmem:[%s343_s10] sm:$0xf] %v1396_v58 }
 0x332 PF: > { %s17_s26 = sadd.s32 1, %s1975_s26   ;;  %s2378_s24 = smov %s1971_s25 }
 0x333   : > { %p14_p5 = scmp.ge.s32.totalorder %s17_s26, 4   ;;  %s2379_s25 = smov %s2381_s27 }
 0x335   :  { %16 = sbr.rel (!%p14_p5) target bundleno = 2 (0x2), region = 92 }

// kernel: unet_extractor_forward.27
= control target key start
LH: loop header
LB: loop body
LE: loop exit
PB: predicated region body
PF: predicated region fallthrough
CT: control target
= control target key end

     0   :  { %s1956_s21 = smov 0   ;;  %s1958_s22 = smov 0   ;;  %s2302_s0 = inlined_call_operand.vmem [shape: bf16[2,4,1152], index: 0, kind: input, shape index: {}]   ;;  %s2303_s1 = inlined_call_operand.vmem [shape: bf16[1152,128], index: 1, kind: input, shape index: {}]   ;;  %s2304_s2 = inlined_call_operand.vmem [shape: f32[1,128], index: 2, kind: input, shape index: {}, may-alias: {2,5}]   ;;  %s2305_s3 = inlined_call_operand.vmem [shape: f32[128,128], index: 3, kind: input, shape index: {}]   ;;  %s2306_s4 = inlined_call_operand.vmem [shape: f32[1,128], index: 4, kind: input, shape index: {}]   ;;  %s2307_s5 = inlined_call_operand.vmem [shape: f32[1,128], index: 5, kind: input, shape index: {}, may-alias: {2,5}]   ;;  %s2308_s6 = inlined_call_operand.vmem [shape: f32[2,4,128], index: 6, kind: output, shape index: {}]  }
   0x1   :  { %s1960_s23 = smov 0  }
   0x2 LB: > { %s28_s24 = sadd.s32 1, %s1911_s22  ;;  %p1439_p0 = scmp.ge.s32.totalorder %s1915_s23, 1  ;;  %s1915_s23 = sphi %s1960_s23, %s16_s23   ;;  %s1911_s22 = sphi %s1958_s22, %s2310_s22   ;;  %s1907_s21 = sphi %s1956_s21, %s2309_s21  }
   0x3   : > { %p30_p1 = scmp.ge.s32.totalorder %s28_s24, 2  ;;  %p242_p2 = scmp.lt.s32.totalorder %s1915_s23, 3 }
   0x5   : > { %s2312_s24 = smov (%p30_p1, %s28_s24), 0  ;;  %p243_p3 = pnand %p1439_p0, %p242_p2 }
   0x6   : > { %v1817_v0 = vld [vmem:[%s2303_s1 + $0x40] sm:$0xff] (!%p243_p3)   ;;  %v1917_v3 = vmov (!%p243_p3), 0.0   ;;  %v1821_v5 = vld [vmem:[%s2303_s1 + $0x48] sm:$0xff] (!%p243_p3)   ;;  %v1825_v9 = vld [vmem:[%s2303_s1 + $0x50] sm:$0xff] (!%p243_p3)   ;;  %p281_p4 = scmp.lt.s32.totalorder (!%p243_p3), %s1907_s21, 1  ;;  %v461_v29 = vlaneseq (!%p243_p3)  ;;  %vm1919_vm0 = vmmov (!%p243_p3), 0  }
   0x7   : > { %246 = sbr.rel (%p243_p3) target bundleno = 814 (0x32e), region = 44  ;;  %v1818_v1 = vld [vmem:[%s2303_s1 + $0xc0] sm:$0xff] (!%p243_p3)   ;;  %1519 = vmatprep.subr.bf16.mxu0 (!%p243_p3), %v1817_v0  ;;  %305 = vst [vmem:[#allocation2] sm:$0xf] (!%p243_p3), %v1917_v3  ;;  %v1822_v6 = vld [vmem:[%s2303_s1 + $0xc8] sm:$0xff] (!%p243_p3)   ;;  %v1826_v10 = vld [vmem:[%s2303_s1 + $0xd0] sm:$0xff] (!%p243_p3)  }
   0x8   : > { %v1819_v2 = vld [vmem:[%s2303_s1] sm:$0xff] (!%p243_p3)   ;;  %1541 = vmatprep.subr.bf16.mxu1 (!%p243_p3), %v1818_v1  ;;  %v1823_v7 = vld [vmem:[%s2303_s1 + $0x8] sm:$0xff] (!%p243_p3)   ;;  %v1827_v11 = vld [vmem:[%s2303_s1 + $0x10] sm:$0xff] (!%p243_p3)   ;;  %v2083_v34 = vshrl.u32 (!%p243_p3), %v461_v29, 7  ;;  %v1918_v37 = vmov (!%p243_p3), 1983009808  }
   0x9   : > { %v1820_v4 = vld [vmem:[%s2303_s1 + $0x80] sm:$0xff] (!%p243_p3)   ;;  %1520 = vmatpush3.bf16.msra.mxu0 (!%p243_p3), %v1819_v2  ;;  %v1824_v8 = vld [vmem:[%s2303_s1 + $0x88] sm:$0xff] (!%p243_p3)   ;;  %v1828_v12 = vld [vmem:[%s2303_s1 + $0x90] sm:$0xff] (!%p243_p3)   ;;  %v459_v38 = vunpack.c.l.s4 (!%p243_p3), %v1918_v37  ;;  %vm1153_vm1 = vcmask (!%p243_p3), 1043456  }
   0xa   : > { %1542 = vmatpush3.bf16.msra.mxu1 (!%p243_p3), %v1820_v4  ;;  %1521 = vmatprep.subr.bf16.mxu0 (!%p243_p3), %v1821_v5  ;;  %v1829_v13 = vld [vmem:[%s2303_s1 + $0x58] sm:$0xff] (!%p243_p3)   ;;  %v1833_v17 = vld [vmem:[%s2303_s1 + $0x60] sm:$0xff] (!%p243_p3)   ;;  %v1837_v21 = vld [vmem:[%s2303_s1 + $0x68] sm:$0xff] (!%p243_p3)  }
   0xb   : > { %1543 = vmatprep.subr.bf16.mxu1 (!%p243_p3), %v1822_v6  ;;  %v1830_v14 = vld [vmem:[%s2303_s1 + $0xd8] sm:$0xff] (!%p243_p3)   ;;  %v1834_v18 = vld [vmem:[%s2303_s1 + $0xe0] sm:$0xff] (!%p243_p3)   ;;  %v1838_v22 = vld [vmem:[%s2303_s1 + $0xe8] sm:$0xff] (!%p243_p3)   ;;  %v460_v39 = vunpack.c.0.s8 (!%p243_p3), %v459_v38 }
   0xc   : > { %v1831_v15 = vld [vmem:[%s2303_s1 + $0x18] sm:$0xff] (!%p243_p3)   ;;  %v1835_v19 = vld [vmem:[%s2303_s1 + $0x20] sm:$0xff] (!%p243_p3)   ;;  %v1839_v23 = vld [vmem:[%s2303_s1 + $0x28] sm:$0xff] (!%p243_p3)  }
   0xd   : > { %1522 = vmatpush3.bf16.msra.mxu0 (!%p243_p3), %v1823_v7  ;;  %v1832_v16 = vld [vmem:[%s2303_s1 + $0x98] sm:$0xff] (!%p243_p3)   ;;  %v1836_v20 = vld [vmem:[%s2303_s1 + $0xa0] sm:$0xff] (!%p243_p3)   ;;  %v1840_v24 = vld [vmem:[%s2303_s1 + $0xa8] sm:$0xff] (!%p243_p3)   ;;  %v2093_v42 = vsub.s32 (!%p243_p3), %v460_v39, %v2083_v34 }
   0xe   : > { %1544 = vmatpush3.bf16.msra.mxu1 %v1824_v8  ;;  %1523 = vmatprep.subr.bf16.mxu0 %v1825_v9  ;;  %s2314_s21 = smov (!%p281_p4, %s1907_s21), 1  ;;  %v1841_v25 = vld [vmem:[%s2303_s1 + $0x70] sm:$0xff]   ;;  %v1845_v30 = vld [vmem:[%s2303_s1 + $0x78] sm:$0xff]   ;;  %v1850_v36 = vld [vmem:[%s2303_s1 + $0x140] sm:$0xff]  }
   0xf   : > { %1545 = vmatprep.subr.bf16.mxu1 %v1826_v10  ;;  %v1842_v26 = vld [vmem:[%s2303_s1 + $0xf0] sm:$0xff]   ;;  %s1788_s13 = smul.u32 18, %s2314_s21  ;;  %v1846_v31 = vld [vmem:[%s2303_s1 + $0xf8] sm:$0xff]   ;;  %v1852_v41 = vld [vmem:[%s2303_s1 + $0x1c0] sm:$0xff]   ;;  %s1441_s11 = sshll.u32 %s2314_s21, 2 }
  0x10   : > { %v1843_v27 = vld [vmem:[%s2303_s1 + $0x30] sm:$0xff]   ;;  %v1847_v32 = vld [vmem:[%s2303_s1 + $0x38] sm:$0xff]   ;;  %v1851_v45 = vld [vmem:[%s2303_s1 + $0x100] sm:$0xff]   ;;  %s299_s14 = scalar_lea.vmem %s2308_s6, %s1441_s11 }
  0x11   : > { %1524 = vmatpush3.bf16.msra.mxu0 %v1827_v11  ;;  %v1844_v28 = vld [vmem:[%s2303_s1 + $0xb0] sm:$0xff]   ;;  %s2075_s28 = scalar_lea.vmem %s2302_s0, %s1788_s13  ;;  %v1848_v33 = vld [vmem:[%s2303_s1 + $0xb8] sm:$0xff]   ;;  %v1853_v46 = vld [vmem:[%s2303_s1 + $0x180] sm:$0xff]  }
  0x12   : > { %1546 = vmatpush3.bf16.msra.mxu1 %v1828_v12  ;;  %1525 = vmatprep.subr.bf16.mxu0 %v1829_v13  ;;  %v307_v35 = vld [vmem:[%s2075_s28] sm:$0xff]  ;;  %v1854_v49 = vld [vmem:[%s2303_s1 + $0x148] sm:$0xff]   ;;  %v1858_v53 = vld [vmem:[%s2303_s1 + $0x150] sm:$0xff]  }
  0x13   : > { %1547 = vmatprep.subr.bf16.mxu1 %v1830_v14  ;;  %v457_v40 = vcombine.high %v307_v35, %v307_v35  ;;  %v464_v43 = vrot.slane %v307_v35, %v2093_v42  ;;  %v1856_v50 = vld [vmem:[%s2303_s1 + $0x1c8] sm:$0xff]   ;;  %v1860_v54 = vld [vmem:[%s2303_s1 + $0x1d0] sm:$0xff]   ;;  %v1862_v57 = vld [vmem:[%s2303_s1 + $0x158] sm:$0xff]  }
  0x14   : > { %v1855_v51 = vld [vmem:[%s2303_s1 + $0x108] sm:$0xff]   ;;  %v1859_v55 = vld [vmem:[%s2303_s1 + $0x110] sm:$0xff]   ;;  %v1864_v58 = vld [vmem:[%s2303_s1 + $0x1d8] sm:$0xff]  }
  0x15   : > { %1526 = vmatpush3.bf16.msra.mxu0 %v1831_v15  ;;  %v471_v44 = vrot.slane %v457_v40, %v2093_v42  ;;  %v472_v47 = vcombine.high %v464_v43, %v464_v43  ;;  %v1857_v52 = vld [vmem:[%s2303_s1 + $0x188] sm:$0xff]   ;;  %v1861_v56 = vld [vmem:[%s2303_s1 + $0x190] sm:$0xff]   ;;  %v1863_v59 = vld [vmem:[%s2303_s1 + $0x118] sm:$0xff]  }
  0x16   : > { %1548 = vmatpush3.bf16.msra.mxu1 %v1832_v16  ;;  %1527 = vmatprep.subr.bf16.mxu0 %v1833_v17  ;;  %v1865_v60 = vld [vmem:[%s2303_s1 + $0x198] sm:$0xff]   ;;  %v1866_v61 = vld [vmem:[%s2303_s1 + $0x160] sm:$0xff]   ;;  %v1870_v1 = vld [vmem:[%s2303_s1 + $0x168] sm:$0xff]  }
  0x17   : > { %1549 = vmatprep.subr.bf16.mxu1 %v1834_v18  ;;  %v473_v48 = vcombine.high %v471_v44, %v471_v44  ;;  %971 = vmatprep.mubr.bf16.mxu0 %v472_v47  ;;  %v1868_v62 = vld [vmem:[%s2303_s1 + $0x1e0] sm:$0xff]   ;;  %v1872_v2 = vld [vmem:[%s2303_s1 + $0x1e8] sm:$0xff]   ;;  %v1874_v6 = vld [vmem:[%s2303_s1 + $0x170] sm:$0xff]  }
  0x18   : > { %v1867_v63 = vld [vmem:[%s2303_s1 + $0x120] sm:$0xff]   ;;  %v1871_v4 = vld [vmem:[%s2303_s1 + $0x128] sm:$0xff]   ;;  %v1876_v7 = vld [vmem:[%s2303_s1 + $0x1f0] sm:$0xff]  }
  0x19   : > { %1528 = vmatpush3.bf16.msra.mxu0 %v1835_v19  ;;  %1011 = vmatprep.mubr.bf16.mxu1 %v473_v48  ;;  %v1869_v0 = vld [vmem:[%s2303_s1 + $0x1a0] sm:$0xff]   ;;  %v1873_v5 = vld [vmem:[%s2303_s1 + $0x1a8] sm:$0xff]   ;;  %v1875_v8 = vld [vmem:[%s2303_s1 + $0x130] sm:$0xff]  }
  0x1a   : > { %1550 = vmatpush3.bf16.msra.mxu1 %v1836_v20  ;;  %1529 = vmatprep.subr.bf16.mxu0 %v1837_v21  ;;  %v308_v9 = vld [vmem:[%s2075_s28 + $0x8] sm:$0xff]  ;;  %v1877_v10 = vld [vmem:[%s2303_s1 + $0x1b0] sm:$0xff]   ;;  %v1878_v13 = vld [vmem:[%s2303_s1 + $0x178] sm:$0xff]  }
  0x1b   : > { %1551 = vmatprep.subr.bf16.mxu1 %v1838_v22  ;;  %v481_v11 = vrot.slane %v308_v9, %v2093_v42  ;;  %v474_v12 = vcombine.high %v308_v9, %v308_v9  ;;  %v1880_v14 = vld [vmem:[%s2303_s1 + $0x1f8] sm:$0xff]   ;;  %v1883_v20 = vld [vmem:[%s2303_s1 + $0x200] sm:$0xff]   ;;  %v1884_v21 = vld [vmem:[%s2303_s1 + $0x208] sm:$0xff]  }
  0x1c   : > { %v1879_v17 = vld [vmem:[%s2303_s1 + $0x138] sm:$0xff]   ;;  %v1885_v22 = vld [vmem:[%s2303_s1 + $0x210] sm:$0xff]   ;;  %v1161_v29 = vld [vmem:[%s2305_s3] sm:$0xff] }
  0x1d   : > { %1530 = vmatpush3.bf16.msra.mxu0 %v1839_v23  ;;  %v489_v15 = vcombine.high %v481_v11, %v481_v11  ;;  %v488_v16 = vrot.slane %v474_v12, %v2093_v42  ;;  %v1881_v19 = vld [vmem:[%s2303_s1 + $0x1b8] sm:$0xff]   ;;  %v1166_v37 = vld [vmem:[%s2305_s3 + $0x28] sm:$0xff]  ;;  %v1167_v39 = vld [vmem:[%s2305_s3 + $0x30] sm:$0xff] }
  0x1e   : > { %1552 = vmatpush3.bf16.msra.mxu1 %v1840_v24  ;;  %1531 = vmatprep.subr.bf16.mxu0 %v1841_v25  ;;  %v1886_v23 = vld [vmem:[%s2303_s1 + $0x218] sm:$0xff]   ;;  %v1887_v24 = vld [vmem:[%s2303_s1 + $0x220] sm:$0xff]   ;;  %v1888_v25 = vld [vmem:[%s2303_s1 + $0x228] sm:$0xff]  }
  0x1f   : > { %1553 = vmatprep.subr.bf16.mxu1 %v1842_v26  ;;  %v490_v18 = vcombine.high %v488_v16, %v488_v16  ;;  %v1889_v26 = vld [vmem:[%s2303_s1 + $0x230] sm:$0xff]   ;;  %v1168_v40 = vld [vmem:[%s2305_s3 + $0x38] sm:$0xff]  ;;  %v1169_v42 = vld [vmem:[%s2305_s3 + $0x40] sm:$0xff] }
  0x20   : > { %v1173_v48 = vld [vmem:[%s2305_s3 + $0x60] sm:$0xff] }
  0x21   : > { %1532 = vmatpush3.bf16.msra.mxu0 %v1843_v27  ;;  %v1890_v27 = vld [vmem:[%s2303_s1 + $0x238] sm:$0xff]  }
  0x22   : > { %1554 = vmatpush3.bf16.msra.mxu1 %v1844_v28  ;;  %1533 = vmatprep.subr.bf16.mxu0 %v1845_v30  ;;  %v1442_v28 = vld.sshfl [vmem:[%s2075_s28 + $0x10] sm:$0x3 pattern:$0x76325410]  ;;  %v1162_v30 = vld [vmem:[%s2305_s3 + $0x8] sm:$0xff] }
  0x23   : > { %1555 = vmatprep.subr.bf16.mxu1 %v1846_v31  ;;  %v1920_v31 = vmov 0.0|0.0  }
  0x25   : > { %1534 = vmatpush3.bf16.msra.mxu0 %v1847_v32  ;;  %v1741_v32 = vpack.c.bf16 %v1162_v30, %v1161_v29 }
  0x26   : > { %1556 = vmatpush3.bf16.msra.mxu1 %v1848_v33  ;;  %1563 = vmatprep.subr.bf16.mxu0 %v1850_v36  ;;  %v1164_v33 = vld [vmem:[%s2305_s3 + $0x18] sm:$0xff]  ;;  %v1165_v36 = vld [vmem:[%s2305_s3 + $0x20] sm:$0xff] }
  0x27   : > { %1585 = vmatprep.subr.bf16.mxu1 %v1852_v41  ;;  %v1747_v38 = vpack.c.bf16 %v1166_v37, %v1165_v36  ;;  %v1750_v41 = vpack.c.bf16 %v1168_v40, %v1167_v39 }
  0x28   : > { %972 = vmatmul.mubr.bf16.vlgmr.msra.gmra.mrb[0].mxu0 %v464_v43  ;;  %v1170_v43 = vld [vmem:[%s2305_s3 + $0x48] sm:$0xff] }
  0x29   : > { %1012 = vmatmul.mubr.bf16.vlgmr.msra.gmra.mrb[0].mxu1 %v471_v44  ;;  %1564 = vmatpush3.bf16.msra.mxu0 %v1851_v45  ;;  %v1753_v44 = vpack.c.bf16 %v1170_v43, %v1169_v42  ;;  %v1171_v45 = vld [vmem:[%s2305_s3 + $0x50] sm:$0xff] }
  0x2a   : > { %1586 = vmatpush3.bf16.msra.mxu1 %v1853_v46  ;;  %1565 = vmatprep.subr.bf16.mxu0 %v1854_v49  ;;  %v1172_v46 = vld [vmem:[%s2305_s3 + $0x58] sm:$0xff]  ;;  %v1174_v49 = vld [vmem:[%s2305_s3 + $0x68] sm:$0xff] }
  0x2b   : > { %1587 = vmatprep.subr.bf16.mxu1 %v1856_v50  ;;  %1051 = vmatprep.mubr.bf16.mxu0 %v489_v15  ;;  %v1756_v47 = vpack.c.bf16 %v1172_v46, %v1171_v45  ;;  %v1759_v50 = vpack.c.bf16 %v1174_v49, %v1173_v48  ;;  %v1334_v48 = vld [vmem:[%s2306_s4] sm:$0x1] }
  0x2c   : > { %1091 = vmatprep.mubr.bf16.mxu1 %v490_v18 }
  0x2d   : > { %1566 = vmatpush3.bf16.msra.mxu0 %v1855_v51  ;;  %v1175_v51 = vld [vmem:[%s2305_s3 + $0x70] sm:$0xff] }
  0x2e   : > { %1588 = vmatpush3.bf16.msra.mxu1 %v1857_v52  ;;  %1567 = vmatprep.subr.bf16.mxu0 %v1858_v53  ;;  %v1176_v52 = vld [vmem:[%s2305_s3 + $0x78] sm:$0xff] }
  0x2f   : > { %1589 = vmatprep.subr.bf16.mxu1 %v1860_v54  ;;  %v1762_v53 = vpack.c.bf16 %v1176_v52, %v1175_v51  ;;  %v1516_v52 = vld [vmem:[%s2307_s5] ss:$0 sm:$0xff] }
  0x31   : > { %1568 = vmatpush3.bf16.msra.mxu0 %v1859_v55 }
  0x32   : > { %1590 = vmatpush3.bf16.msra.mxu1 %v1861_v56  ;;  %1569 = vmatprep.subr.bf16.mxu0 %v1862_v57 }
  0x33   : > { %1591 = vmatprep.subr.bf16.mxu1 %v1864_v58 }
  0x35   : > { %1570 = vmatpush3.bf16.msra.mxu0 %v1863_v59 }
  0x36   : > { %1592 = vmatpush3.bf16.msra.mxu1 %v1865_v60  ;;  %1571 = vmatprep.subr.bf16.mxu0 %v1866_v61 }
  0x37   : > { %1593 = vmatprep.subr.bf16.mxu1 %v1868_v62 }
  0x39   : > { %1572 = vmatpush3.bf16.msra.mxu0 %v1867_v63 }
  0x3a   : > { %1594 = vmatpush3.bf16.msra.mxu1 %v1869_v0  ;;  %1573 = vmatprep.subr.bf16.mxu0 %v1870_v1 }
  0x3b   : > { %1595 = vmatprep.subr.bf16.mxu1 %v1872_v2 }
  0x3d   : > { %1574 = vmatpush3.bf16.msra.mxu0 %v1871_v4 }
  0x3e   : > { %1596 = vmatpush3.bf16.msra.mxu1 %v1873_v5  ;;  %1575 = vmatprep.subr.bf16.mxu0 %v1874_v6 }
  0x3f   : > { %1597 = vmatprep.subr.bf16.mxu1 %v1876_v7 }
  0x41   : > { %1576 = vmatpush3.bf16.msra.mxu0 %v1875_v8 }
  0x42   : > { %1598 = vmatpush3.bf16.msra.mxu1 %v1877_v10  ;;  %1577 = vmatprep.subr.bf16.mxu0 %v1878_v13 }
  0x43   : > { %1599 = vmatprep.subr.bf16.mxu1 %v1880_v14  ;;  %v306_v14 = vld [vmem:[#allocation2] sm:$0xf] }
  0x45   : > { %1578 = vmatpush3.bf16.msra.mxu0 %v1879_v17 }
  0x46   : > { %1600 = vmatpush3.bf16.msra.mxu1 %v1881_v19  ;;  %1650 = vmatprep.subr.bf16.mxu0 %v1917_v3 }
  0x47   : > { %1740 = vmatprep.subr.bf16.mxu1 %v1920_v31 }
  0x48   : > { %1052 = vmatmul.mubr.bf16.vlgmr.msra.gmra.mrb[4].mxu0 %v481_v11 }
  0x49   : > { %1092 = vmatmul.mubr.bf16.vlgmr.msra.gmra.mrb[4].mxu1 %v488_v16  ;;  %1651 = vmatpush3.bf16.msra.mxu0 %v1883_v20 }
  0x4a   : > { %1666 = vmatprep.mubr.msk.bf16.mxu0 %vm1919_vm0, %v1917_v3  ;;  %1652 = vmatprep.subr.bf16.mxu0 %v1917_v3 }
  0x4b   : > { %1702 = vmatprep.mubr.msk.f32.mxu1 %vm1919_vm0, %v1917_v3  ;;  %1742 = vmatpush3.bf16.msra.mxu1 %v1741_v32 }
  0x4c   : > { %1743 = vmatprep.subr.bf16.mxu1 %v1920_v31 }
  0x4d   : > { %1653 = vmatpush3.bf16.msra.mxu0 %v1884_v21  ;;  %v1515_v21 = vld [vmem:[%s2304_s2] ss:$0 sm:$0xff] }
  0x4e   : > { %1654 = vmatprep.subr.bf16.mxu0 %v1917_v3 }
  0x51   : > { %1655 = vmatpush3.bf16.msra.mxu0 %v1885_v22 }
  0x52   : > { %1656 = vmatprep.subr.bf16.mxu0 %v1917_v3 }
  0x55   : > { %1657 = vmatpush3.bf16.msra.mxu0 %v1886_v23 }
  0x56   : > { %1658 = vmatprep.subr.bf16.mxu0 %v1917_v3 }
  0x59   : > { %1659 = vmatpush3.bf16.msra.mxu0 %v1887_v24 }
  0x5a   : > { %1660 = vmatprep.subr.bf16.mxu0 %v1917_v3 }
  0x5d   : > { %1661 = vmatpush3.bf16.msra.mxu0 %v1888_v25 }
  0x5e   : > { %1662 = vmatprep.subr.bf16.mxu0 %v1917_v3 }
  0x61   : > { %1663 = vmatpush3.bf16.msra.mxu0 %v1889_v26 }
  0x62   : > { %1664 = vmatprep.subr.bf16.mxu0 %v1917_v3 }
  0x65   : > { %1665 = vmatpush3.bf16.msra.mxu0 %v1890_v27 }
  0x66   : > { %1764 = vmatprep.subr.bf16.mxu0 %v1920_v31 }
  0x68   : > { %1667 = vmatmul.mubr.bf16.vlgmr.msra.gmra.mrb[8].mxu0 %v1442_v28 }
  0x69   : > { %1737 = vmatprep.mubr.msk.f32.mxu0 %vm1919_vm0, %v1917_v3  ;;  %1766 = vmatpush3.bf16.msra.mxu0 %v1741_v32  ;;  %v1163_v3 = vld [vmem:[%s2305_s3 + $0x10] sm:$0xff] }
  0x6a   : > { %1767 = vmatprep.subr.bf16.mxu0 %v1920_v31  ;;  %v1744_v35 = vpack.c.bf16 %v1164_v33, %v1163_v3 }
  0x6c   : > { %1745 = vmatpush3.bf16.msra.mxu1 %v1744_v35 }
  0x6d   : > { %1769 = vmatpush3.bf16.msra.mxu0 %v1744_v35  ;;  %1746 = vmatprep.subr.bf16.mxu1 %v1920_v31 }
  0x6e   : > { %1770 = vmatprep.subr.bf16.mxu0 %v1920_v31 }
  0x70   : > { %1748 = vmatpush3.bf16.msra.mxu1 %v1747_v38 }
  0x71   : > { %1772 = vmatpush3.bf16.msra.mxu0 %v1747_v38  ;;  %1749 = vmatprep.subr.bf16.mxu1 %v1920_v31 }
  0x72   : > { %1773 = vmatprep.subr.bf16.mxu0 %v1920_v31 }
  0x74   : > { %1751 = vmatpush3.bf16.msra.mxu1 %v1750_v41 }
  0x75   : > { %1775 = vmatpush3.bf16.msra.mxu0 %v1750_v41  ;;  %1752 = vmatprep.subr.bf16.mxu1 %v1920_v31 }
  0x76   : > { %1776 = vmatprep.subr.bf16.mxu0 %v1920_v31 }
  0x78   : > { %1754 = vmatpush3.bf16.msra.mxu1 %v1753_v44 }
  0x79   : > { %1778 = vmatpush3.bf16.msra.mxu0 %v1753_v44  ;;  %1755 = vmatprep.subr.bf16.mxu1 %v1920_v31 }
  0x7a   : > { %1779 = vmatprep.subr.bf16.mxu0 %v1920_v31 }
  0x7c   : > { %1757 = vmatpush3.bf16.msra.mxu1 %v1756_v47 }
  0x7d   : > { %1781 = vmatpush3.bf16.msra.mxu0 %v1756_v47  ;;  %1758 = vmatprep.subr.bf16.mxu1 %v1920_v31 }
  0x7e   : > { %1782 = vmatprep.subr.bf16.mxu0 %v1920_v31 }
  0x80   : > { %1760 = vmatpush3.bf16.msra.mxu1 %v1759_v50 }
  0x81   : > { %1784 = vmatpush3.bf16.msra.mxu0 %v1759_v50  ;;  %1761 = vmatprep.subr.bf16.mxu1 %v1920_v31 }
  0x82   : > { %1785 = vmatprep.subr.bf16.mxu0 %v1920_v31  ;;  %v1250_v31 = vsub.s32 0, %v2083_v34 }
  0x84   : > { %1763 = vmatpush3.bf16.msra.mxu1 %v1762_v53 }
  0x85   : > { %1787 = vmatpush3.bf16.msra.mxu0 %v1762_v53 }
  0xfb   : > { %v1535_v54 = vpop.f32.mrb[0].mxu0 }
  0xfc   : > { %v1557_v55 = vpop.f32.mrb[0].mxu1  ;;  %v1536_v56 = vpop.f32.mrb[1].mxu0 }
  0xfd   : > { %v1558_v57 = vpop.f32.mrb[1].mxu1  ;;  %v1537_v58 = vadd.f32 %v1536_v56, %v1535_v54  ;;  %v1538_v60 = vpop.f32.mrb[2].mxu0 }
  0xfe   : > { %v1559_v59 = vadd.f32 %v1558_v57, %v1557_v55  ;;  %v1560_v61 = vpop.f32.mrb[2].mxu1  ;;  %v1539_v62 = vpop.f32.mrb[3].mxu0 }
  0xff   : > { %v1561_v63 = vpop.f32.mrb[3].mxu1 }
 0x100   : > { %v1014_v0 = vadd.f32 %v1559_v59, %v1537_v58 }
 0x11b   : > { %v1579_v1 = vpop.f32.mrb[4].mxu0 }
 0x11c   : > { %v1601_v2 = vpop.f32.mrb[4].mxu1  ;;  %v1580_v4 = vpop.f32.mrb[5].mxu0 }
 0x11d   : > { %v1602_v5 = vpop.f32.mrb[5].mxu1  ;;  %v1581_v6 = vadd.f32 %v1580_v4, %v1579_v1  ;;  %v1582_v7 = vpop.f32.mrb[6].mxu0 }
 0x11e   : > { %v1603_v8 = vadd.f32 %v1602_v5, %v1601_v2  ;;  %v1604_v9 = vpop.f32.mrb[6].mxu1  ;;  %v1583_v10 = vpop.f32.mrb[7].mxu0 }
 0x11f   : > { %v1605_v11 = vpop.f32.mrb[7].mxu1  ;;  %v1054_v12 = vadd.f32 %v1581_v6, %v1014_v0 }
 0x121   : > { %v1094_v13 = vadd.f32 %v1603_v8, %v1054_v12 }
 0x13b   : > { %v1133_v15 = vpop.f32.mrb[8].mxu0 }
 0x13c   : > { %v1134_v16 = vadd.f32 %v1133_v15, %v1094_v13  ;;  %v1668_v17 = vpop.f32.mrb[9].mxu0 }
 0x13d   : > { %v1136_v18 = vpop.f32.mrb[10].mxu0 }
 0x13e   : > { %v1139_v19 = vadd.f32 %v1134_v16, %v306_v14  ;;  %v1669_v20 = vpop.f32.mrb[11].mxu0 }
 0x140   : > { %1140 = vst [vmem:[#allocation2] sm:$0xf] %v1139_v19 }
 0x147   : > { %v1144_v22 = vld [vmem:[#allocation2] sm:$0xf] }
 0x148   : > { %v1152_v23 = vadd.f32 %v1515_v21, %v1144_v22 }
 0x14a   : > { %v1154_v24 = vsel %vm1153_vm1, %v1152_v23, 0.0 }
 0x14b   : > { %v1155_v25 = vrot.slane %v1154_v24, 4 }
 0x14d   : > { %v1156_v26 = vadd.f32 %v1155_v25, %v1154_v24 }
 0x14f   : > { %v1157_v27 = vrot.slane %v1156_v26, 2 }
 0x151   : > { %v1158_v28 = vadd.f32 %v1157_v27, %v1156_v26 }
 0x153   : > { %v1159_v29 = vrot.slane %v1158_v28, 1 }
 0x155   : > { %v1160_v30 = vadd.f32 %v1159_v29, %v1158_v28 }
 0x157   : > { %1703 = vmatmul.mubr.f32.vlgmr.msra.gmra.mrb[8].mxu1 %v1160_v30 }
 0x22a   : > { %v1243_v32 = vpop.f32.mrb[8].mxu1 }
 0x22b   : > { %v1247_v3 = vmul.f32 0.03125, %v1243_v32  ;;  %v1704_v33 = vpop.f32.mrb[9].mxu1 }
 0x22d   : > { %v1251_v35 = vrot.slane %v1247_v3, %v1250_v31 }
 0x22f   : > { %v1252_v36 = vsub.f32 %v1152_v23, %v1251_v35 }
 0x231   : > { %v1253_v37 = vmul.f32 %v1252_v36, %v1252_v36 }
 0x233   : > { %v1254_v38 = vsel %vm1153_vm1, %v1253_v37, 0.0 }
 0x234   : > { %v1255_v39 = vrot.slane %v1254_v38, 4 }
 0x236   : > { %v1256_v40 = vadd.f32 %v1255_v39, %v1254_v38 }
 0x238   : > { %v1257_v41 = vrot.slane %v1256_v40, 2 }
 0x23a   : > { %v1258_v42 = vadd.f32 %v1257_v41, %v1256_v40 }
 0x23c   : > { %v1259_v43 = vrot.slane %v1258_v42, 1 }
 0x23e   : > { %v1260_v44 = vadd.f32 %v1259_v43, %v1258_v42 }
 0x240   : > { %1738 = vmatmul.mubr.f32.vlgmr.msra.gmra.mrb[12].mxu0 %v1260_v44 }
 0x313   : > { %v1327_v45 = vpop.f32.mrb[12].mxu0 }
 0x314   : > { %v1331_v46 = vmul.f32 0.03125, %v1327_v45  ;;  %v1739_v47 = vpop.f32.mrb[13].mxu0 }
 0x316   : > { %v1332_v34 = vadd.f32 1e-05, %v1331_v46 }
 0x318   : > { %1891 = vrsqrt.f32 %v1332_v34 }
 0x322   : > { %v1892_v49 = vpop.eup %1891 }
 0x323   : > { %v1335_v50 = vmul.f32 %v1892_v49, %v1334_v48 }
 0x325   : > { %v1339_v51 = vrot.slane %v1335_v50, %v1250_v31 }
 0x327   : > { %v1340_v53 = vmul.f32 %v1339_v51, %v1252_v36 }
 0x329   : > { %v1348_v54 = vadd.f32 %v1516_v52, %v1340_v53 }
 0x32b   : > { %v1349_v55 = vmax.f32 %v1348_v54, 0.0 }
 0x32d   : > { %1350 = vst [vmem:[%s299_s14] sm:$0xf] %v1349_v55 }
 0x32e PF: > { %s16_s23 = sadd.s32 1, %s1915_s23   ;;  %s2309_s21 = smov %s1911_s22 }
 0x32f   : > { %p13_p5 = scmp.ge.s32.totalorder %s16_s23, 4   ;;  %s2310_s22 = smov %s2312_s24 }
 0x331   :  { %15 = sbr.rel (!%p13_p5) target bundleno = 2 (0x2), region = 85 }

// kernel: unet_extractor_forward.31
= control target key start
LH: loop header
LB: loop body
LE: loop exit
PB: predicated region body
PF: predicated region fallthrough
CT: control target
= control target key end

     0   :  { %s2554_s0 = inlined_call_operand.vmem [shape: bf16[2,4,1152], index: 0, kind: input, shape index: {}]   ;;  %s2555_s1 = inlined_call_operand.vmem [shape: bf16[1152,128], index: 1, kind: input, shape index: {}]   ;;  %s2556_s2 = inlined_call_operand.vmem [shape: f32[1,128], index: 2, kind: input, shape index: {}, may-alias: {2,5}]   ;;  %s2557_s3 = inlined_call_operand.vmem [shape: f32[128,128], index: 3, kind: input, shape index: {}]   ;;  %s2558_s4 = inlined_call_operand.vmem [shape: f32[1,128], index: 4, kind: input, shape index: {}]   ;;  %s2559_s5 = inlined_call_operand.vmem [shape: f32[1,128], index: 5, kind: input, shape index: {}, may-alias: {2,5}]   ;;  %s2560_s6 = inlined_call_operand.vmem [shape: f32[2,4,128], index: 6, kind: input, shape index: {}]   ;;  %s2561_s7 = inlined_call_operand.hbm [shape: f32[2,4,128], index: 7, kind: output, shape index: {}]  }
   0x1   :  { %2562 = sst [smem:[#allocation6_spill]] %s2554_s0 }
   0x2   :  { %12 = vsyncpa [#allocation4], 0 }
   0x3   :  { %14 = vsyncpa [#allocation4 + $0x1], 0  ;;  %s2130_s24 = smov 0   ;;  %s2132_s25 = smov 0  }
   0x4   :  { %s2134_s26 = smov 0   ;;  %s2136_s27 = smov 0  }
   0x5   :  { %s2138_s28 = smov 0   ;;  %s2140_s29 = smov 0  }
   0x6 LB: > { %s1512_s30 = sadd.s32 4294967295, %s2083_s29   ;;  %s1513_s8 = sadd.s32 4294967294, %s2083_s29   ;;  %s2083_s29 = sphi %s2140_s29, %s20_s29   ;;  %s2079_s28 = sphi %s2138_s28, %s2570_s28   ;;  %s2075_s27 = sphi %s2136_s27, %s2569_s27   ;;  %s2071_s26 = sphi %s2134_s26, %s2568_s26   ;;  %s2067_s25 = sphi %s2132_s25, %s2567_s25   ;;  %s2063_s24 = sphi %s2130_s24, %s2566_s24  }
   0x7   : > { %s32_s9 = sadd.s32 1, %s2079_s28  ;;  %s203_s10 = sadd.s32 1, %s2071_s26 }
   0x8   : > { %p34_p0 = scmp.ge.s32.totalorder %s32_s9, 2  ;;  %p213_p1 = scmp.ne.s32.totalorder %s2071_s26, %s2067_s25 }
   0x9   : > { %p214_p2 = scmp.eq.s32.totalorder %s1512_s30, 1  ;;  %p219_p3 = scmp.ne.s32.totalorder %s2067_s25, %s2063_s24 }
   0xa   : > { %s2572_s9 = smov (%p34_p0, %s32_s9), 0  ;;  %p220_p5 = scmp.eq.s32.totalorder %s1513_s8, 1 }
   0xb   : > { %p2170_p4 = por %p214_p2, %p213_p1  ;;  %s200_s12 = ssub.s32 %s2079_s28, %s2572_s9 }
   0xc   : > { %p1517_p6 = scmp.ge.s32.totalorder %s2083_s29, 1  ;;  %p201_p7 = scmp.eq.s32.totalorder %s200_s12, 0 }
   0xd   : > { %p2177_p8 = por %p220_p5, %p219_p3  ;;  %p279_p9 = scmp.lt.s32.totalorder %s2083_s29, 3 }
   0xe   : > { %s2183_s14 = scalar_select %p201_p7, %s2071_s26, %s203_s10  }
   0xf   : > { %p280_p10 = pnand %p1517_p6, %p279_p9 }
  0x10   : > { %v1929_v0 = vld [vmem:[%s2555_s1 + $0x40] sm:$0xff] (!%p280_p10)   ;;  %v2085_v3 = vmov (!%p280_p10), 0.0   ;;  %v1933_v5 = vld [vmem:[%s2555_s1 + $0x48] sm:$0xff] (!%p280_p10)   ;;  %v1937_v9 = vld [vmem:[%s2555_s1 + $0x50] sm:$0xff] (!%p280_p10)   ;;  %p325_p11 = scmp.lt.s32.totalorder (!%p280_p10), %s2075_s27, 1  ;;  %v505_v29 = vlaneseq (!%p280_p10)  ;;  %s2565_s0 = sld [smem:[#allocation6_spill]] (!%p280_p10) }
  0x11   : > { %283 = sbr.rel (%p280_p10) target bundleno = 841 (0x349), region = 48  ;;  %v1930_v1 = vld [vmem:[%s2555_s1 + $0xc0] sm:$0xff] (!%p280_p10)   ;;  %1600 = vmatprep.subr.bf16.mxu0 (!%p280_p10), %v1929_v0  ;;  %349 = vst [vmem:[#allocation2] sm:$0xf] (!%p280_p10), %v2085_v3  ;;  %v1934_v6 = vld [vmem:[%s2555_s1 + $0xc8] sm:$0xff] (!%p280_p10)   ;;  %v1938_v10 = vld [vmem:[%s2555_s1 + $0xd0] sm:$0xff] (!%p280_p10)  }
  0x12   : > { %v1931_v2 = vld [vmem:[%s2555_s1] sm:$0xff] (!%p280_p10)   ;;  %1622 = vmatprep.subr.bf16.mxu1 (!%p280_p10), %v1930_v1  ;;  %v1935_v7 = vld [vmem:[%s2555_s1 + $0x8] sm:$0xff] (!%p280_p10)   ;;  %v1939_v11 = vld [vmem:[%s2555_s1 + $0x10] sm:$0xff] (!%p280_p10)   ;;  %v2292_v34 = vshrl.u32 (!%p280_p10), %v505_v29, 7  ;;  %v2086_v37 = vmov (!%p280_p10), 1983009808  }
  0x13   : > { %v1932_v4 = vld [vmem:[%s2555_s1 + $0x80] sm:$0xff] (!%p280_p10)   ;;  %1601 = vmatpush3.bf16.msra.mxu0 (!%p280_p10), %v1931_v2  ;;  %v1936_v8 = vld [vmem:[%s2555_s1 + $0x88] sm:$0xff] (!%p280_p10)   ;;  %v1940_v12 = vld [vmem:[%s2555_s1 + $0x90] sm:$0xff] (!%p280_p10)   ;;  %v503_v38 = vunpack.c.l.s4 (!%p280_p10), %v2086_v37  ;;  %vm2087_vm0 = vmmov (!%p280_p10), 0   ;;  %vm1197_vm1 = vcmask (!%p280_p10), 1043456   ;;  %s321_s30 = sand.u32 (!%p280_p10), 1, %s2067_s25  }
  0x14   : > { %1623 = vmatpush3.bf16.msra.mxu1 (!%p280_p10), %v1932_v4  ;;  %1602 = vmatprep.subr.bf16.mxu0 (!%p280_p10), %v1933_v5  ;;  %v1941_v13 = vld [vmem:[%s2555_s1 + $0x58] sm:$0xff] (!%p280_p10)   ;;  %v1945_v17 = vld [vmem:[%s2555_s1 + $0x60] sm:$0xff] (!%p280_p10)   ;;  %v1949_v21 = vld [vmem:[%s2555_s1 + $0x68] sm:$0xff] (!%p280_p10)   ;;  %s1518_s10 = sshll.u32 (!%p280_p10), %s321_s30, 2  ;;  %s1597_s21 = sshll.u32 (!%p280_p10), %s2075_s27, 6 }
  0x15   : > { %1624 = vmatprep.subr.bf16.mxu1 (!%p280_p10), %v1934_v6  ;;  %v1942_v14 = vld [vmem:[%s2555_s1 + $0xd8] sm:$0xff] (!%p280_p10)   ;;  %v1946_v18 = vld [vmem:[%s2555_s1 + $0xe0] sm:$0xff] (!%p280_p10)   ;;  %v1950_v22 = vld [vmem:[%s2555_s1 + $0xe8] sm:$0xff] (!%p280_p10)   ;;  %v504_v39 = vunpack.c.0.s8 (!%p280_p10), %v503_v38  ;;  %s323_s22 = scalar_lea.vmem (!%p280_p10), [#allocation3], %s1518_s10 }
  0x16   : > { %v1943_v15 = vld [vmem:[%s2555_s1 + $0x18] sm:$0xff] (!%p280_p10)   ;;  %v1947_v19 = vld [vmem:[%s2555_s1 + $0x20] sm:$0xff] (!%p280_p10)   ;;  %v1951_v23 = vld [vmem:[%s2555_s1 + $0x28] sm:$0xff] (!%p280_p10)   ;;  %s1412_s23 = sshll.u32 (!%p280_p10), %s323_s22, 4  ;;  %s2509_s23 = int_to_ptr.vmem [resolvable:$true] %s1412_s23 }
  0x17   : > { %1603 = vmatpush3.bf16.msra.mxu0 (!%p280_p10), %v1935_v7  ;;  %v1944_v16 = vld [vmem:[%s2555_s1 + $0x98] sm:$0xff] (!%p280_p10)   ;;  %v1948_v20 = vld [vmem:[%s2555_s1 + $0xa0] sm:$0xff] (!%p280_p10)   ;;  %v1952_v24 = vld [vmem:[%s2555_s1 + $0xa8] sm:$0xff] (!%p280_p10)   ;;  %v2302_v42 = vsub.s32 (!%p280_p10), %v504_v39, %v2292_v34  ;;  %s2005_s12 = scalar_lea.vmem (!%p280_p10), %s2509_s23, 64 }
  0x18   : > { %1625 = vmatpush3.bf16.msra.mxu1 %v1936_v8  ;;  %1604 = vmatprep.subr.bf16.mxu0 %v1937_v9  ;;  %s2254_s20 = scalar_select %p325_p11, %s2075_s27, 1  ;;  %v1953_v25 = vld [vmem:[%s2555_s1 + $0x70] sm:$0xff]   ;;  %v1957_v30 = vld [vmem:[%s2555_s1 + $0x78] sm:$0xff]   ;;  %v1962_v36 = vld [vmem:[%s2555_s1 + $0x140] sm:$0xff]  }
  0x19   : > { %1626 = vmatprep.subr.bf16.mxu1 %v1938_v10  ;;  %v1954_v26 = vld [vmem:[%s2555_s1 + $0xf0] sm:$0xff]   ;;  %v1958_v31 = vld [vmem:[%s2555_s1 + $0xf8] sm:$0xff]   ;;  %v1964_v41 = vld [vmem:[%s2555_s1 + $0x1c0] sm:$0xff]   ;;  %p2006_p12 = scmp.ne.s32.totalorder %s2509_s23, %s2005_s12  ;;  %s2089_s27 = smov [#allocation3]  }
  0x1a   : > { %s1869_s16 = smul.u32 18, %s2254_s20  ;;  %v1955_v27 = vld [vmem:[%s2555_s1 + $0x30] sm:$0xff]   ;;  %v1959_v32 = vld [vmem:[%s2555_s1 + $0x38] sm:$0xff]   ;;  %v1963_v45 = vld [vmem:[%s2555_s1 + $0x100] sm:$0xff]   ;;  %s1520_s8 = sshll.u32 %s2254_s20, 2 }
  0x1b   : > { %1605 = vmatpush3.bf16.msra.mxu0 %v1939_v11  ;;  %v1956_v28 = vld [vmem:[%s2555_s1 + $0xb0] sm:$0xff]   ;;  %v1960_v33 = vld [vmem:[%s2555_s1 + $0xb8] sm:$0xff]   ;;  %v1965_v46 = vld [vmem:[%s2555_s1 + $0x180] sm:$0xff]   ;;  %s343_s19 = scalar_lea.vmem %s2560_s6, %s1520_s8  ;;  %s1399_s8 = scalar_lea.sflag [#allocation4], %s321_s30 }
  0x1c   : > { %1627 = vmatpush3.bf16.msra.mxu1 %v1940_v12  ;;  %1606 = vmatprep.subr.bf16.mxu0 %v1941_v13  ;;  %s2284_s15 = scalar_lea.vmem %s2565_s0, %s1869_s16  ;;  %v1966_v49 = vld [vmem:[%s2555_s1 + $0x148] sm:$0xff]   ;;  %v1970_v53 = vld [vmem:[%s2555_s1 + $0x150] sm:$0xff]   ;;  %v1974_v57 = vld [vmem:[%s2555_s1 + $0x158] sm:$0xff]   ;;  %s2507_s0 = scalar_lea.hbm %s2561_s7, %s1597_s21 }
  0x1d   : > { %1628 = vmatprep.subr.bf16.mxu1 %v1942_v14  ;;  %v351_v35 = vld [vmem:[%s2284_s15] sm:$0xff]  ;;  %v1968_v50 = vld [vmem:[%s2555_s1 + $0x1c8] sm:$0xff]   ;;  %v1972_v54 = vld [vmem:[%s2555_s1 + $0x1d0] sm:$0xff]   ;;  %p2007_p13 = pnand %p2006_p12, %p2170_p4  ;;  %s2009_s10 = sshll.u32 %s2089_s27, 4  ;;  %s2010_s10 = int_to_ptr.vmem [resolvable:$false] %s2009_s10 }
  0x1e   : > { %v501_v40 = vcombine.high %v351_v35, %v351_v35  ;;  %v508_v43 = vrot.slane %v351_v35, %v2302_v42  ;;  %v1967_v51 = vld [vmem:[%s2555_s1 + $0x108] sm:$0xff]   ;;  %v1971_v55 = vld [vmem:[%s2555_s1 + $0x110] sm:$0xff]   ;;  %v1976_v58 = vld [vmem:[%s2555_s1 + $0x1d8] sm:$0xff]   ;;  %p2012_p1 = scmp.lt.s32.totalorder %s2509_s23, %s2010_s10 }
  0x1f   : > { %1607 = vmatpush3.bf16.msra.mxu0 %v1943_v15  ;;  %v1969_v52 = vld [vmem:[%s2555_s1 + $0x188] sm:$0xff]   ;;  %v1973_v56 = vld [vmem:[%s2555_s1 + $0x190] sm:$0xff]   ;;  %v1975_v59 = vld [vmem:[%s2555_s1 + $0x118] sm:$0xff]   ;;  %p2008_p0 = pneg %p2007_p13 }
  0x20   : > { %1629 = vmatpush3.bf16.msra.mxu1 %v1944_v16  ;;  %1608 = vmatprep.subr.bf16.mxu0 %v1945_v17  ;;  %v515_v44 = vrot.slane %v501_v40, %v2302_v42  ;;  %v516_v47 = vcombine.high %v508_v43, %v508_v43  ;;  %v1977_v60 = vld [vmem:[%s2555_s1 + $0x198] sm:$0xff]   ;;  %v1978_v61 = vld [vmem:[%s2555_s1 + $0x160] sm:$0xff]   ;;  %v1982_v1 = vld [vmem:[%s2555_s1 + $0x168] sm:$0xff]  }
  0x21   : > { %1630 = vmatprep.subr.bf16.mxu1 %v1946_v18  ;;  %v1980_v62 = vld [vmem:[%s2555_s1 + $0x1e0] sm:$0xff]   ;;  %v1984_v2 = vld [vmem:[%s2555_s1 + $0x1e8] sm:$0xff]   ;;  %v1986_v6 = vld [vmem:[%s2555_s1 + $0x170] sm:$0xff]  }
  0x22   : > { %v517_v48 = vcombine.high %v515_v44, %v515_v44  ;;  %1015 = vmatprep.mubr.bf16.mxu0 %v516_v47  ;;  %v1979_v63 = vld [vmem:[%s2555_s1 + $0x120] sm:$0xff]   ;;  %v1983_v4 = vld [vmem:[%s2555_s1 + $0x128] sm:$0xff]   ;;  %v1988_v7 = vld [vmem:[%s2555_s1 + $0x1f0] sm:$0xff]  }
  0x23   : > { %1609 = vmatpush3.bf16.msra.mxu0 %v1947_v19  ;;  %v1981_v0 = vld [vmem:[%s2555_s1 + $0x1a0] sm:$0xff]   ;;  %v1985_v5 = vld [vmem:[%s2555_s1 + $0x1a8] sm:$0xff]   ;;  %v1987_v8 = vld [vmem:[%s2555_s1 + $0x130] sm:$0xff]  }
  0x24   : > { %1631 = vmatpush3.bf16.msra.mxu1 %v1948_v20  ;;  %1610 = vmatprep.subr.bf16.mxu0 %v1949_v21  ;;  %v352_v9 = vld [vmem:[%s2284_s15 + $0x8] sm:$0xff]  ;;  %v1989_v10 = vld [vmem:[%s2555_s1 + $0x1b0] sm:$0xff]   ;;  %v1990_v13 = vld [vmem:[%s2555_s1 + $0x178] sm:$0xff]  }
  0x25   : > { %1632 = vmatprep.subr.bf16.mxu1 %v1950_v22  ;;  %1055 = vmatprep.mubr.bf16.mxu1 %v517_v48  ;;  %v525_v11 = vrot.slane %v352_v9, %v2302_v42  ;;  %v518_v12 = vcombine.high %v352_v9, %v352_v9  ;;  %v1992_v14 = vld [vmem:[%s2555_s1 + $0x1f8] sm:$0xff]   ;;  %v1995_v20 = vld [vmem:[%s2555_s1 + $0x200] sm:$0xff]   ;;  %v1996_v21 = vld [vmem:[%s2555_s1 + $0x208] sm:$0xff]  }
  0x26   : > { %v1991_v17 = vld [vmem:[%s2555_s1 + $0x138] sm:$0xff]   ;;  %v1997_v22 = vld [vmem:[%s2555_s1 + $0x210] sm:$0xff]   ;;  %v1205_v29 = vld [vmem:[%s2557_s3] sm:$0xff] }
  0x27   : > { %1611 = vmatpush3.bf16.msra.mxu0 %v1951_v23  ;;  %v533_v15 = vcombine.high %v525_v11, %v525_v11  ;;  %v532_v16 = vrot.slane %v518_v12, %v2302_v42  ;;  %v1993_v19 = vld [vmem:[%s2555_s1 + $0x1b8] sm:$0xff]   ;;  %v1210_v37 = vld [vmem:[%s2557_s3 + $0x28] sm:$0xff]  ;;  %v1211_v39 = vld [vmem:[%s2557_s3 + $0x30] sm:$0xff] }
  0x28   : > { %1633 = vmatpush3.bf16.msra.mxu1 %v1952_v24  ;;  %1612 = vmatprep.subr.bf16.mxu0 %v1953_v25  ;;  %v1998_v23 = vld [vmem:[%s2555_s1 + $0x218] sm:$0xff]   ;;  %v1999_v24 = vld [vmem:[%s2555_s1 + $0x220] sm:$0xff]   ;;  %v2000_v25 = vld [vmem:[%s2555_s1 + $0x228] sm:$0xff]  }
  0x29   : > { %1634 = vmatprep.subr.bf16.mxu1 %v1954_v26  ;;  %v534_v18 = vcombine.high %v532_v16, %v532_v16  ;;  %v2001_v26 = vld [vmem:[%s2555_s1 + $0x230] sm:$0xff]   ;;  %v1212_v40 = vld [vmem:[%s2557_s3 + $0x38] sm:$0xff]  ;;  %v1213_v42 = vld [vmem:[%s2557_s3 + $0x40] sm:$0xff] }
  0x2a   : > { %v1217_v48 = vld [vmem:[%s2557_s3 + $0x60] sm:$0xff] }
  0x2b   : > { %1613 = vmatpush3.bf16.msra.mxu0 %v1955_v27  ;;  %v2002_v27 = vld [vmem:[%s2555_s1 + $0x238] sm:$0xff]  }
  0x2c   : > { %1635 = vmatpush3.bf16.msra.mxu1 %v1956_v28  ;;  %1614 = vmatprep.subr.bf16.mxu0 %v1957_v30  ;;  %v1521_v28 = vld.sshfl [vmem:[%s2284_s15 + $0x10] sm:$0x3 pattern:$0x76325410]  ;;  %v1206_v30 = vld [vmem:[%s2557_s3 + $0x8] sm:$0xff]  ;;  %s2011_s15 = scalar_lea.vmem %s2010_s10, 128 }
  0x2d   : > { %1636 = vmatprep.subr.bf16.mxu1 %v1958_v31  ;;  %v2088_v31 = vmov 0.0|0.0   ;;  %p2013_p2 = scmp.lt.s32.totalorder %s2011_s15, %s2005_s12 }
  0x2f   : > { %1615 = vmatpush3.bf16.msra.mxu0 %v1959_v32  ;;  %v1822_v32 = vpack.c.bf16 %v1206_v30, %v1205_v29  ;;  %p2014_p3 = por %p2013_p2, %p2012_p1 }
  0x30   : > { %1637 = vmatpush3.bf16.msra.mxu1 %v1960_v33  ;;  %1644 = vmatprep.subr.bf16.mxu0 %v1962_v36  ;;  %v1208_v33 = vld [vmem:[%s2557_s3 + $0x18] sm:$0xff]  ;;  %v1209_v36 = vld [vmem:[%s2557_s3 + $0x20] sm:$0xff] }
  0x31   : > { %1666 = vmatprep.subr.bf16.mxu1 %v1964_v41  ;;  %v1828_v38 = vpack.c.bf16 %v1210_v37, %v1209_v36  ;;  %v1831_v41 = vpack.c.bf16 %v1212_v40, %v1211_v39  ;;  %p2015_p5 = pnand %p2014_p3, %p2008_p0 }
  0x32   : > { %1016 = vmatmul.mubr.bf16.vlgmr.msra.gmra.mrb[0].mxu0 %v508_v43  ;;  %v1214_v43 = vld [vmem:[%s2557_s3 + $0x48] sm:$0xff] }
  0x33   : > { %1056 = vmatmul.mubr.bf16.vlgmr.msra.gmra.mrb[0].mxu1 %v515_v44  ;;  %1645 = vmatpush3.bf16.msra.mxu0 %v1963_v45  ;;  %v1834_v44 = vpack.c.bf16 %v1214_v43, %v1213_v42  ;;  %v1215_v45 = vld [vmem:[%s2557_s3 + $0x50] sm:$0xff] }
  0x34   : > { %1667 = vmatpush3.bf16.msra.mxu1 %v1965_v46  ;;  %1646 = vmatprep.subr.bf16.mxu0 %v1966_v49  ;;  %v1216_v46 = vld [vmem:[%s2557_s3 + $0x58] sm:$0xff]  ;;  %v1218_v49 = vld [vmem:[%s2557_s3 + $0x68] sm:$0xff] }
  0x35   : > { %1668 = vmatprep.subr.bf16.mxu1 %v1968_v50  ;;  %1095 = vmatprep.mubr.bf16.mxu0 %v533_v15  ;;  %v1837_v47 = vpack.c.bf16 %v1216_v46, %v1215_v45  ;;  %v1840_v50 = vpack.c.bf16 %v1218_v49, %v1217_v48  ;;  %v1378_v48 = vld [vmem:[%s2558_s4] sm:$0x1] }
  0x36   : > { %1135 = vmatprep.mubr.bf16.mxu1 %v534_v18 }
  0x37   : > { %1647 = vmatpush3.bf16.msra.mxu0 %v1967_v51  ;;  %v1219_v51 = vld [vmem:[%s2557_s3 + $0x70] sm:$0xff] }
  0x38   : > { %1669 = vmatpush3.bf16.msra.mxu1 %v1969_v52  ;;  %1648 = vmatprep.subr.bf16.mxu0 %v1970_v53  ;;  %v1220_v52 = vld [vmem:[%s2557_s3 + $0x78] sm:$0xff] }
  0x39   : > { %1670 = vmatprep.subr.bf16.mxu1 %v1972_v54  ;;  %v1843_v53 = vpack.c.bf16 %v1220_v52, %v1219_v51  ;;  %v1595_v52 = vld [vmem:[%s2559_s5] ss:$0 sm:$0xff] }
  0x3b   : > { %1649 = vmatpush3.bf16.msra.mxu0 %v1971_v55 }
  0x3c   : > { %1671 = vmatpush3.bf16.msra.mxu1 %v1973_v56  ;;  %1650 = vmatprep.subr.bf16.mxu0 %v1974_v57 }
  0x3d   : > { %1672 = vmatprep.subr.bf16.mxu1 %v1976_v58 }
  0x3f   : > { %1651 = vmatpush3.bf16.msra.mxu0 %v1975_v59 }
  0x40   : > { %1673 = vmatpush3.bf16.msra.mxu1 %v1977_v60  ;;  %1652 = vmatprep.subr.bf16.mxu0 %v1978_v61 }
  0x41   : > { %1674 = vmatprep.subr.bf16.mxu1 %v1980_v62 }
  0x43   : > { %1653 = vmatpush3.bf16.msra.mxu0 %v1979_v63 }
  0x44   : > { %1675 = vmatpush3.bf16.msra.mxu1 %v1981_v0  ;;  %1654 = vmatprep.subr.bf16.mxu0 %v1982_v1 }
  0x45   : > { %1676 = vmatprep.subr.bf16.mxu1 %v1984_v2 }
  0x47   : > { %1655 = vmatpush3.bf16.msra.mxu0 %v1983_v4 }
  0x48   : > { %1677 = vmatpush3.bf16.msra.mxu1 %v1985_v5  ;;  %1656 = vmatprep.subr.bf16.mxu0 %v1986_v6 }
  0x49   : > { %1678 = vmatprep.subr.bf16.mxu1 %v1988_v7 }
  0x4b   : > { %1657 = vmatpush3.bf16.msra.mxu0 %v1987_v8 }
  0x4c   : > { %1679 = vmatpush3.bf16.msra.mxu1 %v1989_v10  ;;  %1658 = vmatprep.subr.bf16.mxu0 %v1990_v13 }
  0x4d   : > { %1680 = vmatprep.subr.bf16.mxu1 %v1992_v14  ;;  %v350_v14 = vld [vmem:[#allocation2] sm:$0xf] }
  0x4f   : > { %1659 = vmatpush3.bf16.msra.mxu0 %v1991_v17 }
  0x50   : > { %1681 = vmatpush3.bf16.msra.mxu1 %v1993_v19  ;;  %1731 = vmatprep.subr.bf16.mxu0 %v2085_v3 }
  0x51   : > { %1821 = vmatprep.subr.bf16.mxu1 %v2088_v31 }
  0x52   : > { %1096 = vmatmul.mubr.bf16.vlgmr.msra.gmra.mrb[4].mxu0 %v525_v11 }
  0x53   : > { %1136 = vmatmul.mubr.bf16.vlgmr.msra.gmra.mrb[4].mxu1 %v532_v16  ;;  %1732 = vmatpush3.bf16.msra.mxu0 %v1995_v20 }
  0x54   : > { %1747 = vmatprep.mubr.msk.bf16.mxu0 %vm2087_vm0, %v2085_v3  ;;  %1733 = vmatprep.subr.bf16.mxu0 %v2085_v3 }
  0x55   : > { %1783 = vmatprep.mubr.msk.f32.mxu1 %vm2087_vm0, %v2085_v3  ;;  %1823 = vmatpush3.bf16.msra.mxu1 %v1822_v32 }
  0x56   : > { %1824 = vmatprep.subr.bf16.mxu1 %v2088_v31 }
  0x57   : > { %1734 = vmatpush3.bf16.msra.mxu0 %v1996_v21  ;;  %v1594_v21 = vld [vmem:[%s2556_s2] ss:$0 sm:$0xff] }
  0x58   : > { %1735 = vmatprep.subr.bf16.mxu0 %v2085_v3 }
  0x5b   : > { %1736 = vmatpush3.bf16.msra.mxu0 %v1997_v22 }
  0x5c   : > { %1737 = vmatprep.subr.bf16.mxu0 %v2085_v3 }
  0x5f   : > { %1738 = vmatpush3.bf16.msra.mxu0 %v1998_v23 }
  0x60   : > { %1739 = vmatprep.subr.bf16.mxu0 %v2085_v3 }
  0x63   : > { %1740 = vmatpush3.bf16.msra.mxu0 %v1999_v24 }
  0x64   : > { %1741 = vmatprep.subr.bf16.mxu0 %v2085_v3 }
  0x67   : > { %1742 = vmatpush3.bf16.msra.mxu0 %v2000_v25 }
  0x68   : > { %1743 = vmatprep.subr.bf16.mxu0 %v2085_v3 }
  0x6b   : > { %1744 = vmatpush3.bf16.msra.mxu0 %v2001_v26 }
  0x6c   : > { %1745 = vmatprep.subr.bf16.mxu0 %v2085_v3 }
  0x6f   : > { %1746 = vmatpush3.bf16.msra.mxu0 %v2002_v27 }
  0x70   : > { %1845 = vmatprep.subr.bf16.mxu0 %v2088_v31 }
  0x72   : > { %1748 = vmatmul.mubr.bf16.vlgmr.msra.gmra.mrb[8].mxu0 %v1521_v28 }
  0x73   : > { %1818 = vmatprep.mubr.msk.f32.mxu0 %vm2087_vm0, %v2085_v3  ;;  %1847 = vmatpush3.bf16.msra.mxu0 %v1822_v32  ;;  %v1207_v3 = vld [vmem:[%s2557_s3 + $0x10] sm:$0xff] }
  0x74   : > { %1848 = vmatprep.subr.bf16.mxu0 %v2088_v31  ;;  %v1825_v35 = vpack.c.bf16 %v1208_v33, %v1207_v3 }
  0x76   : > { %1826 = vmatpush3.bf16.msra.mxu1 %v1825_v35 }
  0x77   : > { %1850 = vmatpush3.bf16.msra.mxu0 %v1825_v35  ;;  %1827 = vmatprep.subr.bf16.mxu1 %v2088_v31 }
  0x78   : > { %1851 = vmatprep.subr.bf16.mxu0 %v2088_v31 }
  0x7a   : > { %1829 = vmatpush3.bf16.msra.mxu1 %v1828_v38 }
  0x7b   : > { %1853 = vmatpush3.bf16.msra.mxu0 %v1828_v38  ;;  %1830 = vmatprep.subr.bf16.mxu1 %v2088_v31 }
  0x7c   : > { %1854 = vmatprep.subr.bf16.mxu0 %v2088_v31 }
  0x7e   : > { %1832 = vmatpush3.bf16.msra.mxu1 %v1831_v41 }
  0x7f   : > { %1856 = vmatpush3.bf16.msra.mxu0 %v1831_v41  ;;  %1833 = vmatprep.subr.bf16.mxu1 %v2088_v31 }
  0x80   : > { %1857 = vmatprep.subr.bf16.mxu0 %v2088_v31 }
  0x82   : > { %1835 = vmatpush3.bf16.msra.mxu1 %v1834_v44 }
  0x83   : > { %1859 = vmatpush3.bf16.msra.mxu0 %v1834_v44  ;;  %1836 = vmatprep.subr.bf16.mxu1 %v2088_v31 }
  0x84   : > { %1860 = vmatprep.subr.bf16.mxu0 %v2088_v31 }
  0x86   : > { %1838 = vmatpush3.bf16.msra.mxu1 %v1837_v47 }
  0x87   : > { %1862 = vmatpush3.bf16.msra.mxu0 %v1837_v47  ;;  %1839 = vmatprep.subr.bf16.mxu1 %v2088_v31 }
  0x88   : > { %1863 = vmatprep.subr.bf16.mxu0 %v2088_v31 }
  0x8a   : > { %1841 = vmatpush3.bf16.msra.mxu1 %v1840_v50 }
  0x8b   : > { %1865 = vmatpush3.bf16.msra.mxu0 %v1840_v50  ;;  %1842 = vmatprep.subr.bf16.mxu1 %v2088_v31 }
  0x8c   : > { %1866 = vmatprep.subr.bf16.mxu0 %v2088_v31  ;;  %v1294_v31 = vsub.s32 0, %v2292_v34 }
  0x8e   : > { %1844 = vmatpush3.bf16.msra.mxu1 %v1843_v53 }
  0x8f   : > { %1868 = vmatpush3.bf16.msra.mxu0 %v1843_v53 }
 0x105   : > { %v1616_v54 = vpop.f32.mrb[0].mxu0 }
 0x106   : > { %v1638_v55 = vpop.f32.mrb[0].mxu1  ;;  %v1617_v56 = vpop.f32.mrb[1].mxu0 }
 0x107   : > { %v1639_v57 = vpop.f32.mrb[1].mxu1  ;;  %v1618_v58 = vadd.f32 %v1617_v56, %v1616_v54  ;;  %v1619_v60 = vpop.f32.mrb[2].mxu0 }
 0x108   : > { %v1640_v59 = vadd.f32 %v1639_v57, %v1638_v55  ;;  %v1641_v61 = vpop.f32.mrb[2].mxu1  ;;  %v1620_v62 = vpop.f32.mrb[3].mxu0  ;;  %v1394_v55 = vld [vmem:[%s343_s19] sm:$0xf] }
 0x109   : > { %v1642_v63 = vpop.f32.mrb[3].mxu1 }
 0x10a   : > { %v1058_v0 = vadd.f32 %v1640_v59, %v1618_v58 }
 0x125   : > { %v1660_v1 = vpop.f32.mrb[4].mxu0 }
 0x126   : > { %v1682_v2 = vpop.f32.mrb[4].mxu1  ;;  %v1661_v4 = vpop.f32.mrb[5].mxu0 }
 0x127   : > { %v1683_v5 = vpop.f32.mrb[5].mxu1  ;;  %v1662_v6 = vadd.f32 %v1661_v4, %v1660_v1  ;;  %v1663_v7 = vpop.f32.mrb[6].mxu0 }
 0x128   : > { %v1684_v8 = vadd.f32 %v1683_v5, %v1682_v2  ;;  %v1685_v9 = vpop.f32.mrb[6].mxu1  ;;  %v1664_v10 = vpop.f32.mrb[7].mxu0 }
 0x129   : > { %v1686_v11 = vpop.f32.mrb[7].mxu1  ;;  %v1098_v12 = vadd.f32 %v1662_v6, %v1058_v0 }
 0x12b   : > { %v1138_v13 = vadd.f32 %v1684_v8, %v1098_v12 }
 0x145   : > { %v1177_v15 = vpop.f32.mrb[8].mxu0 }
 0x146   : > { %v1178_v16 = vadd.f32 %v1177_v15, %v1138_v13  ;;  %v1749_v17 = vpop.f32.mrb[9].mxu0 }
 0x147   : > { %v1180_v18 = vpop.f32.mrb[10].mxu0 }
 0x148   : > { %v1183_v19 = vadd.f32 %v1178_v16, %v350_v14  ;;  %v1750_v20 = vpop.f32.mrb[11].mxu0 }
 0x14a   : > { %1184 = vst [vmem:[#allocation2] sm:$0xf] %v1183_v19 }
 0x151   : > { %v1188_v22 = vld [vmem:[#allocation2] sm:$0xf] }
 0x152   : > { %v1196_v23 = vadd.f32 %v1594_v21, %v1188_v22 }
 0x154   : > { %v1198_v24 = vsel %vm1197_vm1, %v1196_v23, 0.0 }
 0x155   : > { %v1199_v25 = vrot.slane %v1198_v24, 4 }
 0x157   : > { %v1200_v26 = vadd.f32 %v1199_v25, %v1198_v24 }
 0x159   : > { %v1201_v27 = vrot.slane %v1200_v26, 2 }
 0x15b   : > { %v1202_v28 = vadd.f32 %v1201_v27, %v1200_v26 }
 0x15d   : > { %v1203_v29 = vrot.slane %v1202_v28, 1 }
 0x15f   : > { %v1204_v30 = vadd.f32 %v1203_v29, %v1202_v28 }
 0x161   : > { %1784 = vmatmul.mubr.f32.vlgmr.msra.gmra.mrb[8].mxu1 %v1204_v30 }
 0x234   : > { %v1287_v32 = vpop.f32.mrb[8].mxu1 }
 0x235   : > { %v1291_v3 = vmul.f32 0.03125, %v1287_v32  ;;  %v1785_v33 = vpop.f32.mrb[9].mxu1 }
 0x237   : > { %v1295_v35 = vrot.slane %v1291_v3, %v1294_v31 }
 0x239   : > { %v1296_v36 = vsub.f32 %v1196_v23, %v1295_v35 }
 0x23b   : > { %v1297_v37 = vmul.f32 %v1296_v36, %v1296_v36 }
 0x23d   : > { %v1298_v38 = vsel %vm1197_vm1, %v1297_v37, 0.0 }
 0x23e   : > { %v1299_v39 = vrot.slane %v1298_v38, 4 }
 0x240   : > { %v1300_v40 = vadd.f32 %v1299_v39, %v1298_v38 }
 0x242   : > { %v1301_v41 = vrot.slane %v1300_v40, 2 }
 0x244   : > { %v1302_v42 = vadd.f32 %v1301_v41, %v1300_v40 }
 0x246   : > { %v1303_v43 = vrot.slane %v1302_v42, 1 }
 0x248   : > { %v1304_v44 = vadd.f32 %v1303_v43, %v1302_v42 }
 0x24a   : > { %1819 = vmatmul.mubr.f32.vlgmr.msra.gmra.mrb[12].mxu0 %v1304_v44 }
 0x31d   : > { %v1371_v45 = vpop.f32.mrb[12].mxu0 }
 0x31e   : > { %v1375_v46 = vmul.f32 0.03125, %v1371_v45  ;;  %v1820_v34 = vpop.f32.mrb[13].mxu0 }
 0x320   : > { %v1376_v47 = vadd.f32 1e-05, %v1375_v46 }
 0x322   : > { %2003 = vrsqrt.f32 %v1376_v47 }
 0x32c   : > { %v2004_v49 = vpop.eup %2003 }
 0x32d   : > { %v1379_v50 = vmul.f32 %v2004_v49, %v1378_v48 }
 0x32f   : > { %v1383_v51 = vrot.slane %v1379_v50, %v1294_v31 }
 0x331   : > { %v1384_v53 = vmul.f32 %v1383_v51, %v1296_v36 }
 0x333   : > { %v1392_v54 = vadd.f32 %v1595_v52, %v1384_v53 }
 0x335   : > { %v1393_v56 = vmax.f32 %v1392_v54, 0.0 }
 0x337   : > { %v1395_v57 = vadd.f32 %v1394_v55, %v1393_v56 }
 0x339   : > { %v1396_v58 = vmax.f32 %v1395_v57, 0.0 }
 0x33b   : > { %1397 = vst [vmem:[%s323_s22] sm:$0xf] %v1396_v58 }
 0x33c   : > { %2018 = shalt.err (!%p2015_p5)
}
 0x33d   : > { %s2019_s30 = scalar_lea.hbm %s2507_s0, 64  ;;  %s2023_s19 = scalar_lea.hbm %s2561_s7, 128 }
 0x33e   : > { %p2020_p6 = scmp.ne.s32.totalorder %s2507_s0, %s2019_s30  ;;  %p2024_p10 = scmp.lt.u32.totalorder %s2507_s0, %s2561_s7 }
 0x33f   : > { %p2025_p11 = scmp.lt.u32.totalorder %s2023_s19, %s2019_s30  ;;  %p2027_p13 = scmp.lt.u32.totalorder %s2019_s30, %s2507_s0 }
 0x340   : > { %p2021_p7 = pnand %p2020_p6, %p2170_p4 }
 0x341   : > { %p2026_p12 = por %p2025_p11, %p2024_p10 }
 0x342   : > { %p2022_p9 = pneg %p2021_p7 }
 0x343   : > { %p2028_p0 = por %p2027_p13, %p2026_p12 }
 0x345   : > { %p2029_p1 = pnand %p2028_p0, %p2022_p9 }
 0x347   : > { %2032 = shalt.err (!%p2029_p1)
}
 0x348   : > { %1870 = dma.vmem_to_hbm [thread:$0]  (%p2170_p4), %s2509_s23, 64, %s2507_s0, %s1399_s8  }
 0x349 PF: > { %p1876_p2 = scmp.ge.s32.totalorder %s2083_s29, 2  ;;  %s1424_s20 = sand.u32 1, %s2063_s24  }
 0x34a   : > { %s1425_s16 = scalar_lea.sflag [#allocation4], %s1424_s20 }
 0x34b   : > { %p1873_p3 = pnand %p1876_p2, %p2177_p8 }
 0x34d   : > { %2058 = dma.done.wait (!%p1873_p3), %s1425_s16, 64  }
 0x34e   : > { %2060 = vsyncadd (!%p1873_p3), %s1425_s16, 4294967232  ;;  %s20_s29 = sadd.s32 1, %s2083_s29   ;;  %s2566_s24 = smov %s2067_s25 }
 0x34f   : > { %p17_p5 = scmp.ge.s32.totalorder %s20_s29, 4   ;;  %s2567_s25 = smov %s2071_s26 }
 0x350   : > { %s2568_s26 = smov %s2183_s14  ;;  %s2569_s27 = smov %s2079_s28 }
 0x351   : > { %s2570_s28 = smov %s2572_s9  ;;  %19 = sbr.rel (!%p17_p5) target bundleno = 6 (0x6), region = 97 }
 0x358   :  { %1430 = vsyncpa [#allocation4], 1 }
 0x359   :  { %1432 = vsyncpa [#allocation4 + $0x1], 1 }

</bundles_post_ra>
